<compile_context>
chip_gen: v7x
topology: tpu7x:2x2x1
jax: 0.10.0
libtpu: 0.0.40
codegen_flags: <defaults>
</compile_context>

<pallas_src>
import functools
import math

import jax
import jax.numpy as jnp
import numpy as np
from jax.experimental import pallas as pl
from jax.experimental.pallas import tpu as pltpu


# ------------------------------ fused per-image kernel ------------------------------
def _fused_kernel(p1_ref, p2_ref, w11_ref, b11_ref, w21_ref, b21_ref,
                  w12_ref, w22_ref, bout_ref, o_ref,
                  midpad_ref, slab_ref, acc1_ref, *, H, W, K):
    """One image: branch1 (conv-H -> conv-W) + branch2 (conv-W -> conv-H), summed.

    p1_ref   : (M, KCP)      bf16  conv1 im2col for branch 1, rows W-major (w*H + h)
    p2_ref   : (M, KCP)      bf16  conv1 im2col for branch 2, rows H-major (h*W + w)
    w11/w21  : (KCP, MID)    bf16  conv1 weights (contraction zero-padded to KCP)
    b11/b21  : (1, MID)      f32
    w12/w22  : (K*MID, CO)   bf16  conv2 weights, C_out zero-padded to CO (=128)
    bout     : (1, CO)       f32   b12 + b22
    o_ref    : (M, CO)       bf16  lane-dense fused output, rows H-major
    midpad   : (M + 2*pad*max(H,W), MID) bf16  halo-padded mid scratch (reused per branch)
    slab     : (M, K*MID)    bf16  conv2 im2col slab (reused per branch)
    acc1     : (W, H, CO)    f32   branch-1 result, W-major
    """
    M = p1_ref.shape[0]
    MID = w11_ref.shape[1]
    CO = w12_ref.shape[1]
    pad = (K - 1) // 2

    def conv_branch(p_ref, w1_ref, b1_ref, w2_ref, row_stride):
        # conv1: one (M, KCP) x (KCP, MID) MXU matmul; bias add in f32, cast once.
        mid = jnp.dot(p_ref[...], w1_ref[...], preferred_element_type=jnp.float32)
        mid = (mid + b1_ref[...]).astype(jnp.bfloat16)                      # (M, MID)

        # Halo-padded mid (conv2-axis major): zero ONLY the halo rows, store interior.
        halo = pad * row_stride
        midpad_ref[0:halo, :] = jnp.zeros((halo, MID), jnp.bfloat16)
        midpad_ref[halo:halo + M, :] = mid
        midpad_ref[halo + M:2 * halo + M, :] = jnp.zeros((halo, MID), jnp.bfloat16)

        # conv2: fold all K taps into ONE matmul with contraction K*MID.  Each slab
        # column block is a contiguous, 16-row-aligned, full-128-lane window copy.
        for k in range(K):
            slab_ref[:, k * MID:(k + 1) * MID] = \
                midpad_ref[k * row_stride:k * row_stride + M, :]
        return jnp.dot(slab_ref[...], w2_ref[...], preferred_element_type=jnp.float32)

    # Branch 1 (conv11 along H, conv12 along W): rows W-major, conv2 tap stride = H rows.
    acc1_ref[...] = conv_branch(p1_ref, w11_ref, b11_ref, w12_ref, H).reshape(W, H, CO)
    # Branch 2 (conv21 along W, conv22 along H): rows H-major, conv2 tap stride = W rows.
    acc2 = conv_branch(p2_ref, w21_ref, b21_ref, w22_ref, W) + bout_ref[...]

    # Fused p1 + p2: acc1[w, h, :] is output pixel (h, w), so acc1[:, h, :] is exactly the
    # (W, CO) row block that aligns with branch-2's h-th row block.  f32 add, bf16 store.
    for h in range(H):
        o_ref[h * W:(h + 1) * W, :] = (acc2[h * W:(h + 1) * W, :]
                                       + acc1_ref[:, h, :]).astype(o_ref.dtype)


# --------------------------------- module forward -----------------------------------
def large_kernel_conv2d(x_nchw, params):
    """Forward of LargeKernelConv2d.  x_nchw: (N, C_in, H, W) f32 -> (N, C_out, H, W) f32."""
    N, C_in, H, W = x_nchw.shape
    K, _, MID = params["w11"].shape
    C_out = params["w12"].shape[-1]
    # NOTE: pad=(K-1)//2 matches nn.Conv2d(padding=k//2) only for odd K (module default 15).
    assert K % 2 == 1, "LargeKernelConv2d 'same' padding assumes an odd kernel size"
    pad = (K - 1) // 2
    M = H * W
    KC = K * C_in
    KCP = ((KC + 63) // 64) * 64            # lane-aligned conv1 contraction (60 -> 64)
    COP = ((C_out + 127) // 128) * 128      # lane-dense output width (8 -> 128)

    def im2col(x_perm):
        # x_perm: (N, A2, A1, C_in); conv1 slides along A1.  The C_in=4 tensor is tiny,
        # so the gather/pad is done once here in XLA instead of lane-concats in-kernel.
        A2, A1 = x_perm.shape[1], x_perm.shape[2]
        xp = jnp.pad(x_perm, ((0, 0), (0, 0), (pad, pad), (0, 0)))
        cols = jnp.concatenate([xp[:, :, k:k + A1, :] for k in range(K)], axis=-1)
        cols = jnp.pad(cols, ((0, 0), (0, 0), (0, 0), (0, KCP - KC)))
        return cols.reshape(N, A2 * A1, KCP).astype(jnp.bfloat16)

    # Branch 1: rows W-major (conv2 slides along W).  Branch 2: rows H-major.
    p1 = im2col(jnp.transpose(x_nchw, (0, 3, 2, 1)))   # (N, W*H, KCP)
    p2 = im2col(jnp.transpose(x_nchw, (0, 2, 3, 1)))   # (N, H*W, KCP)

    def prep_w1(w):                                     # (K, C_in, MID) -> (KCP, MID) bf16
        return jnp.pad(w.reshape(KC, MID), ((0, KCP - KC), (0, 0))).astype(jnp.bfloat16)

    def prep_w2(w):                                     # (K, MID, C_out) -> (K*MID, COP) bf16
        wp = jnp.pad(w, ((0, 0), (0, 0), (0, COP - C_out)))
        return wp.reshape(K * MID, COP).astype(jnp.bfloat16)

    b11 = params["b11"].reshape(1, MID).astype(jnp.float32)
    b21 = params["b21"].reshape(1, MID).astype(jnp.float32)
    b_out = jnp.pad(params["b12"] + params["b22"], (0, COP - C_out)) \
               .reshape(1, COP).astype(jnp.float32)

    kernel = functools.partial(_fused_kernel, H=H, W=W, K=K)
    # Grid: one image per step; "parallel" shards the batch across v7x's two TensorCores.
    # (At N=1 a second parallel axis could be exposed by splitting rows, not needed here.)
    out = pl.pallas_call(
        kernel,
        out_shape=jax.ShapeDtypeStruct((N, M, COP), jnp.bfloat16),
        grid=(N,),
        in_specs=[
            pl.BlockSpec((None, M, KCP), lambda n: (n, 0, 0)),
            pl.BlockSpec((None, M, KCP), lambda n: (n, 0, 0)),
            pl.BlockSpec((KCP, MID), lambda n: (0, 0)),
            pl.BlockSpec((1, MID), lambda n: (0, 0)),
            pl.BlockSpec((KCP, MID), lambda n: (0, 0)),
            pl.BlockSpec((1, MID), lambda n: (0, 0)),
            pl.BlockSpec((K * MID, COP), lambda n: (0, 0)),
            pl.BlockSpec((K * MID, COP), lambda n: (0, 0)),
            pl.BlockSpec((1, COP), lambda n: (0, 0)),
        ],
        out_specs=pl.BlockSpec((None, M, COP), lambda n: (n, 0, 0)),
        scratch_shapes=[
            pltpu.VMEM((M + 2 * pad * max(H, W), MID), jnp.bfloat16),   # halo-padded mid
            pltpu.VMEM((M, K * MID), jnp.bfloat16),                     # conv2 im2col slab
            pltpu.VMEM((W, H, COP), jnp.float32),                       # branch-1 result
        ],
        compiler_params=pltpu.CompilerParams(dimension_semantics=("parallel",)),
    )(p1, p2, prep_w1(params["w11"]), b11, prep_w1(params["w21"]), b21,
      prep_w2(params["w12"]), prep_w2(params["w22"]), b_out)

    out = out.reshape(N, H, W, COP)[..., :C_out].astype(jnp.float32)
    return jnp.transpose(out, (0, 3, 1, 2))             # back to NCHW


# ------------------------------------ params ----------------------------------------
def init_params(key, in_ch, out_ch, mid_ch, k, init_bias=0.0):
    """Deterministic kaiming-normal init (matches the module's explicit kaiming init)."""
    ks = jax.random.split(key, 4)

    def kaiming(kk, ksz, cin, cout):
        fan_in = cin * ksz                      # kernel is (ksz,1) or (1,ksz)
        std = math.sqrt(2.0 / fan_in)
        # stored as (K, C_in, C_out) == torch weight[co, ci, k] transposed
        return std * jax.random.normal(kk, (ksz, cin, cout), jnp.float32)

    return {
        "w11": kaiming(ks[0], k, in_ch, mid_ch),
        "b11": jnp.full((mid_ch,), init_bias, jnp.float32),
        "w12": kaiming(ks[1], k, mid_ch, out_ch),
        "b12": jnp.full((out_ch,), init_bias, jnp.float32),
        "w21": kaiming(ks[2], k, in_ch, mid_ch),
        "b21": jnp.full((mid_ch,), init_bias, jnp.float32),
        "w22": kaiming(ks[3], k, mid_ch, out_ch),
        "b22": jnp.full((out_ch,), init_bias, jnp.float32),
    }


# --------------------------------- pure-JAX reference -------------------------------
def _ref_conv_axis(x_nchw, w, b, axis):
    # w: (K, C_in, C_out); axis: 'h' -> kernel (K,1), 'w' -> kernel (1,K)
    K = w.shape[0]
    pad = (K - 1) // 2
    w_oihw = jnp.transpose(w, (2, 1, 0))
    if axis == "h":
        w_oihw = w_oihw[:, :, :, None]
        padding = ((pad, pad), (0, 0))
    else:
        w_oihw = w_oihw[:, :, None, :]
        padding = ((0, 0), (pad, pad))
    out = jax.lax.conv_general_dilated(
        x_nchw, w_oihw, (1, 1), padding,
        dimension_numbers=("NCHW", "OIHW", "NCHW"),
        precision=jax.lax.Precision.HIGHEST,
    )
    return out + b[None, :, None, None]


def large_kernel_conv2d_ref(x, p):
    p1 = _ref_conv_axis(_ref_conv_axis(x, p["w11"], p["b11"], "h"), p["w12"], p["b12"], "w")
    p2 = _ref_conv_axis(_ref_conv_axis(x, p["w21"], p["b21"], "w"), p["w22"], p["b22"], "h")
    return p1 + p2


# --------------------------------------- main ---------------------------------------
if __name__ == "__main__":
    N, C_IN, H, W = 2, 4, 16, 16
    C_OUT, MID, KSZ = 8, 128, 15

    key = jax.random.PRNGKey(0)
    kx, kp = jax.random.split(key)
    x = jax.random.normal(kx, (N, C_IN, H, W), jnp.float32)
    params = init_params(kp, C_IN, C_OUT, MID, KSZ, init_bias=0.1)

    fwd = jax.jit(large_kernel_conv2d)
    out = jax.block_until_ready(fwd(x, params))

    ref = large_kernel_conv2d_ref(x, params)
    np.testing.assert_allclose(np.asarray(out), np.asarray(ref), rtol=5e-2, atol=5e-2)
    assert out.shape == (N, C_OUT, H, W)
    print("KERNEL_OK")
</pallas_src>

<mosaic_0001>
module attributes {stable_mosaic.version = 11 : i64} {
  func.func @_fused_kernel(%arg0: i32, %arg1: memref<1x256x64xbf16, #tpu.memory_space<vmem>>, %arg2: memref<1x256x64xbf16, #tpu.memory_space<vmem>>, %arg3: memref<64x128xbf16, #tpu.memory_space<vmem>>, %arg4: memref<1x128xf32, #tpu.memory_space<vmem>>, %arg5: memref<64x128xbf16, #tpu.memory_space<vmem>>, %arg6: memref<1x128xf32, #tpu.memory_space<vmem>>, %arg7: memref<1920x128xbf16, #tpu.memory_space<vmem>>, %arg8: memref<1920x128xbf16, #tpu.memory_space<vmem>>, %arg9: memref<1x128xf32, #tpu.memory_space<vmem>>, %arg10: memref<1x256x128xbf16, #tpu.memory_space<vmem>>, %arg11: memref<480x128xbf16, #tpu.memory_space<vmem>>, %arg12: memref<256x1920xbf16, #tpu.memory_space<vmem>>, %arg13: memref<16x16x128xf32, #tpu.memory_space<vmem>>) attributes {dimension_semantics = [#tpu.dimension_semantics<parallel>], iteration_bounds = array<i64: 2>, scalar_prefetch = 0 : i64, scratch_operands = 3 : i64, tpu.core_type = #tpu.core_type<tc>, window_params = [{transform_indices = @transform_0, window_bounds = array<i64: 1, 256, 64>}, {transform_indices = @transform_1, window_bounds = array<i64: 1, 256, 64>}, {pipeline_mode = #tpu.pipeline_mode<synchronous>, transform_indices = @transform_2, window_bounds = array<i64: 64, 128>}, {pipeline_mode = #tpu.pipeline_mode<synchronous>, transform_indices = @transform_3, window_bounds = array<i64: 1, 128>}, {pipeline_mode = #tpu.pipeline_mode<synchronous>, transform_indices = @transform_4, window_bounds = array<i64: 64, 128>}, {pipeline_mode = #tpu.pipeline_mode<synchronous>, transform_indices = @transform_5, window_bounds = array<i64: 1, 128>}, {pipeline_mode = #tpu.pipeline_mode<synchronous>, transform_indices = @transform_6, window_bounds = array<i64: 1920, 128>}, {pipeline_mode = #tpu.pipeline_mode<synchronous>, transform_indices = @transform_7, window_bounds = array<i64: 1920, 128>}, {pipeline_mode = #tpu.pipeline_mode<synchronous>, transform_indices = @transform_8, window_bounds = array<i64: 1, 128>}, {transform_indices = @transform_9, window_bounds = array<i64: 1, 256, 128>}]} {
    %c0 = arith.constant 0 : index
    %c0_0 = arith.constant 0 : index
    %c0_1 = arith.constant 0 : index
    %0 = vector.load %arg1[%c0, %c0_0, %c0_1] : memref<1x256x64xbf16, #tpu.memory_space<vmem>>, vector<1x256x64xbf16>
    %1 = vector.shape_cast %0 : vector<1x256x64xbf16> to vector<256x64xbf16>
    %c0_2 = arith.constant 0 : index
    %c0_3 = arith.constant 0 : index
    %2 = vector.load %arg3[%c0_2, %c0_3] : memref<64x128xbf16, #tpu.memory_space<vmem>>, vector<64x128xbf16>
    %cst = arith.constant dense<0.000000e+00> : vector<256x128xf32>
    %3 = tpu.matmul %1, %2, %cst {dimension_numbers = #tpu.dot_dimension_numbers<[1], [0], [0], [1], [0, 0, 1, 1], [], []>} : vector<256x64xbf16>, vector<64x128xbf16>, vector<256x128xf32> -> vector<256x128xf32>
    %c0_4 = arith.constant 0 : index
    %c0_5 = arith.constant 0 : index
    %4 = vector.load %arg4[%c0_4, %c0_5] : memref<1x128xf32, #tpu.memory_space<vmem>>, vector<1x128xf32>
    %5 = vector.broadcast %4 : vector<1x128xf32> to vector<256x128xf32>
    %6 = arith.addf %3, %5 : vector<256x128xf32>
    %7 = arith.truncf %6 : vector<256x128xf32> to vector<256x128xbf16>
    %cst_6 = arith.constant 0.000000e+00 : bf16
    %8 = vector.broadcast %cst_6 : bf16 to vector<112x128xbf16>
    %c0_7 = arith.constant 0 : index
    %c0_8 = arith.constant 0 : index
    %9 = vector.load %arg11[%c0_7, %c0_8] : memref<480x128xbf16, #tpu.memory_space<vmem>>, vector<112x128xbf16>
    tpu.vector_store %arg11[%c0_7, %c0_8], %8 {strides = array<i32>} : memref<480x128xbf16, #tpu.memory_space<vmem>>, vector<112x128xbf16>,
    %c112 = arith.constant 112 : index
    %c0_9 = arith.constant 0 : index
    %10 = vector.load %arg11[%c112, %c0_9] : memref<480x128xbf16, #tpu.memory_space<vmem>>, vector<256x128xbf16>
    tpu.vector_store %arg11[%c112, %c0_9], %7 {strides = array<i32>} : memref<480x128xbf16, #tpu.memory_space<vmem>>, vector<256x128xbf16>,
    %cst_10 = arith.constant 0.000000e+00 : bf16
    %11 = vector.broadcast %cst_10 : bf16 to vector<112x128xbf16>
    %c368 = arith.constant 368 : index
    %c0_11 = arith.constant 0 : index
    %12 = vector.load %arg11[%c368, %c0_11] : memref<480x128xbf16, #tpu.memory_space<vmem>>, vector<112x128xbf16>
    tpu.vector_store %arg11[%c368, %c0_11], %11 {strides = array<i32>} : memref<480x128xbf16, #tpu.memory_space<vmem>>, vector<112x128xbf16>,
    %c0_12 = arith.constant 0 : index
    %c0_13 = arith.constant 0 : index
    %13 = vector.load %arg11[%c0_12, %c0_13] : memref<480x128xbf16, #tpu.memory_space<vmem>>, vector<256x128xbf16>
    %c0_14 = arith.constant 0 : index
    %c0_15 = arith.constant 0 : index
    %14 = vector.load %arg12[%c0_14, %c0_15] : memref<256x1920xbf16, #tpu.memory_space<vmem>>, vector<256x128xbf16>
    tpu.vector_store %arg12[%c0_14, %c0_15], %13 {strides = array<i32>} : memref<256x1920xbf16, #tpu.memory_space<vmem>>, vector<256x128xbf16>,
    %c16 = arith.constant 16 : index
    %c0_16 = arith.constant 0 : index
    %15 = vector.load %arg11[%c16, %c0_16] : memref<480x128xbf16, #tpu.memory_space<vmem>>, vector<256x128xbf16>
    %c0_17 = arith.constant 0 : index
    %c128 = arith.constant 128 : index
    %16 = vector.load %arg12[%c0_17, %c128] : memref<256x1920xbf16, #tpu.memory_space<vmem>>, vector<256x128xbf16>
    tpu.vector_store %arg12[%c0_17, %c128], %15 {strides = array<i32>} : memref<256x1920xbf16, #tpu.memory_space<vmem>>, vector<256x128xbf16>,
    %c32 = arith.constant 32 : index
    %c0_18 = arith.constant 0 : index
    %17 = vector.load %arg11[%c32, %c0_18] : memref<480x128xbf16, #tpu.memory_space<vmem>>, vector<256x128xbf16>
    %c0_19 = arith.constant 0 : index
    %c256 = arith.constant 256 : index
    %18 = vector.load %arg12[%c0_19, %c256] : memref<256x1920xbf16, #tpu.memory_space<vmem>>, vector<256x128xbf16>
    tpu.vector_store %arg12[%c0_19, %c256], %17 {strides = array<i32>} : memref<256x1920xbf16, #tpu.memory_space<vmem>>, vector<256x128xbf16>,
    %c48 = arith.constant 48 : index
    %c0_20 = arith.constant 0 : index
    %19 = vector.load %arg11[%c48, %c0_20] : memref<480x128xbf16, #tpu.memory_space<vmem>>, vector<256x128xbf16>
    %c0_21 = arith.constant 0 : index
    %c384 = arith.constant 384 : index
    %20 = vector.load %arg12[%c0_21, %c384] : memref<256x1920xbf16, #tpu.memory_space<vmem>>, vector<256x128xbf16>
    tpu.vector_store %arg12[%c0_21, %c384], %19 {strides = array<i32>} : memref<256x1920xbf16, #tpu.memory_space<vmem>>, vector<256x128xbf16>,
    %c64 = arith.constant 64 : index
    %c0_22 = arith.constant 0 : index
    %21 = vector.load %arg11[%c64, %c0_22] : memref<480x128xbf16, #tpu.memory_space<vmem>>, vector<256x128xbf16>
    %c0_23 = arith.constant 0 : index
    %c512 = arith.constant 512 : index
    %22 = vector.load %arg12[%c0_23, %c512] : memref<256x1920xbf16, #tpu.memory_space<vmem>>, vector<256x128xbf16>
    tpu.vector_store %arg12[%c0_23, %c512], %21 {strides = array<i32>} : memref<256x1920xbf16, #tpu.memory_space<vmem>>, vector<256x128xbf16>,
    %c80 = arith.constant 80 : index
    %c0_24 = arith.constant 0 : index
    %23 = vector.load %arg11[%c80, %c0_24] : memref<480x128xbf16, #tpu.memory_space<vmem>>, vector<256x128xbf16>
    %c0_25 = arith.constant 0 : index
    %c640 = arith.constant 640 : index
    %24 = vector.load %arg12[%c0_25, %c640] : memref<256x1920xbf16, #tpu.memory_space<vmem>>, vector<256x128xbf16>
    tpu.vector_store %arg12[%c0_25, %c640], %23 {strides = array<i32>} : memref<256x1920xbf16, #tpu.memory_space<vmem>>, vector<256x128xbf16>,
    %c96 = arith.constant 96 : index
    %c0_26 = arith.constant 0 : index
    %25 = vector.load %arg11[%c96, %c0_26] : memref<480x128xbf16, #tpu.memory_space<vmem>>, vector<256x128xbf16>
    %c0_27 = arith.constant 0 : index
    %c768 = arith.constant 768 : index
    %26 = vector.load %arg12[%c0_27, %c768] : memref<256x1920xbf16, #tpu.memory_space<vmem>>, vector<256x128xbf16>
    tpu.vector_store %arg12[%c0_27, %c768], %25 {strides = array<i32>} : memref<256x1920xbf16, #tpu.memory_space<vmem>>, vector<256x128xbf16>,
    %c112_28 = arith.constant 112 : index
    %c0_29 = arith.constant 0 : index
    %27 = vector.load %arg11[%c112_28, %c0_29] : memref<480x128xbf16, #tpu.memory_space<vmem>>, vector<256x128xbf16>
    %c0_30 = arith.constant 0 : index
    %c896 = arith.constant 896 : index
    %28 = vector.load %arg12[%c0_30, %c896] : memref<256x1920xbf16, #tpu.memory_space<vmem>>, vector<256x128xbf16>
    tpu.vector_store %arg12[%c0_30, %c896], %27 {strides = array<i32>} : memref<256x1920xbf16, #tpu.memory_space<vmem>>, vector<256x128xbf16>,
    %c128_31 = arith.constant 128 : index
    %c0_32 = arith.constant 0 : index
    %29 = vector.load %arg11[%c128_31, %c0_32] : memref<480x128xbf16, #tpu.memory_space<vmem>>, vector<256x128xbf16>
    %c0_33 = arith.constant 0 : index
    %c1024 = arith.constant 1024 : index
    %30 = vector.load %arg12[%c0_33, %c1024] : memref<256x1920xbf16, #tpu.memory_space<vmem>>, vector<256x128xbf16>
    tpu.vector_store %arg12[%c0_33, %c1024], %29 {strides = array<i32>} : memref<256x1920xbf16, #tpu.memory_space<vmem>>, vector<256x128xbf16>,
    %c144 = arith.constant 144 : index
    %c0_34 = arith.constant 0 : index
    %31 = vector.load %arg11[%c144, %c0_34] : memref<480x128xbf16, #tpu.memory_space<vmem>>, vector<256x128xbf16>
    %c0_35 = arith.constant 0 : index
    %c1152 = arith.constant 1152 : index
    %32 = vector.load %arg12[%c0_35, %c1152] : memref<256x1920xbf16, #tpu.memory_space<vmem>>, vector<256x128xbf16>
    tpu.vector_store %arg12[%c0_35, %c1152], %31 {strides = array<i32>} : memref<256x1920xbf16, #tpu.memory_space<vmem>>, vector<256x128xbf16>,
    %c160 = arith.constant 160 : index
    %c0_36 = arith.constant 0 : index
    %33 = vector.load %arg11[%c160, %c0_36] : memref<480x128xbf16, #tpu.memory_space<vmem>>, vector<256x128xbf16>
    %c0_37 = arith.constant 0 : index
    %c1280 = arith.constant 1280 : index
    %34 = vector.load %arg12[%c0_37, %c1280] : memref<256x1920xbf16, #tpu.memory_space<vmem>>, vector<256x128xbf16>
    tpu.vector_store %arg12[%c0_37, %c1280], %33 {strides = array<i32>} : memref<256x1920xbf16, #tpu.memory_space<vmem>>, vector<256x128xbf16>,
    %c176 = arith.constant 176 : index
    %c0_38 = arith.constant 0 : index
    %35 = vector.load %arg11[%c176, %c0_38] : memref<480x128xbf16, #tpu.memory_space<vmem>>, vector<256x128xbf16>
    %c0_39 = arith.constant 0 : index
    %c1408 = arith.constant 1408 : index
    %36 = vector.load %arg12[%c0_39, %c1408] : memref<256x1920xbf16, #tpu.memory_space<vmem>>, vector<256x128xbf16>
    tpu.vector_store %arg12[%c0_39, %c1408], %35 {strides = array<i32>} : memref<256x1920xbf16, #tpu.memory_space<vmem>>, vector<256x128xbf16>,
    %c192 = arith.constant 192 : index
    %c0_40 = arith.constant 0 : index
    %37 = vector.load %arg11[%c192, %c0_40] : memref<480x128xbf16, #tpu.memory_space<vmem>>, vector<256x128xbf16>
    %c0_41 = arith.constant 0 : index
    %c1536 = arith.constant 1536 : index
    %38 = vector.load %arg12[%c0_41, %c1536] : memref<256x1920xbf16, #tpu.memory_space<vmem>>, vector<256x128xbf16>
    tpu.vector_store %arg12[%c0_41, %c1536], %37 {strides = array<i32>} : memref<256x1920xbf16, #tpu.memory_space<vmem>>, vector<256x128xbf16>,
    %c208 = arith.constant 208 : index
    %c0_42 = arith.constant 0 : index
    %39 = vector.load %arg11[%c208, %c0_42] : memref<480x128xbf16, #tpu.memory_space<vmem>>, vector<256x128xbf16>
    %c0_43 = arith.constant 0 : index
    %c1664 = arith.constant 1664 : index
    %40 = vector.load %arg12[%c0_43, %c1664] : memref<256x1920xbf16, #tpu.memory_space<vmem>>, vector<256x128xbf16>
    tpu.vector_store %arg12[%c0_43, %c1664], %39 {strides = array<i32>} : memref<256x1920xbf16, #tpu.memory_space<vmem>>, vector<256x128xbf16>,
    %c224 = arith.constant 224 : index
    %c0_44 = arith.constant 0 : index
    %41 = vector.load %arg11[%c224, %c0_44] : memref<480x128xbf16, #tpu.memory_space<vmem>>, vector<256x128xbf16>
    %c0_45 = arith.constant 0 : index
    %c1792 = arith.constant 1792 : index
    %42 = vector.load %arg12[%c0_45, %c1792] : memref<256x1920xbf16, #tpu.memory_space<vmem>>, vector<256x128xbf16>
    tpu.vector_store %arg12[%c0_45, %c1792], %41 {strides = array<i32>} : memref<256x1920xbf16, #tpu.memory_space<vmem>>, vector<256x128xbf16>,
    %c0_46 = arith.constant 0 : index
    %c0_47 = arith.constant 0 : index
    %43 = vector.load %arg12[%c0_46, %c0_47] : memref<256x1920xbf16, #tpu.memory_space<vmem>>, vector<256x1920xbf16>
    %c0_48 = arith.constant 0 : index
    %c0_49 = arith.constant 0 : index
    %44 = vector.load %arg7[%c0_48, %c0_49] : memref<1920x128xbf16, #tpu.memory_space<vmem>>, vector<1920x128xbf16>
    %cst_50 = arith.constant dense<0.000000e+00> : vector<256x128xf32>
    %45 = tpu.matmul %43, %44, %cst_50 {dimension_numbers = #tpu.dot_dimension_numbers<[1], [0], [0], [1], [0, 0, 1, 1], [], []>} : vector<256x1920xbf16>, vector<1920x128xbf16>, vector<256x128xf32> -> vector<256x128xf32>
    %46 = vector.shape_cast %45 : vector<256x128xf32> to vector<16x16x128xf32>
    %c0_51 = arith.constant 0 : index
    %c0_52 = arith.constant 0 : index
    %c0_53 = arith.constant 0 : index
    %47 = vector.load %arg13[%c0_51, %c0_52, %c0_53] : memref<16x16x128xf32, #tpu.memory_space<vmem>>, vector<16x16x128xf32>
    tpu.vector_store %arg13[%c0_51, %c0_52, %c0_53], %46 {strides = array<i32>} : memref<16x16x128xf32, #tpu.memory_space<vmem>>, vector<16x16x128xf32>,
    %c0_54 = arith.constant 0 : index
    %c0_55 = arith.constant 0 : index
    %c0_56 = arith.constant 0 : index
    %48 = vector.load %arg2[%c0_54, %c0_55, %c0_56] : memref<1x256x64xbf16, #tpu.memory_space<vmem>>, vector<1x256x64xbf16>
    %49 = vector.shape_cast %48 : vector<1x256x64xbf16> to vector<256x64xbf16>
    %c0_57 = arith.constant 0 : index
    %c0_58 = arith.constant 0 : index
    %50 = vector.load %arg5[%c0_57, %c0_58] : memref<64x128xbf16, #tpu.memory_space<vmem>>, vector<64x128xbf16>
    %cst_59 = arith.constant dense<0.000000e+00> : vector<256x128xf32>
    %51 = tpu.matmul %49, %50, %cst_59 {dimension_numbers = #tpu.dot_dimension_numbers<[1], [0], [0], [1], [0, 0, 1, 1], [], []>} : vector<256x64xbf16>, vector<64x128xbf16>, vector<256x128xf32> -> vector<256x128xf32>
    %c0_60 = arith.constant 0 : index
    %c0_61 = arith.constant 0 : index
    %52 = vector.load %arg6[%c0_60, %c0_61] : memref<1x128xf32, #tpu.memory_space<vmem>>, vector<1x128xf32>
    %53 = vector.broadcast %52 : vector<1x128xf32> to vector<256x128xf32>
    %54 = arith.addf %51, %53 : vector<256x128xf32>
    %55 = arith.truncf %54 : vector<256x128xf32> to vector<256x128xbf16>
    %cst_62 = arith.constant 0.000000e+00 : bf16
    %56 = vector.broadcast %cst_62 : bf16 to vector<112x128xbf16>
    %c0_63 = arith.constant 0 : index
    %c0_64 = arith.constant 0 : index
    %57 = vector.load %arg11[%c0_63, %c0_64] : memref<480x128xbf16, #tpu.memory_space<vmem>>, vector<112x128xbf16>
    tpu.vector_store %arg11[%c0_63, %c0_64], %56 {strides = array<i32>} : memref<480x128xbf16, #tpu.memory_space<vmem>>, vector<112x128xbf16>,
    %c112_65 = arith.constant 112 : index
    %c0_66 = arith.constant 0 : index
    %58 = vector.load %arg11[%c112_65, %c0_66] : memref<480x128xbf16, #tpu.memory_space<vmem>>, vector<256x128xbf16>
    tpu.vector_store %arg11[%c112_65, %c0_66], %55 {strides = array<i32>} : memref<480x128xbf16, #tpu.memory_space<vmem>>, vector<256x128xbf16>,
    %cst_67 = arith.constant 0.000000e+00 : bf16
    %59 = vector.broadcast %cst_67 : bf16 to vector<112x128xbf16>
    %c368_68 = arith.constant 368 : index
    %c0_69 = arith.constant 0 : index
    %60 = vector.load %arg11[%c368_68, %c0_69] : memref<480x128xbf16, #tpu.memory_space<vmem>>, vector<112x128xbf16>
    tpu.vector_store %arg11[%c368_68, %c0_69], %59 {strides = array<i32>} : memref<480x128xbf16, #tpu.memory_space<vmem>>, vector<112x128xbf16>,
    %c0_70 = arith.constant 0 : index
    %c0_71 = arith.constant 0 : index
    %61 = vector.load %arg11[%c0_70, %c0_71] : memref<480x128xbf16, #tpu.memory_space<vmem>>, vector<256x128xbf16>
    %c0_72 = arith.constant 0 : index
    %c0_73 = arith.constant 0 : index
    %62 = vector.load %arg12[%c0_72, %c0_73] : memref<256x1920xbf16, #tpu.memory_space<vmem>>, vector<256x128xbf16>
    tpu.vector_store %arg12[%c0_72, %c0_73], %61 {strides = array<i32>} : memref<256x1920xbf16, #tpu.memory_space<vmem>>, vector<256x128xbf16>,
    %c16_74 = arith.constant 16 : index
    %c0_75 = arith.constant 0 : index
    %63 = vector.load %arg11[%c16_74, %c0_75] : memref<480x128xbf16, #tpu.memory_space<vmem>>, vector<256x128xbf16>
    %c0_76 = arith.constant 0 : index
    %c128_77 = arith.constant 128 : index
    %64 = vector.load %arg12[%c0_76, %c128_77] : memref<256x1920xbf16, #tpu.memory_space<vmem>>, vector<256x128xbf16>
    tpu.vector_store %arg12[%c0_76, %c128_77], %63 {strides = array<i32>} : memref<256x1920xbf16, #tpu.memory_space<vmem>>, vector<256x128xbf16>,
    %c32_78 = arith.constant 32 : index
    %c0_79 = arith.constant 0 : index
    %65 = vector.load %arg11[%c32_78, %c0_79] : memref<480x128xbf16, #tpu.memory_space<vmem>>, vector<256x128xbf16>
    %c0_80 = arith.constant 0 : index
    %c256_81 = arith.constant 256 : index
    %66 = vector.load %arg12[%c0_80, %c256_81] : memref<256x1920xbf16, #tpu.memory_space<vmem>>, vector<256x128xbf16>
    tpu.vector_store %arg12[%c0_80, %c256_81], %65 {strides = array<i32>} : memref<256x1920xbf16, #tpu.memory_space<vmem>>, vector<256x128xbf16>,
    %c48_82 = arith.constant 48 : index
    %c0_83 = arith.constant 0 : index
    %67 = vector.load %arg11[%c48_82, %c0_83] : memref<480x128xbf16, #tpu.memory_space<vmem>>, vector<256x128xbf16>
    %c0_84 = arith.constant 0 : index
    %c384_85 = arith.constant 384 : index
    %68 = vector.load %arg12[%c0_84, %c384_85] : memref<256x1920xbf16, #tpu.memory_space<vmem>>, vector<256x128xbf16>
    tpu.vector_store %arg12[%c0_84, %c384_85], %67 {strides = array<i32>} : memref<256x1920xbf16, #tpu.memory_space<vmem>>, vector<256x128xbf16>,
    %c64_86 = arith.constant 64 : index
    %c0_87 = arith.constant 0 : index
    %69 = vector.load %arg11[%c64_86, %c0_87] : memref<480x128xbf16, #tpu.memory_space<vmem>>, vector<256x128xbf16>
    %c0_88 = arith.constant 0 : index
    %c512_89 = arith.constant 512 : index
    %70 = vector.load %arg12[%c0_88, %c512_89] : memref<256x1920xbf16, #tpu.memory_space<vmem>>, vector<256x128xbf16>
    tpu.vector_store %arg12[%c0_88, %c512_89], %69 {strides = array<i32>} : memref<256x1920xbf16, #tpu.memory_space<vmem>>, vector<256x128xbf16>,
    %c80_90 = arith.constant 80 : index
    %c0_91 = arith.constant 0 : index
    %71 = vector.load %arg11[%c80_90, %c0_91] : memref<480x128xbf16, #tpu.memory_space<vmem>>, vector<256x128xbf16>
    %c0_92 = arith.constant 0 : index
    %c640_93 = arith.constant 640 : index
    %72 = vector.load %arg12[%c0_92, %c640_93] : memref<256x1920xbf16, #tpu.memory_space<vmem>>, vector<256x128xbf16>
    tpu.vector_store %arg12[%c0_92, %c640_93], %71 {strides = array<i32>} : memref<256x1920xbf16, #tpu.memory_space<vmem>>, vector<256x128xbf16>,
    %c96_94 = arith.constant 96 : index
    %c0_95 = arith.constant 0 : index
    %73 = vector.load %arg11[%c96_94, %c0_95] : memref<480x128xbf16, #tpu.memory_space<vmem>>, vector<256x128xbf16>
    %c0_96 = arith.constant 0 : index
    %c768_97 = arith.constant 768 : index
    %74 = vector.load %arg12[%c0_96, %c768_97] : memref<256x1920xbf16, #tpu.memory_space<vmem>>, vector<256x128xbf16>
    tpu.vector_store %arg12[%c0_96, %c768_97], %73 {strides = array<i32>} : memref<256x1920xbf16, #tpu.memory_space<vmem>>, vector<256x128xbf16>,
    %c112_98 = arith.constant 112 : index
    %c0_99 = arith.constant 0 : index
    %75 = vector.load %arg11[%c112_98, %c0_99] : memref<480x128xbf16, #tpu.memory_space<vmem>>, vector<256x128xbf16>
    %c0_100 = arith.constant 0 : index
    %c896_101 = arith.constant 896 : index
    %76 = vector.load %arg12[%c0_100, %c896_101] : memref<256x1920xbf16, #tpu.memory_space<vmem>>, vector<256x128xbf16>
    tpu.vector_store %arg12[%c0_100, %c896_101], %75 {strides = array<i32>} : memref<256x1920xbf16, #tpu.memory_space<vmem>>, vector<256x128xbf16>,
    %c128_102 = arith.constant 128 : index
    %c0_103 = arith.constant 0 : index
    %77 = vector.load %arg11[%c128_102, %c0_103] : memref<480x128xbf16, #tpu.memory_space<vmem>>, vector<256x128xbf16>
    %c0_104 = arith.constant 0 : index
    %c1024_105 = arith.constant 1024 : index
    %78 = vector.load %arg12[%c0_104, %c1024_105] : memref<256x1920xbf16, #tpu.memory_space<vmem>>, vector<256x128xbf16>
    tpu.vector_store %arg12[%c0_104, %c1024_105], %77 {strides = array<i32>} : memref<256x1920xbf16, #tpu.memory_space<vmem>>, vector<256x128xbf16>,
    %c144_106 = arith.constant 144 : index
    %c0_107 = arith.constant 0 : index
    %79 = vector.load %arg11[%c144_106, %c0_107] : memref<480x128xbf16, #tpu.memory_space<vmem>>, vector<256x128xbf16>
    %c0_108 = arith.constant 0 : index
    %c1152_109 = arith.constant 1152 : index
    %80 = vector.load %arg12[%c0_108, %c1152_109] : memref<256x1920xbf16, #tpu.memory_space<vmem>>, vector<256x128xbf16>
    tpu.vector_store %arg12[%c0_108, %c1152_109], %79 {strides = array<i32>} : memref<256x1920xbf16, #tpu.memory_space<vmem>>, vector<256x128xbf16>,
    %c160_110 = arith.constant 160 : index
    %c0_111 = arith.constant 0 : index
    %81 = vector.load %arg11[%c160_110, %c0_111] : memref<480x128xbf16, #tpu.memory_space<vmem>>, vector<256x128xbf16>
    %c0_112 = arith.constant 0 : index
    %c1280_113 = arith.constant 1280 : index
    %82 = vector.load %arg12[%c0_112, %c1280_113] : memref<256x1920xbf16, #tpu.memory_space<vmem>>, vector<256x128xbf16>
    tpu.vector_store %arg12[%c0_112, %c1280_113], %81 {strides = array<i32>} : memref<256x1920xbf16, #tpu.memory_space<vmem>>, vector<256x128xbf16>,
    %c176_114 = arith.constant 176 : index
    %c0_115 = arith.constant 0 : index
    %83 = vector.load %arg11[%c176_114, %c0_115] : memref<480x128xbf16, #tpu.memory_space<vmem>>, vector<256x128xbf16>
    %c0_116 = arith.constant 0 : index
    %c1408_117 = arith.constant 1408 : index
    %84 = vector.load %arg12[%c0_116, %c1408_117] : memref<256x1920xbf16, #tpu.memory_space<vmem>>, vector<256x128xbf16>
    tpu.vector_store %arg12[%c0_116, %c1408_117], %83 {strides = array<i32>} : memref<256x1920xbf16, #tpu.memory_space<vmem>>, vector<256x128xbf16>,
    %c192_118 = arith.constant 192 : index
    %c0_119 = arith.constant 0 : index
    %85 = vector.load %arg11[%c192_118, %c0_119] : memref<480x128xbf16, #tpu.memory_space<vmem>>, vector<256x128xbf16>
    %c0_120 = arith.constant 0 : index
    %c1536_121 = arith.constant 1536 : index
    %86 = vector.load %arg12[%c0_120, %c1536_121] : memref<256x1920xbf16, #tpu.memory_space<vmem>>, vector<256x128xbf16>
    tpu.vector_store %arg12[%c0_120, %c1536_121], %85 {strides = array<i32>} : memref<256x1920xbf16, #tpu.memory_space<vmem>>, vector<256x128xbf16>,
    %c208_122 = arith.constant 208 : index
    %c0_123 = arith.constant 0 : index
    %87 = vector.load %arg11[%c208_122, %c0_123] : memref<480x128xbf16, #tpu.memory_space<vmem>>, vector<256x128xbf16>
    %c0_124 = arith.constant 0 : index
    %c1664_125 = arith.constant 1664 : index
    %88 = vector.load %arg12[%c0_124, %c1664_125] : memref<256x1920xbf16, #tpu.memory_space<vmem>>, vector<256x128xbf16>
    tpu.vector_store %arg12[%c0_124, %c1664_125], %87 {strides = array<i32>} : memref<256x1920xbf16, #tpu.memory_space<vmem>>, vector<256x128xbf16>,
    %c224_126 = arith.constant 224 : index
    %c0_127 = arith.constant 0 : index
    %89 = vector.load %arg11[%c224_126, %c0_127] : memref<480x128xbf16, #tpu.memory_space<vmem>>, vector<256x128xbf16>
    %c0_128 = arith.constant 0 : index
    %c1792_129 = arith.constant 1792 : index
    %90 = vector.load %arg12[%c0_128, %c1792_129] : memref<256x1920xbf16, #tpu.memory_space<vmem>>, vector<256x128xbf16>
    tpu.vector_store %arg12[%c0_128, %c1792_129], %89 {strides = array<i32>} : memref<256x1920xbf16, #tpu.memory_space<vmem>>, vector<256x128xbf16>,
    %c0_130 = arith.constant 0 : index
    %c0_131 = arith.constant 0 : index
    %91 = vector.load %arg12[%c0_130, %c0_131] : memref<256x1920xbf16, #tpu.memory_space<vmem>>, vector<256x1920xbf16>
    %c0_132 = arith.constant 0 : index
    %c0_133 = arith.constant 0 : index
    %92 = vector.load %arg8[%c0_132, %c0_133] : memref<1920x128xbf16, #tpu.memory_space<vmem>>, vector<1920x128xbf16>
    %cst_134 = arith.constant dense<0.000000e+00> : vector<256x128xf32>
    %93 = tpu.matmul %91, %92, %cst_134 {dimension_numbers = #tpu.dot_dimension_numbers<[1], [0], [0], [1], [0, 0, 1, 1], [], []>} : vector<256x1920xbf16>, vector<1920x128xbf16>, vector<256x128xf32> -> vector<256x128xf32>
    %c0_135 = arith.constant 0 : index
    %c0_136 = arith.constant 0 : index
    %94 = vector.load %arg9[%c0_135, %c0_136] : memref<1x128xf32, #tpu.memory_space<vmem>>, vector<1x128xf32>
    %95 = vector.broadcast %94 : vector<1x128xf32> to vector<256x128xf32>
    %96 = arith.addf %93, %95 : vector<256x128xf32>
    %97 = vector.extract_strided_slice %96 {offsets = [0, 0], sizes = [16, 128], strides = [1, 1]} : vector<256x128xf32> to vector<16x128xf32>
    %c0_137 = arith.constant 0 : index
    %c0_138 = arith.constant 0 : index
    %c0_139 = arith.constant 0 : index
    %98 = vector.load %arg13[%c0_137, %c0_138, %c0_139] : memref<16x16x128xf32, #tpu.memory_space<vmem>>, vector<16x1x128xf32>
    %99 = vector.shape_cast %98 : vector<16x1x128xf32> to vector<16x128xf32>
    %100 = arith.addf %97, %99 : vector<16x128xf32>
    %101 = arith.truncf %100 : vector<16x128xf32> to vector<16x128xbf16>
    %c0_140 = arith.constant 0 : index
    %c0_141 = arith.constant 0 : index
    %c0_142 = arith.constant 0 : index
    %102 = vector.load %arg10[%c0_140, %c0_141, %c0_142] : memref<1x256x128xbf16, #tpu.memory_space<vmem>>, vector<1x16x128xbf16>
    %103 = vector.shape_cast %102 : vector<1x16x128xbf16> to vector<16x128xbf16>
    %104 = vector.shape_cast %101 : vector<16x128xbf16> to vector<1x16x128xbf16>
    tpu.vector_store %arg10[%c0_140, %c0_141, %c0_142], %104 {strides = array<i32>} : memref<1x256x128xbf16, #tpu.memory_space<vmem>>, vector<1x16x128xbf16>,
    %105 = vector.extract_strided_slice %96 {offsets = [16, 0], sizes = [16, 128], strides = [1, 1]} : vector<256x128xf32> to vector<16x128xf32>
    %c0_143 = arith.constant 0 : index
    %c1 = arith.constant 1 : index
    %c0_144 = arith.constant 0 : index
    %106 = vector.load %arg13[%c0_143, %c1, %c0_144] : memref<16x16x128xf32, #tpu.memory_space<vmem>>, vector<16x1x128xf32>
    %107 = vector.shape_cast %106 : vector<16x1x128xf32> to vector<16x128xf32>
    %108 = arith.addf %105, %107 : vector<16x128xf32>
    %109 = arith.truncf %108 : vector<16x128xf32> to vector<16x128xbf16>
    %c0_145 = arith.constant 0 : index
    %c16_146 = arith.constant 16 : index
    %c0_147 = arith.constant 0 : index
    %110 = vector.load %arg10[%c0_145, %c16_146, %c0_147] : memref<1x256x128xbf16, #tpu.memory_space<vmem>>, vector<1x16x128xbf16>
    %111 = vector.shape_cast %110 : vector<1x16x128xbf16> to vector<16x128xbf16>
    %112 = vector.shape_cast %109 : vector<16x128xbf16> to vector<1x16x128xbf16>
    tpu.vector_store %arg10[%c0_145, %c16_146, %c0_147], %112 {strides = array<i32>} : memref<1x256x128xbf16, #tpu.memory_space<vmem>>, vector<1x16x128xbf16>,
    %113 = vector.extract_strided_slice %96 {offsets = [32, 0], sizes = [16, 128], strides = [1, 1]} : vector<256x128xf32> to vector<16x128xf32>
    %c0_148 = arith.constant 0 : index
    %c2 = arith.constant 2 : index
    %c0_149 = arith.constant 0 : index
    %114 = vector.load %arg13[%c0_148, %c2, %c0_149] : memref<16x16x128xf32, #tpu.memory_space<vmem>>, vector<16x1x128xf32>
    %115 = vector.shape_cast %114 : vector<16x1x128xf32> to vector<16x128xf32>
    %116 = arith.addf %113, %115 : vector<16x128xf32>
    %117 = arith.truncf %116 : vector<16x128xf32> to vector<16x128xbf16>
    %c0_150 = arith.constant 0 : index
    %c32_151 = arith.constant 32 : index
    %c0_152 = arith.constant 0 : index
    %118 = vector.load %arg10[%c0_150, %c32_151, %c0_152] : memref<1x256x128xbf16, #tpu.memory_space<vmem>>, vector<1x16x128xbf16>
    %119 = vector.shape_cast %118 : vector<1x16x128xbf16> to vector<16x128xbf16>
    %120 = vector.shape_cast %117 : vector<16x128xbf16> to vector<1x16x128xbf16>
    tpu.vector_store %arg10[%c0_150, %c32_151, %c0_152], %120 {strides = array<i32>} : memref<1x256x128xbf16, #tpu.memory_space<vmem>>, vector<1x16x128xbf16>,
    %121 = vector.extract_strided_slice %96 {offsets = [48, 0], sizes = [16, 128], strides = [1, 1]} : vector<256x128xf32> to vector<16x128xf32>
    %c0_153 = arith.constant 0 : index
    %c3 = arith.constant 3 : index
    %c0_154 = arith.constant 0 : index
    %122 = vector.load %arg13[%c0_153, %c3, %c0_154] : memref<16x16x128xf32, #tpu.memory_space<vmem>>, vector<16x1x128xf32>
    %123 = vector.shape_cast %122 : vector<16x1x128xf32> to vector<16x128xf32>
    %124 = arith.addf %121, %123 : vector<16x128xf32>
    %125 = arith.truncf %124 : vector<16x128xf32> to vector<16x128xbf16>
    %c0_155 = arith.constant 0 : index
    %c48_156 = arith.constant 48 : index
    %c0_157 = arith.constant 0 : index
    %126 = vector.load %arg10[%c0_155, %c48_156, %c0_157] : memref<1x256x128xbf16, #tpu.memory_space<vmem>>, vector<1x16x128xbf16>
    %127 = vector.shape_cast %126 : vector<1x16x128xbf16> to vector<16x128xbf16>
    %128 = vector.shape_cast %125 : vector<16x128xbf16> to vector<1x16x128xbf16>
    tpu.vector_store %arg10[%c0_155, %c48_156, %c0_157], %128 {strides = array<i32>} : memref<1x256x128xbf16, #tpu.memory_space<vmem>>, vector<1x16x128xbf16>,
    %129 = vector.extract_strided_slice %96 {offsets = [64, 0], sizes = [16, 128], strides = [1, 1]} : vector<256x128xf32> to vector<16x128xf32>
    %c0_158 = arith.constant 0 : index
    %c4 = arith.constant 4 : index
    %c0_159 = arith.constant 0 : index
    %130 = vector.load %arg13[%c0_158, %c4, %c0_159] : memref<16x16x128xf32, #tpu.memory_space<vmem>>, vector<16x1x128xf32>
    %131 = vector.shape_cast %130 : vector<16x1x128xf32> to vector<16x128xf32>
    %132 = arith.addf %129, %131 : vector<16x128xf32>
    %133 = arith.truncf %132 : vector<16x128xf32> to vector<16x128xbf16>
    %c0_160 = arith.constant 0 : index
    %c64_161 = arith.constant 64 : index
    %c0_162 = arith.constant 0 : index
    %134 = vector.load %arg10[%c0_160, %c64_161, %c0_162] : memref<1x256x128xbf16, #tpu.memory_space<vmem>>, vector<1x16x128xbf16>
    %135 = vector.shape_cast %134 : vector<1x16x128xbf16> to vector<16x128xbf16>
    %136 = vector.shape_cast %133 : vector<16x128xbf16> to vector<1x16x128xbf16>
    tpu.vector_store %arg10[%c0_160, %c64_161, %c0_162], %136 {strides = array<i32>} : memref<1x256x128xbf16, #tpu.memory_space<vmem>>, vector<1x16x128xbf16>,
    %137 = vector.extract_strided_slice %96 {offsets = [80, 0], sizes = [16, 128], strides = [1, 1]} : vector<256x128xf32> to vector<16x128xf32>
    %c0_163 = arith.constant 0 : index
    %c5 = arith.constant 5 : index
    %c0_164 = arith.constant 0 : index
    %138 = vector.load %arg13[%c0_163, %c5, %c0_164] : memref<16x16x128xf32, #tpu.memory_space<vmem>>, vector<16x1x128xf32>
    %139 = vector.shape_cast %138 : vector<16x1x128xf32> to vector<16x128xf32>
    %140 = arith.addf %137, %139 : vector<16x128xf32>
    %141 = arith.truncf %140 : vector<16x128xf32> to vector<16x128xbf16>
    %c0_165 = arith.constant 0 : index
    %c80_166 = arith.constant 80 : index
    %c0_167 = arith.constant 0 : index
    %142 = vector.load %arg10[%c0_165, %c80_166, %c0_167] : memref<1x256x128xbf16, #tpu.memory_space<vmem>>, vector<1x16x128xbf16>
    %143 = vector.shape_cast %142 : vector<1x16x128xbf16> to vector<16x128xbf16>
    %144 = vector.shape_cast %141 : vector<16x128xbf16> to vector<1x16x128xbf16>
    tpu.vector_store %arg10[%c0_165, %c80_166, %c0_167], %144 {strides = array<i32>} : memref<1x256x128xbf16, #tpu.memory_space<vmem>>, vector<1x16x128xbf16>,
    %145 = vector.extract_strided_slice %96 {offsets = [96, 0], sizes = [16, 128], strides = [1, 1]} : vector<256x128xf32> to vector<16x128xf32>
    %c0_168 = arith.constant 0 : index
    %c6 = arith.constant 6 : index
    %c0_169 = arith.constant 0 : index
    %146 = vector.load %arg13[%c0_168, %c6, %c0_169] : memref<16x16x128xf32, #tpu.memory_space<vmem>>, vector<16x1x128xf32>
    %147 = vector.shape_cast %146 : vector<16x1x128xf32> to vector<16x128xf32>
    %148 = arith.addf %145, %147 : vector<16x128xf32>
    %149 = arith.truncf %148 : vector<16x128xf32> to vector<16x128xbf16>
    %c0_170 = arith.constant 0 : index
    %c96_171 = arith.constant 96 : index
    %c0_172 = arith.constant 0 : index
    %150 = vector.load %arg10[%c0_170, %c96_171, %c0_172] : memref<1x256x128xbf16, #tpu.memory_space<vmem>>, vector<1x16x128xbf16>
    %151 = vector.shape_cast %150 : vector<1x16x128xbf16> to vector<16x128xbf16>
    %152 = vector.shape_cast %149 : vector<16x128xbf16> to vector<1x16x128xbf16>
    tpu.vector_store %arg10[%c0_170, %c96_171, %c0_172], %152 {strides = array<i32>} : memref<1x256x128xbf16, #tpu.memory_space<vmem>>, vector<1x16x128xbf16>,
    %153 = vector.extract_strided_slice %96 {offsets = [112, 0], sizes = [16, 128], strides = [1, 1]} : vector<256x128xf32> to vector<16x128xf32>
    %c0_173 = arith.constant 0 : index
    %c7 = arith.constant 7 : index
    %c0_174 = arith.constant 0 : index
    %154 = vector.load %arg13[%c0_173, %c7, %c0_174] : memref<16x16x128xf32, #tpu.memory_space<vmem>>, vector<16x1x128xf32>
    %155 = vector.shape_cast %154 : vector<16x1x128xf32> to vector<16x128xf32>
    %156 = arith.addf %153, %155 : vector<16x128xf32>
    %157 = arith.truncf %156 : vector<16x128xf32> to vector<16x128xbf16>
    %c0_175 = arith.constant 0 : index
    %c112_176 = arith.constant 112 : index
    %c0_177 = arith.constant 0 : index
    %158 = vector.load %arg10[%c0_175, %c112_176, %c0_177] : memref<1x256x128xbf16, #tpu.memory_space<vmem>>, vector<1x16x128xbf16>
    %159 = vector.shape_cast %158 : vector<1x16x128xbf16> to vector<16x128xbf16>
    %160 = vector.shape_cast %157 : vector<16x128xbf16> to vector<1x16x128xbf16>
    tpu.vector_store %arg10[%c0_175, %c112_176, %c0_177], %160 {strides = array<i32>} : memref<1x256x128xbf16, #tpu.memory_space<vmem>>, vector<1x16x128xbf16>,
    %161 = vector.extract_strided_slice %96 {offsets = [128, 0], sizes = [16, 128], strides = [1, 1]} : vector<256x128xf32> to vector<16x128xf32>
    %c0_178 = arith.constant 0 : index
    %c8 = arith.constant 8 : index
    %c0_179 = arith.constant 0 : index
    %162 = vector.load %arg13[%c0_178, %c8, %c0_179] : memref<16x16x128xf32, #tpu.memory_space<vmem>>, vector<16x1x128xf32>
    %163 = vector.shape_cast %162 : vector<16x1x128xf32> to vector<16x128xf32>
    %164 = arith.addf %161, %163 : vector<16x128xf32>
    %165 = arith.truncf %164 : vector<16x128xf32> to vector<16x128xbf16>
    %c0_180 = arith.constant 0 : index
    %c128_181 = arith.constant 128 : index
    %c0_182 = arith.constant 0 : index
    %166 = vector.load %arg10[%c0_180, %c128_181, %c0_182] : memref<1x256x128xbf16, #tpu.memory_space<vmem>>, vector<1x16x128xbf16>
    %167 = vector.shape_cast %166 : vector<1x16x128xbf16> to vector<16x128xbf16>
    %168 = vector.shape_cast %165 : vector<16x128xbf16> to vector<1x16x128xbf16>
    tpu.vector_store %arg10[%c0_180, %c128_181, %c0_182], %168 {strides = array<i32>} : memref<1x256x128xbf16, #tpu.memory_space<vmem>>, vector<1x16x128xbf16>,
    %169 = vector.extract_strided_slice %96 {offsets = [144, 0], sizes = [16, 128], strides = [1, 1]} : vector<256x128xf32> to vector<16x128xf32>
    %c0_183 = arith.constant 0 : index
    %c9 = arith.constant 9 : index
    %c0_184 = arith.constant 0 : index
    %170 = vector.load %arg13[%c0_183, %c9, %c0_184] : memref<16x16x128xf32, #tpu.memory_space<vmem>>, vector<16x1x128xf32>
    %171 = vector.shape_cast %170 : vector<16x1x128xf32> to vector<16x128xf32>
    %172 = arith.addf %169, %171 : vector<16x128xf32>
    %173 = arith.truncf %172 : vector<16x128xf32> to vector<16x128xbf16>
    %c0_185 = arith.constant 0 : index
    %c144_186 = arith.constant 144 : index
    %c0_187 = arith.constant 0 : index
    %174 = vector.load %arg10[%c0_185, %c144_186, %c0_187] : memref<1x256x128xbf16, #tpu.memory_space<vmem>>, vector<1x16x128xbf16>
    %175 = vector.shape_cast %174 : vector<1x16x128xbf16> to vector<16x128xbf16>
    %176 = vector.shape_cast %173 : vector<16x128xbf16> to vector<1x16x128xbf16>
    tpu.vector_store %arg10[%c0_185, %c144_186, %c0_187], %176 {strides = array<i32>} : memref<1x256x128xbf16, #tpu.memory_space<vmem>>, vector<1x16x128xbf16>,
    %177 = vector.extract_strided_slice %96 {offsets = [160, 0], sizes = [16, 128], strides = [1, 1]} : vector<256x128xf32> to vector<16x128xf32>
    %c0_188 = arith.constant 0 : index
    %c10 = arith.constant 10 : index
    %c0_189 = arith.constant 0 : index
    %178 = vector.load %arg13[%c0_188, %c10, %c0_189] : memref<16x16x128xf32, #tpu.memory_space<vmem>>, vector<16x1x128xf32>
    %179 = vector.shape_cast %178 : vector<16x1x128xf32> to vector<16x128xf32>
    %180 = arith.addf %177, %179 : vector<16x128xf32>
    %181 = arith.truncf %180 : vector<16x128xf32> to vector<16x128xbf16>
    %c0_190 = arith.constant 0 : index
    %c160_191 = arith.constant 160 : index
    %c0_192 = arith.constant 0 : index
    %182 = vector.load %arg10[%c0_190, %c160_191, %c0_192] : memref<1x256x128xbf16, #tpu.memory_space<vmem>>, vector<1x16x128xbf16>
    %183 = vector.shape_cast %182 : vector<1x16x128xbf16> to vector<16x128xbf16>
    %184 = vector.shape_cast %181 : vector<16x128xbf16> to vector<1x16x128xbf16>
    tpu.vector_store %arg10[%c0_190, %c160_191, %c0_192], %184 {strides = array<i32>} : memref<1x256x128xbf16, #tpu.memory_space<vmem>>, vector<1x16x128xbf16>,
    %185 = vector.extract_strided_slice %96 {offsets = [176, 0], sizes = [16, 128], strides = [1, 1]} : vector<256x128xf32> to vector<16x128xf32>
    %c0_193 = arith.constant 0 : index
    %c11 = arith.constant 11 : index
    %c0_194 = arith.constant 0 : index
    %186 = vector.load %arg13[%c0_193, %c11, %c0_194] : memref<16x16x128xf32, #tpu.memory_space<vmem>>, vector<16x1x128xf32>
    %187 = vector.shape_cast %186 : vector<16x1x128xf32> to vector<16x128xf32>
    %188 = arith.addf %185, %187 : vector<16x128xf32>
    %189 = arith.truncf %188 : vector<16x128xf32> to vector<16x128xbf16>
    %c0_195 = arith.constant 0 : index
    %c176_196 = arith.constant 176 : index
    %c0_197 = arith.constant 0 : index
    %190 = vector.load %arg10[%c0_195, %c176_196, %c0_197] : memref<1x256x128xbf16, #tpu.memory_space<vmem>>, vector<1x16x128xbf16>
    %191 = vector.shape_cast %190 : vector<1x16x128xbf16> to vector<16x128xbf16>
    %192 = vector.shape_cast %189 : vector<16x128xbf16> to vector<1x16x128xbf16>
    tpu.vector_store %arg10[%c0_195, %c176_196, %c0_197], %192 {strides = array<i32>} : memref<1x256x128xbf16, #tpu.memory_space<vmem>>, vector<1x16x128xbf16>,
    %193 = vector.extract_strided_slice %96 {offsets = [192, 0], sizes = [16, 128], strides = [1, 1]} : vector<256x128xf32> to vector<16x128xf32>
    %c0_198 = arith.constant 0 : index
    %c12 = arith.constant 12 : index
    %c0_199 = arith.constant 0 : index
    %194 = vector.load %arg13[%c0_198, %c12, %c0_199] : memref<16x16x128xf32, #tpu.memory_space<vmem>>, vector<16x1x128xf32>
    %195 = vector.shape_cast %194 : vector<16x1x128xf32> to vector<16x128xf32>
    %196 = arith.addf %193, %195 : vector<16x128xf32>
    %197 = arith.truncf %196 : vector<16x128xf32> to vector<16x128xbf16>
    %c0_200 = arith.constant 0 : index
    %c192_201 = arith.constant 192 : index
    %c0_202 = arith.constant 0 : index
    %198 = vector.load %arg10[%c0_200, %c192_201, %c0_202] : memref<1x256x128xbf16, #tpu.memory_space<vmem>>, vector<1x16x128xbf16>
    %199 = vector.shape_cast %198 : vector<1x16x128xbf16> to vector<16x128xbf16>
    %200 = vector.shape_cast %197 : vector<16x128xbf16> to vector<1x16x128xbf16>
    tpu.vector_store %arg10[%c0_200, %c192_201, %c0_202], %200 {strides = array<i32>} : memref<1x256x128xbf16, #tpu.memory_space<vmem>>, vector<1x16x128xbf16>,
    %201 = vector.extract_strided_slice %96 {offsets = [208, 0], sizes = [16, 128], strides = [1, 1]} : vector<256x128xf32> to vector<16x128xf32>
    %c0_203 = arith.constant 0 : index
    %c13 = arith.constant 13 : index
    %c0_204 = arith.constant 0 : index
    %202 = vector.load %arg13[%c0_203, %c13, %c0_204] : memref<16x16x128xf32, #tpu.memory_space<vmem>>, vector<16x1x128xf32>
    %203 = vector.shape_cast %202 : vector<16x1x128xf32> to vector<16x128xf32>
    %204 = arith.addf %201, %203 : vector<16x128xf32>
    %205 = arith.truncf %204 : vector<16x128xf32> to vector<16x128xbf16>
    %c0_205 = arith.constant 0 : index
    %c208_206 = arith.constant 208 : index
    %c0_207 = arith.constant 0 : index
    %206 = vector.load %arg10[%c0_205, %c208_206, %c0_207] : memref<1x256x128xbf16, #tpu.memory_space<vmem>>, vector<1x16x128xbf16>
    %207 = vector.shape_cast %206 : vector<1x16x128xbf16> to vector<16x128xbf16>
    %208 = vector.shape_cast %205 : vector<16x128xbf16> to vector<1x16x128xbf16>
    tpu.vector_store %arg10[%c0_205, %c208_206, %c0_207], %208 {strides = array<i32>} : memref<1x256x128xbf16, #tpu.memory_space<vmem>>, vector<1x16x128xbf16>,
    %209 = vector.extract_strided_slice %96 {offsets = [224, 0], sizes = [16, 128], strides = [1, 1]} : vector<256x128xf32> to vector<16x128xf32>
    %c0_208 = arith.constant 0 : index
    %c14 = arith.constant 14 : index
    %c0_209 = arith.constant 0 : index
    %210 = vector.load %arg13[%c0_208, %c14, %c0_209] : memref<16x16x128xf32, #tpu.memory_space<vmem>>, vector<16x1x128xf32>
    %211 = vector.shape_cast %210 : vector<16x1x128xf32> to vector<16x128xf32>
    %212 = arith.addf %209, %211 : vector<16x128xf32>
    %213 = arith.truncf %212 : vector<16x128xf32> to vector<16x128xbf16>
    %c0_210 = arith.constant 0 : index
    %c224_211 = arith.constant 224 : index
    %c0_212 = arith.constant 0 : index
    %214 = vector.load %arg10[%c0_210, %c224_211, %c0_212] : memref<1x256x128xbf16, #tpu.memory_space<vmem>>, vector<1x16x128xbf16>
    %215 = vector.shape_cast %214 : vector<1x16x128xbf16> to vector<16x128xbf16>
    %216 = vector.shape_cast %213 : vector<16x128xbf16> to vector<1x16x128xbf16>
    tpu.vector_store %arg10[%c0_210, %c224_211, %c0_212], %216 {strides = array<i32>} : memref<1x256x128xbf16, #tpu.memory_space<vmem>>, vector<1x16x128xbf16>,
    %217 = vector.extract_strided_slice %96 {offsets = [240, 0], sizes = [16, 128], strides = [1, 1]} : vector<256x128xf32> to vector<16x128xf32>
    %c0_213 = arith.constant 0 : index
    %c15 = arith.constant 15 : index
    %c0_214 = arith.constant 0 : index
    %218 = vector.load %arg13[%c0_213, %c15, %c0_214] : memref<16x16x128xf32, #tpu.memory_space<vmem>>, vector<16x1x128xf32>
    %219 = vector.shape_cast %218 : vector<16x1x128xf32> to vector<16x128xf32>
    %220 = arith.addf %217, %219 : vector<16x128xf32>
    %221 = arith.truncf %220 : vector<16x128xf32> to vector<16x128xbf16>
    %c0_215 = arith.constant 0 : index
    %c240 = arith.constant 240 : index
    %c0_216 = arith.constant 0 : index
    %222 = vector.load %arg10[%c0_215, %c240, %c0_216] : memref<1x256x128xbf16, #tpu.memory_space<vmem>>, vector<1x16x128xbf16>
    %223 = vector.shape_cast %222 : vector<1x16x128xbf16> to vector<16x128xbf16>
    %224 = vector.shape_cast %221 : vector<16x128xbf16> to vector<1x16x128xbf16>
    tpu.vector_store %arg10[%c0_215, %c240, %c0_216], %224 {strides = array<i32>} : memref<1x256x128xbf16, #tpu.memory_space<vmem>>, vector<1x16x128xbf16>,
    return
  }
  func.func @transform_0(%arg0: i32) -> (i32, i32, i32) {
    %c0_i32 = arith.constant 0 : i32
    %c0_i32_0 = arith.constant 0 : i32
    %c0_i32_1 = arith.constant 0 : i32
    return %arg0, %c0_i32, %c0_i32_0 : i32, i32, i32
  }
  func.func @transform_1(%arg0: i32) -> (i32, i32, i32) {
    %c0_i32 = arith.constant 0 : i32
    %c0_i32_0 = arith.constant 0 : i32
    %c0_i32_1 = arith.constant 0 : i32
    return %arg0, %c0_i32, %c0_i32_0 : i32, i32, i32
  }
  func.func @transform_2(%arg0: i32) -> (i32, i32) {
    %c0_i32 = arith.constant 0 : i32
    %c0_i32_0 = arith.constant 0 : i32
    %c0_i32_1 = arith.constant 0 : i32
    return %c0_i32, %c0_i32_0 : i32, i32
  }
  func.func @transform_3(%arg0: i32) -> (i32, i32) {
    %c0_i32 = arith.constant 0 : i32
    %c0_i32_0 = arith.constant 0 : i32
    %c0_i32_1 = arith.constant 0 : i32
    return %c0_i32, %c0_i32_0 : i32, i32
  }
  func.func @transform_4(%arg0: i32) -> (i32, i32) {
    %c0_i32 = arith.constant 0 : i32
    %c0_i32_0 = arith.constant 0 : i32
    %c0_i32_1 = arith.constant 0 : i32
    return %c0_i32, %c0_i32_0 : i32, i32
  }
  func.func @transform_5(%arg0: i32) -> (i32, i32) {
    %c0_i32 = arith.constant 0 : i32
    %c0_i32_0 = arith.constant 0 : i32
    %c0_i32_1 = arith.constant 0 : i32
    return %c0_i32, %c0_i32_0 : i32, i32
  }
  func.func @transform_6(%arg0: i32) -> (i32, i32) {
    %c0_i32 = arith.constant 0 : i32
    %c0_i32_0 = arith.constant 0 : i32
    %c0_i32_1 = arith.constant 0 : i32
    return %c0_i32, %c0_i32_0 : i32, i32
  }
  func.func @transform_7(%arg0: i32) -> (i32, i32) {
    %c0_i32 = arith.constant 0 : i32
    %c0_i32_0 = arith.constant 0 : i32
    %c0_i32_1 = arith.constant 0 : i32
    return %c0_i32, %c0_i32_0 : i32, i32
  }
  func.func @transform_8(%arg0: i32) -> (i32, i32) {
    %c0_i32 = arith.constant 0 : i32
    %c0_i32_0 = arith.constant 0 : i32
    %c0_i32_1 = arith.constant 0 : i32
    return %c0_i32, %c0_i32_0 : i32, i32
  }
  func.func @transform_9(%arg0: i32) -> (i32, i32, i32) {
    %c0_i32 = arith.constant 0 : i32
    %c0_i32_0 = arith.constant 0 : i32
    %c0_i32_1 = arith.constant 0 : i32
    return %arg0, %c0_i32, %c0_i32_0 : i32, i32, i32
  }
}

</mosaic_0001>

<bundles_post_ra>
// kernel: large_kernel_conv2d.1
= control target key start
LH: loop header
LB: loop body
LE: loop exit
PB: predicated region body
PF: predicated region fallthrough
CT: control target
= control target key end

     0   :  { %s11070_s30 = smov 0   ;;  %s13782_s0 = inlined_call_operand.vmem [shape: bf16[2,256,64], index: 0, kind: input, shape index: {}]   ;;  %s13783_s1 = inlined_call_operand.vmem [shape: bf16[2,256,64], index: 1, kind: input, shape index: {}]   ;;  %s13784_s2 = inlined_call_operand.vmem [shape: bf16[64,128], index: 2, kind: input, shape index: {}]   ;;  %s13785_s3 = inlined_call_operand.vmem [shape: f32[1,128], index: 3, kind: input, shape index: {}]   ;;  %s13786_s4 = inlined_call_operand.vmem [shape: bf16[64,128], index: 4, kind: input, shape index: {}]   ;;  %s13787_s5 = inlined_call_operand.vmem [shape: f32[1,128], index: 5, kind: input, shape index: {}]   ;;  %s13788_s6 = inlined_call_operand.vmem [shape: bf16[1920,128], index: 6, kind: input, shape index: {}]   ;;  %s13789_s7 = inlined_call_operand.vmem [shape: bf16[1920,128], index: 7, kind: input, shape index: {}]   ;;  %s13790_s8 = inlined_call_operand.vmem [shape: f32[1,128], index: 8, kind: input, shape index: {}]   ;;  %s13791_s9 = inlined_call_operand.vmem [shape: bf16[2,256,128], index: 9, kind: output, shape index: {}]  }
   0x1 LB: > { %s8400_s10 = sadd.s32 4294967295, %s11017_s30   ;;  %p8404_p0 = scmp.ge.s32.totalorder %s11017_s30, 1  ;;  %s11017_s30 = sphi %s11070_s30, %s19_s30  }
   0x2   : > { %p297_p1 = scmp.lt.s32.totalorder %s11017_s30, 3 }
   0x4   : > { %p298_p2 = pnand %p8404_p0, %p297_p1 }
   0x6   : > { %301 = sbr.rel (%p298_p2) target bundleno = 1570 (0x622), region = 56 }
   0xd   : > { %v10731_v0 = vld [vmem:[%s13784_s2] sm:$0xff]   ;;  %p338_p3 = scmp.lt.s32.totalorder %s8400_s10, 1  ;;  %v10732_v1 = vld [vmem:[%s13784_s2 + $0x8] sm:$0xff]   ;;  %v10733_v2 = vld [vmem:[%s13784_s2 + $0x10] sm:$0xff]   ;;  %v11019_v3 = vmov 0   ;;  %vm505_vm0 = vcmask 523264  }
   0xe   : > { %10546 = vmatprep.subr.bf16.mxu0 %v10731_v0  ;;  %2473 = vmatprep.mubr.bf16.mxu1 %v11019_v3  ;;  %v10734_v5 = vld [vmem:[%s13784_s2 + $0x18] sm:$0xff]   ;;  %v10747_v6 = vld [vmem:[%s13788_s6 + $0xc0] sm:$0xff]   ;;  %v10749_v10 = vld [vmem:[%s13788_s6 + $0xc8] sm:$0xff]   ;;  %vm7175_vm1 = vcmask 1041409   ;;  %vm7178_vm2 = vcmask 1042434   ;;  %vm7181_vm3 = vcmask 1043459  }
   0xf   : > { %s13830_s10 = smov (!%p338_p3, %s8400_s10), 1  ;;  %10547 = vmatpush3.bf16.msra.mxu0 %v10731_v0  ;;  %v10748_v7 = vld [vmem:[%s13788_s6 + $0x80] sm:$0xff]   ;;  %v10750_v11 = vld [vmem:[%s13788_s6 + $0x88] sm:$0xff]   ;;  %v10751_v13 = vld [vmem:[%s13788_s6 + $0xd0] sm:$0xff]   ;;  %vm7184_vm4 = vcmask 1044484   ;;  %vm7187_vm5 = vcmask 1045509  }
  0x10   : > { %10548 = vmatprep.subr.bf16.mxu0 %v10732_v1  ;;  %s11087_s17 = sshll.u32 %s13830_s10, 7  ;;  %v10752_v15 = vld [vmem:[%s13788_s6 + $0x40] sm:$0xff]   ;;  %v10753_v16 = vld [vmem:[%s13788_s6 + $0x90] sm:$0xff]   ;;  %v10755_v18 = vld [vmem:[%s13788_s6 + $0x48] sm:$0xff]   ;;  %vm7190_vm6 = vcmask 1046534   ;;  %vm7193_vm7 = vcmask 1047559  }
  0x11   : > { %s11094_s20 = scalar_lea.vmem %s13782_s0, %s11087_s17  ;;  %8910 = vmatprep.subr.bf16.mxu1 %v10752_v15  ;;  %v10754_v17 = vld [vmem:[%s13788_s6] sm:$0xff]   ;;  %v10756_v19 = vld [vmem:[%s13788_s6 + $0x8] sm:$0xff]   ;;  %v10757_v20 = vld [vmem:[%s13788_s6 + $0xd8] sm:$0xff]   ;;  %s11268_s28 = scalar_lea.vmem %s13783_s1, %s11087_s17 }
  0x12   : > { %v10735_v4 = vld [vmem:[%s11094_s20] sm:$0xff]   ;;  %v10736_v8 = vld [vmem:[%s11094_s20 + $0x8] sm:$0xff]   ;;  %v10737_v9 = vld [vmem:[%s11094_s20 + $0x10] sm:$0xff]   ;;  %8911 = vmatpush3.bf16.msra.mxu1 %v10754_v17  ;;  %s13423_s24 = scalar_lea.vmem %s13791_s9, %s11087_s17 }
  0x13   : > { %10549 = vmatpush3.bf16.msra.mxu0 %v10732_v1  ;;  %10554 = vmatprep.mubr.msk.bf16.mxu0 %vm505_vm0, %v10735_v4  ;;  %v10738_v12 = vld [vmem:[%s11094_s20 + $0x18] sm:$0xff]   ;;  %v10739_v14 = vld [vmem:[%s11094_s20 + $0x20] sm:$0xff]   ;;  %v10758_v21 = vld [vmem:[%s13788_s6 + $0x50] sm:$0xff]  }
  0x14   : > { %10550 = vmatprep.subr.bf16.mxu0 %v10733_v2  ;;  %8912 = vmatprep.subr.bf16.mxu1 %v10755_v18  ;;  %v10740_v22 = vld [vmem:[%s11094_s20 + $0x28] sm:$0xff]   ;;  %v10759_v23 = vld [vmem:[%s13788_s6 + $0x98] sm:$0xff]   ;;  %v10741_v24 = vld [vmem:[%s11094_s20 + $0x30] sm:$0xff]  }
  0x15   : > { %v10760_v25 = vld [vmem:[%s13788_s6 + $0x10] sm:$0xff]   ;;  %v10761_v26 = vld [vmem:[%s13788_s6 + $0x58] sm:$0xff]   ;;  %v10763_v28 = vld [vmem:[%s13788_s6 + $0xe0] sm:$0xff]  }
  0x16   : > { %8913 = vmatpush3.bf16.msra.mxu1 %v10756_v19  ;;  %v10762_v27 = vld [vmem:[%s13788_s6 + $0x18] sm:$0xff]   ;;  %v10764_v29 = vld [vmem:[%s13788_s6 + $0x60] sm:$0xff]   ;;  %v10767_v33 = vld [vmem:[%s13788_s6 + $0x68] sm:$0xff]  }
  0x17   : > { %10551 = vmatpush3.bf16.msra.mxu0 %v10733_v2  ;;  %8914 = vmatprep.subr.bf16.mxu1 %v10758_v21  ;;  %v10765_v30 = vld [vmem:[%s13788_s6 + $0xa0] sm:$0xff]   ;;  %v10742_v31 = vld [vmem:[%s11094_s20 + $0x38] sm:$0xff]   ;;  %v10769_v34 = vld [vmem:[%s13788_s6 + $0xe8] sm:$0xff]  }
  0x18   : > { %10552 = vmatprep.subr.bf16.mxu0 %v10734_v5  ;;  %v10766_v32 = vld [vmem:[%s13788_s6 + $0x20] sm:$0xff]   ;;  %v10771_v36 = vld [vmem:[%s13788_s6 + $0xa8] sm:$0xff]   ;;  %v10770_v38 = vld [vmem:[%s13788_s6 + $0x70] sm:$0xff]  }
  0x19   : > { %v10743_v35 = vld [vmem:[%s11094_s20 + $0x40] sm:$0xff]   ;;  %v10768_v37 = vld [vmem:[%s13788_s6 + $0x28] sm:$0xff]   ;;  %v10772_v40 = vld [vmem:[%s13788_s6 + $0x30] sm:$0xff]  }
  0x1a   : > { %8915 = vmatpush3.bf16.msra.mxu1 %v10760_v25  ;;  %v10744_v39 = vld [vmem:[%s11094_s20 + $0x48] sm:$0xff]   ;;  %v10745_v41 = vld [vmem:[%s11094_s20 + $0x50] sm:$0xff]   ;;  %v10774_v42 = vld [vmem:[%s13788_s6 + $0x78] sm:$0xff]  }
  0x1b   : > { %10553 = vmatpush3.bf16.msra.mxu0 %v10734_v5  ;;  %8916 = vmatprep.subr.bf16.mxu1 %v10761_v26  ;;  %v10777_v43 = vld [vmem:[%s13788_s6 + $0xf0] sm:$0xff]   ;;  %v10776_v45 = vld [vmem:[%s13788_s6 + $0x38] sm:$0xff]   ;;  %v10783_v48 = vld [vmem:[%s13788_s6 + $0x1c0] sm:$0xff]  }
  0x1c   : > { %9022 = vmatprep.subr.bf16.mxu0 %v10747_v6  ;;  %v10778_v44 = vld [vmem:[%s13788_s6 + $0xb0] sm:$0xff]   ;;  %v10781_v46 = vld [vmem:[%s13788_s6 + $0xf8] sm:$0xff]   ;;  %v10773_v50 = vld [vmem:[%s11094_s20 + $0x60] sm:$0xff]  }
  0x1d   : > { %v10782_v47 = vld [vmem:[%s13788_s6 + $0xb8] sm:$0xff]   ;;  %v10775_v51 = vld [vmem:[%s11094_s20 + $0x68] sm:$0xff]   ;;  %v10779_v52 = vld [vmem:[%s11094_s20 + $0x70] sm:$0xff]  }
  0x1e   : > { %10555 = vmatmul.mubr.msk.bf16.vlgmr.msra.gmra.mrb[0].mxu0 %vm505_vm0, %v10736_v8  ;;  %8917 = vmatpush3.bf16.msra.mxu1 %v10762_v27  ;;  %v10746_v49 = vld [vmem:[%s11094_s20 + $0x58] sm:$0xff]   ;;  %v10784_v54 = vld [vmem:[%s13788_s6 + $0x180] sm:$0xff]   ;;  %v10785_v55 = vld [vmem:[%s13788_s6 + $0x1c8] sm:$0xff]  }
  0x1f   : > { %10558 = vmatprep.mubr.msk.bf16.mxu0 %vm505_vm0, %v10737_v9  ;;  %9023 = vmatpush3.bf16.msra.mxu0 %v10748_v7  ;;  %v10780_v53 = vld [vmem:[%s11094_s20 + $0x78] sm:$0xff]   ;;  %v10786_v56 = vld [vmem:[%s13788_s6 + $0x188] sm:$0xff]   ;;  %v10787_v57 = vld [vmem:[%s13788_s6 + $0x1d0] sm:$0xff]  }
  0x20   : > { %9024 = vmatprep.subr.bf16.mxu0 %v10749_v10  ;;  %8918 = vmatprep.subr.bf16.mxu1 %v10764_v29  ;;  %v10788_v58 = vld [vmem:[%s13788_s6 + $0x190] sm:$0xff]   ;;  %v10789_v59 = vld [vmem:[%s13788_s6 + $0x1d8] sm:$0xff]   ;;  %v10791_v61 = vld [vmem:[%s13788_s6 + $0x1e0] sm:$0xff]  }
  0x21   : > { %v10790_v60 = vld [vmem:[%s13788_s6 + $0x198] sm:$0xff]   ;;  %v10792_v62 = vld [vmem:[%s13788_s6 + $0x1a0] sm:$0xff]   ;;  %v10793_v63 = vld [vmem:[%s13788_s6 + $0x1e8] sm:$0xff]  }
  0x22   : > { %8919 = vmatpush3.bf16.msra.mxu1 %v10766_v32  ;;  %v10794_v0 = vld [vmem:[%s13788_s6 + $0x140] sm:$0xff]   ;;  %v10795_v2 = vld [vmem:[%s13788_s6 + $0x1a8] sm:$0xff]   ;;  %v10799_v6 = vld [vmem:[%s13788_s6 + $0x150] sm:$0xff]  }
  0x23   : > { %9025 = vmatpush3.bf16.msra.mxu0 %v10750_v11  ;;  %8920 = vmatprep.subr.bf16.mxu1 %v10767_v33  ;;  %v10796_v1 = vld [vmem:[%s13788_s6 + $0x100] sm:$0xff]   ;;  %v10797_v4 = vld [vmem:[%s13788_s6 + $0x148] sm:$0xff]   ;;  %v10800_v7 = vld [vmem:[%s13788_s6 + $0x110] sm:$0xff]  }
  0x24   : > { %9026 = vmatprep.subr.bf16.mxu0 %v10751_v13  ;;  %v10798_v5 = vld [vmem:[%s13788_s6 + $0x108] sm:$0xff]   ;;  %v10801_v8 = vld [vmem:[%s13788_s6 + $0x158] sm:$0xff]   ;;  %v10803_v10 = vld [vmem:[%s13788_s6 + $0x1f0] sm:$0xff]  }
  0x25   : > { %v10802_v9 = vld [vmem:[%s13788_s6 + $0x118] sm:$0xff]   ;;  %v10804_v11 = vld [vmem:[%s13788_s6 + $0x160] sm:$0xff]   ;;  %v10805_v13 = vld [vmem:[%s13788_s6 + $0x1b0] sm:$0xff]  }
  0x26   : > { %10559 = vmatmul.mubr.msk.bf16.gmra.mrb[4].mxu0 %vm505_vm0, %v10738_v12  ;;  %8921 = vmatpush3.bf16.msra.mxu1 %v10768_v37  ;;  %v10806_v12 = vld [vmem:[%s13788_s6 + $0x120] sm:$0xff]   ;;  %v10808_v15 = vld [vmem:[%s13788_s6 + $0x128] sm:$0xff]   ;;  %v10810_v17 = vld [vmem:[%s13788_s6 + $0x130] sm:$0xff]  }
  0x27   : > { %10562 = vmatprep.mubr.msk.bf16.mxu0 %vm505_vm0, %v10739_v14  ;;  %9027 = vmatpush3.bf16.msra.mxu0 %v10753_v16  ;;  %v10807_v14 = vld [vmem:[%s13788_s6 + $0x168] sm:$0xff]   ;;  %v10809_v16 = vld [vmem:[%s13788_s6 + $0x170] sm:$0xff]   ;;  %v10811_v18 = vld [vmem:[%s13788_s6 + $0x178] sm:$0xff]  }
  0x28   : > { %9028 = vmatprep.subr.bf16.mxu0 %v10757_v20  ;;  %8922 = vmatprep.subr.bf16.mxu1 %v10770_v38  ;;  %v10812_v19 = vld [vmem:[%s13788_s6 + $0x138] sm:$0xff]  }
  0x29   : > { %v10813_v20 = vld [vmem:[%s13788_s6 + $0x1f8] sm:$0xff]  }
  0x2a   : > { %8923 = vmatpush3.bf16.msra.mxu1 %v10772_v40  ;;  %v10814_v21 = vld [vmem:[%s13788_s6 + $0x1b8] sm:$0xff]  }
  0x2b   : > { %9029 = vmatpush3.bf16.msra.mxu0 %v10759_v23  ;;  %8924 = vmatprep.subr.bf16.mxu1 %v10774_v42 }
  0x2c   : > { %9030 = vmatprep.subr.bf16.mxu0 %v10763_v28 }
  0x2e   : > { %10563 = vmatmul.mubr.msk.bf16.gmra.mrb[8].mxu0 %vm505_vm0, %v10740_v22  ;;  %8925 = vmatpush3.bf16.msra.mxu1 %v10776_v45  ;;  %v10815_v22 = vld [vmem:[%s13788_s6 + $0x2c0] sm:$0xff]  }
  0x2f   : > { %10566 = vmatprep.mubr.msk.bf16.mxu0 %vm505_vm0, %v10741_v24  ;;  %9031 = vmatpush3.bf16.msra.mxu0 %v10765_v30  ;;  %v11354_v24 = vld [vmem:[%s13785_s3] ss:$0 sm:$0xff] }
  0x30   : > { %9032 = vmatprep.subr.bf16.mxu0 %v10769_v34  ;;  %9134 = vmatprep.subr.bf16.mxu1 %v10794_v0 }
  0x31   : > { %2474 = vmatmul.mubr.bf16.vlgmr.msra.gmra.mrb[0].mxu1 %v11019_v3 }
  0x32   : > { %2481 = vmatprep.mubr.bf16.mxu1 %v11019_v3  ;;  %9135 = vmatpush3.bf16.msra.mxu1 %v10796_v1 }
  0x33   : > { %9033 = vmatpush3.bf16.msra.mxu0 %v10771_v36  ;;  %9136 = vmatprep.subr.bf16.mxu1 %v10797_v4 }
  0x34   : > { %9034 = vmatprep.subr.bf16.mxu0 %v10777_v43 }
  0x36   : > { %10567 = vmatmul.mubr.msk.bf16.gmra.mrb[12].mxu0 %vm505_vm0, %v10742_v31  ;;  %9137 = vmatpush3.bf16.msra.mxu1 %v10798_v5 }
  0x37   : > { %10570 = vmatprep.mubr.msk.bf16.mxu0 %vm505_vm0, %v10743_v35  ;;  %9035 = vmatpush3.bf16.msra.mxu0 %v10778_v44 }
  0x38   : > { %9036 = vmatprep.subr.bf16.mxu0 %v10781_v46  ;;  %9138 = vmatprep.subr.bf16.mxu1 %v10799_v6 }
  0x39   : > { %2482 = vmatmul.mubr.bf16.gmra.mrb[4].mxu1 %v11019_v3 }
  0x3a   : > { %2489 = vmatprep.mubr.bf16.mxu1 %v11019_v3  ;;  %9139 = vmatpush3.bf16.msra.mxu1 %v10800_v7 }
  0x3b   : > { %9037 = vmatpush3.bf16.msra.mxu0 %v10782_v47  ;;  %9140 = vmatprep.subr.bf16.mxu1 %v10801_v8 }
  0x3c   : > { %9246 = vmatprep.subr.bf16.mxu0 %v10783_v48 }
  0x3e   : > { %10571 = vmatmul.mubr.msk.bf16.gmra.mrb[16].mxu0 %vm505_vm0, %v10744_v39  ;;  %9141 = vmatpush3.bf16.msra.mxu1 %v10802_v9 }
  0x3f   : > { %10574 = vmatprep.mubr.msk.bf16.mxu0 %vm505_vm0, %v10745_v41  ;;  %9142 = vmatprep.subr.bf16.mxu1 %v10804_v11 }
  0x41   : > { %2490 = vmatmul.mubr.bf16.gmra.mrb[8].mxu1 %v11019_v3 }
  0x42   : > { %2497 = vmatprep.mubr.bf16.mxu1 %v11019_v3  ;;  %9143 = vmatpush3.bf16.msra.mxu1 %v10806_v12 }
  0x43   : > { %9144 = vmatprep.subr.bf16.mxu1 %v10807_v14 }
  0x46   : > { %10575 = vmatmul.mubr.msk.bf16.gmra.mrb[20].mxu0 %vm505_vm0, %v10746_v49  ;;  %9145 = vmatpush3.bf16.msra.mxu1 %v10808_v15 }
  0x47   : > { %10578 = vmatprep.mubr.msk.bf16.mxu0 %vm505_vm0, %v10773_v50  ;;  %9146 = vmatprep.subr.bf16.mxu1 %v10809_v16 }
  0x49   : > { %2498 = vmatmul.mubr.bf16.gmra.mrb[12].mxu1 %v11019_v3 }
  0x4a   : > { %2505 = vmatprep.mubr.bf16.mxu1 %v11019_v3  ;;  %9147 = vmatpush3.bf16.msra.mxu1 %v10810_v17 }
  0x4b   : > { %9148 = vmatprep.subr.bf16.mxu1 %v10811_v18 }
  0x4e   : > { %10579 = vmatmul.mubr.msk.bf16.gmra.mrb[24].mxu0 %vm505_vm0, %v10775_v51  ;;  %9149 = vmatpush3.bf16.msra.mxu1 %v10812_v19 }
  0x4f   : > { %10582 = vmatprep.mubr.msk.bf16.mxu0 %vm505_vm0, %v10779_v52 }
  0x51   : > { %2506 = vmatmul.mubr.bf16.gmra.mrb[16].mxu1 %v11019_v3 }
  0x52   : > { %2513 = vmatprep.mubr.bf16.mxu1 %v11019_v3 }
  0x56   : > { %10583 = vmatmul.mubr.msk.bf16.gmra.mrb[28].mxu0 %vm505_vm0, %v10780_v53 }
  0x57   : > { %2634 = vmatprep.mubr.bf16.mxu0 %v11019_v3 }
  0x59   : > { %2514 = vmatmul.mubr.bf16.gmra.mrb[20].mxu1 %v11019_v3 }
  0x5e   : > { %2635 = vmatmul.mubr.bf16.vlgmr.msra.gmra.mrb[32].mxu0 %v11019_v3 }
  0x5f   : > { %9247 = vmatpush3.bf16.msra.mxu0 %v10784_v54  ;;  %2642 = vmatprep.mubr.bf16.mxu0 %v11019_v3 }
  0x60   : > { %9248 = vmatprep.subr.bf16.mxu0 %v10785_v55 }
  0x63   : > { %9249 = vmatpush3.bf16.msra.mxu0 %v10786_v56 }
  0x64   : > { %9250 = vmatprep.subr.bf16.mxu0 %v10787_v57 }
  0x66   : > { %2643 = vmatmul.mubr.bf16.gmra.mrb[36].mxu0 %v11019_v3 }
  0x67   : > { %2650 = vmatprep.mubr.bf16.mxu0 %v11019_v3  ;;  %9251 = vmatpush3.bf16.msra.mxu0 %v10788_v58 }
  0x68   : > { %9252 = vmatprep.subr.bf16.mxu0 %v10789_v59 }
  0x6b   : > { %9253 = vmatpush3.bf16.msra.mxu0 %v10790_v60 }
  0x6c   : > { %9254 = vmatprep.subr.bf16.mxu0 %v10791_v61 }
  0x6e   : > { %2651 = vmatmul.mubr.bf16.gmra.mrb[40].mxu0 %v11019_v3 }
  0x6f   : > { %2658 = vmatprep.mubr.bf16.mxu0 %v11019_v3  ;;  %9255 = vmatpush3.bf16.msra.mxu0 %v10792_v62 }
  0x70   : > { %9256 = vmatprep.subr.bf16.mxu0 %v10793_v63 }
  0x73   : > { %9257 = vmatpush3.bf16.msra.mxu0 %v10795_v2 }
  0x74   : > { %9258 = vmatprep.subr.bf16.mxu0 %v10803_v10 }
  0x76   : > { %2659 = vmatmul.mubr.bf16.gmra.mrb[44].mxu0 %v11019_v3 }
  0x77   : > { %9259 = vmatpush3.bf16.msra.mxu0 %v10805_v13 }
  0x78   : > { %9260 = vmatprep.subr.bf16.mxu0 %v10813_v20 }
  0x7b   : > { %9261 = vmatpush3.bf16.msra.mxu0 %v10814_v21 }
  0x7c   : > { %9470 = vmatprep.subr.bf16.mxu0 %v10815_v22 }
  0xf1   : > { %v10556_v23 = vpop.f32.mrb[0].mxu0 }
  0xf2   : > { %v588_v25 = vpop.f32.mrb[1].mxu0  ;;  %v597_v27 = vadd.f32 %v10556_v23, %v11354_v24 }
  0xf3   : > { %v10557_v26 = vpop.f32.mrb[2].mxu0  ;;  %v589_v30 = vadd.f32 %v11354_v24, %v588_v25 }
  0xf4   : > { %v600_v28 = vadd.f32 %v10557_v26, %v11354_v24  ;;  %v591_v29 = vpop.f32.mrb[3].mxu0 }
  0xf5   : > { %v592_v31 = vadd.f32 %v11354_v24, %v591_v29 }
  0xf6   : > { %v11360_v32 = vpack.c.bf16 %v600_v28, %v597_v27 }
  0xf7   : > { %v11362_v33 = vpack.c.bf16 %v592_v31, %v589_v30 }
  0xf9   : > { %2521 = vmatprep.mubr.bf16.mxu1 %v11362_v33  ;;  %2666 = vmatprep.mubr.bf16.mxu0 %v11362_v33  ;;  %v10560_v34 = vpop.f32.mrb[4].mxu0 }
  0xfa   : > { %2522 = vmatmul.mubr.bf16.gmra.mrb[24].mxu1 %v11019_v3  ;;  %2667 = vmatmul.mubr.bf16.gmra.mrb[48].mxu0 %v11019_v3  ;;  %v613_v35 = vadd.f32 %v10560_v34, %v11354_v24  ;;  %v604_v36 = vpop.f32.mrb[5].mxu0 }
  0xfb   : > { %2529 = vmatprep.mubr.bf16.mxu1 %v11360_v32  ;;  %2674 = vmatprep.mubr.bf16.mxu0 %v11360_v32  ;;  %v605_v37 = vadd.f32 %v11354_v24, %v604_v36  ;;  %v10561_v38 = vpop.f32.mrb[6].mxu0  ;;  %v10826_v36 = vld [vmem:[%s13788_s6 + $0x240] sm:$0xff]  }
  0xfc   : > { %v616_v39 = vadd.f32 %v10561_v38, %v11354_v24  ;;  %v607_v40 = vpop.f32.mrb[7].mxu0  ;;  %9358 = vmatprep.subr.bf16.mxu1 %v10826_v36 }
  0xfd   : > { %v608_v41 = vadd.f32 %v11354_v24, %v607_v40 }
  0xfe   : > { %v11374_v42 = vpack.c.bf16 %v616_v39, %v613_v35 }
  0xff   : > { %v11376_v43 = vpack.c.bf16 %v608_v41, %v605_v37 }
 0x101   : > { %v10564_v44 = vpop.f32.mrb[8].mxu0 }
 0x102   : > { %2530 = vmatmul.mubr.bf16.gmra.mrb[28].mxu1 %v11362_v33  ;;  %2675 = vmatmul.mubr.bf16.gmra.mrb[52].mxu0 %v11362_v33  ;;  %v629_v45 = vadd.f32 %v10564_v44, %v11354_v24  ;;  %v620_v46 = vpop.f32.mrb[9].mxu0 }
 0x103   : > { %2537 = vmatprep.mubr.bf16.mxu1 %v11376_v43  ;;  %2682 = vmatprep.mubr.bf16.mxu0 %v11376_v43  ;;  %v621_v47 = vadd.f32 %v11354_v24, %v620_v46  ;;  %v10565_v48 = vpop.f32.mrb[10].mxu0 }
 0x104   : > { %v632_v49 = vadd.f32 %v10565_v48, %v11354_v24  ;;  %v623_v50 = vpop.f32.mrb[11].mxu0  ;;  %v8926_v27 = vpop.f32.mrb[0].mxu1 }
 0x105   : > { %v624_v51 = vadd.f32 %v11354_v24, %v623_v50  ;;  %v8927_v39 = vpop.f32.mrb[1].mxu1 }
 0x106   : > { %v11386_v52 = vpack.c.bf16 %v632_v49, %v629_v45  ;;  %v8928_v44 = vadd.f32 %v8927_v39, %v8926_v27  ;;  %v8929_v45 = vpop.f32.mrb[2].mxu1 }
 0x107   : > { %v11388_v53 = vpack.c.bf16 %v624_v51, %v621_v47  ;;  %v8930_v48 = vpop.f32.mrb[3].mxu1 }
 0x108   : > { %v8931_v50 = vadd.f32 %v8930_v48, %v8929_v45 }
 0x109   : > { %v10568_v54 = vpop.f32.mrb[12].mxu0 }
 0x10a   : > { %2538 = vmatmul.mubr.bf16.gmra.mrb[32].mxu1 %v11360_v32  ;;  %2683 = vmatmul.mubr.bf16.gmra.mrb[56].mxu0 %v11360_v32  ;;  %v645_v55 = vadd.f32 %v10568_v54, %v11354_v24  ;;  %v636_v56 = vpop.f32.mrb[13].mxu0 }
 0x10b   : > { %2545 = vmatprep.mubr.bf16.mxu1 %v11374_v42  ;;  %2690 = vmatprep.mubr.bf16.mxu0 %v11374_v42  ;;  %v637_v57 = vadd.f32 %v11354_v24, %v636_v56  ;;  %v10569_v58 = vpop.f32.mrb[14].mxu0 }
 0x10c   : > { %v648_v59 = vadd.f32 %v10569_v58, %v11354_v24  ;;  %v639_v60 = vpop.f32.mrb[15].mxu0  ;;  %v8932_v51 = vpop.f32.mrb[4].mxu1 }
 0x10d   : > { %v640_v61 = vadd.f32 %v11354_v24, %v639_v60  ;;  %v8933_v58 = vpop.f32.mrb[5].mxu1 }
 0x10e   : > { %v11398_v62 = vpack.c.bf16 %v648_v59, %v645_v55 }
 0x10f   : > { %v11400_v63 = vpack.c.bf16 %v640_v61, %v637_v57  ;;  %v8935_v61 = vpop.f32.mrb[6].mxu1 }
 0x111   : > { %v10572_v0 = vpop.f32.mrb[16].mxu0 }
 0x112   : > { %2546 = vmatmul.mubr.bf16.gmra.mrb[36].mxu1 %v11376_v43  ;;  %2691 = vmatmul.mubr.bf16.gmra.mrb[60].mxu0 %v11376_v43  ;;  %v661_v1 = vadd.f32 %v10572_v0, %v11354_v24  ;;  %v652_v2 = vpop.f32.mrb[17].mxu0 }
 0x113   : > { %2553 = vmatprep.mubr.bf16.mxu1 %v11388_v53  ;;  %2698 = vmatprep.mubr.bf16.mxu0 %v11388_v53  ;;  %v653_v4 = vadd.f32 %v11354_v24, %v652_v2  ;;  %v10573_v5 = vpop.f32.mrb[18].mxu0 }
 0x114   : > { %v664_v6 = vadd.f32 %v10573_v5, %v11354_v24  ;;  %v655_v7 = vpop.f32.mrb[19].mxu0 }
 0x115   : > { %v656_v8 = vadd.f32 %v11354_v24, %v655_v7 }
 0x116   : > { %v11410_v9 = vpack.c.bf16 %v664_v6, %v661_v1  ;;  %v8936_v1 = vpop.f32.mrb[7].mxu1 }
 0x117   : > { %v11412_v10 = vpack.c.bf16 %v656_v8, %v653_v4  ;;  %v8937_v5 = vadd.f32 %v8936_v1, %v8935_v61  ;;  %v8938_v6 = vpop.f32.mrb[8].mxu1 }
 0x119   : > { %v10576_v11 = vpop.f32.mrb[20].mxu0 }
 0x11a   : > { %2554 = vmatmul.mubr.bf16.gmra.mrb[40].mxu1 %v11374_v42  ;;  %2699 = vmatmul.mubr.bf16.gmra.mrb[64].mxu0 %v11374_v42  ;;  %v677_v12 = vadd.f32 %v10576_v11, %v11354_v24  ;;  %v668_v13 = vpop.f32.mrb[21].mxu0 }
 0x11b   : > { %2561 = vmatprep.mubr.bf16.mxu1 %v11386_v52  ;;  %2706 = vmatprep.mubr.bf16.mxu0 %v11386_v52  ;;  %v669_v14 = vadd.f32 %v11354_v24, %v668_v13  ;;  %v10577_v15 = vpop.f32.mrb[22].mxu0 }
 0x11c   : > { %v680_v16 = vadd.f32 %v10577_v15, %v11354_v24  ;;  %v671_v17 = vpop.f32.mrb[23].mxu0 }
 0x11d   : > { %v672_v18 = vadd.f32 %v11354_v24, %v671_v17 }
 0x11e   : > { %v11422_v19 = vpack.c.bf16 %v680_v16, %v677_v12  ;;  %v8939_v12 = vpop.f32.mrb[9].mxu1 }
 0x11f   : > { %v11424_v20 = vpack.c.bf16 %v672_v18, %v669_v14  ;;  %v8940_v15 = vadd.f32 %v8939_v12, %v8938_v6  ;;  %v8941_v16 = vpop.f32.mrb[10].mxu1 }
 0x120   : > { %v8942_v18 = vpop.f32.mrb[11].mxu1 }
 0x121   : > { %v10580_v21 = vpop.f32.mrb[24].mxu0 }
 0x122   : > { %2562 = vmatmul.mubr.bf16.gmra.mrb[44].mxu1 %v11388_v53  ;;  %2707 = vmatmul.mubr.bf16.gmra.mrb[68].mxu0 %v11388_v53  ;;  %v693_v22 = vadd.f32 %v10580_v21, %v11354_v24  ;;  %v684_v23 = vpop.f32.mrb[25].mxu0 }
 0x123   : > { %2569 = vmatprep.mubr.bf16.mxu1 %v11400_v63  ;;  %2714 = vmatprep.mubr.bf16.mxu0 %v11400_v63  ;;  %v685_v25 = vadd.f32 %v11354_v24, %v684_v23  ;;  %v10581_v26 = vpop.f32.mrb[26].mxu0  ;;  %v8943_v23 = vadd.f32 %v8942_v18, %v8941_v16  ;;  %v10834_v18 = vld [vmem:[%s13788_s6 + $0x218] sm:$0xff]  }
 0x124   : > { %v696_v28 = vadd.f32 %v10581_v26, %v11354_v24  ;;  %v687_v29 = vpop.f32.mrb[27].mxu0 }
 0x125   : > { %v688_v30 = vadd.f32 %v11354_v24, %v687_v29 }
 0x126   : > { %v11434_v31 = vpack.c.bf16 %v696_v28, %v693_v22 }
 0x127   : > { %v11436_v34 = vpack.c.bf16 %v688_v30, %v685_v25  ;;  %v8944_v25 = vpop.f32.mrb[12].mxu1 }
 0x128   : > { %v8945_v29 = vpop.f32.mrb[13].mxu1 }
 0x129   : > { %v10584_v35 = vpop.f32.mrb[28].mxu0  ;;  %v8946_v36 = vadd.f32 %v8945_v29, %v8944_v25  ;;  %v10817_v25 = vld [vmem:[%s13788_s6 + $0x2c8] sm:$0xff]  }
 0x12a   : > { %2570 = vmatmul.mubr.bf16.gmra.mrb[48].mxu1 %v11386_v52  ;;  %2715 = vmatmul.mubr.bf16.gmra.mrb[72].mxu0 %v11386_v52  ;;  %v709_v37 = vadd.f32 %v10584_v35, %v11354_v24  ;;  %v700_v38 = vpop.f32.mrb[29].mxu0  ;;  %v10818_v29 = vld [vmem:[%s13788_s6 + $0x288] sm:$0xff]  }
 0x12b   : > { %2577 = vmatprep.mubr.bf16.mxu1 %v11398_v62  ;;  %2722 = vmatprep.mubr.bf16.mxu0 %v11398_v62  ;;  %v701_v40 = vadd.f32 %v11354_v24, %v700_v38  ;;  %v10585_v41 = vpop.f32.mrb[30].mxu0 }
 0x12c   : > { %v712_v46 = vadd.f32 %v10585_v41, %v11354_v24  ;;  %v703_v47 = vpop.f32.mrb[31].mxu0 }
 0x12d   : > { %v704_v49 = vadd.f32 %v11354_v24, %v703_v47  ;;  %v8934_v24 = vadd.f32 %v8933_v58, %v8932_v51 }
 0x12e   : > { %v11449_v54 = vpack.c.bf16 %v712_v46, %v709_v37  ;;  %v8947_v37 = vpop.f32.mrb[14].mxu1 }
 0x12f   : > { %v11451_v55 = vpack.c.bf16 %v704_v49, %v701_v40  ;;  %v8948_v39 = vpop.f32.mrb[15].mxu1  ;;  %v10828_v49 = vld [vmem:[%s13788_s6 + $0x200] sm:$0xff]  }
 0x130   : > { %v8950_v45 = vpop.f32.mrb[16].mxu1 }
 0x131   : > { %v9038_v56 = vpop.f32.mrb[32].mxu0  ;;  %v8951_v46 = vpop.f32.mrb[17].mxu1 }
 0x132   : > { %2578 = vmatmul.mubr.bf16.gmra.mrb[52].mxu1 %v11400_v63  ;;  %2723 = vmatmul.mubr.bf16.gmra.mrb[76].mxu0 %v11400_v63  ;;  %v9039_v57 = vpop.f32.mrb[33].mxu0  ;;  %v11477_v48 = vadd.f32 %v8951_v46, %v8950_v45  ;;  %v10823_v45 = vld [vmem:[%s13788_s6 + $0x2e0] sm:$0xff]  }
 0x133   : > { %2585 = vmatprep.mubr.bf16.mxu1 %v11412_v10  ;;  %2730 = vmatprep.mubr.bf16.mxu0 %v11412_v10  ;;  %v9040_v59 = vadd.f32 %v9039_v57, %v9038_v56  ;;  %v9041_v60 = vpop.f32.mrb[34].mxu0  ;;  %v8953_v57 = vpop.f32.mrb[18].mxu1  ;;  %v10824_v46 = vld [vmem:[%s13788_s6 + $0x2a0] sm:$0xff]  }
 0x134   : > { %v9042_v0 = vpop.f32.mrb[35].mxu0 }
 0x135   : > { %v11457_v2 = vadd.f32 %v9040_v59, %v8928_v44  ;;  %v9043_v4 = vadd.f32 %v9042_v0, %v9041_v60  ;;  %v8949_v44 = vadd.f32 %v8948_v39, %v8947_v37  ;;  %v8954_v60 = vpop.f32.mrb[19].mxu1  ;;  %v10841_v37 = vld [vmem:[%s13788_s6 + $0x270] sm:$0xff]  }
 0x136   : > { %v11492_v0 = vadd.f32 %v8954_v60, %v8953_v57  ;;  %v8956_v1 = vpop.f32.mrb[20].mxu1  ;;  %v10842_v39 = vld [vmem:[%s13788_s6 + $0x230] sm:$0xff]   ;;  %v10845_v57 = vld [vmem:[%s13788_s6 + $0x2f8] sm:$0xff]   ;;  %v10853_v60 = vld [vmem:[%s13788_s6 + $0x340] sm:$0xff]  }
 0x137   : > { %v11459_v7 = vadd.f32 %v9043_v4, %v8931_v50  ;;  %v10829_v50 = vld [vmem:[%s13788_s6 + $0x248] sm:$0xff]   ;;  %v10831_v4 = vld [vmem:[%s13788_s6 + $0x250] sm:$0xff]  }
 0x139   : > { %v9044_v8 = vpop.f32.mrb[36].mxu0 }
 0x13a   : > { %2586 = vmatmul.mubr.bf16.gmra.mrb[56].mxu1 %v11398_v62  ;;  %2731 = vmatmul.mubr.bf16.gmra.mrb[80].mxu0 %v11398_v62  ;;  %v9045_v11 = vpop.f32.mrb[37].mxu0 }
 0x13b   : > { %2593 = vmatprep.mubr.bf16.mxu1 %v11410_v9  ;;  %2738 = vmatprep.mubr.bf16.mxu0 %v11410_v9  ;;  %v9046_v13 = vadd.f32 %v9045_v11, %v9044_v8  ;;  %v9047_v14 = vpop.f32.mrb[38].mxu0  ;;  %v8957_v8 = vpop.f32.mrb[21].mxu1 }
 0x13c   : > { %v9048_v17 = vpop.f32.mrb[39].mxu0  ;;  %v11499_v11 = vadd.f32 %v8957_v8, %v8956_v1  ;;  %v10856_v1 = vld [vmem:[%s13788_s6 + $0x308] sm:$0xff]   ;;  %v10857_v8 = vld [vmem:[%s13788_s6 + $0x350] sm:$0xff]  }
 0x13d   : > { %v11465_v21 = vadd.f32 %v9046_v13, %v8934_v24  ;;  %v9049_v22 = vadd.f32 %v9048_v17, %v9047_v14  ;;  %v10830_v24 = vld [vmem:[%s13788_s6 + $0x208] sm:$0xff]   ;;  %v10832_v13 = vld [vmem:[%s13788_s6 + $0x210] sm:$0xff]   ;;  %v8959_v14 = vpop.f32.mrb[22].mxu1 }
 0x13e   : > { %v8960_v16 = vpop.f32.mrb[23].mxu1 }
 0x13f   : > { %v11467_v26 = vadd.f32 %v9049_v22, %v8937_v5  ;;  %v11511_v17 = vadd.f32 %v8960_v16, %v8959_v14  ;;  %v10836_v22 = vld [vmem:[%s13788_s6 + $0x260] sm:$0xff]  }
 0x141   : > { %v9050_v27 = vpop.f32.mrb[40].mxu0 }
 0x142   : > { %2594 = vmatmul.mubr.bf16.gmra.mrb[60].mxu1 %v11412_v10  ;;  %2739 = vmatmul.mubr.bf16.gmra.mrb[84].mxu0 %v11412_v10  ;;  %v9051_v28 = vpop.f32.mrb[41].mxu0 }
 0x143   : > { %2746 = vmatprep.mubr.bf16.mxu0 %v11424_v20  ;;  %2795 = vmatprep.mubr.bf16.mxu1 %v11019_v3  ;;  %v9052_v30 = vadd.f32 %v9051_v28, %v9050_v27  ;;  %v9053_v35 = vpop.f32.mrb[42].mxu0  ;;  %v10838_v27 = vld [vmem:[%s13788_s6 + $0x220] sm:$0xff]   ;;  %v10839_v28 = vld [vmem:[%s13788_s6 + $0x268] sm:$0xff]  }
 0x144   : > { %v9054_v38 = vpop.f32.mrb[43].mxu0 }
 0x145   : > { %v11473_v40 = vadd.f32 %v9052_v30, %v8940_v15  ;;  %v9055_v41 = vadd.f32 %v9054_v38, %v9053_v35  ;;  %v10833_v15 = vld [vmem:[%s13788_s6 + $0x258] sm:$0xff]   ;;  %v10819_v30 = vld [vmem:[%s13788_s6 + $0x2d0] sm:$0xff]   ;;  %v10840_v35 = vld [vmem:[%s13788_s6 + $0x228] sm:$0xff]  }
 0x146   : > { %v10821_v38 = vld [vmem:[%s13788_s6 + $0x2d8] sm:$0xff]  }
 0x147   : > { %v11475_v47 = vadd.f32 %v9055_v41, %v8943_v23  ;;  %v10816_v23 = vld [vmem:[%s13788_s6 + $0x280] sm:$0xff]   ;;  %v10843_v41 = vld [vmem:[%s13788_s6 + $0x278] sm:$0xff]  }
 0x149   : > { %v9056_v51 = vpop.f32.mrb[44].mxu0 }
 0x14a   : > { %2747 = vmatmul.mubr.bf16.gmra.mrb[88].mxu0 %v11410_v9  ;;  %2796 = vmatmul.mubr.bf16.vlgmr.msra.gmra.mrb[64].mxu1 %v11019_v3  ;;  %v9057_v56 = vpop.f32.mrb[45].mxu0 }
 0x14b   : > { %2754 = vmatprep.mubr.bf16.mxu0 %v11422_v19  ;;  %2803 = vmatprep.mubr.bf16.mxu1 %v11019_v3  ;;  %v9058_v58 = vadd.f32 %v9057_v56, %v9056_v51  ;;  %v9059_v59 = vpop.f32.mrb[46].mxu0  ;;  %v10835_v51 = vld [vmem:[%s13788_s6 + $0x2f0] sm:$0xff]  }
 0x14c   : > { %9359 = vmatpush3.bf16.msra.mxu1 %v10828_v49  ;;  %v9060_v61 = vpop.f32.mrb[47].mxu0  ;;  %v10825_v49 = vld [vmem:[%s13788_s6 + $0x2e8] sm:$0xff]   ;;  %v10837_v56 = vld [vmem:[%s13788_s6 + $0x2b0] sm:$0xff]  }
 0x14d   : > { %9360 = vmatprep.subr.bf16.mxu1 %v10829_v50  ;;  %v11497_v5 = vadd.f32 %v9058_v58, %v8946_v36  ;;  %v9061_v6 = vadd.f32 %v9060_v61, %v9059_v59  ;;  %v10820_v36 = vld [vmem:[%s13788_s6 + $0x290] sm:$0xff]   ;;  %v10827_v50 = vld [vmem:[%s13788_s6 + $0x2a8] sm:$0xff]   ;;  %v10846_v58 = vld [vmem:[%s13788_s6 + $0x2b8] sm:$0xff]  }
 0x14e   : > { %v11606_v59 = vld [vmem:[%s13788_s6 + $0x380] sm:$0xff]   ;;  %v10855_v61 = vld [vmem:[%s13788_s6 + $0x348] sm:$0xff]  }
 0x14f   : > { %v11501_v12 = vadd.f32 %v9061_v6, %v8949_v44  ;;  %v10822_v44 = vld [vmem:[%s13788_s6 + $0x298] sm:$0xff]  }
 0x150   : > { %9361 = vmatpush3.bf16.msra.mxu1 %v10830_v24  ;;  %v10854_v24 = vld [vmem:[%s13788_s6 + $0x300] sm:$0xff]  }
 0x151   : > { %9362 = vmatprep.subr.bf16.mxu1 %v10831_v4 }
 0x152   : > { %2755 = vmatmul.mubr.bf16.gmra.mrb[92].mxu0 %v11424_v20  ;;  %2804 = vmatmul.mubr.bf16.gmra.mrb[68].mxu1 %v11019_v3 }
 0x153   : > { %2811 = vmatprep.mubr.bf16.mxu1 %v11362_v33  ;;  %2956 = vmatprep.mubr.bf16.mxu0 %v11362_v33 }
 0x154   : > { %9363 = vmatpush3.bf16.msra.mxu1 %v10832_v13 }
 0x155   : > { %9364 = vmatprep.subr.bf16.mxu1 %v10833_v15 }
 0x158   : > { %9365 = vmatpush3.bf16.msra.mxu1 %v10834_v18 }
 0x159   : > { %9366 = vmatprep.subr.bf16.mxu1 %v10836_v22 }
 0x15a   : > { %2812 = vmatmul.mubr.bf16.gmra.mrb[72].mxu1 %v11019_v3  ;;  %2957 = vmatmul.mubr.bf16.vlgmr.msra.gmra.mrb[96].mxu0 %v11019_v3 }
 0x15b   : > { %9471 = vmatpush3.bf16.msra.mxu0 %v10816_v23  ;;  %2819 = vmatprep.mubr.bf16.mxu1 %v11360_v32 }
 0x15c   : > { %2964 = vmatprep.mubr.bf16.mxu0 %v11360_v32  ;;  %9472 = vmatprep.subr.bf16.mxu0 %v10817_v25  ;;  %v10858_v25 = vld [vmem:[%s13788_s6 + $0x310] sm:$0xff]  }
 0x15d   : > { %9367 = vmatpush3.bf16.msra.mxu1 %v10838_v27 }
 0x15e   : > { %9368 = vmatprep.subr.bf16.mxu1 %v10839_v28 }
 0x15f   : > { %9473 = vmatpush3.bf16.msra.mxu0 %v10818_v29 }
 0x160   : > { %9474 = vmatprep.subr.bf16.mxu0 %v10819_v30  ;;  %v10859_v30 = vld [vmem:[%s13788_s6 + $0x358] sm:$0xff]  }
 0x161   : > { %9369 = vmatpush3.bf16.msra.mxu1 %v10840_v35 }
 0x162   : > { %2820 = vmatmul.mubr.bf16.gmra.mrb[76].mxu1 %v11362_v33  ;;  %2965 = vmatmul.mubr.bf16.gmra.mrb[100].mxu0 %v11362_v33  ;;  %v10844_v33 = vld [vmem:[%s13788_s6 + $0x238] sm:$0xff]  }
 0x163   : > { %2827 = vmatprep.mubr.bf16.mxu1 %v11376_v43  ;;  %2972 = vmatprep.mubr.bf16.mxu0 %v11376_v43 }
 0x164   : > { %9475 = vmatpush3.bf16.msra.mxu0 %v10820_v36  ;;  %9370 = vmatprep.subr.bf16.mxu1 %v10841_v37 }
 0x165   : > { %9476 = vmatprep.subr.bf16.mxu0 %v10821_v38  ;;  %9371 = vmatpush3.bf16.msra.mxu1 %v10842_v39  ;;  %v10862_v38 = vld [vmem:[%s13788_s6 + $0x360] sm:$0xff]  }
 0x166   : > { %9372 = vmatprep.subr.bf16.mxu1 %v10843_v41 }
 0x168   : > { %9477 = vmatpush3.bf16.msra.mxu0 %v10822_v44 }
 0x169   : > { %9478 = vmatprep.subr.bf16.mxu0 %v10823_v45  ;;  %9373 = vmatpush3.bf16.msra.mxu1 %v10844_v33 }
 0x16a   : > { %2828 = vmatmul.mubr.bf16.gmra.mrb[80].mxu1 %v11360_v32  ;;  %2973 = vmatmul.mubr.bf16.gmra.mrb[104].mxu0 %v11360_v32 }
 0x16b   : > { %2835 = vmatprep.mubr.bf16.mxu1 %v11374_v42  ;;  %2980 = vmatprep.mubr.bf16.mxu0 %v11374_v42 }
 0x16c   : > { %9479 = vmatpush3.bf16.msra.mxu0 %v10824_v46  ;;  %9582 = vmatprep.subr.bf16.mxu1 %v10853_v60 }
 0x16d   : > { %9480 = vmatprep.subr.bf16.mxu0 %v10825_v49  ;;  %v10848_v49 = vld [vmem:[%s13788_s6 + $0x388] sm:$0xff]  }
 0x170   : > { %9481 = vmatpush3.bf16.msra.mxu0 %v10827_v50 }
 0x171   : > { %9482 = vmatprep.subr.bf16.mxu0 %v10835_v51 }
 0x172   : > { %2836 = vmatmul.mubr.bf16.gmra.mrb[84].mxu1 %v11376_v43  ;;  %2981 = vmatmul.mubr.bf16.gmra.mrb[108].mxu0 %v11376_v43 }
 0x173   : > { %2843 = vmatprep.mubr.bf16.mxu1 %v11388_v53  ;;  %2988 = vmatprep.mubr.bf16.mxu0 %v11388_v53 }
 0x174   : > { %9483 = vmatpush3.bf16.msra.mxu0 %v10837_v56 }
 0x175   : > { %9484 = vmatprep.subr.bf16.mxu0 %v10845_v57  ;;  %v10863_v57 = vld [vmem:[%s13788_s6 + $0x320] sm:$0xff]  }
 0x178   : > { %9485 = vmatpush3.bf16.msra.mxu0 %v10846_v58  ;;  %v10864_v58 = vld [vmem:[%s13788_s6 + $0x368] sm:$0xff]  }
 0x179   : > { %10586 = vmatprep.subr.bf16.mxu0 %v11606_v59 }
 0x17a   : > { %2844 = vmatmul.mubr.bf16.gmra.mrb[88].mxu1 %v11374_v42  ;;  %2989 = vmatmul.mubr.bf16.gmra.mrb[112].mxu0 %v11374_v42 }
 0x17b   : > { %2851 = vmatprep.mubr.bf16.mxu1 %v11386_v52  ;;  %2996 = vmatprep.mubr.bf16.mxu0 %v11386_v52 }
 0x182   : > { %2852 = vmatmul.mubr.bf16.gmra.mrb[92].mxu1 %v11388_v53  ;;  %2997 = vmatmul.mubr.bf16.gmra.mrb[116].mxu0 %v11388_v53 }
 0x183   : > { %2859 = vmatprep.mubr.bf16.mxu1 %v11400_v63  ;;  %3004 = vmatprep.mubr.bf16.mxu0 %v11400_v63 }
 0x18a   : > { %2860 = vmatmul.mubr.bf16.gmra.mrb[96].mxu1 %v11386_v52  ;;  %3005 = vmatmul.mubr.bf16.gmra.mrb[120].mxu0 %v11386_v52 }
 0x18b   : > { %2867 = vmatprep.mubr.bf16.mxu1 %v11398_v62  ;;  %3012 = vmatprep.mubr.bf16.mxu0 %v11398_v62 }
 0x192   : > { %2868 = vmatmul.mubr.bf16.gmra.mrb[100].mxu1 %v11400_v63  ;;  %3013 = vmatmul.mubr.bf16.gmra.mrb[124].mxu0 %v11400_v63 }
 0x193   : > { %2875 = vmatprep.mubr.bf16.mxu1 %v11412_v10  ;;  %3020 = vmatprep.mubr.bf16.mxu0 %v11412_v10 }
 0x19a   : > { %2876 = vmatmul.mubr.bf16.gmra.mrb[104].mxu1 %v11398_v62  ;;  %3021 = vmatmul.mubr.bf16.gmra.mrb[128].mxu0 %v11398_v62 }
 0x19b   : > { %2883 = vmatprep.mubr.bf16.mxu1 %v11410_v9  ;;  %3028 = vmatprep.mubr.bf16.mxu0 %v11410_v9 }
 0x1a2   : > { %2884 = vmatmul.mubr.bf16.gmra.mrb[108].mxu1 %v11412_v10  ;;  %3029 = vmatmul.mubr.bf16.gmra.mrb[132].mxu0 %v11412_v10 }
 0x1a3   : > { %2891 = vmatprep.mubr.bf16.mxu1 %v11424_v20  ;;  %3036 = vmatprep.mubr.bf16.mxu0 %v11424_v20 }
 0x1aa   : > { %2892 = vmatmul.mubr.bf16.gmra.mrb[112].mxu1 %v11410_v9  ;;  %3037 = vmatmul.mubr.bf16.gmra.mrb[136].mxu0 %v11410_v9 }
 0x1ab   : > { %2899 = vmatprep.mubr.bf16.mxu1 %v11422_v19  ;;  %3044 = vmatprep.mubr.bf16.mxu0 %v11422_v19 }
 0x1b2   : > { %2900 = vmatmul.mubr.bf16.gmra.mrb[116].mxu1 %v11424_v20  ;;  %3045 = vmatmul.mubr.bf16.gmra.mrb[140].mxu0 %v11424_v20 }
 0x1b3   : > { %2907 = vmatprep.mubr.bf16.mxu1 %v11436_v34  ;;  %3052 = vmatprep.mubr.bf16.mxu0 %v11436_v34 }
 0x1ba   : > { %2908 = vmatmul.mubr.bf16.gmra.mrb[120].mxu1 %v11422_v19  ;;  %3053 = vmatmul.mubr.bf16.gmra.mrb[144].mxu0 %v11422_v19 }
 0x1bb   : > { %2915 = vmatprep.mubr.bf16.mxu1 %v11434_v31  ;;  %3060 = vmatprep.mubr.bf16.mxu0 %v11434_v31 }
 0x1c2   : > { %2916 = vmatmul.mubr.bf16.gmra.mrb[124].mxu1 %v11436_v34  ;;  %3061 = vmatmul.mubr.bf16.gmra.mrb[148].mxu0 %v11436_v34 }
 0x1c3   : > { %3068 = vmatprep.mubr.bf16.mxu0 %v11451_v55  ;;  %3117 = vmatprep.mubr.bf16.mxu1 %v11376_v43 }
 0x1ca   : > { %3069 = vmatmul.mubr.bf16.gmra.mrb[152].mxu0 %v11434_v31  ;;  %3118 = vmatmul.mubr.bf16.vlgmr.msra.gmra.mrb[128].mxu1 %v11360_v32 }
 0x1cb   : > { %3076 = vmatprep.mubr.bf16.mxu0 %v11449_v54  ;;  %3125 = vmatprep.mubr.bf16.mxu1 %v11374_v42 }
 0x1cc   : > { %9583 = vmatpush3.bf16.msra.mxu1 %v10854_v24 }
 0x1cd   : > { %v9062_v4 = vpop.f32.mrb[48].mxu0  ;;  %v8962_v6 = vpop.f32.mrb[24].mxu1  ;;  %9584 = vmatprep.subr.bf16.mxu1 %v10855_v61  ;;  %v10865_v61 = vld [vmem:[%s13788_s6 + $0x328] sm:$0xff]  }
 0x1ce   : > { %v9063_v13 = vpop.f32.mrb[49].mxu0  ;;  %v8963_v14 = vpop.f32.mrb[25].mxu1 }
 0x1cf   : > { %v9064_v15 = vadd.f32 %v9063_v13, %v9062_v4  ;;  %v9065_v32 = vpop.f32.mrb[50].mxu0  ;;  %v8964_v16 = vadd.f32 %v8963_v14, %v8962_v6  ;;  %v8965_v18 = vpop.f32.mrb[26].mxu1 }
 0x1d0   : > { %v9066_v22 = vpop.f32.mrb[51].mxu0  ;;  %v8966_v23 = vpop.f32.mrb[27].mxu1  ;;  %9585 = vmatpush3.bf16.msra.mxu1 %v10856_v1 }
 0x1d1   : > { %v11672_v27 = vadd.f32 %v9064_v15, %v11477_v48  ;;  %v9067_v28 = vadd.f32 %v9066_v22, %v9065_v32  ;;  %v11674_v29 = vadd.f32 %v8966_v23, %v8965_v18  ;;  %9586 = vmatprep.subr.bf16.mxu1 %v10857_v8  ;;  %v10860_v48 = vld [vmem:[%s13788_s6 + $0x318] sm:$0xff]   ;;  %v10866_v15 = vld [vmem:[%s13788_s6 + $0x370] sm:$0xff]  }
 0x1d2   : > { %3077 = vmatmul.mubr.bf16.gmra.mrb[156].mxu0 %v11451_v55  ;;  %3126 = vmatmul.mubr.bf16.gmra.mrb[132].mxu1 %v11376_v43  ;;  %v10850_v23 = vld [vmem:[%s13788_s6 + $0x398] sm:$0xff]  }
 0x1d3   : > { %v11682_v35 = vadd.f32 %v9067_v28, %v11492_v0  ;;  %3133 = vmatprep.mubr.bf16.mxu1 %v11388_v53  ;;  %3278 = vmatprep.mubr.bf16.mxu0 %v11388_v53 }
 0x1d4   : > { %9587 = vmatpush3.bf16.msra.mxu1 %v10858_v25  ;;  %v10867_v25 = vld [vmem:[%s13788_s6 + $0x330] sm:$0xff]  }
 0x1d5   : > { %v8968_v36 = vpop.f32.mrb[28].mxu1  ;;  %v9068_v37 = vpop.f32.mrb[52].mxu0  ;;  %9588 = vmatprep.subr.bf16.mxu1 %v10859_v30 }
 0x1d6   : > { %v8969_v43 = vpop.f32.mrb[29].mxu1  ;;  %v9069_v39 = vpop.f32.mrb[53].mxu0 }
 0x1d7   : > { %v11692_v0 = vadd.f32 %v8969_v43, %v8968_v36  ;;  %v9070_v41 = vadd.f32 %v9069_v39, %v9068_v37  ;;  %v8971_v44 = vpop.f32.mrb[30].mxu1  ;;  %v9071_v45 = vpop.f32.mrb[54].mxu0  ;;  %v10869_v36 = vld [vmem:[%s13788_s6 + $0x338] sm:$0xff]  }
 0x1d8   : > { %v8972_v33 = vpop.f32.mrb[31].mxu1  ;;  %v9072_v46 = vpop.f32.mrb[55].mxu0  ;;  %9589 = vmatpush3.bf16.msra.mxu1 %v10860_v48 }
 0x1d9   : > { %v11698_v50 = vadd.f32 %v9070_v41, %v11499_v11  ;;  %v11700_v51 = vadd.f32 %v8972_v33, %v8971_v44  ;;  %v9073_v56 = vadd.f32 %v9072_v46, %v9071_v45  ;;  %9590 = vmatprep.subr.bf16.mxu1 %v10862_v38  ;;  %v10849_v11 = vld [vmem:[%s13788_s6 + $0x390] sm:$0xff]  }
 0x1da   : > { %3134 = vmatmul.mubr.bf16.gmra.mrb[136].mxu1 %v11374_v42  ;;  %3279 = vmatmul.mubr.bf16.vlgmr.msra.gmra.mrb[160].mxu0 %v11374_v42 }
 0x1db   : > { %v11711_v60 = vadd.f32 %v9073_v56, %v11511_v17  ;;  %10587 = vmatpush3.bf16.msra.mxu0 %v11606_v59  ;;  %3141 = vmatprep.mubr.bf16.mxu1 %v11386_v52  ;;  %v10852_v56 = vld [vmem:[%s13788_s6 + $0x3a8] sm:$0xff]  }
 0x1dc   : > { %3286 = vmatprep.mubr.bf16.mxu0 %v11386_v52  ;;  %10588 = vmatprep.subr.bf16.mxu0 %v10848_v49 }
 0x1dd   : > { %v8974_v24 = vpop.f32.mrb[32].mxu1  ;;  %v9074_v42 = vpop.f32.mrb[56].mxu0  ;;  %9591 = vmatpush3.bf16.msra.mxu1 %v10863_v57 }
 0x1de   : > { %v8975_v17 = vpop.f32.mrb[33].mxu1  ;;  %v9075_v1 = vpop.f32.mrb[57].mxu0  ;;  %9592 = vmatprep.subr.bf16.mxu1 %v10864_v58 }
 0x1df   : > { %v11722_v59 = vadd.f32 %v8975_v17, %v8974_v24  ;;  %v9076_v4 = vadd.f32 %v9075_v1, %v9074_v42  ;;  %v8977_v6 = vpop.f32.mrb[34].mxu1  ;;  %v9077_v8 = vpop.f32.mrb[58].mxu0  ;;  %10589 = vmatpush3.bf16.msra.mxu0 %v10848_v49 }
 0x1e0   : > { %v8978_v13 = vpop.f32.mrb[35].mxu1  ;;  %v9078_v14 = vpop.f32.mrb[59].mxu0  ;;  %10590 = vmatprep.subr.bf16.mxu0 %v10849_v11 }
 0x1e1   : > { %v11727_v32 = vadd.f32 %v9076_v4, %v8964_v16  ;;  %v8979_v18 = vadd.f32 %v8978_v13, %v8977_v6  ;;  %v9079_v22 = vadd.f32 %v9078_v14, %v9077_v8  ;;  %9593 = vmatpush3.bf16.msra.mxu1 %v10865_v61  ;;  %v10868_v16 = vld [vmem:[%s13788_s6 + $0x378] sm:$0xff]  }
 0x1e2   : > { %3142 = vmatmul.mubr.bf16.gmra.mrb[140].mxu1 %v11388_v53  ;;  %3287 = vmatmul.mubr.bf16.gmra.mrb[164].mxu0 %v11388_v53  ;;  %v10851_v53 = vld [vmem:[%s13788_s6 + $0x3a0] sm:$0xff]  }
 0x1e3   : > { %v11741_v28 = vadd.f32 %v9079_v22, %v11674_v29  ;;  %3149 = vmatprep.mubr.bf16.mxu1 %v11400_v63  ;;  %3294 = vmatprep.mubr.bf16.mxu0 %v11400_v63 }
 0x1e4   : > { %10591 = vmatpush3.bf16.msra.mxu0 %v10849_v11  ;;  %9594 = vmatprep.subr.bf16.mxu1 %v10866_v15  ;;  %v10861_v11 = vld [vmem:[%s13788_s6 + $0x3b0] sm:$0xff]   ;;  %v10870_v15 = vld [vmem:[%s13788_s6 + $0x3b8] sm:$0xff]  }
 0x1e5   : > { %v8980_v30 = vpop.f32.mrb[36].mxu1  ;;  %v9080_v48 = vpop.f32.mrb[60].mxu0  ;;  %10592 = vmatprep.subr.bf16.mxu0 %v10850_v23  ;;  %9595 = vmatpush3.bf16.msra.mxu1 %v10867_v25  ;;  %v11782_v25 = vld [vmem:[%s13786_s4] sm:$0xff]  }
 0x1e6   : > { %v8981_v29 = vpop.f32.mrb[37].mxu1  ;;  %v9081_v37 = vpop.f32.mrb[61].mxu0  ;;  %9596 = vmatprep.subr.bf16.mxu1 %v10868_v16 }
 0x1e7   : > { %v8982_v38 = vadd.f32 %v8981_v29, %v8980_v30  ;;  %v9082_v43 = vadd.f32 %v9081_v37, %v9080_v48  ;;  %v8983_v39 = vpop.f32.mrb[38].mxu1  ;;  %v9083_v41 = vpop.f32.mrb[62].mxu0 }
 0x1e8   : > { %v8984_v44 = vpop.f32.mrb[39].mxu1  ;;  %v9084_v45 = vpop.f32.mrb[63].mxu0  ;;  %10593 = vmatpush3.bf16.msra.mxu0 %v10850_v23 }
 0x1e9   : > { %v11752_v33 = vadd.f32 %v9082_v43, %v11692_v0  ;;  %v8985_v46 = vadd.f32 %v8984_v44, %v8983_v39  ;;  %v9085_v49 = vadd.f32 %v9084_v45, %v9083_v41  ;;  %10594 = vmatprep.subr.bf16.mxu0 %v10851_v53  ;;  %9597 = vmatpush3.bf16.msra.mxu1 %v10869_v36 }
 0x1ea   : > { %3150 = vmatmul.mubr.bf16.gmra.mrb[144].mxu1 %v11386_v52  ;;  %3295 = vmatmul.mubr.bf16.gmra.mrb[168].mxu0 %v11386_v52 }
 0x1eb   : > { %v11760_v57 = vadd.f32 %v9085_v49, %v11700_v51  ;;  %3157 = vmatprep.mubr.bf16.mxu1 %v11398_v62  ;;  %3302 = vmatprep.mubr.bf16.mxu0 %v11398_v62 }
 0x1ec   : > { %10595 = vmatpush3.bf16.msra.mxu0 %v10851_v53 }
 0x1ed   : > { %v8986_v0 = vpop.f32.mrb[40].mxu1  ;;  %v9086_v58 = vpop.f32.mrb[64].mxu0  ;;  %10596 = vmatprep.subr.bf16.mxu0 %v10852_v56 }
 0x1ee   : > { %v8987_v24 = vpop.f32.mrb[41].mxu1  ;;  %v9087_v42 = vpop.f32.mrb[65].mxu0 }
 0x1ef   : > { %v8988_v61 = vadd.f32 %v8987_v24, %v8986_v0  ;;  %v9088_v17 = vadd.f32 %v9087_v42, %v9086_v58  ;;  %v8989_v1 = vpop.f32.mrb[42].mxu1  ;;  %v9089_v4 = vpop.f32.mrb[66].mxu0 }
 0x1f0   : > { %v8990_v51 = vpop.f32.mrb[43].mxu1  ;;  %v9090_v6 = vpop.f32.mrb[67].mxu0  ;;  %10597 = vmatpush3.bf16.msra.mxu0 %v10852_v56 }
 0x1f1   : > { %v11768_v8 = vadd.f32 %v9088_v17, %v11722_v59  ;;  %v8991_v13 = vadd.f32 %v8990_v51, %v8989_v1  ;;  %v9091_v14 = vadd.f32 %v9090_v6, %v9089_v4  ;;  %10598 = vmatprep.subr.bf16.mxu0 %v10861_v11 }
 0x1f2   : > { %3158 = vmatmul.mubr.bf16.gmra.mrb[148].mxu1 %v11400_v63  ;;  %3303 = vmatmul.mubr.bf16.gmra.mrb[172].mxu0 %v11400_v63 }
 0x1f3   : > { %v11775_v22 = vadd.f32 %v9091_v14, %v8979_v18  ;;  %3165 = vmatprep.mubr.bf16.mxu1 %v11412_v10  ;;  %3310 = vmatprep.mubr.bf16.mxu0 %v11412_v10 }
 0x1f4   : > { %10599 = vmatpush3.bf16.msra.mxu0 %v10861_v11 }
 0x1f5   : > { %v8992_v59 = vpop.f32.mrb[44].mxu1  ;;  %v9092_v23 = vpop.f32.mrb[68].mxu0  ;;  %10600 = vmatprep.subr.bf16.mxu0 %v10870_v15 }
 0x1f6   : > { %v8993_v16 = vpop.f32.mrb[45].mxu1  ;;  %v9093_v30 = vpop.f32.mrb[69].mxu0 }
 0x1f7   : > { %v8994_v48 = vadd.f32 %v8993_v16, %v8992_v59  ;;  %v9094_v53 = vadd.f32 %v9093_v30, %v9092_v23  ;;  %v8995_v36 = vpop.f32.mrb[46].mxu1  ;;  %v9095_v18 = vpop.f32.mrb[70].mxu0 }
 0x1f8   : > { %v8996_v29 = vpop.f32.mrb[47].mxu1  ;;  %v9096_v37 = vpop.f32.mrb[71].mxu0  ;;  %10601 = vmatpush3.bf16.msra.mxu0 %v10870_v15 }
 0x1f9   : > { %v11784_v43 = vadd.f32 %v9094_v53, %v8982_v38  ;;  %v8997_v39 = vadd.f32 %v8996_v29, %v8995_v36  ;;  %v9097_v41 = vadd.f32 %v9096_v37, %v9095_v18  ;;  %10634 = vmatprep.subr.bf16.mxu0 %v11782_v25 }
 0x1fa   : > { %3166 = vmatmul.mubr.bf16.gmra.mrb[152].mxu1 %v11398_v62  ;;  %3311 = vmatmul.mubr.bf16.gmra.mrb[176].mxu0 %v11398_v62 }
 0x1fb   : > { %v11789_v44 = vadd.f32 %v9097_v41, %v8985_v46  ;;  %3173 = vmatprep.mubr.bf16.mxu1 %v11410_v9  ;;  %3318 = vmatprep.mubr.bf16.mxu0 %v11410_v9 }
 0x1fd   : > { %v8998_v45 = vpop.f32.mrb[48].mxu1  ;;  %v9098_v49 = vpop.f32.mrb[72].mxu0 }
 0x1fe   : > { %v8999_v56 = vpop.f32.mrb[49].mxu1  ;;  %v9099_v0 = vpop.f32.mrb[73].mxu0 }
 0x1ff   : > { %v9000_v38 = vadd.f32 %v8999_v56, %v8998_v45  ;;  %v9100_v58 = vadd.f32 %v9099_v0, %v9098_v49  ;;  %v9001_v11 = vpop.f32.mrb[50].mxu1  ;;  %v9101_v24 = vpop.f32.mrb[74].mxu0 }
 0x200   : > { %v9002_v42 = vpop.f32.mrb[51].mxu1  ;;  %v9102_v17 = vpop.f32.mrb[75].mxu0 }
 0x201   : > { %v11793_v1 = vadd.f32 %v9100_v58, %v8988_v61  ;;  %v9003_v4 = vadd.f32 %v9002_v42, %v9001_v11  ;;  %v9103_v51 = vadd.f32 %v9102_v17, %v9101_v24 }
 0x202   : > { %3174 = vmatmul.mubr.bf16.gmra.mrb[156].mxu1 %v11412_v10  ;;  %3319 = vmatmul.mubr.bf16.gmra.mrb[180].mxu0 %v11412_v10 }
 0x203   : > { %v11797_v46 = vadd.f32 %v9103_v51, %v8991_v13  ;;  %3181 = vmatprep.mubr.bf16.mxu1 %v11424_v20  ;;  %3326 = vmatprep.mubr.bf16.mxu0 %v11424_v20 }
 0x205   : > { %v9004_v6 = vpop.f32.mrb[52].mxu1  ;;  %v9104_v14 = vpop.f32.mrb[76].mxu0 }
 0x206   : > { %v9005_v15 = vpop.f32.mrb[53].mxu1  ;;  %v9105_v59 = vpop.f32.mrb[77].mxu0 }
 0x207   : > { %v9006_v23 = vadd.f32 %v9005_v15, %v9004_v6  ;;  %v9106_v16 = vadd.f32 %v9105_v59, %v9104_v14  ;;  %v9007_v61 = vpop.f32.mrb[54].mxu1  ;;  %v9107_v30 = vpop.f32.mrb[78].mxu0 }
 0x208   : > { %v9008_v53 = vpop.f32.mrb[55].mxu1  ;;  %v9108_v36 = vpop.f32.mrb[79].mxu0 }
 0x209   : > { %v11801_v18 = vadd.f32 %v9106_v16, %v8994_v48  ;;  %v9009_v29 = vadd.f32 %v9008_v53, %v9007_v61  ;;  %v9109_v37 = vadd.f32 %v9108_v36, %v9107_v30 }
 0x20a   : > { %3182 = vmatmul.mubr.bf16.gmra.mrb[160].mxu1 %v11410_v9  ;;  %3327 = vmatmul.mubr.bf16.gmra.mrb[184].mxu0 %v11410_v9 }
 0x20b   : > { %v11805_v13 = vadd.f32 %v9109_v37, %v8997_v39  ;;  %3189 = vmatprep.mubr.bf16.mxu1 %v11422_v19  ;;  %3334 = vmatprep.mubr.bf16.mxu0 %v11422_v19 }
 0x20d   : > { %v9010_v41 = vpop.f32.mrb[56].mxu1  ;;  %v9110_v45 = vpop.f32.mrb[80].mxu0 }
 0x20e   : > { %v9011_v49 = vpop.f32.mrb[57].mxu1  ;;  %v9111_v56 = vpop.f32.mrb[81].mxu0 }
 0x20f   : > { %v9012_v0 = vadd.f32 %v9011_v49, %v9010_v41  ;;  %v9112_v58 = vadd.f32 %v9111_v56, %v9110_v45  ;;  %v9013_v48 = vpop.f32.mrb[58].mxu1  ;;  %v9113_v11 = vpop.f32.mrb[82].mxu0 }
 0x210   : > { %v9014_v24 = vpop.f32.mrb[59].mxu1  ;;  %v9114_v42 = vpop.f32.mrb[83].mxu0 }
 0x211   : > { %v11809_v17 = vadd.f32 %v9112_v58, %v9000_v38  ;;  %v9015_v51 = vadd.f32 %v9014_v24, %v9013_v48  ;;  %v9115_v6 = vadd.f32 %v9114_v42, %v9113_v11 }
 0x212   : > { %3190 = vmatmul.mubr.bf16.gmra.mrb[164].mxu1 %v11424_v20  ;;  %3335 = vmatmul.mubr.bf16.gmra.mrb[188].mxu0 %v11424_v20 }
 0x213   : > { %v11813_v39 = vadd.f32 %v9115_v6, %v9003_v4  ;;  %3197 = vmatprep.mubr.bf16.mxu1 %v11436_v34  ;;  %3342 = vmatprep.mubr.bf16.mxu0 %v11436_v34 }
 0x215   : > { %v9016_v14 = vpop.f32.mrb[60].mxu1  ;;  %v9116_v15 = vpop.f32.mrb[84].mxu0 }
 0x216   : > { %v9017_v59 = vpop.f32.mrb[61].mxu1  ;;  %v9117_v16 = vpop.f32.mrb[85].mxu0 }
 0x217   : > { %v9018_v61 = vadd.f32 %v9017_v59, %v9016_v14  ;;  %v9118_v30 = vadd.f32 %v9117_v16, %v9116_v15  ;;  %v9019_v38 = vpop.f32.mrb[62].mxu1  ;;  %v9119_v53 = vpop.f32.mrb[86].mxu0 }
 0x218   : > { %v9020_v36 = vpop.f32.mrb[63].mxu1  ;;  %v9120_v37 = vpop.f32.mrb[87].mxu0 }
 0x219   : > { %v11817_v41 = vadd.f32 %v9118_v30, %v9006_v23  ;;  %v9021_v45 = vadd.f32 %v9020_v36, %v9019_v38  ;;  %v9121_v49 = vadd.f32 %v9120_v37, %v9119_v53 }
 0x21a   : > { %3198 = vmatmul.mubr.bf16.gmra.mrb[168].mxu1 %v11422_v19  ;;  %3343 = vmatmul.mubr.bf16.gmra.mrb[192].mxu0 %v11422_v19 }
 0x21b   : > { %v11821_v4 = vadd.f32 %v9121_v49, %v9009_v29  ;;  %3205 = vmatprep.mubr.bf16.mxu1 %v11434_v31  ;;  %3350 = vmatprep.mubr.bf16.mxu0 %v11434_v31 }
 0x21d   : > { %v9122_v56 = vpop.f32.mrb[88].mxu0  ;;  %v9150_v58 = vpop.f32.mrb[64].mxu1 }
 0x21e   : > { %v9123_v48 = vpop.f32.mrb[89].mxu0  ;;  %v9151_v11 = vpop.f32.mrb[65].mxu1 }
 0x21f   : > { %v9124_v24 = vadd.f32 %v9123_v48, %v9122_v56  ;;  %v9152_v42 = vadd.f32 %v9151_v11, %v9150_v58  ;;  %v9125_v23 = vpop.f32.mrb[90].mxu0  ;;  %v9153_v6 = vpop.f32.mrb[66].mxu1 }
 0x220   : > { %v9126_v14 = vpop.f32.mrb[91].mxu0  ;;  %v9154_v15 = vpop.f32.mrb[67].mxu1 }
 0x221   : > { %v11825_v59 = vadd.f32 %v9124_v24, %v9012_v0  ;;  %v2798_v16 = vadd.f32 %v9152_v42, %v11457_v2  ;;  %v9127_v29 = vadd.f32 %v9126_v14, %v9125_v23  ;;  %v9155_v30 = vadd.f32 %v9154_v15, %v9153_v6 }
 0x222   : > { %3206 = vmatmul.mubr.bf16.gmra.mrb[172].mxu1 %v11436_v34  ;;  %3351 = vmatmul.mubr.bf16.gmra.mrb[196].mxu0 %v11436_v34 }
 0x223   : > { %v11830_v38 = vadd.f32 %v9127_v29, %v9015_v51  ;;  %v2801_v53 = vadd.f32 %v9155_v30, %v11459_v7  ;;  %3213 = vmatprep.mubr.bf16.mxu1 %v11451_v55  ;;  %3358 = vmatprep.mubr.bf16.mxu0 %v11451_v55 }
 0x225   : > { %v9128_v36 = vpop.f32.mrb[92].mxu0  ;;  %v9156_v37 = vpop.f32.mrb[68].mxu1 }
 0x226   : > { %v9129_v0 = vpop.f32.mrb[93].mxu0  ;;  %v9157_v49 = vpop.f32.mrb[69].mxu1 }
 0x227   : > { %v9130_v56 = vadd.f32 %v9129_v0, %v9128_v36  ;;  %v9158_v2 = vadd.f32 %v9157_v49, %v9156_v37  ;;  %v9131_v58 = vpop.f32.mrb[94].mxu0  ;;  %v9159_v48 = vpop.f32.mrb[70].mxu1 }
 0x228   : > { %v9132_v11 = vpop.f32.mrb[95].mxu0  ;;  %v9160_v24 = vpop.f32.mrb[71].mxu1 }
 0x229   : > { %v11835_v42 = vadd.f32 %v9130_v56, %v9018_v61  ;;  %v2806_v51 = vadd.f32 %v9158_v2, %v11465_v21  ;;  %v9133_v23 = vadd.f32 %v9132_v11, %v9131_v58  ;;  %v9161_v7 = vadd.f32 %v9160_v24, %v9159_v48 }
 0x22a   : > { %3214 = vmatmul.mubr.bf16.gmra.mrb[176].mxu1 %v11434_v31  ;;  %3359 = vmatmul.mubr.bf16.gmra.mrb[200].mxu0 %v11434_v31 }
 0x22b   : > { %v11840_v6 = vadd.f32 %v9133_v23, %v9021_v45  ;;  %v2809_v14 = vadd.f32 %v9161_v7, %v11467_v26  ;;  %3221 = vmatprep.mubr.bf16.mxu1 %v11449_v54  ;;  %3366 = vmatprep.mubr.bf16.mxu0 %v11449_v54 }
 0x22d   : > { %v9162_v15 = vpop.f32.mrb[72].mxu1  ;;  %v9262_v29 = vpop.f32.mrb[96].mxu0 }
 0x22e   : > { %v9163_v61 = vpop.f32.mrb[73].mxu1  ;;  %v9263_v30 = vpop.f32.mrb[97].mxu0 }
 0x22f   : > { %v9164_v36 = vadd.f32 %v9163_v61, %v9162_v15  ;;  %v9264_v21 = vadd.f32 %v9263_v30, %v9262_v29  ;;  %v9165_v37 = vpop.f32.mrb[74].mxu1  ;;  %v9265_v0 = vpop.f32.mrb[98].mxu0 }
 0x230   : > { %v9166_v49 = vpop.f32.mrb[75].mxu1  ;;  %v9266_v56 = vpop.f32.mrb[99].mxu0 }
 0x231   : > { %v2814_v2 = vadd.f32 %v9164_v36, %v11473_v40  ;;  %v11846_v45 = vadd.f32 %v9264_v21, %v2798_v16  ;;  %v9167_v58 = vadd.f32 %v9166_v49, %v9165_v37  ;;  %v9267_v26 = vadd.f32 %v9266_v56, %v9265_v0 }
 0x232   : > { %3222 = vmatmul.mubr.bf16.gmra.mrb[180].mxu1 %v11451_v55  ;;  %3367 = vmatmul.mubr.bf16.gmra.mrb[204].mxu0 %v11451_v55 }
 0x233   : > { %v2817_v48 = vadd.f32 %v9167_v58, %v11475_v47  ;;  %v11851_v11 = vadd.f32 %v9267_v26, %v2801_v53  ;;  %3229 = vmatprep.mubr.bf16.mxu1 %v11019_v3  ;;  %3374 = vmatprep.mubr.bf16.mxu0 %v11019_v3 }
 0x235   : > { %v9168_v24 = vpop.f32.mrb[76].mxu1  ;;  %v9268_v23 = vpop.f32.mrb[100].mxu0 }
 0x236   : > { %v9169_v7 = vpop.f32.mrb[77].mxu1  ;;  %v9269_v40 = vpop.f32.mrb[101].mxu0 }
 0x237   : > { %v9170_v16 = vadd.f32 %v9169_v7, %v9168_v24  ;;  %v9270_v15 = vadd.f32 %v9269_v40, %v9268_v23  ;;  %v9171_v29 = vpop.f32.mrb[78].mxu1  ;;  %v9271_v61 = vpop.f32.mrb[102].mxu0 }
 0x238   : > { %v9172_v30 = vpop.f32.mrb[79].mxu1  ;;  %v9272_v36 = vpop.f32.mrb[103].mxu0 }
 0x239   : > { %v2822_v21 = vadd.f32 %v9170_v16, %v11497_v5  ;;  %v11856_v37 = vadd.f32 %v9270_v15, %v2806_v51  ;;  %v9173_v47 = vadd.f32 %v9172_v30, %v9171_v29  ;;  %v9273_v53 = vadd.f32 %v9272_v36, %v9271_v61 }
 0x23a   : > { %3230 = vmatmul.mubr.bf16.gmra.mrb[184].mxu1 %v11449_v54  ;;  %3375 = vmatmul.mubr.bf16.gmra.mrb[208].mxu0 %v11449_v54 }
 0x23b   : > { %v2825_v0 = vadd.f32 %v9173_v47, %v11501_v12  ;;  %v11861_v49 = vadd.f32 %v9273_v53, %v2809_v14  ;;  %3237 = vmatprep.mubr.bf16.mxu1 %v11019_v3  ;;  %3382 = vmatprep.mubr.bf16.mxu0 %v11019_v3 }
 0x23d   : > { %v9174_v56 = vpop.f32.mrb[80].mxu1  ;;  %v9274_v58 = vpop.f32.mrb[104].mxu0 }
 0x23e   : > { %v9175_v26 = vpop.f32.mrb[81].mxu1  ;;  %v9275_v5 = vpop.f32.mrb[105].mxu0 }
 0x23f   : > { %v9176_v51 = vadd.f32 %v9175_v26, %v9174_v56  ;;  %v9276_v24 = vadd.f32 %v9275_v5, %v9274_v58  ;;  %v9177_v23 = vpop.f32.mrb[82].mxu1  ;;  %v9277_v7 = vpop.f32.mrb[106].mxu0 }
 0x240   : > { %v9178_v40 = vpop.f32.mrb[83].mxu1  ;;  %v9278_v16 = vpop.f32.mrb[107].mxu0 }
 0x241   : > { %v2830_v15 = vadd.f32 %v9176_v51, %v11672_v27  ;;  %v11866_v29 = vadd.f32 %v9276_v24, %v2814_v2  ;;  %v9179_v12 = vadd.f32 %v9178_v40, %v9177_v23  ;;  %v9279_v14 = vadd.f32 %v9278_v16, %v9277_v7  ;;  %v10881_v27 = vld [vmem:[%s13789_s7 + $0x40] sm:$0xff]  }
 0x242   : > { %3238 = vmatmul.mubr.bf16.gmra.mrb[188].mxu1 %v11019_v3  ;;  %3383 = vmatmul.mubr.bf16.gmra.mrb[212].mxu0 %v11019_v3  ;;  %v10883_v40 = vld [vmem:[%s13789_s7] sm:$0xff]  }
 0x243   : > { %v2833_v61 = vadd.f32 %v9179_v12, %v11682_v35  ;;  %v11871_v30 = vadd.f32 %v9279_v14, %v2817_v48  ;;  %3439 = vmatprep.mubr.bf16.mxu1 %v11400_v63  ;;  %3390 = vmatprep.mubr.bf16.mxu0 %v11019_v3 }
 0x244   : > { %9738 = vmatprep.subr.bf16.mxu1 %v10881_v27 }
 0x245   : > { %v9180_v36 = vpop.f32.mrb[84].mxu1  ;;  %v9280_v47 = vpop.f32.mrb[108].mxu0 }
 0x246   : > { %v9181_v2 = vpop.f32.mrb[85].mxu1  ;;  %v9281_v53 = vpop.f32.mrb[109].mxu0 }
 0x247   : > { %v9182_v56 = vadd.f32 %v9181_v2, %v9180_v36  ;;  %v9282_v58 = vadd.f32 %v9281_v53, %v9280_v47  ;;  %v9183_v26 = vpop.f32.mrb[86].mxu1  ;;  %v9283_v5 = vpop.f32.mrb[110].mxu0 }
 0x248   : > { %v9184_v35 = vpop.f32.mrb[87].mxu1  ;;  %v9284_v48 = vpop.f32.mrb[111].mxu0 }
 0x249   : > { %v2838_v51 = vadd.f32 %v9182_v56, %v11698_v50  ;;  %v11879_v24 = vadd.f32 %v9282_v58, %v2822_v21  ;;  %v9185_v23 = vadd.f32 %v9184_v35, %v9183_v26  ;;  %v9285_v7 = vadd.f32 %v9284_v48, %v9283_v5 }
 0x24a   : > { %3391 = vmatmul.mubr.bf16.gmra.mrb[216].mxu0 %v11019_v3  ;;  %3440 = vmatmul.mubr.bf16.vlgmr.msra.gmra.mrb[192].mxu1 %v11386_v52 }
 0x24b   : > { %v2841_v16 = vadd.f32 %v9185_v23, %v11711_v60  ;;  %v11887_v12 = vadd.f32 %v9285_v7, %v2825_v0  ;;  %3447 = vmatprep.mubr.bf16.mxu1 %v11398_v62  ;;  %3398 = vmatprep.mubr.bf16.mxu0 %v11019_v3 }
 0x24c   : > { %9739 = vmatpush3.bf16.msra.mxu1 %v10883_v40 }
 0x24d   : > { %v9186_v50 = vpop.f32.mrb[88].mxu1  ;;  %v9286_v21 = vpop.f32.mrb[112].mxu0 }
 0x24e   : > { %v9187_v14 = vpop.f32.mrb[89].mxu1  ;;  %v9287_v36 = vpop.f32.mrb[113].mxu0 }
 0x24f   : > { %v9188_v47 = vadd.f32 %v9187_v14, %v9186_v50  ;;  %v9288_v27 = vadd.f32 %v9287_v36, %v9286_v21  ;;  %v9189_v2 = vpop.f32.mrb[90].mxu1  ;;  %v9289_v53 = vpop.f32.mrb[114].mxu0  ;;  %v10872_v14 = vld [vmem:[%s13786_s4 + $0x8] sm:$0xff]  }
 0x250   : > { %v9190_v56 = vpop.f32.mrb[91].mxu1  ;;  %v9290_v58 = vpop.f32.mrb[115].mxu0 }
 0x251   : > { %v2846_v52 = vadd.f32 %v9188_v47, %v11727_v32  ;;  %v11892_v60 = vadd.f32 %v9288_v27, %v2830_v15  ;;  %v9191_v0 = vadd.f32 %v9190_v56, %v9189_v2  ;;  %v9291_v26 = vadd.f32 %v9290_v58, %v9289_v53  ;;  %v10885_v32 = vld [vmem:[%s13789_s7 + $0x48] sm:$0xff]  }
 0x252   : > { %3399 = vmatmul.mubr.bf16.gmra.mrb[220].mxu0 %v11019_v3  ;;  %3448 = vmatmul.mubr.bf16.gmra.mrb[196].mxu1 %v11400_v63  ;;  %v10887_v53 = vld [vmem:[%s13789_s7 + $0x8] sm:$0xff]  }
 0x253   : > { %v2849_v5 = vadd.f32 %v9191_v0, %v11741_v28  ;;  %v11897_v35 = vadd.f32 %v9291_v26, %v2833_v61  ;;  %3455 = vmatprep.mubr.bf16.mxu1 %v11412_v10  ;;  %10602 = vmatprep.mubr.bf16.mxu0 %v11398_v62 }
 0x254   : > { %9740 = vmatprep.subr.bf16.mxu1 %v10885_v32 }
 0x255   : > { %v9192_v48 = vpop.f32.mrb[92].mxu1  ;;  %v9292_v23 = vpop.f32.mrb[116].mxu0  ;;  %9741 = vmatpush3.bf16.msra.mxu1 %v10887_v53 }
 0x256   : > { %v9193_v15 = vpop.f32.mrb[93].mxu1  ;;  %v9293_v7 = vpop.f32.mrb[117].mxu0 }
 0x257   : > { %v9194_v40 = vadd.f32 %v9193_v15, %v9192_v48  ;;  %v9294_v50 = vadd.f32 %v9293_v7, %v9292_v23  ;;  %v9195_v21 = vpop.f32.mrb[94].mxu1  ;;  %v9295_v63 = vpop.f32.mrb[118].mxu0 }
 0x258   : > { %v9196_v28 = vpop.f32.mrb[95].mxu1  ;;  %v9296_v61 = vpop.f32.mrb[119].mxu0 }
 0x259   : > { %v2854_v36 = vadd.f32 %v9194_v40, %v11752_v33  ;;  %v11908_v47 = vadd.f32 %v9294_v50, %v2838_v51  ;;  %v9197_v27 = vadd.f32 %v9196_v28, %v9195_v21  ;;  %v9297_v2 = vadd.f32 %v9296_v61, %v9295_v63  ;;  %v10873_v33 = vld [vmem:[%s13786_s4 + $0x10] sm:$0xff]   ;;  %v10874_v21 = vld [vmem:[%s13786_s4 + $0x18] sm:$0xff]  }
 0x25a   : > { %3456 = vmatmul.mubr.bf16.gmra.mrb[200].mxu1 %v11398_v62  ;;  %10603 = vmatmul.mubr.bf16.vlgmr.msra.gmra.mrb[224].mxu0 %v11412_v10  ;;  %v10889_v61 = vld [vmem:[%s13789_s7 + $0x50] sm:$0xff]  }
 0x25b   : > { %v2857_v56 = vadd.f32 %v9197_v27, %v11760_v57  ;;  %v11916_v58 = vadd.f32 %v9297_v2, %v2841_v16  ;;  %10635 = vmatpush3.bf16.msra.mxu0 %v11782_v25  ;;  %3463 = vmatprep.mubr.bf16.mxu1 %v11410_v9 }
 0x25c   : > { %10606 = vmatprep.mubr.bf16.mxu0 %v11410_v9  ;;  %10636 = vmatprep.subr.bf16.mxu0 %v10872_v14 }
 0x25d   : > { %v9198_v51 = vpop.f32.mrb[96].mxu1  ;;  %v9298_v0 = vpop.f32.mrb[120].mxu0  ;;  %9742 = vmatprep.subr.bf16.mxu1 %v10889_v61 }
 0x25e   : > { %v9199_v62 = vpop.f32.mrb[97].mxu1  ;;  %v9299_v26 = vpop.f32.mrb[121].mxu0 }
 0x25f   : > { %v9200_v48 = vadd.f32 %v9199_v62, %v9198_v51  ;;  %v9300_v57 = vadd.f32 %v9299_v26, %v9298_v0  ;;  %v9201_v16 = vpop.f32.mrb[98].mxu1  ;;  %v9301_v23 = vpop.f32.mrb[122].mxu0  ;;  %10637 = vmatpush3.bf16.msra.mxu0 %v10872_v14 }
 0x260   : > { %v9202_v25 = vpop.f32.mrb[99].mxu1  ;;  %v9302_v32 = vpop.f32.mrb[123].mxu0  ;;  %10638 = vmatprep.subr.bf16.mxu0 %v10873_v33 }
 0x261   : > { %v2862_v15 = vadd.f32 %v9200_v48, %v11768_v8  ;;  %v11925_v7 = vadd.f32 %v9300_v57, %v2846_v52  ;;  %v9203_v40 = vadd.f32 %v9202_v25, %v9201_v16  ;;  %v9303_v50 = vadd.f32 %v9302_v32, %v9301_v23  ;;  %v10890_v48 = vld [vmem:[%s13789_s7 + $0x10] sm:$0xff]  }
 0x262   : > { %3464 = vmatmul.mubr.bf16.gmra.mrb[204].mxu1 %v11412_v10  ;;  %10607 = vmatmul.mubr.bf16.gmra.mrb[228].mxu0 %v11424_v20 }
 0x263   : > { %v2865_v63 = vadd.f32 %v9203_v40, %v11775_v22  ;;  %v11933_v28 = vadd.f32 %v9303_v50, %v2849_v5  ;;  %3471 = vmatprep.mubr.bf16.mxu1 %v11424_v20  ;;  %10610 = vmatprep.mubr.bf16.mxu0 %v11422_v19 }
 0x264   : > { %10639 = vmatpush3.bf16.msra.mxu0 %v10873_v33  ;;  %9743 = vmatpush3.bf16.msra.mxu1 %v10890_v48 }
 0x265   : > { %v9204_v8 = vpop.f32.mrb[100].mxu1  ;;  %v9304_v52 = vpop.f32.mrb[124].mxu0  ;;  %10640 = vmatprep.subr.bf16.mxu0 %v10874_v21 }
 0x266   : > { %v9205_v14 = vpop.f32.mrb[101].mxu1  ;;  %v9305_v10 = vpop.f32.mrb[125].mxu0 }
 0x267   : > { %v9206_v27 = vadd.f32 %v9205_v14, %v9204_v8  ;;  %v9306_v2 = vadd.f32 %v9305_v10, %v9304_v52  ;;  %v9207_v53 = vpop.f32.mrb[102].mxu1  ;;  %v9307_v22 = vpop.f32.mrb[126].mxu0 }
 0x268   : > { %v9208_v5 = vpop.f32.mrb[103].mxu1  ;;  %v9308_v51 = vpop.f32.mrb[127].mxu0  ;;  %10641 = vmatpush3.bf16.msra.mxu0 %v10874_v21 }
 0x269   : > { %v2870_v0 = vadd.f32 %v9206_v27, %v11784_v43  ;;  %v11941_v33 = vadd.f32 %v9306_v2, %v2854_v36  ;;  %v9209_v62 = vadd.f32 %v9208_v5, %v9207_v53  ;;  %v9309_v26 = vadd.f32 %v9308_v51, %v9307_v22 }
 0x26a   : > { %3472 = vmatmul.mubr.bf16.gmra.mrb[208].mxu1 %v11410_v9  ;;  %10611 = vmatmul.mubr.bf16.gmra.mrb[232].mxu0 %v11436_v34 }
 0x26b   : > { %v2873_v57 = vadd.f32 %v9209_v62, %v11789_v44  ;;  %v11949_v16 = vadd.f32 %v9309_v26, %v2857_v56  ;;  %3479 = vmatprep.mubr.bf16.mxu1 %v11422_v19  ;;  %10614 = vmatprep.mubr.bf16.mxu0 %v11434_v31 }
 0x26d   : > { %v9210_v43 = vpop.f32.mrb[104].mxu1  ;;  %v9310_v36 = vpop.f32.mrb[128].mxu0 }
 0x26e   : > { %v9211_v23 = vpop.f32.mrb[105].mxu1  ;;  %v9311_v25 = vpop.f32.mrb[129].mxu0 }
 0x26f   : > { %v9212_v32 = vadd.f32 %v9211_v23, %v9210_v43  ;;  %v9312_v40 = vadd.f32 %v9311_v25, %v9310_v36  ;;  %v9213_v50 = vpop.f32.mrb[106].mxu1  ;;  %v9313_v21 = vpop.f32.mrb[130].mxu0  ;;  %v10894_v36 = vld [vmem:[%s13789_s7 + $0x18] sm:$0xff]  }
 0x270   : > { %v9214_v9 = vpop.f32.mrb[107].mxu1  ;;  %v9314_v8 = vpop.f32.mrb[131].mxu0 }
 0x271   : > { %v2878_v52 = vadd.f32 %v9212_v32, %v11793_v1  ;;  %v11954_v44 = vadd.f32 %v9312_v40, %v2862_v15  ;;  %v9215_v56 = vadd.f32 %v9214_v9, %v9213_v50  ;;  %v9315_v61 = vadd.f32 %v9314_v8, %v9313_v21  ;;  %v10893_v1 = vld [vmem:[%s13789_s7 + $0x58] sm:$0xff]  }
 0x272   : > { %3480 = vmatmul.mubr.bf16.gmra.mrb[212].mxu1 %v11424_v20  ;;  %10615 = vmatmul.mubr.bf16.gmra.mrb[236].mxu0 %v11451_v55 }
 0x273   : > { %v2881_v14 = vadd.f32 %v9215_v56, %v11797_v46  ;;  %v11959_v10 = vadd.f32 %v9315_v61, %v2865_v63  ;;  %3487 = vmatprep.mubr.bf16.mxu1 %v11436_v34  ;;  %10618 = vmatprep.mubr.bf16.mxu0 %v11449_v54 }
 0x274   : > { %9744 = vmatprep.subr.bf16.mxu1 %v10893_v1 }
 0x275   : > { %v9216_v27 = vpop.f32.mrb[108].mxu1  ;;  %v9316_v2 = vpop.f32.mrb[132].mxu0  ;;  %9745 = vmatpush3.bf16.msra.mxu1 %v10894_v36  ;;  %v10896_v36 = vld [vmem:[%s13789_s7 + $0x20] sm:$0xff]  }
 0x276   : > { %v9217_v15 = vpop.f32.mrb[109].mxu1  ;;  %v9317_v53 = vpop.f32.mrb[133].mxu0 }
 0x277   : > { %v9218_v22 = vadd.f32 %v9217_v15, %v9216_v27  ;;  %v9318_v20 = vadd.f32 %v9317_v53, %v9316_v2  ;;  %v9219_v5 = vpop.f32.mrb[110].mxu1  ;;  %v9319_v51 = vpop.f32.mrb[134].mxu0 }
 0x278   : > { %v9220_v46 = vpop.f32.mrb[111].mxu1  ;;  %v9320_v63 = vpop.f32.mrb[135].mxu0 }
 0x279   : > { %v2886_v62 = vadd.f32 %v9218_v22, %v11801_v18  ;;  %v11967_v26 = vadd.f32 %v9318_v20, %v2870_v0  ;;  %v9221_v48 = vadd.f32 %v9220_v46, %v9219_v5  ;;  %v9321_v43 = vadd.f32 %v9320_v63, %v9319_v51 }
 0x27a   : > { %3488 = vmatmul.mubr.bf16.gmra.mrb[216].mxu1 %v11422_v19  ;;  %10619 = vmatmul.mubr.bf16.gmra.mrb[240].mxu0 %v11019_v3 }
 0x27b   : > { %v2889_v23 = vadd.f32 %v9221_v48, %v11805_v13  ;;  %v11975_v25 = vadd.f32 %v9321_v43, %v2873_v57  ;;  %3495 = vmatprep.mubr.bf16.mxu1 %v11434_v31  ;;  %10622 = vmatprep.mubr.bf16.mxu0 %v11019_v3 }
 0x27d   : > { %v9222_v18 = vpop.f32.mrb[112].mxu1  ;;  %v9322_v0 = vpop.f32.mrb[136].mxu0 }
 0x27e   : > { %v9223_v32 = vpop.f32.mrb[113].mxu1  ;;  %v9323_v40 = vpop.f32.mrb[137].mxu0 }
 0x27f   : > { %v9224_v50 = vadd.f32 %v9223_v32, %v9222_v18  ;;  %v9324_v21 = vadd.f32 %v9323_v40, %v9322_v0  ;;  %v9225_v9 = vpop.f32.mrb[114].mxu1  ;;  %v9325_v8 = vpop.f32.mrb[138].mxu0 }
 0x280   : > { %v9226_v19 = vpop.f32.mrb[115].mxu1  ;;  %v9326_v56 = vpop.f32.mrb[139].mxu0 }
 0x281   : > { %v2894_v61 = vadd.f32 %v9224_v50, %v11809_v17  ;;  %v11980_v13 = vadd.f32 %v9324_v21, %v2878_v52  ;;  %v9227_v57 = vadd.f32 %v9226_v19, %v9225_v9  ;;  %v9327_v27 = vadd.f32 %v9326_v56, %v9325_v8  ;;  %v10895_v17 = vld [vmem:[%s13789_s7 + $0x60] sm:$0xff]  }
 0x282   : > { %3496 = vmatmul.mubr.bf16.gmra.mrb[220].mxu1 %v11436_v34  ;;  %10623 = vmatmul.mubr.bf16.gmra.mrb[244].mxu0 %v11019_v3 }
 0x283   : > { %v2897_v2 = vadd.f32 %v9227_v57, %v11813_v39  ;;  %v11985_v1 = vadd.f32 %v9327_v27, %v2881_v14  ;;  %3503 = vmatprep.mubr.bf16.mxu1 %v11451_v55  ;;  %10626 = vmatprep.mubr.bf16.mxu0 %v11019_v3 }
 0x284   : > { %9746 = vmatprep.subr.bf16.mxu1 %v10895_v17 }
 0x285   : > { %v9228_v15 = vpop.f32.mrb[116].mxu1  ;;  %v9328_v53 = vpop.f32.mrb[140].mxu0  ;;  %9747 = vmatpush3.bf16.msra.mxu1 %v10896_v36 }
 0x286   : > { %v9229_v52 = vpop.f32.mrb[117].mxu1  ;;  %v9329_v22 = vpop.f32.mrb[141].mxu0 }
 0x287   : > { %v9230_v20 = vadd.f32 %v9229_v52, %v9228_v15  ;;  %v9330_v34 = vadd.f32 %v9329_v22, %v9328_v53  ;;  %v9231_v5 = vpop.f32.mrb[118].mxu1  ;;  %v9331_v51 = vpop.f32.mrb[142].mxu0 }
 0x288   : > { %v9232_v39 = vpop.f32.mrb[119].mxu1  ;;  %v9332_v14 = vpop.f32.mrb[143].mxu0 }
 0x289   : > { %v2902_v46 = vadd.f32 %v9230_v20, %v11817_v41  ;;  %v11993_v63 = vadd.f32 %v9330_v34, %v2886_v62  ;;  %v9233_v48 = vadd.f32 %v9232_v39, %v9231_v5  ;;  %v9333_v43 = vadd.f32 %v9332_v14, %v9331_v51 }
 0x28a   : > { %3504 = vmatmul.mubr.bf16.gmra.mrb[224].mxu1 %v11434_v31  ;;  %10627 = vmatmul.mubr.bf16.gmra.mrb[248].mxu0 %v11019_v3  ;;  %v10875_v31 = vld [vmem:[%s11268_s28] sm:$0xff]  }
 0x28b   : > { %v2905_v18 = vadd.f32 %v9233_v48, %v11821_v4  ;;  %v12001_v0 = vadd.f32 %v9333_v43, %v2889_v23  ;;  %3511 = vmatprep.mubr.bf16.mxu1 %v11449_v54  ;;  %10630 = vmatprep.mubr.bf16.mxu0 %v11019_v3 }
 0x28d   : > { %v9234_v41 = vpop.f32.mrb[120].mxu1  ;;  %v9334_v62 = vpop.f32.mrb[144].mxu0 }
 0x28e   : > { %v9235_v32 = vpop.f32.mrb[121].mxu1  ;;  %v9335_v40 = vpop.f32.mrb[145].mxu0 }
 0x28f   : > { %v9236_v50 = vadd.f32 %v9235_v32, %v9234_v41  ;;  %v9336_v21 = vadd.f32 %v9335_v40, %v9334_v62  ;;  %v9237_v9 = vpop.f32.mrb[122].mxu1  ;;  %v9337_v8 = vpop.f32.mrb[146].mxu0  ;;  %v10898_v41 = vld [vmem:[%s13789_s7 + $0x28] sm:$0xff]  }
 0x290   : > { %v9238_v19 = vpop.f32.mrb[123].mxu1  ;;  %v9338_v56 = vpop.f32.mrb[147].mxu0 }
 0x291   : > { %v2910_v4 = vadd.f32 %v9236_v50, %v11825_v59  ;;  %v12007_v23 = vadd.f32 %v9336_v21, %v2894_v61  ;;  %v9239_v57 = vadd.f32 %v9238_v19, %v9237_v9  ;;  %v9339_v27 = vadd.f32 %v9338_v56, %v9337_v8  ;;  %v10897_v59 = vld [vmem:[%s13789_s7 + $0x68] sm:$0xff]   ;;  %v10878_v21 = vld [vmem:[%s11268_s28 + $0x18] sm:$0xff]   ;;  %v10879_v19 = vld [vmem:[%s11268_s28 + $0x20] sm:$0xff]  }
 0x292   : > { %3512 = vmatmul.mubr.bf16.gmra.mrb[228].mxu1 %v11451_v55  ;;  %10631 = vmatmul.mubr.bf16.gmra.mrb[252].mxu0 %v11019_v3  ;;  %v10876_v55 = vld [vmem:[%s11268_s28 + $0x8] sm:$0xff]  }
 0x293   : > { %v2913_v15 = vadd.f32 %v9239_v57, %v11830_v38  ;;  %v12012_v53 = vadd.f32 %v9339_v27, %v2897_v2  ;;  %3519 = vmatprep.mubr.bf16.mxu1 %v11019_v3  ;;  %10642 = vmatprep.mubr.msk.bf16.mxu0 %vm505_vm0, %v10875_v31  ;;  %v10877_v38 = vld [vmem:[%s11268_s28 + $0x10] sm:$0xff]  }
 0x294   : > { %9748 = vmatprep.subr.bf16.mxu1 %v10897_v59 }
 0x295   : > { %v9240_v17 = vpop.f32.mrb[124].mxu1  ;;  %v9340_v52 = vpop.f32.mrb[148].mxu0  ;;  %9749 = vmatpush3.bf16.msra.mxu1 %v10898_v41 }
 0x296   : > { %v9241_v61 = vpop.f32.mrb[125].mxu1  ;;  %v9341_v22 = vpop.f32.mrb[149].mxu0 }
 0x297   : > { %v9242_v20 = vadd.f32 %v9241_v61, %v9240_v17  ;;  %v9342_v34 = vadd.f32 %v9341_v22, %v9340_v52  ;;  %v9243_v5 = vpop.f32.mrb[126].mxu1  ;;  %v9343_v51 = vpop.f32.mrb[150].mxu0  ;;  %v10899_v22 = vld [vmem:[%s13789_s7 + $0x70] sm:$0xff]  }
 0x298   : > { %v9244_v2 = vpop.f32.mrb[127].mxu1  ;;  %v9344_v39 = vpop.f32.mrb[151].mxu0  ;;  %9750 = vmatprep.subr.bf16.mxu1 %v10899_v22  ;;  %v10907_v22 = vld [vmem:[%s13789_s7 + $0xd8] sm:$0xff]  }
 0x299   : > { %v2918_v14 = vadd.f32 %v9242_v20, %v11835_v42  ;;  %v12022_v48 = vadd.f32 %v9342_v34, %v2902_v46  ;;  %v9245_v43 = vadd.f32 %v9244_v2, %v9243_v5  ;;  %v9345_v36 = vadd.f32 %v9344_v39, %v9343_v51  ;;  %v10880_v20 = vld [vmem:[%s11268_s28 + $0x28] sm:$0xff]   ;;  %v10882_v2 = vld [vmem:[%s11268_s28 + $0x30] sm:$0xff]  }
 0x29a   : > { %3520 = vmatmul.mubr.bf16.gmra.mrb[232].mxu1 %v11449_v54  ;;  %10643 = vmatmul.mubr.msk.bf16.vlgmr.msra.gmra.mrb[0].mxu0 %vm505_vm0, %v10876_v55 }
 0x29b   : > { %v2921_v62 = vadd.f32 %v9245_v43, %v11840_v6  ;;  %v12030_v32 = vadd.f32 %v9345_v36, %v2905_v18  ;;  %3527 = vmatprep.mubr.bf16.mxu1 %v11019_v3  ;;  %10646 = vmatprep.mubr.msk.bf16.mxu0 %vm505_vm0, %v10877_v38  ;;  %v10903_v36 = vld [vmem:[%s13789_s7 + $0xc8] sm:$0xff]  }
 0x29d   : > { %v9346_v42 = vpop.f32.mrb[152].mxu0  ;;  %v9374_v46 = vpop.f32.mrb[128].mxu1 }
 0x29e   : > { %v9347_v40 = vpop.f32.mrb[153].mxu0  ;;  %v9375_v50 = vpop.f32.mrb[129].mxu1 }
 0x29f   : > { %v9348_v9 = vadd.f32 %v9347_v40, %v9346_v42  ;;  %v9376_v8 = vadd.f32 %v9375_v50, %v9374_v46  ;;  %v9349_v54 = vpop.f32.mrb[154].mxu0  ;;  %v9377_v31 = vpop.f32.mrb[130].mxu1  ;;  %v10901_v50 = vld [vmem:[%s13789_s7 + $0x30] sm:$0xff]  }
 0x2a0   : > { %v9350_v56 = vpop.f32.mrb[155].mxu0  ;;  %v9378_v57 = vpop.f32.mrb[131].mxu1  ;;  %9751 = vmatpush3.bf16.msra.mxu1 %v10901_v50 }
 0x2a1   : > { %v12036_v6 = vadd.f32 %v9348_v9, %v2910_v4  ;;  %v3120_v18 = vadd.f32 %v9376_v8, %v11846_v45  ;;  %v9351_v27 = vadd.f32 %v9350_v56, %v9349_v54  ;;  %v9379_v17 = vadd.f32 %v9378_v57, %v9377_v31  ;;  %v10900_v45 = vld [vmem:[%s13789_s7 + $0xc0] sm:$0xff]   ;;  %v10905_v9 = vld [vmem:[%s13789_s7 + $0xd0] sm:$0xff]  }
 0x2a2   : > { %3528 = vmatmul.mubr.bf16.gmra.mrb[236].mxu1 %v11019_v3  ;;  %10647 = vmatmul.mubr.msk.bf16.gmra.mrb[4].mxu0 %vm505_vm0, %v10878_v21  ;;  %v10904_v21 = vld [vmem:[%s13789_s7 + $0x88] sm:$0xff]  }
 0x2a3   : > { %v12041_v52 = vadd.f32 %v9351_v27, %v2913_v15  ;;  %v3123_v59 = vadd.f32 %v9379_v17, %v11851_v11  ;;  %3535 = vmatprep.mubr.bf16.mxu1 %v11019_v3  ;;  %10650 = vmatprep.mubr.msk.bf16.mxu0 %vm505_vm0, %v10879_v19  ;;  %v10902_v15 = vld [vmem:[%s13789_s7 + $0x80] sm:$0xff]   ;;  %v10884_v19 = vld [vmem:[%s11268_s28 + $0x38] sm:$0xff]  }
 0x2a4   : > { %9850 = vmatprep.subr.bf16.mxu0 %v10900_v45  ;;  %v10886_v45 = vld [vmem:[%s11268_s28 + $0x40] sm:$0xff]  }
 0x2a5   : > { %v9352_v4 = vpop.f32.mrb[156].mxu0  ;;  %v9380_v61 = vpop.f32.mrb[132].mxu1  ;;  %9851 = vmatpush3.bf16.msra.mxu0 %v10902_v15 }
 0x2a6   : > { %v9353_v11 = vpop.f32.mrb[157].mxu0  ;;  %v9381_v55 = vpop.f32.mrb[133].mxu1  ;;  %9852 = vmatprep.subr.bf16.mxu0 %v10903_v36 }
 0x2a7   : > { %v9354_v34 = vadd.f32 %v9353_v11, %v9352_v4  ;;  %v9382_v5 = vadd.f32 %v9381_v55, %v9380_v61  ;;  %v9355_v51 = vpop.f32.mrb[158].mxu0  ;;  %v9383_v38 = vpop.f32.mrb[134].mxu1 }
 0x2a8   : > { %v9356_v39 = vpop.f32.mrb[159].mxu0  ;;  %v9384_v43 = vpop.f32.mrb[135].mxu1 }
 0x2a9   : > { %v12060_v41 = vadd.f32 %v9354_v34, %v2918_v14  ;;  %v12063_v42 = vadd.f32 %v9382_v5, %v11856_v37  ;;  %v9357_v46 = vadd.f32 %v9356_v39, %v9355_v51  ;;  %v9385_v40 = vadd.f32 %v9384_v43, %v9383_v38  ;;  %9853 = vmatpush3.bf16.msra.mxu0 %v10904_v21  ;;  %v10908_v34 = vld [vmem:[%s13789_s7 + $0x98] sm:$0xff]   ;;  %v10888_v43 = vld [vmem:[%s11268_s28 + $0x48] sm:$0xff]   ;;  %v10891_v21 = vld [vmem:[%s11268_s28 + $0x50] sm:$0xff]  }
 0x2aa   : > { %3536 = vmatmul.mubr.bf16.gmra.mrb[240].mxu1 %v11019_v3  ;;  %10651 = vmatmul.mubr.msk.bf16.gmra.mrb[8].mxu0 %vm505_vm0, %v10880_v20 }
 0x2ab   : > { %v12073_v14 = vadd.f32 %v9357_v46, %v2921_v62  ;;  %v12076_v37 = vadd.f32 %v9385_v40, %v11861_v49  ;;  %3543 = vmatprep.mubr.bf16.mxu1 %v11019_v3  ;;  %10654 = vmatprep.mubr.msk.bf16.mxu0 %vm505_vm0, %v10882_v2  ;;  %v10906_v62 = vld [vmem:[%s13789_s7 + $0x90] sm:$0xff]  }
 0x2ac   : > { %9854 = vmatprep.subr.bf16.mxu0 %v10905_v9 }
 0x2ad   : > { %v9386_v8 = vpop.f32.mrb[136].mxu1  ;;  %v9486_v54 = vpop.f32.mrb[160].mxu0  ;;  %9855 = vmatpush3.bf16.msra.mxu0 %v10906_v62 }
 0x2ae   : > { %v9387_v49 = vpop.f32.mrb[137].mxu1  ;;  %v9487_v31 = vpop.f32.mrb[161].mxu0  ;;  %9856 = vmatprep.subr.bf16.mxu0 %v10907_v22 }
 0x2af   : > { %v9388_v56 = vadd.f32 %v9387_v49, %v9386_v8  ;;  %v9488_v57 = vadd.f32 %v9487_v31, %v9486_v54  ;;  %v9389_v27 = vpop.f32.mrb[138].mxu1  ;;  %v9489_v17 = vpop.f32.mrb[162].mxu0  ;;  %v10915_v54 = vld [vmem:[%s13789_s7 + $0xe8] sm:$0xff]  }
 0x2b0   : > { %v9390_v4 = vpop.f32.mrb[139].mxu1  ;;  %v9490_v61 = vpop.f32.mrb[163].mxu0 }
 0x2b1   : > { %v12092_v15 = vadd.f32 %v9388_v56, %v11866_v29  ;;  %v12094_v11 = vadd.f32 %v9488_v57, %v3120_v18  ;;  %v9391_v55 = vadd.f32 %v9390_v4, %v9389_v27  ;;  %v9491_v20 = vadd.f32 %v9490_v61, %v9489_v17  ;;  %v10912_v29 = vld [vmem:[%s13789_s7 + $0xe0] sm:$0xff]   ;;  %9857 = vmatpush3.bf16.msra.mxu0 %v10908_v34  ;;  %v10916_v56 = vld [vmem:[%s13789_s7 + $0xa8] sm:$0xff]   ;;  %v10892_v61 = vld [vmem:[%s11268_s28 + $0x58] sm:$0xff]  }
 0x2b2   : > { %3544 = vmatmul.mubr.bf16.gmra.mrb[244].mxu1 %v11019_v3  ;;  %10655 = vmatmul.mubr.msk.bf16.gmra.mrb[12].mxu0 %vm505_vm0, %v10884_v19 }
 0x2b3   : > { %v12102_v5 = vadd.f32 %v9391_v55, %v11871_v30  ;;  %v12104_v51 = vadd.f32 %v9491_v20, %v3123_v59  ;;  %3551 = vmatprep.mubr.bf16.mxu1 %v11019_v3  ;;  %10658 = vmatprep.mubr.msk.bf16.mxu0 %vm505_vm0, %v10886_v45  ;;  %v10911_v30 = vld [vmem:[%s13789_s7 + $0x78] sm:$0xff]   ;;  %v10914_v59 = vld [vmem:[%s13789_s7 + $0xa0] sm:$0xff]  }
 0x2b4   : > { %9858 = vmatprep.subr.bf16.mxu0 %v10912_v29  ;;  %9752 = vmatprep.subr.bf16.mxu1 %v10911_v30  ;;  %v10913_v45 = vld [vmem:[%s13789_s7 + $0x38] sm:$0xff]   ;;  %v10909_v29 = vld [vmem:[%s11268_s28 + $0x60] sm:$0xff]  }
 0x2b5   : > { %v9392_v18 = vpop.f32.mrb[140].mxu1  ;;  %v9492_v38 = vpop.f32.mrb[164].mxu0  ;;  %9859 = vmatpush3.bf16.msra.mxu0 %v10914_v59  ;;  %9753 = vmatpush3.bf16.msra.mxu1 %v10913_v45  ;;  %v10921_v30 = vld [vmem:[%s13789_s7 + $0xf8] sm:$0xff]  }
 0x2b6   : > { %v9393_v2 = vpop.f32.mrb[141].mxu1  ;;  %v9493_v39 = vpop.f32.mrb[165].mxu0  ;;  %9860 = vmatprep.subr.bf16.mxu0 %v10915_v54 }
 0x2b7   : > { %v9394_v36 = vadd.f32 %v9393_v2, %v9392_v18  ;;  %v9494_v46 = vadd.f32 %v9493_v39, %v9492_v38  ;;  %v9395_v40 = vpop.f32.mrb[142].mxu1  ;;  %v9495_v50 = vpop.f32.mrb[166].mxu0 }
 0x2b8   : > { %v9396_v9 = vpop.f32.mrb[143].mxu1  ;;  %v9496_v8 = vpop.f32.mrb[167].mxu0 }
 0x2b9   : > { %v3144_v62 = vadd.f32 %v9394_v36, %v11879_v24  ;;  %v12124_v49 = vadd.f32 %v9494_v46, %v12063_v42  ;;  %v9397_v31 = vadd.f32 %v9396_v9, %v9395_v40  ;;  %v9497_v19 = vadd.f32 %v9496_v8, %v9495_v50  ;;  %v10919_v24 = vld [vmem:[%s13789_s7 + $0xf0] sm:$0xff]   ;;  %9861 = vmatpush3.bf16.msra.mxu0 %v10916_v56  ;;  %v10922_v36 = vld [vmem:[%s13789_s7 + $0xb8] sm:$0xff]   ;;  %v10910_v9 = vld [vmem:[%s11268_s28 + $0x68] sm:$0xff]  }
 0x2ba   : > { %3552 = vmatmul.mubr.bf16.gmra.mrb[248].mxu1 %v11019_v3  ;;  %10659 = vmatmul.mubr.msk.bf16.gmra.mrb[16].mxu0 %vm505_vm0, %v10888_v43  ;;  %v10917_v56 = vld [vmem:[%s11268_s28 + $0x70] sm:$0xff]  }
 0x2bb   : > { %v3147_v57 = vadd.f32 %v9397_v31, %v11887_v12  ;;  %v12133_v27 = vadd.f32 %v9497_v19, %v12076_v37  ;;  %3559 = vmatprep.mubr.bf16.mxu1 %v11019_v3  ;;  %10662 = vmatprep.mubr.msk.bf16.mxu0 %vm505_vm0, %v10891_v21  ;;  %v10920_v12 = vld [vmem:[%s13789_s7 + $0xb0] sm:$0xff]  }
 0x2bc   : > { %9862 = vmatprep.subr.bf16.mxu0 %v10919_v24 }
 0x2bd   : > { %v9398_v42 = vpop.f32.mrb[144].mxu1  ;;  %v9498_v17 = vpop.f32.mrb[168].mxu0  ;;  %9863 = vmatpush3.bf16.msra.mxu0 %v10920_v12 }
 0x2be   : > { %v9399_v37 = vpop.f32.mrb[145].mxu1  ;;  %v9499_v4 = vpop.f32.mrb[169].mxu0  ;;  %9864 = vmatprep.subr.bf16.mxu0 %v10921_v30 }
 0x2bf   : > { %v9400_v22 = vadd.f32 %v9399_v37, %v9398_v42  ;;  %v9500_v55 = vadd.f32 %v9499_v4, %v9498_v17  ;;  %v9401_v20 = vpop.f32.mrb[146].mxu1  ;;  %v9501_v34 = vpop.f32.mrb[170].mxu0 }
 0x2c0   : > { %v9402_v18 = vpop.f32.mrb[147].mxu1  ;;  %v9502_v38 = vpop.f32.mrb[171].mxu0 }
 0x2c1   : > { %v3152_v59 = vadd.f32 %v9400_v22, %v11892_v60  ;;  %v12153_v2 = vadd.f32 %v9500_v55, %v12092_v15  ;;  %v9403_v39 = vadd.f32 %v9402_v18, %v9401_v20  ;;  %v9503_v43 = vadd.f32 %v9502_v38, %v9501_v34  ;;  %9865 = vmatpush3.bf16.msra.mxu0 %v10922_v36  ;;  %v10918_v20 = vld [vmem:[%s11268_s28 + $0x78] sm:$0xff]  }
 0x2c2   : > { %3560 = vmatmul.mubr.bf16.gmra.mrb[252].mxu1 %v11019_v3  ;;  %10663 = vmatmul.mubr.msk.bf16.gmra.mrb[20].mxu0 %vm505_vm0, %v10892_v61 }
 0x2c3   : > { %v3155_v46 = vadd.f32 %v9403_v39, %v11897_v35  ;;  %v12162_v60 = vadd.f32 %v9503_v43, %v12102_v5  ;;  %10666 = vmatprep.mubr.msk.bf16.mxu0 %vm505_vm0, %v10909_v29  ;;  %5886 = vmatprep.mubr.bf16.mxu1 %v11019_v3  ;;  %v10923_v35 = vld [vmem:[%s13789_s7 + $0x140] sm:$0xff]  }
 0x2c4   : > { %9962 = vmatprep.subr.bf16.mxu1 %v10923_v35 }
 0x2c5   : > { %v9404_v15 = vpop.f32.mrb[148].mxu1  ;;  %v9504_v40 = vpop.f32.mrb[172].mxu0 }
 0x2c6   : > { %v9405_v50 = vpop.f32.mrb[149].mxu1  ;;  %v9505_v21 = vpop.f32.mrb[173].mxu0 }
 0x2c7   : > { %v9406_v8 = vadd.f32 %v9405_v50, %v9404_v15  ;;  %v9506_v54 = vadd.f32 %v9505_v21, %v9504_v40  ;;  %v9407_v31 = vpop.f32.mrb[150].mxu1  ;;  %v9507_v19 = vpop.f32.mrb[174].mxu0 }
 0x2c8   : > { %v9408_v5 = vpop.f32.mrb[151].mxu1  ;;  %v9508_v24 = vpop.f32.mrb[175].mxu0 }
 0x2c9   : > { %v3160_v42 = vadd.f32 %v9406_v8, %v11908_v47  ;;  %v12172_v17 = vadd.f32 %v9506_v54, %v3144_v62  ;;  %v9409_v45 = vadd.f32 %v9408_v5, %v9407_v31  ;;  %v9509_v12 = vadd.f32 %v9508_v24, %v9507_v19  ;;  %v10924_v62 = vld [vmem:[%s13789_s7 + $0x100] sm:$0xff]   ;;  %v10925_v19 = vld [vmem:[%s13789_s7 + $0x148] sm:$0xff]  }
 0x2ca   : > { %10667 = vmatmul.mubr.msk.bf16.gmra.mrb[24].mxu0 %vm505_vm0, %v10910_v9  ;;  %5887 = vmatmul.mubr.bf16.vlgmr.msra.gmra.mrb[0].mxu1 %v11019_v3 }
 0x2cb   : > { %v3163_v37 = vadd.f32 %v9409_v45, %v11916_v58  ;;  %v12177_v4 = vadd.f32 %v9509_v12, %v3147_v57  ;;  %10670 = vmatprep.mubr.msk.bf16.mxu0 %vm505_vm0, %v10917_v56  ;;  %5894 = vmatprep.mubr.bf16.mxu1 %v11019_v3 }
 0x2cc   : > { %9963 = vmatpush3.bf16.msra.mxu1 %v10924_v62 }
 0x2cd   : > { %v9410_v61 = vpop.f32.mrb[152].mxu1  ;;  %v9510_v47 = vpop.f32.mrb[176].mxu0  ;;  %9964 = vmatprep.subr.bf16.mxu1 %v10925_v19 }
 0x2ce   : > { %v9411_v22 = vpop.f32.mrb[153].mxu1  ;;  %v9511_v55 = vpop.f32.mrb[177].mxu0 }
 0x2cf   : > { %v9412_v34 = vadd.f32 %v9411_v22, %v9410_v61  ;;  %v9512_v29 = vadd.f32 %v9511_v55, %v9510_v47  ;;  %v9413_v18 = vpop.f32.mrb[154].mxu1  ;;  %v9513_v38 = vpop.f32.mrb[178].mxu0 }
 0x2d0   : > { %v9414_v58 = vpop.f32.mrb[155].mxu1  ;;  %v9514_v57 = vpop.f32.mrb[179].mxu0 }
 0x2d1   : > { %v3168_v30 = vadd.f32 %v9412_v34, %v11925_v7  ;;  %v12186_v39 = vadd.f32 %v9512_v29, %v3152_v59  ;;  %v9415_v43 = vadd.f32 %v9414_v58, %v9413_v18  ;;  %v9515_v36 = vadd.f32 %v9514_v57, %v9513_v38 }
 0x2d2   : > { %10671 = vmatmul.mubr.msk.bf16.gmra.mrb[28].mxu0 %vm505_vm0, %v10918_v20  ;;  %5895 = vmatmul.mubr.bf16.gmra.mrb[4].mxu1 %v11019_v3 }
 0x2d3   : > { %v3171_v15 = vadd.f32 %v9415_v43, %v11933_v28  ;;  %v12191_v40 = vadd.f32 %v9515_v36, %v3155_v46  ;;  %6047 = vmatprep.mubr.bf16.mxu0 %v11019_v3  ;;  %5902 = vmatprep.mubr.bf16.mxu1 %v11019_v3 }
 0x2d5   : > { %v9416_v50 = vpop.f32.mrb[156].mxu1  ;;  %v9516_v21 = vpop.f32.mrb[180].mxu0 }
 0x2d6   : > { %v9417_v9 = vpop.f32.mrb[157].mxu1  ;;  %v9517_v7 = vpop.f32.mrb[181].mxu0 }
 0x2d7   : > { %v9418_v59 = vadd.f32 %v9417_v9, %v9416_v50  ;;  %v9518_v8 = vadd.f32 %v9517_v7, %v9516_v21  ;;  %v9419_v54 = vpop.f32.mrb[158].mxu1  ;;  %v9519_v31 = vpop.f32.mrb[182].mxu0 }
 0x2d8   : > { %v9420_v56 = vpop.f32.mrb[159].mxu1  ;;  %v9520_v28 = vpop.f32.mrb[183].mxu0 }
 0x2d9   : > { %v3176_v46 = vadd.f32 %v9418_v59, %v11941_v33  ;;  %v12199_v35 = vadd.f32 %v9518_v8, %v3160_v42  ;;  %v9421_v5 = vadd.f32 %v9420_v56, %v9419_v54  ;;  %v9521_v24 = vadd.f32 %v9520_v28, %v9519_v31  ;;  %v10926_v33 = vld [vmem:[%s13789_s7 + $0x108] sm:$0xff]   ;;  %v10927_v8 = vld [vmem:[%s13789_s7 + $0x150] sm:$0xff]  }
 0x2da   : > { %6048 = vmatmul.mubr.bf16.vlgmr.msra.gmra.mrb[32].mxu0 %v11019_v3  ;;  %5903 = vmatmul.mubr.bf16.gmra.mrb[8].mxu1 %v11019_v3 }
 0x2db   : > { %v3179_v45 = vadd.f32 %v9421_v5, %v11949_v16  ;;  %v12204_v12 = vadd.f32 %v9521_v24, %v3163_v37  ;;  %6055 = vmatprep.mubr.bf16.mxu0 %v11019_v3  ;;  %5910 = vmatprep.mubr.bf16.mxu1 %v11019_v3 }
 0x2dc   : > { %9965 = vmatpush3.bf16.msra.mxu1 %v10926_v33 }
 0x2dd   : > { %v9422_v61 = vpop.f32.mrb[160].mxu1  ;;  %v9522_v47 = vpop.f32.mrb[184].mxu0  ;;  %9966 = vmatprep.subr.bf16.mxu1 %v10927_v8 }
 0x2de   : > { %v9423_v42 = vpop.f32.mrb[161].mxu1  ;;  %v9523_v62 = vpop.f32.mrb[185].mxu0 }
 0x2df   : > { %v9424_v22 = vadd.f32 %v9423_v42, %v9422_v61  ;;  %v9524_v55 = vadd.f32 %v9523_v62, %v9522_v47  ;;  %v9425_v20 = vpop.f32.mrb[162].mxu1  ;;  %v9525_v34 = vpop.f32.mrb[186].mxu0 }
 0x2e0   : > { %v9426_v16 = vpop.f32.mrb[163].mxu1  ;;  %v9526_v37 = vpop.f32.mrb[187].mxu0 }
 0x2e1   : > { %v3184_v29 = vadd.f32 %v9424_v22, %v11954_v44  ;;  %v12212_v18 = vadd.f32 %v9524_v55, %v3168_v30  ;;  %v9427_v38 = vadd.f32 %v9426_v16, %v9425_v20  ;;  %v9527_v58 = vadd.f32 %v9526_v37, %v9525_v34 }
 0x2e2   : > { %6056 = vmatmul.mubr.bf16.gmra.mrb[36].mxu0 %v11019_v3  ;;  %5911 = vmatmul.mubr.bf16.gmra.mrb[12].mxu1 %v11019_v3 }
 0x2e3   : > { %v3187_v57 = vadd.f32 %v9427_v38, %v11959_v10  ;;  %v12217_v43 = vadd.f32 %v9527_v58, %v3171_v15  ;;  %6063 = vmatprep.mubr.bf16.mxu0 %v11019_v3  ;;  %5918 = vmatprep.mubr.bf16.mxu1 %v11019_v3 }
 0x2e5   : > { %v9428_v36 = vpop.f32.mrb[164].mxu1  ;;  %v9528_v50 = vpop.f32.mrb[188].mxu0 }
 0x2e6   : > { %v9429_v21 = vpop.f32.mrb[165].mxu1  ;;  %v9529_v44 = vpop.f32.mrb[189].mxu0 }
 0x2e7   : > { %v9430_v30 = vadd.f32 %v9429_v21, %v9428_v36  ;;  %v9530_v9 = vadd.f32 %v9529_v44, %v9528_v50  ;;  %v9431_v7 = vpop.f32.mrb[166].mxu1  ;;  %v9531_v59 = vpop.f32.mrb[190].mxu0 }
 0x2e8   : > { %v9432_v54 = vpop.f32.mrb[167].mxu1  ;;  %v9532_v10 = vpop.f32.mrb[191].mxu0 }
 0x2e9   : > { %v3192_v15 = vadd.f32 %v9430_v30, %v11967_v26  ;;  %v12225_v31 = vadd.f32 %v9530_v9, %v3176_v46  ;;  %v9433_v19 = vadd.f32 %v9432_v54, %v9431_v7  ;;  %v9533_v56 = vadd.f32 %v9532_v10, %v9531_v59  ;;  %v10928_v26 = vld [vmem:[%s13789_s7 + $0x110] sm:$0xff]  }
 0x2ea   : > { %6064 = vmatmul.mubr.bf16.gmra.mrb[40].mxu0 %v11019_v3  ;;  %5919 = vmatmul.mubr.bf16.gmra.mrb[16].mxu1 %v11019_v3 }
 0x2eb   : > { %v3195_v28 = vadd.f32 %v9433_v19, %v11975_v25  ;;  %v12230_v5 = vadd.f32 %v9533_v56, %v3179_v45  ;;  %6071 = vmatprep.mubr.bf16.mxu0 %v11019_v3  ;;  %5926 = vmatprep.mubr.bf16.mxu1 %v11019_v3 }
 0x2ec   : > { %9967 = vmatpush3.bf16.msra.mxu1 %v10928_v26 }
 0x2ed   : > { %v9434_v24 = vpop.f32.mrb[168].mxu1  ;;  %v9534_v61 = vpop.f32.mrb[192].mxu0 }
 0x2ee   : > { %v9435_v46 = vpop.f32.mrb[169].mxu1  ;;  %v9535_v47 = vpop.f32.mrb[193].mxu0 }
 0x2ef   : > { %v9436_v33 = vadd.f32 %v9435_v46, %v9434_v24  ;;  %v9536_v42 = vadd.f32 %v9535_v47, %v9534_v61  ;;  %v9437_v62 = vpop.f32.mrb[170].mxu1  ;;  %v9537_v22 = vpop.f32.mrb[194].mxu0  ;;  %v10930_v61 = vld [vmem:[%s13789_s7 + $0x118] sm:$0xff]  }
 0x2f0   : > { %v9438_v25 = vpop.f32.mrb[171].mxu1  ;;  %v9538_v45 = vpop.f32.mrb[195].mxu0 }
 0x2f1   : > { %v3200_v55 = vadd.f32 %v9436_v33, %v11980_v13  ;;  %v12238_v20 = vadd.f32 %v9536_v42, %v3184_v29  ;;  %v9439_v34 = vadd.f32 %v9438_v25, %v9437_v62  ;;  %v9539_v16 = vadd.f32 %v9538_v45, %v9537_v22  ;;  %v10929_v29 = vld [vmem:[%s13789_s7 + $0x158] sm:$0xff]  }
 0x2f2   : > { %6072 = vmatmul.mubr.bf16.gmra.mrb[44].mxu0 %v11019_v3  ;;  %5927 = vmatmul.mubr.bf16.gmra.mrb[20].mxu1 %v11019_v3 }
 0x2f3   : > { %v3203_v37 = vadd.f32 %v9439_v34, %v11985_v1  ;;  %v12243_v38 = vadd.f32 %v9539_v16, %v3187_v57  ;;  %9968 = vmatprep.subr.bf16.mxu1 %v10929_v29 }
 0x2f4   : > { %9969 = vmatpush3.bf16.msra.mxu1 %v10930_v61 }
 0x2f5   : > { %v9440_v58 = vpop.f32.mrb[172].mxu1  ;;  %v9540_v36 = vpop.f32.mrb[196].mxu0 }
 0x2f6   : > { %v9441_v50 = vpop.f32.mrb[173].mxu1  ;;  %v9541_v21 = vpop.f32.mrb[197].mxu0 }
 0x2f7   : > { %v9442_v44 = vadd.f32 %v9441_v50, %v9440_v58  ;;  %v9542_v30 = vadd.f32 %v9541_v21, %v9540_v36  ;;  %v9443_v9 = vpop.f32.mrb[174].mxu1  ;;  %v9543_v13 = vpop.f32.mrb[198].mxu0 }
 0x2f8   : > { %v9444_v7 = vpop.f32.mrb[175].mxu1  ;;  %v9544_v59 = vpop.f32.mrb[199].mxu0 }
 0x2f9   : > { %v3208_v8 = vadd.f32 %v9442_v44, %v11993_v63  ;;  %v12249_v54 = vadd.f32 %v9542_v30, %v3192_v15  ;;  %v9445_v1 = vadd.f32 %v9444_v7, %v9443_v9  ;;  %v9545_v57 = vadd.f32 %v9544_v59, %v9543_v13 }
 0x2fb   : > { %v3211_v10 = vadd.f32 %v9445_v1, %v12001_v0  ;;  %v12252_v19 = vadd.f32 %v9545_v57, %v3195_v28 }
 0x2fd   : > { %v9446_v56 = vpop.f32.mrb[176].mxu1  ;;  %v9546_v24 = vpop.f32.mrb[200].mxu0 }
 0x2fe   : > { %v9447_v26 = vpop.f32.mrb[177].mxu1  ;;  %v9547_v46 = vpop.f32.mrb[201].mxu0 }
 0x2ff   : > { %v9448_v47 = vadd.f32 %v9447_v26, %v9446_v56  ;;  %v9548_v33 = vadd.f32 %v9547_v46, %v9546_v24  ;;  %v9449_v63 = vpop.f32.mrb[178].mxu1  ;;  %v9549_v15 = vpop.f32.mrb[202].mxu0  ;;  %v10932_v24 = vld [vmem:[%s13789_s7 + $0x120] sm:$0xff]  }
 0x300   : > { %v9450_v42 = vpop.f32.mrb[179].mxu1  ;;  %v9550_v62 = vpop.f32.mrb[203].mxu0 }
 0x301   : > { %v3216_v22 = vadd.f32 %v9448_v47, %v12007_v23  ;;  %v12258_v0 = vadd.f32 %v9548_v33, %v3200_v55  ;;  %v9451_v28 = vadd.f32 %v9450_v42, %v9449_v63  ;;  %v9551_v25 = vadd.f32 %v9550_v62, %v9549_v15  ;;  %v10931_v23 = vld [vmem:[%s13789_s7 + $0x160] sm:$0xff]  }
 0x302   : > { %9970 = vmatprep.subr.bf16.mxu1 %v10931_v23  ;;  %v10933_v33 = vld [vmem:[%s13789_s7 + $0x1c0] sm:$0xff]  }
 0x303   : > { %v3219_v45 = vadd.f32 %v9451_v28, %v12012_v53  ;;  %v12261_v34 = vadd.f32 %v9551_v25, %v3203_v37  ;;  %9971 = vmatpush3.bf16.msra.mxu1 %v10932_v24  ;;  %10074 = vmatprep.subr.bf16.mxu0 %v10933_v33 }
 0x305   : > { %v9452_v16 = vpop.f32.mrb[180].mxu1  ;;  %v9552_v58 = vpop.f32.mrb[204].mxu0 }
 0x306   : > { %v9453_v36 = vpop.f32.mrb[181].mxu1  ;;  %v9553_v50 = vpop.f32.mrb[205].mxu0 }
 0x307   : > { %v9454_v21 = vadd.f32 %v9453_v36, %v9452_v16  ;;  %v9554_v44 = vadd.f32 %v9553_v50, %v9552_v58  ;;  %v9455_v30 = vpop.f32.mrb[182].mxu1  ;;  %v9555_v9 = vpop.f32.mrb[206].mxu0 }
 0x308   : > { %v9456_v55 = vpop.f32.mrb[183].mxu1  ;;  %v9556_v13 = vpop.f32.mrb[207].mxu0 }
 0x309   : > { %v3224_v29 = vadd.f32 %v9454_v21, %v12022_v48  ;;  %v12267_v7 = vadd.f32 %v9554_v44, %v3208_v8  ;;  %v9457_v53 = vadd.f32 %v9456_v55, %v9455_v30  ;;  %v9557_v37 = vadd.f32 %v9556_v13, %v9555_v9 }
 0x30b   : > { %v3227_v59 = vadd.f32 %v9457_v53, %v12030_v32  ;;  %v12270_v1 = vadd.f32 %v9557_v37, %v3211_v10  ;;  %v10934_v32 = vld [vmem:[%s13789_s7 + $0x180] sm:$0xff]  }
 0x30c   : > { %10075 = vmatpush3.bf16.msra.mxu0 %v10934_v32 }
 0x30d   : > { %v9458_v57 = vpop.f32.mrb[184].mxu1  ;;  %v9558_v56 = vpop.f32.mrb[208].mxu0 }
 0x30e   : > { %v9459_v61 = vpop.f32.mrb[185].mxu1  ;;  %v9559_v26 = vpop.f32.mrb[209].mxu0 }
 0x30f   : > { %v9460_v46 = vadd.f32 %v9459_v61, %v9458_v57  ;;  %v9560_v47 = vadd.f32 %v9559_v26, %v9558_v56  ;;  %v9461_v48 = vpop.f32.mrb[186].mxu1  ;;  %v9561_v8 = vpop.f32.mrb[210].mxu0  ;;  %v10936_v61 = vld [vmem:[%s13789_s7 + $0x128] sm:$0xff]  }
 0x310   : > { %v9462_v10 = vpop.f32.mrb[187].mxu1  ;;  %v9562_v63 = vpop.f32.mrb[211].mxu0 }
 0x311   : > { %v3232_v15 = vadd.f32 %v9460_v46, %v12036_v6  ;;  %v12282_v42 = vadd.f32 %v9560_v47, %v3216_v22  ;;  %v9463_v62 = vadd.f32 %v9462_v10, %v9461_v48  ;;  %v9563_v28 = vadd.f32 %v9562_v63, %v9561_v8  ;;  %v10935_v6 = vld [vmem:[%s13789_s7 + $0x168] sm:$0xff]  }
 0x312   : > { %9972 = vmatprep.subr.bf16.mxu1 %v10935_v6  ;;  %v10937_v8 = vld [vmem:[%s13789_s7 + $0x1c8] sm:$0xff]  }
 0x313   : > { %v3235_v25 = vadd.f32 %v9463_v62, %v12041_v52  ;;  %v12285_v16 = vadd.f32 %v9563_v28, %v3219_v45  ;;  %9973 = vmatpush3.bf16.msra.mxu1 %v10936_v61  ;;  %10076 = vmatprep.subr.bf16.mxu0 %v10937_v8 }
 0x315   : > { %v9464_v58 = vpop.f32.mrb[188].mxu1  ;;  %v9564_v36 = vpop.f32.mrb[212].mxu0 }
 0x316   : > { %v9465_v50 = vpop.f32.mrb[189].mxu1  ;;  %v9565_v21 = vpop.f32.mrb[213].mxu0 }
 0x317   : > { %v9466_v44 = vadd.f32 %v9465_v50, %v9464_v58  ;;  %v9566_v30 = vadd.f32 %v9565_v21, %v9564_v36  ;;  %v9467_v9 = vpop.f32.mrb[190].mxu1  ;;  %v9567_v23 = vpop.f32.mrb[214].mxu0 }
 0x318   : > { %v9468_v22 = vpop.f32.mrb[191].mxu1  ;;  %v9568_v55 = vpop.f32.mrb[215].mxu0 }
 0x319   : > { %v3240_v13 = vadd.f32 %v9466_v44, %v12060_v41  ;;  %v12291_v53 = vadd.f32 %v9566_v30, %v3224_v29  ;;  %v9469_v52 = vadd.f32 %v9468_v22, %v9467_v9  ;;  %v9569_v45 = vadd.f32 %v9568_v55, %v9567_v23 }
 0x31b   : > { %v3243_v37 = vadd.f32 %v9469_v52, %v12073_v14  ;;  %v12294_v57 = vadd.f32 %v9569_v45, %v3227_v59  ;;  %v10938_v14 = vld [vmem:[%s13789_s7 + $0x188] sm:$0xff]   ;;  %v10939_v59 = vld [vmem:[%s13789_s7 + $0x170] sm:$0xff]  }
 0x31c   : > { %10077 = vmatpush3.bf16.msra.mxu0 %v10938_v14  ;;  %9974 = vmatprep.subr.bf16.mxu1 %v10939_v59 }
 0x31d   : > { %v9570_v56 = vpop.f32.mrb[216].mxu0  ;;  %v9598_v24 = vpop.f32.mrb[192].mxu1 }
 0x31e   : > { %v9571_v26 = vpop.f32.mrb[217].mxu0  ;;  %v9599_v46 = vpop.f32.mrb[193].mxu1 }
 0x31f   : > { %v9572_v47 = vadd.f32 %v9571_v26, %v9570_v56  ;;  %v9600_v48 = vadd.f32 %v9599_v46, %v9598_v24  ;;  %v9573_v41 = vpop.f32.mrb[218].mxu0  ;;  %v9601_v29 = vpop.f32.mrb[194].mxu1 }
 0x320   : > { %v9574_v33 = vpop.f32.mrb[219].mxu0  ;;  %v9602_v32 = vpop.f32.mrb[195].mxu1 }
 0x321   : > { %v12308_v10 = vadd.f32 %v9572_v47, %v3232_v15  ;;  %v9575_v63 = vadd.f32 %v9574_v33, %v9573_v41  ;;  %v9603_v62 = vadd.f32 %v9602_v32, %v9601_v29  ;;  %v3442_v28 = vadd.f32 %v9600_v48, %v12094_v11  ;;  %v10940_v15 = vld [vmem:[%s13789_s7 + $0x130] sm:$0xff]   ;;  %v10943_v33 = vld [vmem:[%s13789_s7 + $0x178] sm:$0xff]  }
 0x322   : > { %v10941_v11 = vld [vmem:[%s13789_s7 + $0x1d0] sm:$0xff]   ;;  %9975 = vmatpush3.bf16.msra.mxu1 %v10940_v15  ;;  %v10944_v15 = vld [vmem:[%s13789_s7 + $0x138] sm:$0xff]  }
 0x323   : > { %v12311_v58 = vadd.f32 %v9575_v63, %v3235_v25  ;;  %v3445_v36 = vadd.f32 %v9603_v62, %v12104_v51  ;;  %v10942_v51 = vld [vmem:[%s13789_s7 + $0x190] sm:$0xff]   ;;  %10078 = vmatprep.subr.bf16.mxu0 %v10941_v11  ;;  %9976 = vmatprep.subr.bf16.mxu1 %v10943_v33 }
 0x324   : > { %10079 = vmatpush3.bf16.msra.mxu0 %v10942_v51 }
 0x325   : > { %v9576_v50 = vpop.f32.mrb[220].mxu0  ;;  %v9604_v21 = vpop.f32.mrb[196].mxu1 }
 0x326   : > { %v9577_v44 = vpop.f32.mrb[221].mxu0  ;;  %v9605_v30 = vpop.f32.mrb[197].mxu1  ;;  %9977 = vmatpush3.bf16.msra.mxu1 %v10944_v15 }
 0x327   : > { %v9578_v9 = vadd.f32 %v9577_v44, %v9576_v50  ;;  %v9606_v23 = vadd.f32 %v9605_v30, %v9604_v21  ;;  %v9579_v6 = vpop.f32.mrb[222].mxu0  ;;  %v9607_v22 = vpop.f32.mrb[198].mxu1 }
 0x328   : > { %v9580_v25 = vpop.f32.mrb[223].mxu0  ;;  %v9608_v55 = vpop.f32.mrb[199].mxu1 }
 0x329   : > { %v12323_v52 = vadd.f32 %v9578_v9, %v3240_v13  ;;  %v9581_v45 = vadd.f32 %v9580_v25, %v9579_v6  ;;  %v9609_v56 = vadd.f32 %v9608_v55, %v9607_v22  ;;  %v3450_v24 = vadd.f32 %v9606_v23, %v12124_v49 }
 0x32b   : > { %v12326_v61 = vadd.f32 %v9581_v45, %v3243_v37  ;;  %v3453_v26 = vadd.f32 %v9609_v56, %v12133_v27 }
 0x32d   : > { %v9610_v46 = vpop.f32.mrb[200].mxu1  ;;  %v10604_v47 = vpop.f32.mrb[224].mxu0 }
 0x32e   : > { %v3611_v48 = vadd.f32 %v10604_v47, %v3450_v24  ;;  %v9611_v41 = vpop.f32.mrb[201].mxu1  ;;  %v3602_v29 = vpop.f32.mrb[225].mxu0 }
 0x32f   : > { %v9612_v8 = vadd.f32 %v9611_v41, %v9610_v46  ;;  %v3603_v14 = vadd.f32 %v3602_v29, %v3442_v28  ;;  %v9613_v59 = vpop.f32.mrb[202].mxu1  ;;  %v10605_v13 = vpop.f32.mrb[226].mxu0 }
 0x330   : > { %3731 = vst [vmem:[#allocation4 + $0x10] sm:$0xff] %v3611_v48  ;;  %v3614_v49 = vadd.f32 %v10605_v13, %v3453_v26  ;;  %v9614_v32 = vpop.f32.mrb[203].mxu1  ;;  %v3605_v37 = vpop.f32.mrb[227].mxu0 }
 0x331   : > { %3729 = vst [vmem:[#allocation4] sm:$0xff] %v3603_v14  ;;  %v9615_v63 = vadd.f32 %v9614_v32, %v9613_v59  ;;  %v3606_v27 = vadd.f32 %v3605_v37, %v3445_v36  ;;  %v3458_v62 = vadd.f32 %v9612_v8, %v12153_v2  ;;  %v10945_v2 = vld [vmem:[%s13789_s7 + $0x1d8] sm:$0xff]  }
 0x332   : > { %3732 = vst [vmem:[#allocation4 + $0x18] sm:$0xff] %v3614_v49  ;;  %10080 = vmatprep.subr.bf16.mxu0 %v10945_v2 }
 0x333   : > { %3730 = vst [vmem:[#allocation4 + $0x8] sm:$0xff] %v3606_v27  ;;  %v3461_v28 = vadd.f32 %v9615_v63, %v12162_v60  ;;  %v10946_v60 = vld [vmem:[%s13789_s7 + $0x198] sm:$0xff]   ;;  %v10948_v27 = vld [vmem:[%s13789_s7 + $0x1e0] sm:$0xff]  }
 0x334   : > { %10081 = vmatpush3.bf16.msra.mxu0 %v10946_v60 }
 0x335   : > { %v9616_v50 = vpop.f32.mrb[204].mxu1  ;;  %v10608_v21 = vpop.f32.mrb[228].mxu0  ;;  %10082 = vmatprep.subr.bf16.mxu0 %v10948_v27 }
 0x336   : > { %v9617_v44 = vpop.f32.mrb[205].mxu1  ;;  %v3618_v30 = vpop.f32.mrb[229].mxu0 }
 0x337   : > { %v9618_v9 = vadd.f32 %v9617_v44, %v9616_v50  ;;  %v3619_v23 = vadd.f32 %v3618_v30, %v3458_v62  ;;  %v9619_v6 = vpop.f32.mrb[206].mxu1  ;;  %v10609_v22 = vpop.f32.mrb[230].mxu0  ;;  %v10950_v50 = vld [vmem:[%s13789_s7 + $0x1a0] sm:$0xff]  }
 0x338   : > { %v9620_v36 = vpop.f32.mrb[207].mxu1  ;;  %v3621_v11 = vpop.f32.mrb[231].mxu0  ;;  %10083 = vmatpush3.bf16.msra.mxu0 %v10950_v50 }
 0x339   : > { %v3466_v51 = vadd.f32 %v9618_v9, %v12172_v17  ;;  %3733 = vst [vmem:[#allocation4 + $0x20] sm:$0xff] %v3619_v23  ;;  %v9621_v25 = vadd.f32 %v9620_v36, %v9619_v6  ;;  %v3622_v55 = vadd.f32 %v3621_v11, %v3461_v28  ;;  %v10947_v17 = vld [vmem:[%s13789_s7 + $0x240] sm:$0xff]   ;;  %v10952_v9 = vld [vmem:[%s13789_s7 + $0x1a8] sm:$0xff]  }
 0x33a   : > { %10186 = vmatprep.subr.bf16.mxu1 %v10947_v17 }
 0x33b   : > { %v3627_v45 = vadd.f32 %v10608_v21, %v3466_v51  ;;  %v3469_v56 = vadd.f32 %v9621_v25, %v12177_v4  ;;  %3734 = vst [vmem:[#allocation4 + $0x28] sm:$0xff] %v3622_v55  ;;  %v10953_v51 = vld [vmem:[%s13789_s7 + $0x1f0] sm:$0xff]  }
 0x33d   : > { %3735 = vst [vmem:[#allocation4 + $0x30] sm:$0xff] %v3627_v45  ;;  %v3630_v24 = vadd.f32 %v10609_v22, %v3469_v56  ;;  %v9622_v26 = vpop.f32.mrb[208].mxu1  ;;  %v10612_v46 = vpop.f32.mrb[232].mxu0 }
 0x33e   : > { %v9623_v47 = vpop.f32.mrb[209].mxu1  ;;  %v3634_v48 = vpop.f32.mrb[233].mxu0 }
 0x33f   : > { %3736 = vst [vmem:[#allocation4 + $0x38] sm:$0xff] %v3630_v24  ;;  %v9624_v41 = vadd.f32 %v9623_v47, %v9622_v26  ;;  %v9625_v29 = vpop.f32.mrb[210].mxu1  ;;  %v10613_v8 = vpop.f32.mrb[234].mxu0  ;;  %v10955_v24 = vld [vmem:[%s13789_s7 + $0x1f8] sm:$0xff]  }
 0x340   : > { %v9626_v14 = vpop.f32.mrb[211].mxu1  ;;  %v3637_v59 = vpop.f32.mrb[235].mxu0  ;;  %v10956_v47 = vld [vmem:[%s13789_s7 + $0x1b8] sm:$0xff]  }
 0x341   : > { %v3474_v13 = vadd.f32 %v9624_v41, %v12186_v39  ;;  %v9627_v4 = vadd.f32 %v9626_v14, %v9625_v29 }
 0x343   : > { %v3635_v33 = vadd.f32 %v3634_v48, %v3474_v13  ;;  %v3477_v49 = vadd.f32 %v9627_v4, %v12191_v40  ;;  %v10951_v40 = vld [vmem:[%s13789_s7 + $0x1e8] sm:$0xff]  }
 0x344   : > { %10084 = vmatprep.subr.bf16.mxu0 %v10951_v40 }
 0x345   : > { %3737 = vst [vmem:[#allocation4 + $0x40] sm:$0xff] %v3635_v33  ;;  %v3638_v32 = vadd.f32 %v3637_v59, %v3477_v49  ;;  %v9628_v37 = vpop.f32.mrb[212].mxu1  ;;  %v10616_v63 = vpop.f32.mrb[236].mxu0  ;;  %10085 = vmatpush3.bf16.msra.mxu0 %v10952_v9 }
 0x346   : > { %v9629_v62 = vpop.f32.mrb[213].mxu1  ;;  %v3650_v28 = vpop.f32.mrb[237].mxu0  ;;  %10086 = vmatprep.subr.bf16.mxu0 %v10953_v51 }
 0x347   : > { %3738 = vst [vmem:[#allocation4 + $0x48] sm:$0xff] %v3638_v32  ;;  %v9630_v39 = vadd.f32 %v9629_v62, %v9628_v37  ;;  %v9631_v21 = vpop.f32.mrb[214].mxu1  ;;  %v10617_v44 = vpop.f32.mrb[238].mxu0 }
 0x348   : > { %v9632_v30 = vpop.f32.mrb[215].mxu1  ;;  %v3653_v15 = vpop.f32.mrb[239].mxu0 }
 0x349   : > { %v3482_v23 = vadd.f32 %v9630_v39, %v12199_v35  ;;  %v9633_v6 = vadd.f32 %v9632_v30, %v9631_v21  ;;  %v10954_v35 = vld [vmem:[%s13789_s7 + $0x1b0] sm:$0xff]  }
 0x34a   : > { %10087 = vmatpush3.bf16.msra.mxu0 %v10954_v35 }
 0x34b   : > { %v3643_v22 = vadd.f32 %v10612_v46, %v3482_v23  ;;  %v3485_v2 = vadd.f32 %v9633_v6, %v12204_v12  ;;  %10088 = vmatprep.subr.bf16.mxu0 %v10955_v24 }
 0x34d   : > { %3739 = vst [vmem:[#allocation4 + $0x50] sm:$0xff] %v3643_v22  ;;  %v3646_v60 = vadd.f32 %v10613_v8, %v3485_v2  ;;  %v9634_v36 = vpop.f32.mrb[216].mxu1  ;;  %v12364_v11 = vpop.f32.mrb[240].mxu0 }
 0x34e   : > { %v9635_v25 = vpop.f32.mrb[217].mxu1  ;;  %v3666_v55 = vpop.f32.mrb[241].mxu0  ;;  %10089 = vmatpush3.bf16.msra.mxu0 %v10956_v47 }
 0x34f   : > { %3740 = vst [vmem:[#allocation4 + $0x58] sm:$0xff] %v3646_v60  ;;  %v9636_v45 = vadd.f32 %v9635_v25, %v9634_v36  ;;  %v9637_v56 = vpop.f32.mrb[218].mxu1  ;;  %v10621_v12 = vpop.f32.mrb[242].mxu0 }
 0x350   : > { %v9638_v26 = vpop.f32.mrb[219].mxu1  ;;  %v3669_v46 = vpop.f32.mrb[243].mxu0 }
 0x351   : > { %v3490_v48 = vadd.f32 %v9636_v45, %v12212_v18  ;;  %v9639_v41 = vadd.f32 %v9638_v26, %v9637_v56 }
 0x353   : > { %v3651_v29 = vadd.f32 %v3650_v28, %v3490_v48  ;;  %v3493_v8 = vadd.f32 %v9639_v41, %v12217_v43 }
 0x355   : > { %3741 = vst [vmem:[#allocation4 + $0x60] sm:$0xff] %v3651_v29  ;;  %v3654_v17 = vadd.f32 %v3653_v15, %v3493_v8  ;;  %v9640_v14 = vpop.f32.mrb[220].mxu1  ;;  %v12380_v59 = vpop.f32.mrb[244].mxu0  ;;  %v12412_v29 = vld [vmem:[%s13787_s5] ss:$0 sm:$0xff] }
 0x356   : > { %v9641_v13 = vpop.f32.mrb[221].mxu1  ;;  %v12382_v4 = vpop.f32.mrb[245].mxu0 }
 0x357   : > { %3742 = vst [vmem:[#allocation4 + $0x68] sm:$0xff] %v3654_v17  ;;  %v9642_v33 = vadd.f32 %v9641_v13, %v9640_v14  ;;  %v9643_v49 = vpop.f32.mrb[222].mxu1  ;;  %v12384_v32 = vpop.f32.mrb[246].mxu0 }
 0x358   : > { %v9644_v18 = vpop.f32.mrb[223].mxu1  ;;  %v3685_v37 = vpop.f32.mrb[247].mxu0 }
 0x359   : > { %v3498_v27 = vadd.f32 %v9642_v33, %v12225_v31  ;;  %v9645_v62 = vadd.f32 %v9644_v18, %v9643_v49 }
 0x35b   : > { %v3659_v43 = vadd.f32 %v10616_v63, %v3498_v27  ;;  %v3501_v28 = vadd.f32 %v9645_v62, %v12230_v5 }
 0x35d   : > { %3743 = vst [vmem:[#allocation4 + $0x70] sm:$0xff] %v3659_v43  ;;  %v3662_v50 = vadd.f32 %v10617_v44, %v3501_v28  ;;  %v9646_v39 = vpop.f32.mrb[224].mxu1  ;;  %v12388_v21 = vpop.f32.mrb[248].mxu0 }
 0x35e   : > { %v9647_v40 = vpop.f32.mrb[225].mxu1  ;;  %v12390_v30 = vpop.f32.mrb[249].mxu0 }
 0x35f   : > { %3744 = vst [vmem:[#allocation4 + $0x78] sm:$0xff] %v3662_v50  ;;  %v9648_v15 = vadd.f32 %v9647_v40, %v9646_v39  ;;  %v9649_v9 = vpop.f32.mrb[226].mxu1  ;;  %v12392_v23 = vpop.f32.mrb[250].mxu0 }
 0x360   : > { %v9650_v6 = vpop.f32.mrb[227].mxu1  ;;  %v12394_v22 = vpop.f32.mrb[251].mxu0 }
 0x361   : > { %v3506_v31 = vadd.f32 %v9648_v15, %v12238_v20  ;;  %v9651_v63 = vadd.f32 %v9650_v6, %v9649_v9 }
 0x363   : > { %v3667_v5 = vadd.f32 %v3666_v55, %v3506_v31  ;;  %v3509_v44 = vadd.f32 %v9651_v63, %v12243_v38 }
 0x365   : > { %3745 = vst [vmem:[#allocation4 + $0x80] sm:$0xff] %v3667_v5  ;;  %v3670_v2 = vadd.f32 %v3669_v46, %v3509_v44  ;;  %v9652_v60 = vpop.f32.mrb[228].mxu1  ;;  %v12398_v36 = vpop.f32.mrb[252].mxu0 }
 0x366   : > { %v9653_v51 = vpop.f32.mrb[229].mxu1  ;;  %v12400_v25 = vpop.f32.mrb[253].mxu0 }
 0x367   : > { %3746 = vst [vmem:[#allocation4 + $0x88] sm:$0xff] %v3670_v2  ;;  %v9654_v35 = vadd.f32 %v9653_v51, %v9652_v60  ;;  %v9655_v45 = vpop.f32.mrb[230].mxu1  ;;  %v12402_v56 = vpop.f32.mrb[254].mxu0 }
 0x368   : > { %v9656_v24 = vpop.f32.mrb[231].mxu1  ;;  %v12404_v26 = vpop.f32.mrb[255].mxu0 }
 0x369   : > { %v3514_v20 = vadd.f32 %v9654_v35, %v12249_v54  ;;  %v9657_v55 = vadd.f32 %v9656_v24, %v9655_v45 }
 0x36b   : > { %v3675_v38 = vadd.f32 %v12364_v11, %v3514_v20  ;;  %v3517_v46 = vadd.f32 %v9657_v55, %v12252_v19 }
 0x36d   : > { %3747 = vst [vmem:[#allocation4 + $0x90] sm:$0xff] %v3675_v38  ;;  %v3678_v47 = vadd.f32 %v10621_v12, %v3517_v46  ;;  %v9658_v48 = vpop.f32.mrb[232].mxu1  ;;  %v10644_v41 = vpop.f32.mrb[0].mxu0 }
 0x36e   : > { %v9659_v8 = vpop.f32.mrb[233].mxu1  ;;  %v3994_v17 = vpop.f32.mrb[1].mxu0  ;;  %v4003_v33 = vadd.f32 %v10644_v41, %v12412_v29 }
 0x36f   : > { %3748 = vst [vmem:[#allocation4 + $0x98] sm:$0xff] %v3678_v47  ;;  %v9660_v14 = vadd.f32 %v9659_v8, %v9658_v48  ;;  %v9661_v13 = vpop.f32.mrb[234].mxu1  ;;  %v10645_v54 = vpop.f32.mrb[2].mxu0  ;;  %v3995_v18 = vadd.f32 %v12412_v29, %v3994_v17 }
 0x370   : > { %v4006_v11 = vadd.f32 %v10645_v54, %v12412_v29  ;;  %v9662_v19 = vpop.f32.mrb[235].mxu1  ;;  %v3997_v49 = vpop.f32.mrb[3].mxu0 }
 0x371   : > { %v3522_v12 = vadd.f32 %v9660_v14, %v12258_v0  ;;  %v9663_v27 = vadd.f32 %v9662_v19, %v9661_v13  ;;  %v3998_v62 = vadd.f32 %v12412_v29, %v3997_v49 }
 0x372   : > { %v12419_v43 = vpack.c.bf16 %v4006_v11, %v4003_v33 }
 0x373   : > { %v3683_v28 = vadd.f32 %v12382_v4, %v3522_v12  ;;  %v3525_v50 = vadd.f32 %v9663_v27, %v12261_v34  ;;  %v12423_v39 = vpack.c.bf16 %v3998_v62, %v3995_v18 }
 0x375   : > { %3749 = vst [vmem:[#allocation4 + $0xa0] sm:$0xff] %v3683_v28  ;;  %v3686_v40 = vadd.f32 %v3685_v37, %v3525_v50  ;;  %v9664_v15 = vpop.f32.mrb[236].mxu1  ;;  %5934 = vmatprep.mubr.bf16.mxu1 %v12423_v39  ;;  %6079 = vmatprep.mubr.bf16.mxu0 %v12423_v39  ;;  %v10648_v0 = vpop.f32.mrb[4].mxu0 }
 0x376   : > { %v9665_v9 = vpop.f32.mrb[237].mxu1  ;;  %5935 = vmatmul.mubr.bf16.gmra.mrb[24].mxu1 %v11019_v3  ;;  %6080 = vmatmul.mubr.bf16.gmra.mrb[48].mxu0 %v11019_v3  ;;  %v4019_v6 = vadd.f32 %v10648_v0, %v12412_v29  ;;  %v4010_v4 = vpop.f32.mrb[5].mxu0  ;;  %v10965_v0 = vld [vmem:[%s13789_s7 + $0x2c0] sm:$0xff]  }
 0x377   : > { %3750 = vst [vmem:[#allocation4 + $0xa8] sm:$0xff] %v3686_v40  ;;  %v9666_v34 = vadd.f32 %v9665_v9, %v9664_v15  ;;  %v9667_v31 = vpop.f32.mrb[238].mxu1  ;;  %5942 = vmatprep.mubr.bf16.mxu1 %v12419_v43  ;;  %6087 = vmatprep.mubr.bf16.mxu0 %v12419_v43  ;;  %v4011_v37 = vadd.f32 %v12412_v29, %v4010_v4  ;;  %v10649_v63 = vpop.f32.mrb[6].mxu0 }
 0x378   : > { %v9668_v5 = vpop.f32.mrb[239].mxu1  ;;  %v4022_v44 = vadd.f32 %v10649_v63, %v12412_v29  ;;  %v4013_v2 = vpop.f32.mrb[7].mxu0  ;;  %10298 = vmatprep.subr.bf16.mxu0 %v10965_v0 }
 0x379   : > { %v3530_v60 = vadd.f32 %v9666_v34, %v12267_v7  ;;  %v9669_v51 = vadd.f32 %v9668_v5, %v9667_v31  ;;  %v4014_v35 = vadd.f32 %v12412_v29, %v4013_v2 }
 0x37a   : > { %v12436_v45 = vpack.c.bf16 %v4022_v44, %v4019_v6 }
 0x37b   : > { %v3691_v24 = vadd.f32 %v12380_v59, %v3530_v60  ;;  %v3533_v20 = vadd.f32 %v9669_v51, %v12270_v1  ;;  %v12440_v55 = vpack.c.bf16 %v4014_v35, %v4011_v37 }
 0x37d   : > { %3751 = vst [vmem:[#allocation4 + $0xb0] sm:$0xff] %v3691_v24  ;;  %v3694_v38 = vadd.f32 %v12384_v32, %v3533_v20  ;;  %v9670_v46 = vpop.f32.mrb[240].mxu1  ;;  %v10652_v47 = vpop.f32.mrb[8].mxu0 }
 0x37e   : > { %v9671_v48 = vpop.f32.mrb[241].mxu1  ;;  %5943 = vmatmul.mubr.bf16.gmra.mrb[28].mxu1 %v12423_v39  ;;  %6088 = vmatmul.mubr.bf16.gmra.mrb[52].mxu0 %v12423_v39  ;;  %v4035_v7 = vadd.f32 %v10652_v47, %v12412_v29  ;;  %v4026_v41 = vpop.f32.mrb[9].mxu0 }
 0x37f   : > { %3752 = vst [vmem:[#allocation4 + $0xb8] sm:$0xff] %v3694_v38  ;;  %v9672_v8 = vadd.f32 %v9671_v48, %v9670_v46  ;;  %v9673_v59 = vpop.f32.mrb[242].mxu1  ;;  %5950 = vmatprep.mubr.bf16.mxu1 %v12440_v55  ;;  %6095 = vmatprep.mubr.bf16.mxu0 %v12440_v55  ;;  %v4027_v1 = vadd.f32 %v12412_v29, %v4026_v41  ;;  %v10653_v32 = vpop.f32.mrb[10].mxu0 }
 0x380   : > { %v9674_v17 = vpop.f32.mrb[243].mxu1  ;;  %v4038_v14 = vadd.f32 %v10653_v32, %v12412_v29  ;;  %v4029_v13 = vpop.f32.mrb[11].mxu0 }
 0x381   : > { %v3538_v54 = vadd.f32 %v9672_v8, %v12282_v42  ;;  %v9675_v33 = vadd.f32 %v9674_v17, %v9673_v59  ;;  %v4030_v11 = vadd.f32 %v12412_v29, %v4029_v13 }
 0x382   : > { %v12452_v19 = vpack.c.bf16 %v4038_v14, %v4035_v7 }
 0x383   : > { %v3699_v49 = vadd.f32 %v12390_v30, %v3538_v54  ;;  %v3541_v12 = vadd.f32 %v9675_v33, %v12285_v16  ;;  %v12456_v18 = vpack.c.bf16 %v4030_v11, %v4027_v1 }
 0x385   : > { %3753 = vst [vmem:[#allocation4 + $0xc0] sm:$0xff] %v3699_v49  ;;  %v3702_v27 = vadd.f32 %v12394_v22, %v3541_v12  ;;  %v9676_v62 = vpop.f32.mrb[244].mxu1  ;;  %v10656_v28 = vpop.f32.mrb[12].mxu0 }
 0x386   : > { %v9677_v50 = vpop.f32.mrb[245].mxu1  ;;  %5951 = vmatmul.mubr.bf16.gmra.mrb[32].mxu1 %v12419_v43  ;;  %6096 = vmatmul.mubr.bf16.gmra.mrb[56].mxu0 %v12419_v43  ;;  %v4051_v42 = vadd.f32 %v10656_v28, %v12412_v29  ;;  %v4042_v40 = vpop.f32.mrb[13].mxu0 }
 0x387   : > { %3754 = vst [vmem:[#allocation4 + $0xc8] sm:$0xff] %v3702_v27  ;;  %v9678_v15 = vadd.f32 %v9677_v50, %v9676_v62  ;;  %v9679_v30 = vpop.f32.mrb[246].mxu1  ;;  %5958 = vmatprep.mubr.bf16.mxu1 %v12436_v45  ;;  %6103 = vmatprep.mubr.bf16.mxu0 %v12436_v45  ;;  %v4043_v16 = vadd.f32 %v12412_v29, %v4042_v40  ;;  %v10657_v22 = vpop.f32.mrb[14].mxu0 }
 0x388   : > { %v9680_v9 = vpop.f32.mrb[247].mxu1  ;;  %v4054_v6 = vadd.f32 %v10657_v22, %v12412_v29  ;;  %v4045_v4 = vpop.f32.mrb[15].mxu0 }
 0x389   : > { %v3546_v34 = vadd.f32 %v9678_v15, %v12291_v53  ;;  %v9681_v31 = vadd.f32 %v9680_v9, %v9679_v30  ;;  %v4046_v37 = vadd.f32 %v12412_v29, %v4045_v4 }
 0x38a   : > { %v12471_v63 = vpack.c.bf16 %v4054_v6, %v4051_v42 }
 0x38b   : > { %v3707_v5 = vadd.f32 %v12388_v21, %v3546_v34  ;;  %v3549_v44 = vadd.f32 %v9681_v31, %v12294_v57  ;;  %v12475_v2 = vpack.c.bf16 %v4046_v37, %v4043_v16 }
 0x38d   : > { %3755 = vst [vmem:[#allocation4 + $0xd0] sm:$0xff] %v3707_v5  ;;  %v3710_v60 = vadd.f32 %v12392_v23, %v3549_v44  ;;  %v9682_v51 = vpop.f32.mrb[248].mxu1  ;;  %v10660_v35 = vpop.f32.mrb[16].mxu0 }
 0x38e   : > { %v9683_v24 = vpop.f32.mrb[249].mxu1  ;;  %5959 = vmatmul.mubr.bf16.gmra.mrb[36].mxu1 %v12440_v55  ;;  %6104 = vmatmul.mubr.bf16.gmra.mrb[60].mxu0 %v12440_v55  ;;  %v4067_v53 = vadd.f32 %v10660_v35, %v12412_v29  ;;  %v4058_v20 = vpop.f32.mrb[17].mxu0 }
 0x38f   : > { %3756 = vst [vmem:[#allocation4 + $0xd8] sm:$0xff] %v3710_v60  ;;  %v9684_v38 = vadd.f32 %v9683_v24, %v9682_v51  ;;  %v9685_v21 = vpop.f32.mrb[250].mxu1  ;;  %5966 = vmatprep.mubr.bf16.mxu1 %v12456_v18  ;;  %6111 = vmatprep.mubr.bf16.mxu0 %v12456_v18  ;;  %v4059_v57 = vadd.f32 %v12412_v29, %v4058_v20  ;;  %v10661_v23 = vpop.f32.mrb[18].mxu0 }
 0x390   : > { %v9686_v46 = vpop.f32.mrb[251].mxu1  ;;  %v4070_v47 = vadd.f32 %v10661_v23, %v12412_v29  ;;  %v4061_v48 = vpop.f32.mrb[19].mxu0 }
 0x391   : > { %v3554_v7 = vadd.f32 %v9684_v38, %v12308_v10  ;;  %v9687_v41 = vadd.f32 %v9686_v46, %v9685_v21  ;;  %v4062_v8 = vadd.f32 %v12412_v29, %v4061_v48 }
 0x392   : > { %v12487_v59 = vpack.c.bf16 %v4070_v47, %v4067_v53 }
 0x393   : > { %v3715_v1 = vadd.f32 %v12400_v25, %v3554_v7  ;;  %v3557_v32 = vadd.f32 %v9687_v41, %v12311_v58  ;;  %v12491_v17 = vpack.c.bf16 %v4062_v8, %v4059_v57 }
 0x395   : > { %3757 = vst [vmem:[#allocation4 + $0xe0] sm:$0xff] %v3715_v1  ;;  %v3718_v14 = vadd.f32 %v12404_v26, %v3557_v32  ;;  %v9688_v13 = vpop.f32.mrb[252].mxu1  ;;  %v10664_v54 = vpop.f32.mrb[20].mxu0 }
 0x396   : > { %v9689_v33 = vpop.f32.mrb[253].mxu1  ;;  %5967 = vmatmul.mubr.bf16.gmra.mrb[40].mxu1 %v12436_v45  ;;  %6112 = vmatmul.mubr.bf16.gmra.mrb[64].mxu0 %v12436_v45  ;;  %v4083_v10 = vadd.f32 %v10664_v54, %v12412_v29  ;;  %v4074_v11 = vpop.f32.mrb[21].mxu0 }
 0x397   : > { %3758 = vst [vmem:[#allocation4 + $0xe8] sm:$0xff] %v3718_v14  ;;  %v9690_v49 = vadd.f32 %v9689_v33, %v9688_v13  ;;  %v9691_v25 = vpop.f32.mrb[254].mxu1  ;;  %5974 = vmatprep.mubr.bf16.mxu1 %v12452_v19  ;;  %6119 = vmatprep.mubr.bf16.mxu0 %v12452_v19  ;;  %v4075_v58 = vadd.f32 %v12412_v29, %v4074_v11  ;;  %v10665_v26 = vpop.f32.mrb[22].mxu0  ;;  %v12535_v14 = vld [vmem:[%s13790_s8] ss:$0 sm:$0xff] }
 0x398   : > { %v9692_v12 = vpop.f32.mrb[255].mxu1  ;;  %v4086_v27 = vadd.f32 %v10665_v26, %v12412_v29  ;;  %v4077_v62 = vpop.f32.mrb[23].mxu0 }
 0x399   : > { %v3562_v28 = vadd.f32 %v9690_v49, %v12323_v52  ;;  %v9693_v50 = vadd.f32 %v9692_v12, %v9691_v25  ;;  %v4078_v42 = vadd.f32 %v12412_v29, %v4077_v62 }
 0x39a   : > { %v12503_v40 = vpack.c.bf16 %v4086_v27, %v4083_v10 }
 0x39b   : > { %v3723_v15 = vadd.f32 %v12398_v36, %v3562_v28  ;;  %v3565_v30 = vadd.f32 %v9693_v50, %v12326_v61  ;;  %v12507_v16 = vpack.c.bf16 %v4078_v42, %v4075_v58 }
 0x39d   : > { %3759 = vst [vmem:[#allocation4 + $0xf0] sm:$0xff] %v3723_v15  ;;  %v3726_v22 = vadd.f32 %v12402_v56, %v3565_v30  ;;  %v10668_v0 = vpop.f32.mrb[24].mxu0  ;;  %v9754_v9 = vpop.f32.mrb[0].mxu1 }
 0x39e   : > { %5975 = vmatmul.mubr.bf16.gmra.mrb[44].mxu1 %v12456_v18  ;;  %6120 = vmatmul.mubr.bf16.gmra.mrb[68].mxu0 %v12456_v18  ;;  %v4099_v52 = vadd.f32 %v10668_v0, %v12412_v29  ;;  %v4090_v6 = vpop.f32.mrb[25].mxu0  ;;  %v9755_v4 = vpop.f32.mrb[1].mxu1 }
 0x39f   : > { %3760 = vst [vmem:[#allocation4 + $0xf8] sm:$0xff] %v3726_v22  ;;  %5982 = vmatprep.mubr.bf16.mxu1 %v12475_v2  ;;  %6127 = vmatprep.mubr.bf16.mxu0 %v12475_v2  ;;  %v4091_v61 = vadd.f32 %v12412_v29, %v4090_v6  ;;  %v10669_v36 = vpop.f32.mrb[26].mxu0  ;;  %v9756_v34 = vadd.f32 %v9755_v4, %v9754_v9  ;;  %v9757_v56 = vpop.f32.mrb[2].mxu1 }
 0x3a0   : > { %v4102_v31 = vadd.f32 %v10669_v36, %v12412_v29  ;;  %v4093_v37 = vpop.f32.mrb[27].mxu0  ;;  %v9758_v5 = vpop.f32.mrb[3].mxu1 }
 0x3a1   : > { %v4094_v44 = vadd.f32 %v12412_v29, %v4093_v37  ;;  %v9759_v60 = vadd.f32 %v9758_v5, %v9757_v56  ;;  %v5889_v54 = vadd.f32 %v9756_v34, %v12535_v14 }
 0x3a2   : > { %v12518_v51 = vpack.c.bf16 %v4102_v31, %v4099_v52 }
 0x3a3   : > { %v12520_v35 = vpack.c.bf16 %v4094_v44, %v4091_v61  ;;  %v5892_v49 = vadd.f32 %v9759_v60, %v12535_v14 }
 0x3a5   : > { %v10672_v24 = vpop.f32.mrb[28].mxu0  ;;  %v9760_v53 = vpop.f32.mrb[4].mxu1 }
 0x3a6   : > { %5983 = vmatmul.mubr.bf16.gmra.mrb[48].mxu1 %v12452_v19  ;;  %6128 = vmatmul.mubr.bf16.gmra.mrb[72].mxu0 %v12452_v19  ;;  %v4115_v20 = vadd.f32 %v10672_v24, %v12412_v29  ;;  %v4106_v38 = vpop.f32.mrb[29].mxu0  ;;  %v9761_v21 = vpop.f32.mrb[5].mxu1 }
 0x3a7   : > { %5990 = vmatprep.mubr.bf16.mxu1 %v12471_v63  ;;  %6135 = vmatprep.mubr.bf16.mxu0 %v12471_v63  ;;  %v4107_v57 = vadd.f32 %v12412_v29, %v4106_v38  ;;  %v10673_v23 = vpop.f32.mrb[30].mxu0  ;;  %v9762_v46 = vadd.f32 %v9761_v21, %v9760_v53  ;;  %v9763_v47 = vpop.f32.mrb[6].mxu1 }
 0x3a8   : > { %v4118_v48 = vadd.f32 %v10673_v23, %v12412_v29  ;;  %v4109_v7 = vpop.f32.mrb[31].mxu0  ;;  %v9764_v41 = vpop.f32.mrb[7].mxu1 }
 0x3a9   : > { %v4110_v8 = vadd.f32 %v12412_v29, %v4109_v7  ;;  %v9765_v1 = vadd.f32 %v9764_v41, %v9763_v47  ;;  %v5897_v30 = vadd.f32 %v9762_v46, %v12535_v14 }
 0x3aa   : > { %v12530_v32 = vpack.c.bf16 %v4118_v48, %v4115_v20 }
 0x3ab   : > { %v12537_v13 = vpack.c.bf16 %v4110_v8, %v4107_v57  ;;  %v5900_v6 = vadd.f32 %v9765_v1, %v12535_v14 }
 0x3ad   : > { %v9866_v33 = vpop.f32.mrb[32].mxu0  ;;  %v9766_v10 = vpop.f32.mrb[8].mxu1 }
 0x3ae   : > { %5991 = vmatmul.mubr.bf16.gmra.mrb[52].mxu1 %v12475_v2  ;;  %6136 = vmatmul.mubr.bf16.gmra.mrb[76].mxu0 %v12475_v2  ;;  %v9867_v11 = vpop.f32.mrb[33].mxu0  ;;  %v9767_v29 = vpop.f32.mrb[9].mxu1 }
 0x3af   : > { %5998 = vmatprep.mubr.bf16.mxu1 %v12491_v17  ;;  %6143 = vmatprep.mubr.bf16.mxu0 %v12491_v17  ;;  %v9868_v25 = vadd.f32 %v9867_v11, %v9866_v33  ;;  %v9869_v58 = vpop.f32.mrb[34].mxu0  ;;  %v9768_v26 = vadd.f32 %v9767_v29, %v9766_v10  ;;  %v9769_v12 = vpop.f32.mrb[10].mxu1  ;;  %v10949_v33 = vld [vmem:[%s13789_s7 + $0x200] sm:$0xff]   ;;  %v10957_v11 = vld [vmem:[%s13789_s7 + $0x248] sm:$0xff]  }
 0x3b0   : > { %v9870_v27 = vpop.f32.mrb[35].mxu0  ;;  %v9770_v62 = vpop.f32.mrb[11].mxu1 }
 0x3b1   : > { %v12545_v28 = vadd.f32 %v9868_v25, %v5889_v54  ;;  %v9871_v50 = vadd.f32 %v9870_v27, %v9869_v58  ;;  %v9771_v42 = vadd.f32 %v9770_v62, %v9769_v12  ;;  %v5905_v24 = vadd.f32 %v9768_v26, %v12535_v14  ;;  %v10958_v12 = vld [vmem:[%s13789_s7 + $0x208] sm:$0xff]  }
 0x3b3   : > { %v12547_v15 = vadd.f32 %v9871_v50, %v5892_v49  ;;  %v5908_v57 = vadd.f32 %v9771_v42, %v12535_v14 }
 0x3b5   : > { %v9872_v22 = vpop.f32.mrb[36].mxu0  ;;  %v9772_v0 = vpop.f32.mrb[12].mxu1 }
 0x3b6   : > { %5999 = vmatmul.mubr.bf16.gmra.mrb[56].mxu1 %v12471_v63  ;;  %6144 = vmatmul.mubr.bf16.gmra.mrb[80].mxu0 %v12471_v63  ;;  %v9873_v9 = vpop.f32.mrb[37].mxu0  ;;  %v9773_v52 = vpop.f32.mrb[13].mxu1 }
 0x3b7   : > { %6006 = vmatprep.mubr.bf16.mxu1 %v12487_v59  ;;  %6151 = vmatprep.mubr.bf16.mxu0 %v12487_v59  ;;  %v9874_v4 = vadd.f32 %v9873_v9, %v9872_v22  ;;  %v9875_v61 = vpop.f32.mrb[38].mxu0  ;;  %v9774_v36 = vadd.f32 %v9773_v52, %v9772_v0  ;;  %v9775_v34 = vpop.f32.mrb[14].mxu1  ;;  %v10959_v22 = vld [vmem:[%s13789_s7 + $0x250] sm:$0xff]  }
 0x3b8   : > { %v9876_v56 = vpop.f32.mrb[39].mxu0  ;;  %v9776_v31 = vpop.f32.mrb[15].mxu1 }
 0x3b9   : > { %v12555_v37 = vadd.f32 %v9874_v4, %v5897_v30  ;;  %v9877_v5 = vadd.f32 %v9876_v56, %v9875_v61  ;;  %v9777_v44 = vadd.f32 %v9776_v31, %v9775_v34  ;;  %v5913_v29 = vadd.f32 %v9774_v36, %v12535_v14  ;;  %v10960_v36 = vld [vmem:[%s13789_s7 + $0x210] sm:$0xff]   ;;  %v10961_v34 = vld [vmem:[%s13789_s7 + $0x258] sm:$0xff]   ;;  %v10963_v31 = vld [vmem:[%s13789_s7 + $0x260] sm:$0xff]  }
 0x3ba   : > { %v10962_v56 = vld [vmem:[%s13789_s7 + $0x218] sm:$0xff]  }
 0x3bb   : > { %v12557_v60 = vadd.f32 %v9877_v5, %v5900_v6  ;;  %v5916_v27 = vadd.f32 %v9777_v44, %v12535_v14  ;;  %v10964_v5 = vld [vmem:[%s13789_s7 + $0x220] sm:$0xff]  }
 0x3bc   : > { %v10966_v44 = vld [vmem:[%s13789_s7 + $0x280] sm:$0xff]  }
 0x3bd   : > { %v9878_v53 = vpop.f32.mrb[40].mxu0  ;;  %v9778_v20 = vpop.f32.mrb[16].mxu1 }
 0x3be   : > { %6007 = vmatmul.mubr.bf16.gmra.mrb[60].mxu1 %v12491_v17  ;;  %6152 = vmatmul.mubr.bf16.gmra.mrb[84].mxu0 %v12491_v17  ;;  %v9879_v38 = vpop.f32.mrb[41].mxu0  ;;  %v9779_v21 = vpop.f32.mrb[17].mxu1 }
 0x3bf   : > { %6159 = vmatprep.mubr.bf16.mxu0 %v12507_v16  ;;  %6208 = vmatprep.mubr.bf16.mxu1 %v11019_v3  ;;  %v9880_v23 = vadd.f32 %v9879_v38, %v9878_v53  ;;  %v9881_v46 = vpop.f32.mrb[42].mxu0  ;;  %v12565_v47 = vadd.f32 %v9779_v21, %v9778_v20  ;;  %v9781_v48 = vpop.f32.mrb[18].mxu1  ;;  %v10969_v53 = vld [vmem:[%s13789_s7 + $0x2c8] sm:$0xff]   ;;  %v10971_v21 = vld [vmem:[%s13789_s7 + $0x270] sm:$0xff]  }
 0x3c0   : > { %v9882_v7 = vpop.f32.mrb[43].mxu0  ;;  %v9782_v41 = vpop.f32.mrb[19].mxu1  ;;  %v10968_v20 = vld [vmem:[%s13789_s7 + $0x228] sm:$0xff]  }
 0x3c1   : > { %v12567_v8 = vadd.f32 %v9880_v23, %v5905_v24  ;;  %v9883_v1 = vadd.f32 %v9882_v7, %v9881_v46  ;;  %v12569_v54 = vadd.f32 %v9782_v41, %v9781_v48  ;;  %v10967_v24 = vld [vmem:[%s13789_s7 + $0x268] sm:$0xff]   ;;  %v10972_v23 = vld [vmem:[%s13789_s7 + $0x230] sm:$0xff]   ;;  %v10975_v48 = vld [vmem:[%s13789_s7 + $0x278] sm:$0xff]  }
 0x3c2   : > { %v10970_v38 = vld [vmem:[%s13789_s7 + $0x288] sm:$0xff]   ;;  %v10974_v46 = vld [vmem:[%s13789_s7 + $0x290] sm:$0xff]   ;;  %v10977_v7 = vld [vmem:[%s13789_s7 + $0x2d8] sm:$0xff]  }
 0x3c3   : > { %v12574_v10 = vadd.f32 %v9883_v1, %v5908_v57  ;;  %v10973_v57 = vld [vmem:[%s13789_s7 + $0x2d0] sm:$0xff]   ;;  %v10976_v41 = vld [vmem:[%s13789_s7 + $0x238] sm:$0xff]  }
 0x3c4   : > { %v10978_v1 = vld [vmem:[%s13789_s7 + $0x298] sm:$0xff]  }
 0x3c5   : > { %v9884_v49 = vpop.f32.mrb[44].mxu0  ;;  %v9784_v25 = vpop.f32.mrb[20].mxu1 }
 0x3c6   : > { %6160 = vmatmul.mubr.bf16.gmra.mrb[88].mxu0 %v12487_v59  ;;  %6209 = vmatmul.mubr.bf16.vlgmr.msra.gmra.mrb[64].mxu1 %v11019_v3  ;;  %v9885_v58 = vpop.f32.mrb[45].mxu0  ;;  %v9785_v26 = vpop.f32.mrb[21].mxu1 }
 0x3c7   : > { %10187 = vmatpush3.bf16.msra.mxu1 %v10949_v33  ;;  %6167 = vmatprep.mubr.bf16.mxu0 %v12503_v40  ;;  %v9886_v62 = vadd.f32 %v9885_v58, %v9884_v49  ;;  %v9887_v50 = vpop.f32.mrb[46].mxu0  ;;  %v12587_v42 = vadd.f32 %v9785_v26, %v9784_v25  ;;  %v9787_v30 = vpop.f32.mrb[22].mxu1  ;;  %v10980_v33 = vld [vmem:[%s13789_s7 + $0x2e0] sm:$0xff]   ;;  %v10984_v49 = vld [vmem:[%s13789_s7 + $0x2a8] sm:$0xff]   ;;  %v10985_v25 = vld [vmem:[%s13789_s7 + $0x2f0] sm:$0xff]  }
 0x3c8   : > { %6216 = vmatprep.mubr.bf16.mxu1 %v11019_v3  ;;  %10188 = vmatprep.subr.bf16.mxu1 %v10957_v11  ;;  %v9888_v0 = vpop.f32.mrb[47].mxu0  ;;  %v9788_v9 = vpop.f32.mrb[23].mxu1  ;;  %v10982_v11 = vld [vmem:[%s13789_s7 + $0x2a0] sm:$0xff]   ;;  %v10986_v58 = vld [vmem:[%s13789_s7 + $0x2b0] sm:$0xff]   ;;  %v10987_v26 = vld [vmem:[%s13789_s7 + $0x2f8] sm:$0xff]  }
 0x3c9   : > { %v12593_v52 = vadd.f32 %v9886_v62, %v5913_v29  ;;  %v9889_v6 = vadd.f32 %v9888_v0, %v9887_v50  ;;  %v12595_v4 = vadd.f32 %v9788_v9, %v9787_v30  ;;  %v10983_v29 = vld [vmem:[%s13789_s7 + $0x2e8] sm:$0xff]   ;;  %v10981_v62 = vld [vmem:[%s13789_s7 + $0x300] sm:$0xff]  }
 0x3ca   : > { %v10989_v50 = vld [vmem:[%s13789_s7 + $0x348] sm:$0xff]  }
 0x3cb   : > { %10189 = vmatpush3.bf16.msra.mxu1 %v10958_v12  ;;  %v12597_v61 = vadd.f32 %v9889_v6, %v5916_v27  ;;  %v10988_v12 = vld [vmem:[%s13789_s7 + $0x2b8] sm:$0xff]   ;;  %v12715_v27 = vld [vmem:[%s13789_s7 + $0x380] sm:$0xff]   ;;  %v10990_v30 = vld [vmem:[%s13789_s7 + $0x308] sm:$0xff]  }
 0x3cc   : > { %10190 = vmatprep.subr.bf16.mxu1 %v10959_v22  ;;  %v10991_v22 = vld [vmem:[%s13789_s7 + $0x350] sm:$0xff]  }
 0x3ce   : > { %6168 = vmatmul.mubr.bf16.gmra.mrb[92].mxu0 %v12507_v16  ;;  %6217 = vmatmul.mubr.bf16.gmra.mrb[68].mxu1 %v11019_v3 }
 0x3cf   : > { %6224 = vmatprep.mubr.bf16.mxu1 %v12423_v39  ;;  %6369 = vmatprep.mubr.bf16.mxu0 %v12423_v39 }
 0x3d0   : > { %10191 = vmatpush3.bf16.msra.mxu1 %v10960_v36 }
 0x3d1   : > { %10192 = vmatprep.subr.bf16.mxu1 %v10961_v34 }
 0x3d4   : > { %10193 = vmatpush3.bf16.msra.mxu1 %v10962_v56 }
 0x3d5   : > { %10194 = vmatprep.subr.bf16.mxu1 %v10963_v31 }
 0x3d6   : > { %6225 = vmatmul.mubr.bf16.gmra.mrb[72].mxu1 %v11019_v3  ;;  %6370 = vmatmul.mubr.bf16.vlgmr.msra.gmra.mrb[96].mxu0 %v11019_v3 }
 0x3d7   : > { %6232 = vmatprep.mubr.bf16.mxu1 %v12419_v43  ;;  %6377 = vmatprep.mubr.bf16.mxu0 %v12419_v43 }
 0x3d8   : > { %10195 = vmatpush3.bf16.msra.mxu1 %v10964_v5  ;;  %10299 = vmatpush3.bf16.msra.mxu0 %v10966_v44 }
 0x3d9   : > { %10196 = vmatprep.subr.bf16.mxu1 %v10967_v24  ;;  %10300 = vmatprep.subr.bf16.mxu0 %v10969_v53  ;;  %v10992_v53 = vld [vmem:[%s13789_s7 + $0x310] sm:$0xff]  }
 0x3dc   : > { %10197 = vmatpush3.bf16.msra.mxu1 %v10968_v20  ;;  %10301 = vmatpush3.bf16.msra.mxu0 %v10970_v38  ;;  %v5924_v20 = vadd.f32 %v12569_v54, %v12535_v14  ;;  %v10994_v54 = vld [vmem:[%s13789_s7 + $0x318] sm:$0xff]  }
 0x3dd   : > { %10198 = vmatprep.subr.bf16.mxu1 %v10971_v21  ;;  %10302 = vmatprep.subr.bf16.mxu0 %v10973_v57 }
 0x3de   : > { %6233 = vmatmul.mubr.bf16.gmra.mrb[76].mxu1 %v12423_v39  ;;  %6378 = vmatmul.mubr.bf16.gmra.mrb[100].mxu0 %v12423_v39  ;;  %v10979_v39 = vld [vmem:[%s13789_s7 + $0x340] sm:$0xff]  }
 0x3df   : > { %6240 = vmatprep.mubr.bf16.mxu1 %v12440_v55  ;;  %6385 = vmatprep.mubr.bf16.mxu0 %v12440_v55 }
 0x3e0   : > { %10199 = vmatpush3.bf16.msra.mxu1 %v10972_v23  ;;  %10303 = vmatpush3.bf16.msra.mxu0 %v10974_v46 }
 0x3e1   : > { %10200 = vmatprep.subr.bf16.mxu1 %v10975_v48  ;;  %10304 = vmatprep.subr.bf16.mxu0 %v10977_v7  ;;  %v10995_v7 = vld [vmem:[%s13789_s7 + $0x360] sm:$0xff]  }
 0x3e4   : > { %10201 = vmatpush3.bf16.msra.mxu1 %v10976_v41  ;;  %10305 = vmatpush3.bf16.msra.mxu0 %v10978_v1  ;;  %v5929_v1 = vadd.f32 %v12587_v42, %v12535_v14  ;;  %v10998_v42 = vld [vmem:[%s13789_s7 + $0x368] sm:$0xff]  }
 0x3e5   : > { %10410 = vmatprep.subr.bf16.mxu1 %v10979_v39  ;;  %10306 = vmatprep.subr.bf16.mxu0 %v10980_v33 }
 0x3e6   : > { %6241 = vmatmul.mubr.bf16.gmra.mrb[80].mxu1 %v12419_v43  ;;  %6386 = vmatmul.mubr.bf16.gmra.mrb[104].mxu0 %v12419_v43 }
 0x3e7   : > { %6248 = vmatprep.mubr.bf16.mxu1 %v12436_v45  ;;  %6393 = vmatprep.mubr.bf16.mxu0 %v12436_v45 }
 0x3e8   : > { %10307 = vmatpush3.bf16.msra.mxu0 %v10982_v11 }
 0x3e9   : > { %10308 = vmatprep.subr.bf16.mxu0 %v10983_v29 }
 0x3ec   : > { %10309 = vmatpush3.bf16.msra.mxu0 %v10984_v49 }
 0x3ed   : > { %10310 = vmatprep.subr.bf16.mxu0 %v10985_v25 }
 0x3ee   : > { %6249 = vmatmul.mubr.bf16.gmra.mrb[84].mxu1 %v12440_v55  ;;  %6394 = vmatmul.mubr.bf16.gmra.mrb[108].mxu0 %v12440_v55 }
 0x3ef   : > { %6256 = vmatprep.mubr.bf16.mxu1 %v12456_v18  ;;  %6401 = vmatprep.mubr.bf16.mxu0 %v12456_v18 }
 0x3f0   : > { %10311 = vmatpush3.bf16.msra.mxu0 %v10986_v58  ;;  %v10996_v58 = vld [vmem:[%s13789_s7 + $0x320] sm:$0xff]  }
 0x3f1   : > { %10312 = vmatprep.subr.bf16.mxu0 %v10987_v26  ;;  %v5932_v26 = vadd.f32 %v12595_v4, %v12535_v14  ;;  %v10999_v4 = vld [vmem:[%s13789_s7 + $0x328] sm:$0xff]  }
 0x3f4   : > { %10313 = vmatpush3.bf16.msra.mxu0 %v10988_v12 }
 0x3f5   : > { %10674 = vmatprep.subr.bf16.mxu0 %v12715_v27 }
 0x3f6   : > { %6257 = vmatmul.mubr.bf16.gmra.mrb[88].mxu1 %v12436_v45  ;;  %6402 = vmatmul.mubr.bf16.gmra.mrb[112].mxu0 %v12436_v45 }
 0x3f7   : > { %6264 = vmatprep.mubr.bf16.mxu1 %v12452_v19  ;;  %6409 = vmatprep.mubr.bf16.mxu0 %v12452_v19 }
 0x3fe   : > { %6265 = vmatmul.mubr.bf16.gmra.mrb[92].mxu1 %v12456_v18  ;;  %6410 = vmatmul.mubr.bf16.gmra.mrb[116].mxu0 %v12456_v18 }
 0x3ff   : > { %6272 = vmatprep.mubr.bf16.mxu1 %v12475_v2  ;;  %6417 = vmatprep.mubr.bf16.mxu0 %v12475_v2 }
 0x406   : > { %6273 = vmatmul.mubr.bf16.gmra.mrb[96].mxu1 %v12452_v19  ;;  %6418 = vmatmul.mubr.bf16.gmra.mrb[120].mxu0 %v12452_v19 }
 0x407   : > { %6280 = vmatprep.mubr.bf16.mxu1 %v12471_v63  ;;  %6425 = vmatprep.mubr.bf16.mxu0 %v12471_v63 }
 0x40e   : > { %6281 = vmatmul.mubr.bf16.gmra.mrb[100].mxu1 %v12475_v2  ;;  %6426 = vmatmul.mubr.bf16.gmra.mrb[124].mxu0 %v12475_v2 }
 0x40f   : > { %6288 = vmatprep.mubr.bf16.mxu1 %v12491_v17  ;;  %6433 = vmatprep.mubr.bf16.mxu0 %v12491_v17 }
 0x416   : > { %6289 = vmatmul.mubr.bf16.gmra.mrb[104].mxu1 %v12471_v63  ;;  %6434 = vmatmul.mubr.bf16.gmra.mrb[128].mxu0 %v12471_v63 }
 0x417   : > { %6296 = vmatprep.mubr.bf16.mxu1 %v12487_v59  ;;  %6441 = vmatprep.mubr.bf16.mxu0 %v12487_v59 }
 0x41e   : > { %6297 = vmatmul.mubr.bf16.gmra.mrb[108].mxu1 %v12491_v17  ;;  %6442 = vmatmul.mubr.bf16.gmra.mrb[132].mxu0 %v12491_v17 }
 0x41f   : > { %6304 = vmatprep.mubr.bf16.mxu1 %v12507_v16  ;;  %6449 = vmatprep.mubr.bf16.mxu0 %v12507_v16 }
 0x426   : > { %6305 = vmatmul.mubr.bf16.gmra.mrb[112].mxu1 %v12487_v59  ;;  %6450 = vmatmul.mubr.bf16.gmra.mrb[136].mxu0 %v12487_v59 }
 0x427   : > { %6312 = vmatprep.mubr.bf16.mxu1 %v12503_v40  ;;  %6457 = vmatprep.mubr.bf16.mxu0 %v12503_v40 }
 0x42e   : > { %6313 = vmatmul.mubr.bf16.gmra.mrb[116].mxu1 %v12507_v16  ;;  %6458 = vmatmul.mubr.bf16.gmra.mrb[140].mxu0 %v12507_v16 }
 0x42f   : > { %6320 = vmatprep.mubr.bf16.mxu1 %v12520_v35  ;;  %6465 = vmatprep.mubr.bf16.mxu0 %v12520_v35 }
 0x436   : > { %6321 = vmatmul.mubr.bf16.gmra.mrb[120].mxu1 %v12503_v40  ;;  %6466 = vmatmul.mubr.bf16.gmra.mrb[144].mxu0 %v12503_v40 }
 0x437   : > { %6328 = vmatprep.mubr.bf16.mxu1 %v12518_v51  ;;  %6473 = vmatprep.mubr.bf16.mxu0 %v12518_v51 }
 0x43e   : > { %6329 = vmatmul.mubr.bf16.gmra.mrb[124].mxu1 %v12520_v35  ;;  %6474 = vmatmul.mubr.bf16.gmra.mrb[148].mxu0 %v12520_v35 }
 0x43f   : > { %6530 = vmatprep.mubr.bf16.mxu1 %v12440_v55  ;;  %6481 = vmatprep.mubr.bf16.mxu0 %v12537_v13 }
 0x446   : > { %6482 = vmatmul.mubr.bf16.gmra.mrb[152].mxu0 %v12518_v51  ;;  %6531 = vmatmul.mubr.bf16.vlgmr.msra.gmra.mrb[128].mxu1 %v12419_v43  ;;  %v5921_v43 = vadd.f32 %v12565_v47, %v12535_v14  ;;  %v10993_v47 = vld [vmem:[%s13789_s7 + $0x358] sm:$0xff]  }
 0x447   : > { %10411 = vmatpush3.bf16.msra.mxu1 %v10981_v62  ;;  %6538 = vmatprep.mubr.bf16.mxu1 %v12436_v45 }
 0x448   : > { %6489 = vmatprep.mubr.bf16.mxu0 %v12530_v32  ;;  %10412 = vmatprep.subr.bf16.mxu1 %v10989_v50 }
 0x449   : > { %v9790_v0 = vpop.f32.mrb[24].mxu1  ;;  %v9890_v9 = vpop.f32.mrb[48].mxu0 }
 0x44a   : > { %v9791_v6 = vpop.f32.mrb[25].mxu1  ;;  %v9891_v36 = vpop.f32.mrb[49].mxu0 }
 0x44b   : > { %v9792_v34 = vadd.f32 %v9791_v6, %v9790_v0  ;;  %v9892_v56 = vadd.f32 %v9891_v36, %v9890_v9  ;;  %v9793_v31 = vpop.f32.mrb[26].mxu1  ;;  %v9893_v5 = vpop.f32.mrb[50].mxu0  ;;  %10413 = vmatpush3.bf16.msra.mxu1 %v10990_v30  ;;  %v11000_v30 = vld [vmem:[%s13789_s7 + $0x388] sm:$0xff]  }
 0x44c   : > { %v9794_v44 = vpop.f32.mrb[27].mxu1  ;;  %v9894_v24 = vpop.f32.mrb[51].mxu0  ;;  %10414 = vmatprep.subr.bf16.mxu1 %v10991_v22 }
 0x44d   : > { %v12769_v38 = vadd.f32 %v9892_v56, %v5921_v43  ;;  %v9795_v21 = vadd.f32 %v9794_v44, %v9793_v31  ;;  %v9895_v57 = vadd.f32 %v9894_v24, %v9893_v5  ;;  %v5937_v43 = vadd.f32 %v9792_v34, %v12535_v14 }
 0x44e   : > { %6490 = vmatmul.mubr.bf16.gmra.mrb[156].mxu0 %v12537_v13  ;;  %6539 = vmatmul.mubr.bf16.gmra.mrb[132].mxu1 %v12440_v55 }
 0x44f   : > { %v12776_v23 = vadd.f32 %v9895_v57, %v5924_v20  ;;  %6546 = vmatprep.mubr.bf16.mxu1 %v12456_v18  ;;  %6691 = vmatprep.mubr.bf16.mxu0 %v12456_v18  ;;  %v11003_v20 = vld [vmem:[%s13789_s7 + $0x390] sm:$0xff]   ;;  %v5940_v57 = vadd.f32 %v9795_v21, %v12535_v14  ;;  %v11005_v21 = vld [vmem:[%s13789_s7 + $0x338] sm:$0xff]  }
 0x450   : > { %10415 = vmatpush3.bf16.msra.mxu1 %v10992_v53  ;;  %v11002_v53 = vld [vmem:[%s13789_s7 + $0x330] sm:$0xff]  }
 0x451   : > { %v9796_v46 = vpop.f32.mrb[28].mxu1  ;;  %v9896_v48 = vpop.f32.mrb[52].mxu0  ;;  %10416 = vmatprep.subr.bf16.mxu1 %v10993_v47 }
 0x452   : > { %v9797_v41 = vpop.f32.mrb[29].mxu1  ;;  %v9897_v55 = vpop.f32.mrb[53].mxu0 }
 0x453   : > { %v12788_v39 = vadd.f32 %v9797_v41, %v9796_v46  ;;  %v9898_v33 = vadd.f32 %v9897_v55, %v9896_v48  ;;  %v9799_v11 = vpop.f32.mrb[30].mxu1  ;;  %v9899_v29 = vpop.f32.mrb[54].mxu0  ;;  %v11004_v46 = vld [vmem:[%s13789_s7 + $0x378] sm:$0xff]  }
 0x454   : > { %v9800_v49 = vpop.f32.mrb[31].mxu1  ;;  %v9900_v25 = vpop.f32.mrb[55].mxu0  ;;  %10417 = vmatpush3.bf16.msra.mxu1 %v10994_v54  ;;  %v11006_v48 = vld [vmem:[%s13789_s7 + $0x398] sm:$0xff]  }
 0x455   : > { %v12795_v12 = vadd.f32 %v9898_v33, %v5929_v1  ;;  %v9801_v62 = vadd.f32 %v9800_v49, %v9799_v11  ;;  %v9901_v50 = vadd.f32 %v9900_v25, %v9899_v29  ;;  %10418 = vmatprep.subr.bf16.mxu1 %v10995_v7  ;;  %v5945_v33 = vadd.f32 %v12788_v39, %v12535_v14  ;;  %v11008_v39 = vld [vmem:[%s13789_s7 + $0x3a8] sm:$0xff]  }
 0x456   : > { %6547 = vmatmul.mubr.bf16.gmra.mrb[136].mxu1 %v12436_v45  ;;  %6692 = vmatmul.mubr.bf16.vlgmr.msra.gmra.mrb[160].mxu0 %v12436_v45  ;;  %v11001_v45 = vld [vmem:[%s13789_s7 + $0x370] sm:$0xff]  }
 0x457   : > { %v12805_v22 = vadd.f32 %v9901_v50, %v5932_v26  ;;  %6554 = vmatprep.mubr.bf16.mxu1 %v12452_v19  ;;  %6699 = vmatprep.mubr.bf16.mxu0 %v12452_v19  ;;  %v11007_v50 = vld [vmem:[%s13789_s7 + $0x3a0] sm:$0xff]  }
 0x458   : > { %10419 = vmatpush3.bf16.msra.mxu1 %v10996_v58  ;;  %10675 = vmatpush3.bf16.msra.mxu0 %v12715_v27 }
 0x459   : > { %v9802_v0 = vpop.f32.mrb[32].mxu1  ;;  %v9902_v9 = vpop.f32.mrb[56].mxu0  ;;  %10420 = vmatprep.subr.bf16.mxu1 %v10998_v42  ;;  %10676 = vmatprep.subr.bf16.mxu0 %v11000_v30  ;;  %v5948_v42 = vadd.f32 %v9801_v62, %v12535_v14 }
 0x45a   : > { %v9803_v6 = vpop.f32.mrb[33].mxu1  ;;  %v9903_v36 = vpop.f32.mrb[57].mxu0 }
 0x45b   : > { %v9804_v56 = vadd.f32 %v9803_v6, %v9802_v0  ;;  %v9904_v31 = vadd.f32 %v9903_v36, %v9902_v9  ;;  %v9805_v5 = vpop.f32.mrb[34].mxu1  ;;  %v9905_v27 = vpop.f32.mrb[58].mxu0 }
 0x45c   : > { %v9806_v44 = vpop.f32.mrb[35].mxu1  ;;  %v9906_v24 = vpop.f32.mrb[59].mxu0  ;;  %10421 = vmatpush3.bf16.msra.mxu1 %v10999_v4  ;;  %10677 = vmatpush3.bf16.msra.mxu0 %v11000_v30 }
 0x45d   : > { %v12824_v47 = vadd.f32 %v9904_v31, %v5937_v43  ;;  %v9807_v34 = vadd.f32 %v9806_v44, %v9805_v5  ;;  %v9907_v54 = vadd.f32 %v9906_v24, %v9905_v27  ;;  %10422 = vmatprep.subr.bf16.mxu1 %v11001_v45  ;;  %10678 = vmatprep.subr.bf16.mxu0 %v11003_v20 }
 0x45e   : > { %6555 = vmatmul.mubr.bf16.gmra.mrb[140].mxu1 %v12456_v18  ;;  %6700 = vmatmul.mubr.bf16.gmra.mrb[164].mxu0 %v12456_v18  ;;  %v5953_v43 = vadd.f32 %v9804_v56, %v12535_v14  ;;  %v11010_v56 = vld [vmem:[%s13789_s7 + $0x3b8] sm:$0xff]  }
 0x45f   : > { %v12834_v7 = vadd.f32 %v9907_v54, %v5940_v57  ;;  %6562 = vmatprep.mubr.bf16.mxu1 %v12475_v2  ;;  %6707 = vmatprep.mubr.bf16.mxu0 %v12475_v2  ;;  %v5956_v57 = vadd.f32 %v9807_v34, %v12535_v14 }
 0x460   : > { %10423 = vmatpush3.bf16.msra.mxu1 %v11002_v53  ;;  %10679 = vmatpush3.bf16.msra.mxu0 %v11003_v20  ;;  %v11009_v20 = vld [vmem:[%s13789_s7 + $0x3b0] sm:$0xff]  }
 0x461   : > { %v9808_v41 = vpop.f32.mrb[36].mxu1  ;;  %v9908_v55 = vpop.f32.mrb[60].mxu0  ;;  %10424 = vmatprep.subr.bf16.mxu1 %v11004_v46  ;;  %10680 = vmatprep.subr.bf16.mxu0 %v11006_v48 }
 0x462   : > { %v9809_v18 = vpop.f32.mrb[37].mxu1  ;;  %v9909_v1 = vpop.f32.mrb[61].mxu0 }
 0x463   : > { %v9810_v11 = vadd.f32 %v9809_v18, %v9808_v41  ;;  %v9910_v29 = vadd.f32 %v9909_v1, %v9908_v55  ;;  %v9811_v49 = vpop.f32.mrb[38].mxu1  ;;  %v9911_v25 = vpop.f32.mrb[62].mxu0 }
 0x464   : > { %v9812_v58 = vpop.f32.mrb[39].mxu1  ;;  %v9912_v26 = vpop.f32.mrb[63].mxu0  ;;  %10425 = vmatpush3.bf16.msra.mxu1 %v11005_v21  ;;  %10681 = vmatpush3.bf16.msra.mxu0 %v11006_v48 }
 0x465   : > { %v12847_v30 = vadd.f32 %v9910_v29, %v5945_v33  ;;  %v9813_v4 = vadd.f32 %v9812_v58, %v9811_v49  ;;  %v9913_v0 = vadd.f32 %v9912_v26, %v9911_v25  ;;  %10682 = vmatprep.subr.bf16.mxu0 %v11007_v50  ;;  %v5961_v1 = vadd.f32 %v9810_v11, %v12535_v14 }
 0x466   : > { %6563 = vmatmul.mubr.bf16.gmra.mrb[144].mxu1 %v12452_v19  ;;  %6708 = vmatmul.mubr.bf16.gmra.mrb[168].mxu0 %v12452_v19 }
 0x467   : > { %v12854_v9 = vadd.f32 %v9913_v0, %v5948_v42  ;;  %6570 = vmatprep.mubr.bf16.mxu1 %v12471_v63  ;;  %6715 = vmatprep.mubr.bf16.mxu0 %v12471_v63 }
 0x468   : > { %10683 = vmatpush3.bf16.msra.mxu0 %v11007_v50  ;;  %v5964_v50 = vadd.f32 %v9813_v4, %v12535_v14 }
 0x469   : > { %v9814_v62 = vpop.f32.mrb[40].mxu1  ;;  %v9914_v45 = vpop.f32.mrb[64].mxu0  ;;  %10684 = vmatprep.subr.bf16.mxu0 %v11008_v39 }
 0x46a   : > { %v9815_v6 = vpop.f32.mrb[41].mxu1  ;;  %v9915_v36 = vpop.f32.mrb[65].mxu0 }
 0x46b   : > { %v9816_v31 = vadd.f32 %v9815_v6, %v9814_v62  ;;  %v9916_v5 = vadd.f32 %v9915_v36, %v9914_v45  ;;  %v9817_v27 = vpop.f32.mrb[42].mxu1  ;;  %v9917_v44 = vpop.f32.mrb[66].mxu0 }
 0x46c   : > { %v9818_v24 = vpop.f32.mrb[43].mxu1  ;;  %v9918_v53 = vpop.f32.mrb[67].mxu0  ;;  %10685 = vmatpush3.bf16.msra.mxu0 %v11008_v39 }
 0x46d   : > { %v12863_v54 = vadd.f32 %v9916_v5, %v5953_v43  ;;  %v9819_v46 = vadd.f32 %v9818_v24, %v9817_v27  ;;  %v9919_v48 = vadd.f32 %v9918_v53, %v9917_v44  ;;  %10686 = vmatprep.subr.bf16.mxu0 %v11009_v20  ;;  %v5969_v4 = vadd.f32 %v9816_v31, %v12535_v14 }
 0x46e   : > { %6571 = vmatmul.mubr.bf16.gmra.mrb[148].mxu1 %v12475_v2  ;;  %6716 = vmatmul.mubr.bf16.gmra.mrb[172].mxu0 %v12475_v2 }
 0x46f   : > { %v12870_v21 = vadd.f32 %v9919_v48, %v5956_v57  ;;  %6578 = vmatprep.mubr.bf16.mxu1 %v12491_v17  ;;  %6723 = vmatprep.mubr.bf16.mxu0 %v12491_v17 }
 0x470   : > { %10687 = vmatpush3.bf16.msra.mxu0 %v11009_v20  ;;  %v5972_v20 = vadd.f32 %v9819_v46, %v12535_v14 }
 0x471   : > { %v9820_v34 = vpop.f32.mrb[44].mxu1  ;;  %v9920_v41 = vpop.f32.mrb[68].mxu0  ;;  %10688 = vmatprep.subr.bf16.mxu0 %v11010_v56 }
 0x472   : > { %v9821_v55 = vpop.f32.mrb[45].mxu1  ;;  %v9921_v18 = vpop.f32.mrb[69].mxu0 }
 0x473   : > { %v9822_v33 = vadd.f32 %v9821_v55, %v9820_v34  ;;  %v9922_v29 = vadd.f32 %v9921_v18, %v9920_v41  ;;  %v9823_v49 = vpop.f32.mrb[46].mxu1  ;;  %v9923_v25 = vpop.f32.mrb[70].mxu0 }
 0x474   : > { %v9824_v58 = vpop.f32.mrb[47].mxu1  ;;  %v9924_v26 = vpop.f32.mrb[71].mxu0  ;;  %10689 = vmatpush3.bf16.msra.mxu0 %v11010_v56 }
 0x475   : > { %v12876_v42 = vadd.f32 %v9922_v29, %v5961_v1  ;;  %v9825_v0 = vadd.f32 %v9824_v58, %v9823_v49  ;;  %v9925_v39 = vadd.f32 %v9924_v26, %v9923_v25  ;;  %v5977_v46 = vadd.f32 %v9822_v33, %v12535_v14 }
 0x476   : > { %6579 = vmatmul.mubr.bf16.gmra.mrb[152].mxu1 %v12471_v63  ;;  %6724 = vmatmul.mubr.bf16.gmra.mrb[176].mxu0 %v12471_v63 }
 0x477   : > { %v12880_v62 = vadd.f32 %v9925_v39, %v5964_v50  ;;  %6586 = vmatprep.mubr.bf16.mxu1 %v12487_v59  ;;  %6731 = vmatprep.mubr.bf16.mxu0 %v12487_v59  ;;  %v5980_v50 = vadd.f32 %v9825_v0, %v12535_v14 }
 0x479   : > { %v9826_v11 = vpop.f32.mrb[48].mxu1  ;;  %v9926_v45 = vpop.f32.mrb[72].mxu0 }
 0x47a   : > { %v9827_v6 = vpop.f32.mrb[49].mxu1  ;;  %v9927_v36 = vpop.f32.mrb[73].mxu0 }
 0x47b   : > { %v9828_v43 = vadd.f32 %v9827_v6, %v9826_v11  ;;  %v9928_v5 = vadd.f32 %v9927_v36, %v9926_v45  ;;  %v9829_v27 = vpop.f32.mrb[50].mxu1  ;;  %v9929_v44 = vpop.f32.mrb[74].mxu0 }
 0x47c   : > { %v9830_v24 = vpop.f32.mrb[51].mxu1  ;;  %v9930_v53 = vpop.f32.mrb[75].mxu0 }
 0x47d   : > { %v12886_v57 = vadd.f32 %v9928_v5, %v5969_v4  ;;  %v9831_v48 = vadd.f32 %v9830_v24, %v9829_v27  ;;  %v9931_v56 = vadd.f32 %v9930_v53, %v9929_v44  ;;  %v5985_v0 = vadd.f32 %v9828_v43, %v12535_v14 }
 0x47e   : > { %6587 = vmatmul.mubr.bf16.gmra.mrb[156].mxu1 %v12491_v17  ;;  %6732 = vmatmul.mubr.bf16.gmra.mrb[180].mxu0 %v12491_v17 }
 0x47f   : > { %v12890_v34 = vadd.f32 %v9931_v56, %v5972_v20  ;;  %6594 = vmatprep.mubr.bf16.mxu1 %v12507_v16  ;;  %6739 = vmatprep.mubr.bf16.mxu0 %v12507_v16 }
 0x481   : > { %v9832_v31 = vpop.f32.mrb[52].mxu1  ;;  %v9932_v41 = vpop.f32.mrb[76].mxu0 }
 0x482   : > { %v9833_v55 = vpop.f32.mrb[53].mxu1  ;;  %v9933_v18 = vpop.f32.mrb[77].mxu0 }
 0x483   : > { %v9834_v1 = vadd.f32 %v9833_v55, %v9832_v31  ;;  %v9934_v29 = vadd.f32 %v9933_v18, %v9932_v41  ;;  %v9835_v49 = vpop.f32.mrb[54].mxu1  ;;  %v9935_v25 = vpop.f32.mrb[78].mxu0  ;;  %v5988_v31 = vadd.f32 %v9831_v48, %v12535_v14 }
 0x484   : > { %v9836_v58 = vpop.f32.mrb[55].mxu1  ;;  %v9936_v26 = vpop.f32.mrb[79].mxu0 }
 0x485   : > { %v12896_v39 = vadd.f32 %v9934_v29, %v5977_v46  ;;  %v9837_v11 = vadd.f32 %v9836_v58, %v9835_v49  ;;  %v9937_v45 = vadd.f32 %v9936_v26, %v9935_v25  ;;  %v5993_v48 = vadd.f32 %v9834_v1, %v12535_v14 }
 0x486   : > { %6595 = vmatmul.mubr.bf16.gmra.mrb[160].mxu1 %v12487_v59  ;;  %6740 = vmatmul.mubr.bf16.gmra.mrb[184].mxu0 %v12487_v59 }
 0x487   : > { %v12900_v6 = vadd.f32 %v9937_v45, %v5980_v50  ;;  %6602 = vmatprep.mubr.bf16.mxu1 %v12503_v40  ;;  %6747 = vmatprep.mubr.bf16.mxu0 %v12503_v40 }
 0x489   : > { %v9838_v33 = vpop.f32.mrb[56].mxu1  ;;  %v9938_v36 = vpop.f32.mrb[80].mxu0 }
 0x48a   : > { %v9839_v4 = vpop.f32.mrb[57].mxu1  ;;  %v9939_v5 = vpop.f32.mrb[81].mxu0 }
 0x48b   : > { %v9840_v27 = vadd.f32 %v9839_v4, %v9838_v33  ;;  %v9940_v44 = vadd.f32 %v9939_v5, %v9938_v36  ;;  %v9841_v24 = vpop.f32.mrb[58].mxu1  ;;  %v9941_v53 = vpop.f32.mrb[82].mxu0  ;;  %v5996_v4 = vadd.f32 %v9837_v11, %v12535_v14 }
 0x48c   : > { %v9842_v20 = vpop.f32.mrb[59].mxu1  ;;  %v9942_v56 = vpop.f32.mrb[83].mxu0 }
 0x48d   : > { %v12906_v41 = vadd.f32 %v9940_v44, %v5985_v0  ;;  %v9843_v55 = vadd.f32 %v9842_v20, %v9841_v24  ;;  %v9943_v18 = vadd.f32 %v9942_v56, %v9941_v53  ;;  %v6001_v11 = vadd.f32 %v9840_v27, %v12535_v14 }
 0x48e   : > { %6603 = vmatmul.mubr.bf16.gmra.mrb[164].mxu1 %v12507_v16  ;;  %6748 = vmatmul.mubr.bf16.gmra.mrb[188].mxu0 %v12507_v16 }
 0x48f   : > { %v12910_v46 = vadd.f32 %v9943_v18, %v5988_v31  ;;  %6610 = vmatprep.mubr.bf16.mxu1 %v12520_v35  ;;  %6755 = vmatprep.mubr.bf16.mxu0 %v12520_v35 }
 0x491   : > { %v9844_v43 = vpop.f32.mrb[60].mxu1  ;;  %v9944_v29 = vpop.f32.mrb[84].mxu0 }
 0x492   : > { %v9845_v49 = vpop.f32.mrb[61].mxu1  ;;  %v9945_v25 = vpop.f32.mrb[85].mxu0 }
 0x493   : > { %v9846_v58 = vadd.f32 %v9845_v49, %v9844_v43  ;;  %v9946_v26 = vadd.f32 %v9945_v25, %v9944_v29  ;;  %v9847_v50 = vpop.f32.mrb[62].mxu1  ;;  %v9947_v45 = vpop.f32.mrb[86].mxu0  ;;  %v6004_v49 = vadd.f32 %v9843_v55, %v12535_v14 }
 0x494   : > { %v9848_v33 = vpop.f32.mrb[63].mxu1  ;;  %v9948_v36 = vpop.f32.mrb[87].mxu0 }
 0x495   : > { %v12916_v5 = vadd.f32 %v9946_v26, %v5993_v48  ;;  %v9849_v0 = vadd.f32 %v9848_v33, %v9847_v50  ;;  %v9949_v44 = vadd.f32 %v9948_v36, %v9947_v45 }
 0x496   : > { %6611 = vmatmul.mubr.bf16.gmra.mrb[168].mxu1 %v12503_v40  ;;  %6756 = vmatmul.mubr.bf16.gmra.mrb[192].mxu0 %v12503_v40 }
 0x497   : > { %v12920_v24 = vadd.f32 %v9949_v44, %v5996_v4  ;;  %6618 = vmatprep.mubr.bf16.mxu1 %v12518_v51  ;;  %6763 = vmatprep.mubr.bf16.mxu0 %v12518_v51 }
 0x499   : > { %v9950_v1 = vpop.f32.mrb[88].mxu0  ;;  %v9978_v53 = vpop.f32.mrb[64].mxu1 }
 0x49a   : > { %v9951_v20 = vpop.f32.mrb[89].mxu0  ;;  %v9979_v56 = vpop.f32.mrb[65].mxu1 }
 0x49b   : > { %v9952_v31 = vadd.f32 %v9951_v20, %v9950_v1  ;;  %v9980_v18 = vadd.f32 %v9979_v56, %v9978_v53  ;;  %v9953_v43 = vpop.f32.mrb[90].mxu0  ;;  %v9981_v29 = vpop.f32.mrb[66].mxu1 }
 0x49c   : > { %v9954_v25 = vpop.f32.mrb[91].mxu0  ;;  %v9982_v48 = vpop.f32.mrb[67].mxu1 }
 0x49d   : > { %v12926_v26 = vadd.f32 %v9952_v31, %v6001_v11  ;;  %v6211_v50 = vadd.f32 %v9980_v18, %v12545_v28  ;;  %v9955_v45 = vadd.f32 %v9954_v25, %v9953_v43  ;;  %v9983_v33 = vadd.f32 %v9982_v48, %v9981_v29 }
 0x49e   : > { %6619 = vmatmul.mubr.bf16.gmra.mrb[172].mxu1 %v12520_v35  ;;  %6764 = vmatmul.mubr.bf16.gmra.mrb[196].mxu0 %v12520_v35  ;;  %v6009_v28 = vadd.f32 %v9846_v58, %v12535_v14  ;;  %v6012_v31 = vadd.f32 %v9849_v0, %v12535_v14 }
 0x49f   : > { %v12931_v36 = vadd.f32 %v9955_v45, %v6004_v49  ;;  %v6214_v27 = vadd.f32 %v9983_v33, %v12547_v15  ;;  %6626 = vmatprep.mubr.bf16.mxu1 %v12537_v13  ;;  %6771 = vmatprep.mubr.bf16.mxu0 %v12537_v13 }
 0x4a1   : > { %v9956_v55 = vpop.f32.mrb[92].mxu0  ;;  %v9984_v4 = vpop.f32.mrb[68].mxu1 }
 0x4a2   : > { %v9957_v44 = vpop.f32.mrb[93].mxu0  ;;  %v9985_v1 = vpop.f32.mrb[69].mxu1 }
 0x4a3   : > { %v9958_v53 = vadd.f32 %v9957_v44, %v9956_v55  ;;  %v9986_v20 = vadd.f32 %v9985_v1, %v9984_v4  ;;  %v9959_v56 = vpop.f32.mrb[94].mxu0  ;;  %v9987_v11 = vpop.f32.mrb[70].mxu1 }
 0x4a4   : > { %v9960_v18 = vpop.f32.mrb[95].mxu0  ;;  %v9988_v43 = vpop.f32.mrb[71].mxu1 }
 0x4a5   : > { %v12938_v29 = vadd.f32 %v9958_v53, %v6009_v28  ;;  %v6219_v15 = vadd.f32 %v9986_v20, %v12555_v37  ;;  %v9961_v49 = vadd.f32 %v9960_v18, %v9959_v56  ;;  %v9989_v25 = vadd.f32 %v9988_v43, %v9987_v11 }
 0x4a6   : > { %6627 = vmatmul.mubr.bf16.gmra.mrb[176].mxu1 %v12518_v51  ;;  %6772 = vmatmul.mubr.bf16.gmra.mrb[200].mxu0 %v12518_v51 }
 0x4a7   : > { %v12943_v48 = vadd.f32 %v9961_v49, %v6012_v31  ;;  %v6222_v58 = vadd.f32 %v9989_v25, %v12557_v60  ;;  %6634 = vmatprep.mubr.bf16.mxu1 %v12530_v32  ;;  %6779 = vmatprep.mubr.bf16.mxu0 %v12530_v32 }
 0x4a9   : > { %v9990_v14 = vpop.f32.mrb[72].mxu1  ;;  %v10090_v0 = vpop.f32.mrb[96].mxu0 }
 0x4aa   : > { %v9991_v45 = vpop.f32.mrb[73].mxu1  ;;  %v10091_v33 = vpop.f32.mrb[97].mxu0 }
 0x4ab   : > { %v9992_v55 = vadd.f32 %v9991_v45, %v9990_v14  ;;  %v10092_v37 = vadd.f32 %v10091_v33, %v10090_v0  ;;  %v9993_v4 = vpop.f32.mrb[74].mxu1  ;;  %v10093_v44 = vpop.f32.mrb[98].mxu0 }
 0x4ac   : > { %v9994_v1 = vpop.f32.mrb[75].mxu1  ;;  %v10094_v28 = vpop.f32.mrb[99].mxu0 }
 0x4ad   : > { %v6227_v53 = vadd.f32 %v9992_v55, %v12567_v8  ;;  %v12949_v20 = vadd.f32 %v10092_v37, %v6211_v50  ;;  %v9995_v56 = vadd.f32 %v9994_v1, %v9993_v4  ;;  %v10095_v60 = vadd.f32 %v10094_v28, %v10093_v44 }
 0x4ae   : > { %6635 = vmatmul.mubr.bf16.gmra.mrb[180].mxu1 %v12537_v13  ;;  %6780 = vmatmul.mubr.bf16.gmra.mrb[204].mxu0 %v12537_v13 }
 0x4af   : > { %v6230_v11 = vadd.f32 %v9995_v56, %v12574_v10  ;;  %v12954_v31 = vadd.f32 %v10095_v60, %v6214_v27  ;;  %6642 = vmatprep.mubr.bf16.mxu1 %v11019_v3  ;;  %6787 = vmatprep.mubr.bf16.mxu0 %v11019_v3 }
 0x4b1   : > { %v9996_v18 = vpop.f32.mrb[76].mxu1  ;;  %v10096_v43 = vpop.f32.mrb[100].mxu0 }
 0x4b2   : > { %v9997_v49 = vpop.f32.mrb[77].mxu1  ;;  %v10097_v8 = vpop.f32.mrb[101].mxu0 }
 0x4b3   : > { %v9998_v50 = vadd.f32 %v9997_v49, %v9996_v18  ;;  %v10098_v25 = vadd.f32 %v10097_v8, %v10096_v43  ;;  %v9999_v14 = vpop.f32.mrb[78].mxu1  ;;  %v10099_v0 = vpop.f32.mrb[102].mxu0 }
 0x4b4   : > { %v10000_v45 = vpop.f32.mrb[79].mxu1  ;;  %v10100_v33 = vpop.f32.mrb[103].mxu0 }
 0x4b5   : > { %v6235_v55 = vadd.f32 %v9998_v50, %v12593_v52  ;;  %v12959_v37 = vadd.f32 %v10098_v25, %v6219_v15  ;;  %v10001_v10 = vadd.f32 %v10000_v45, %v9999_v14  ;;  %v10101_v27 = vadd.f32 %v10100_v33, %v10099_v0 }
 0x4b6   : > { %6643 = vmatmul.mubr.bf16.gmra.mrb[184].mxu1 %v12530_v32  ;;  %6788 = vmatmul.mubr.bf16.gmra.mrb[208].mxu0 %v12530_v32 }
 0x4b7   : > { %v6238_v4 = vadd.f32 %v10001_v10, %v12597_v61  ;;  %v12964_v44 = vadd.f32 %v10101_v27, %v6222_v58  ;;  %6650 = vmatprep.mubr.bf16.mxu1 %v11019_v3  ;;  %6795 = vmatprep.mubr.bf16.mxu0 %v11019_v3 }
 0x4b9   : > { %v10002_v1 = vpop.f32.mrb[80].mxu1  ;;  %v10102_v28 = vpop.f32.mrb[104].mxu0 }
 0x4ba   : > { %v10003_v56 = vpop.f32.mrb[81].mxu1  ;;  %v10103_v52 = vpop.f32.mrb[105].mxu0 }
 0x4bb   : > { %v10004_v15 = vadd.f32 %v10003_v56, %v10002_v1  ;;  %v10104_v60 = vadd.f32 %v10103_v52, %v10102_v28  ;;  %v10005_v18 = vpop.f32.mrb[82].mxu1  ;;  %v10105_v43 = vpop.f32.mrb[106].mxu0 }
 0x4bc   : > { %v10006_v49 = vpop.f32.mrb[83].mxu1  ;;  %v10106_v8 = vpop.f32.mrb[107].mxu0 }
 0x4bd   : > { %v6243_v50 = vadd.f32 %v10004_v15, %v12769_v38  ;;  %v12969_v25 = vadd.f32 %v10104_v60, %v6227_v53  ;;  %v10007_v61 = vadd.f32 %v10006_v49, %v10005_v18  ;;  %v10107_v58 = vadd.f32 %v10106_v8, %v10105_v43 }
 0x4be   : > { %6651 = vmatmul.mubr.bf16.gmra.mrb[188].mxu1 %v11019_v3  ;;  %6796 = vmatmul.mubr.bf16.gmra.mrb[212].mxu0 %v11019_v3 }
 0x4bf   : > { %v6246_v14 = vadd.f32 %v10007_v61, %v12776_v23  ;;  %v12974_v0 = vadd.f32 %v10107_v58, %v6230_v11  ;;  %6852 = vmatprep.mubr.bf16.mxu1 %v12475_v2  ;;  %6803 = vmatprep.mubr.bf16.mxu0 %v11019_v3 }
 0x4c1   : > { %v10008_v45 = vpop.f32.mrb[84].mxu1  ;;  %v10108_v33 = vpop.f32.mrb[108].mxu0 }
 0x4c2   : > { %v10009_v10 = vpop.f32.mrb[85].mxu1  ;;  %v10109_v38 = vpop.f32.mrb[109].mxu0 }
 0x4c3   : > { %v10010_v53 = vadd.f32 %v10009_v10, %v10008_v45  ;;  %v10110_v27 = vadd.f32 %v10109_v38, %v10108_v33  ;;  %v10011_v1 = vpop.f32.mrb[86].mxu1  ;;  %v10111_v28 = vpop.f32.mrb[110].mxu0 }
 0x4c4   : > { %v10012_v56 = vpop.f32.mrb[87].mxu1  ;;  %v10112_v52 = vpop.f32.mrb[111].mxu0 }
 0x4c5   : > { %v6251_v15 = vadd.f32 %v10010_v53, %v12795_v12  ;;  %v12979_v60 = vadd.f32 %v10110_v27, %v6235_v55  ;;  %v10013_v23 = vadd.f32 %v10012_v56, %v10011_v1  ;;  %v10113_v11 = vadd.f32 %v10112_v52, %v10111_v28 }
 0x4c6   : > { %6804 = vmatmul.mubr.bf16.gmra.mrb[216].mxu0 %v11019_v3  ;;  %6853 = vmatmul.mubr.bf16.vlgmr.msra.gmra.mrb[192].mxu1 %v12452_v19 }
 0x4c7   : > { %v6254_v18 = vadd.f32 %v10013_v23, %v12805_v22  ;;  %v12984_v43 = vadd.f32 %v10113_v11, %v6238_v4  ;;  %6860 = vmatprep.mubr.bf16.mxu1 %v12471_v63  ;;  %6811 = vmatprep.mubr.bf16.mxu0 %v11019_v3 }
 0x4c9   : > { %v10014_v49 = vpop.f32.mrb[88].mxu1  ;;  %v10114_v8 = vpop.f32.mrb[112].mxu0 }
 0x4ca   : > { %v10015_v61 = vpop.f32.mrb[89].mxu1  ;;  %v10115_v12 = vpop.f32.mrb[113].mxu0 }
 0x4cb   : > { %v10016_v55 = vadd.f32 %v10015_v61, %v10014_v49  ;;  %v10116_v58 = vadd.f32 %v10115_v12, %v10114_v8  ;;  %v10017_v45 = vpop.f32.mrb[90].mxu1  ;;  %v10117_v33 = vpop.f32.mrb[114].mxu0 }
 0x4cc   : > { %v10018_v10 = vpop.f32.mrb[91].mxu1  ;;  %v10118_v38 = vpop.f32.mrb[115].mxu0 }
 0x4cd   : > { %v6259_v19 = vadd.f32 %v10016_v55, %v12824_v47  ;;  %v12989_v53 = vadd.f32 %v10116_v58, %v6243_v50  ;;  %v10019_v22 = vadd.f32 %v10018_v10, %v10017_v45  ;;  %v10119_v4 = vadd.f32 %v10118_v38, %v10117_v33 }
 0x4ce   : > { %6812 = vmatmul.mubr.bf16.gmra.mrb[220].mxu0 %v11019_v3  ;;  %6861 = vmatmul.mubr.bf16.gmra.mrb[196].mxu1 %v12475_v2 }
 0x4cf   : > { %v6262_v27 = vadd.f32 %v10019_v22, %v12834_v7  ;;  %v12994_v1 = vadd.f32 %v10119_v4, %v6246_v14  ;;  %6868 = vmatprep.mubr.bf16.mxu1 %v12491_v17  ;;  %10690 = vmatprep.mubr.bf16.mxu0 %v12471_v63 }
 0x4d1   : > { %v10020_v28 = vpop.f32.mrb[92].mxu1  ;;  %v10120_v56 = vpop.f32.mrb[116].mxu0 }
 0x4d2   : > { %v10021_v52 = vpop.f32.mrb[93].mxu1  ;;  %v10121_v47 = vpop.f32.mrb[117].mxu0 }
 0x4d3   : > { %v10022_v50 = vadd.f32 %v10021_v52, %v10020_v28  ;;  %v10122_v23 = vadd.f32 %v10121_v47, %v10120_v56  ;;  %v10023_v11 = vpop.f32.mrb[94].mxu1  ;;  %v10123_v49 = vpop.f32.mrb[118].mxu0 }
 0x4d4   : > { %v10024_v8 = vpop.f32.mrb[95].mxu1  ;;  %v10124_v61 = vpop.f32.mrb[119].mxu0 }
 0x4d5   : > { %v6267_v2 = vadd.f32 %v10022_v50, %v12847_v30  ;;  %v12999_v12 = vadd.f32 %v10122_v23, %v6251_v15  ;;  %v10025_v7 = vadd.f32 %v10024_v8, %v10023_v11  ;;  %v10125_v14 = vadd.f32 %v10124_v61, %v10123_v49 }
 0x4d6   : > { %6869 = vmatmul.mubr.bf16.gmra.mrb[200].mxu1 %v12471_v63  ;;  %10691 = vmatmul.mubr.bf16.vlgmr.msra.gmra.mrb[224].mxu0 %v12491_v17 }
 0x4d7   : > { %v6270_v55 = vadd.f32 %v10025_v7, %v12854_v9  ;;  %v13004_v58 = vadd.f32 %v10125_v14, %v6254_v18  ;;  %6876 = vmatprep.mubr.bf16.mxu1 %v12487_v59  ;;  %10694 = vmatprep.mubr.bf16.mxu0 %v12487_v59 }
 0x4d9   : > { %v10026_v45 = vpop.f32.mrb[96].mxu1  ;;  %v10126_v33 = vpop.f32.mrb[120].mxu0 }
 0x4da   : > { %v10027_v10 = vpop.f32.mrb[97].mxu1  ;;  %v10127_v30 = vpop.f32.mrb[121].mxu0 }
 0x4db   : > { %v10028_v15 = vadd.f32 %v10027_v10, %v10026_v45  ;;  %v10128_v38 = vadd.f32 %v10127_v30, %v10126_v33  ;;  %v10029_v22 = vpop.f32.mrb[98].mxu1  ;;  %v10129_v4 = vpop.f32.mrb[122].mxu0 }
 0x4dc   : > { %v10030_v28 = vpop.f32.mrb[99].mxu1  ;;  %v10130_v63 = vpop.f32.mrb[123].mxu0 }
 0x4dd   : > { %v6275_v56 = vadd.f32 %v10028_v15, %v12863_v54  ;;  %v13009_v52 = vadd.f32 %v10128_v38, %v6259_v19  ;;  %v10031_v9 = vadd.f32 %v10030_v28, %v10029_v22  ;;  %v10131_v18 = vadd.f32 %v10130_v63, %v10129_v4 }
 0x4de   : > { %6877 = vmatmul.mubr.bf16.gmra.mrb[204].mxu1 %v12491_v17  ;;  %10695 = vmatmul.mubr.bf16.gmra.mrb[228].mxu0 %v12507_v16 }
 0x4df   : > { %v6278_v47 = vadd.f32 %v10031_v9, %v12870_v21  ;;  %v13014_v50 = vadd.f32 %v10131_v18, %v6262_v27  ;;  %6884 = vmatprep.mubr.bf16.mxu1 %v12507_v16  ;;  %10698 = vmatprep.mubr.bf16.mxu0 %v12503_v40 }
 0x4e1   : > { %v10032_v23 = vpop.f32.mrb[100].mxu1  ;;  %v10132_v11 = vpop.f32.mrb[124].mxu0 }
 0x4e2   : > { %v10033_v49 = vpop.f32.mrb[101].mxu1  ;;  %v10133_v54 = vpop.f32.mrb[125].mxu0 }
 0x4e3   : > { %v10034_v19 = vadd.f32 %v10033_v49, %v10032_v23  ;;  %v10134_v8 = vadd.f32 %v10133_v54, %v10132_v11  ;;  %v10035_v61 = vpop.f32.mrb[102].mxu1  ;;  %v10135_v7 = vpop.f32.mrb[126].mxu0 }
 0x4e4   : > { %v10036_v14 = vpop.f32.mrb[103].mxu1  ;;  %v10136_v17 = vpop.f32.mrb[127].mxu0 }
 0x4e5   : > { %v6283_v45 = vadd.f32 %v10034_v19, %v12876_v42  ;;  %v13019_v33 = vadd.f32 %v10134_v8, %v6267_v2  ;;  %v10037_v21 = vadd.f32 %v10036_v14, %v10035_v61  ;;  %v10137_v27 = vadd.f32 %v10136_v17, %v10135_v7 }
 0x4e6   : > { %6885 = vmatmul.mubr.bf16.gmra.mrb[208].mxu1 %v12487_v59  ;;  %10699 = vmatmul.mubr.bf16.gmra.mrb[232].mxu0 %v12520_v35 }
 0x4e7   : > { %v6286_v10 = vadd.f32 %v10037_v21, %v12880_v62  ;;  %v13024_v30 = vadd.f32 %v10137_v27, %v6270_v55  ;;  %6892 = vmatprep.mubr.bf16.mxu1 %v12503_v40  ;;  %10702 = vmatprep.mubr.bf16.mxu0 %v12518_v51 }
 0x4e9   : > { %v10038_v15 = vpop.f32.mrb[104].mxu1  ;;  %v10138_v38 = vpop.f32.mrb[128].mxu0 }
 0x4ea   : > { %v10039_v22 = vpop.f32.mrb[105].mxu1  ;;  %v10139_v42 = vpop.f32.mrb[129].mxu0 }
 0x4eb   : > { %v10040_v2 = vadd.f32 %v10039_v22, %v10038_v15  ;;  %v10140_v4 = vadd.f32 %v10139_v42, %v10138_v38  ;;  %v10041_v28 = vpop.f32.mrb[106].mxu1  ;;  %v10141_v63 = vpop.f32.mrb[130].mxu0 }
 0x4ec   : > { %v10042_v9 = vpop.f32.mrb[107].mxu1  ;;  %v10142_v59 = vpop.f32.mrb[131].mxu0 }
 0x4ed   : > { %v6291_v18 = vadd.f32 %v10040_v2, %v12886_v57  ;;  %v13029_v23 = vadd.f32 %v10140_v4, %v6275_v56  ;;  %v10043_v62 = vadd.f32 %v10042_v9, %v10041_v28  ;;  %v10143_v55 = vadd.f32 %v10142_v59, %v10141_v63 }
 0x4ee   : > { %6893 = vmatmul.mubr.bf16.gmra.mrb[212].mxu1 %v12507_v16  ;;  %10703 = vmatmul.mubr.bf16.gmra.mrb[236].mxu0 %v12537_v13 }
 0x4ef   : > { %v6294_v11 = vadd.f32 %v10043_v62, %v12890_v34  ;;  %v13034_v49 = vadd.f32 %v10143_v55, %v6278_v47  ;;  %6900 = vmatprep.mubr.bf16.mxu1 %v12520_v35  ;;  %10706 = vmatprep.mubr.bf16.mxu0 %v12530_v32 }
 0x4f1   : > { %v10044_v54 = vpop.f32.mrb[108].mxu1  ;;  %v10144_v19 = vpop.f32.mrb[132].mxu0 }
 0x4f2   : > { %v10045_v8 = vpop.f32.mrb[109].mxu1  ;;  %v10145_v57 = vpop.f32.mrb[133].mxu0 }
 0x4f3   : > { %v10046_v56 = vadd.f32 %v10045_v8, %v10044_v54  ;;  %v10146_v61 = vadd.f32 %v10145_v57, %v10144_v19  ;;  %v10047_v7 = vpop.f32.mrb[110].mxu1  ;;  %v10147_v14 = vpop.f32.mrb[134].mxu0 }
 0x4f4   : > { %v10048_v17 = vpop.f32.mrb[111].mxu1  ;;  %v10148_v16 = vpop.f32.mrb[135].mxu0 }
 0x4f5   : > { %v6299_v21 = vadd.f32 %v10046_v56, %v12896_v39  ;;  %v13039_v27 = vadd.f32 %v10146_v61, %v6283_v45  ;;  %v10049_v34 = vadd.f32 %v10048_v17, %v10047_v7  ;;  %v10149_v47 = vadd.f32 %v10148_v16, %v10147_v14 }
 0x4f6   : > { %6901 = vmatmul.mubr.bf16.gmra.mrb[216].mxu1 %v12503_v40  ;;  %10707 = vmatmul.mubr.bf16.gmra.mrb[240].mxu0 %v11019_v3 }
 0x4f7   : > { %v6302_v15 = vadd.f32 %v10049_v34, %v12900_v6  ;;  %v13044_v38 = vadd.f32 %v10149_v47, %v6286_v10  ;;  %6908 = vmatprep.mubr.bf16.mxu1 %v12518_v51  ;;  %10710 = vmatprep.mubr.bf16.mxu0 %v11019_v3 }
 0x4f9   : > { %v10050_v22 = vpop.f32.mrb[112].mxu1  ;;  %v10150_v42 = vpop.f32.mrb[136].mxu0 }
 0x4fa   : > { %v10051_v2 = vpop.f32.mrb[113].mxu1  ;;  %v10151_v39 = vpop.f32.mrb[137].mxu0 }
 0x4fb   : > { %v10052_v45 = vadd.f32 %v10051_v2, %v10050_v22  ;;  %v10152_v4 = vadd.f32 %v10151_v39, %v10150_v42  ;;  %v10053_v28 = vpop.f32.mrb[114].mxu1  ;;  %v10153_v63 = vpop.f32.mrb[138].mxu0 }
 0x4fc   : > { %v10054_v9 = vpop.f32.mrb[115].mxu1  ;;  %v10154_v40 = vpop.f32.mrb[139].mxu0 }
 0x4fd   : > { %v6307_v59 = vadd.f32 %v10052_v45, %v12906_v41  ;;  %v13049_v62 = vadd.f32 %v10152_v4, %v6291_v18  ;;  %v10055_v6 = vadd.f32 %v10054_v9, %v10053_v28  ;;  %v10155_v10 = vadd.f32 %v10154_v40, %v10153_v63 }
 0x4fe   : > { %6909 = vmatmul.mubr.bf16.gmra.mrb[220].mxu1 %v12520_v35  ;;  %10711 = vmatmul.mubr.bf16.gmra.mrb[244].mxu0 %v11019_v3 }
 0x4ff   : > { %v6310_v55 = vadd.f32 %v10055_v6, %v12910_v46  ;;  %v13054_v54 = vadd.f32 %v10155_v10, %v6294_v11  ;;  %6916 = vmatprep.mubr.bf16.mxu1 %v12537_v13  ;;  %10714 = vmatprep.mubr.bf16.mxu0 %v11019_v3 }
 0x501   : > { %v10056_v19 = vpop.f32.mrb[116].mxu1  ;;  %v10156_v8 = vpop.f32.mrb[140].mxu0 }
 0x502   : > { %v10057_v57 = vpop.f32.mrb[117].mxu1  ;;  %v10157_v41 = vpop.f32.mrb[141].mxu0 }
 0x503   : > { %v10058_v18 = vadd.f32 %v10057_v57, %v10056_v19  ;;  %v10158_v56 = vadd.f32 %v10157_v41, %v10156_v8  ;;  %v10059_v61 = vpop.f32.mrb[118].mxu1  ;;  %v10159_v7 = vpop.f32.mrb[142].mxu0 }
 0x504   : > { %v10060_v14 = vpop.f32.mrb[119].mxu1  ;;  %v10160_v35 = vpop.f32.mrb[143].mxu0 }
 0x505   : > { %v6315_v17 = vadd.f32 %v10058_v18, %v12916_v5  ;;  %v13059_v16 = vadd.f32 %v10158_v56, %v6299_v21  ;;  %v10061_v46 = vadd.f32 %v10060_v14, %v10059_v61  ;;  %v10161_v11 = vadd.f32 %v10160_v35, %v10159_v7 }
 0x506   : > { %6917 = vmatmul.mubr.bf16.gmra.mrb[224].mxu1 %v12518_v51  ;;  %10715 = vmatmul.mubr.bf16.gmra.mrb[248].mxu0 %v11019_v3 }
 0x507   : > { %v6318_v34 = vadd.f32 %v10061_v46, %v12920_v24  ;;  %v13064_v47 = vadd.f32 %v10161_v11, %v6302_v15  ;;  %6924 = vmatprep.mubr.bf16.mxu1 %v12530_v32  ;;  %10718 = vmatprep.mubr.bf16.mxu0 %v11019_v3 }
 0x509   : > { %v10062_v22 = vpop.f32.mrb[120].mxu1  ;;  %v10162_v42 = vpop.f32.mrb[144].mxu0 }
 0x50a   : > { %v10063_v2 = vpop.f32.mrb[121].mxu1  ;;  %v10163_v5 = vpop.f32.mrb[145].mxu0 }
 0x50b   : > { %v10064_v21 = vadd.f32 %v10063_v2, %v10062_v22  ;;  %v10164_v39 = vadd.f32 %v10163_v5, %v10162_v42  ;;  %v10065_v45 = vpop.f32.mrb[122].mxu1  ;;  %v10165_v4 = vpop.f32.mrb[146].mxu0 }
 0x50c   : > { %v10066_v28 = vpop.f32.mrb[123].mxu1  ;;  %v10166_v51 = vpop.f32.mrb[147].mxu0 }
 0x50d   : > { %v6323_v63 = vadd.f32 %v10064_v21, %v12926_v26  ;;  %v13069_v9 = vadd.f32 %v10164_v39, %v6307_v59  ;;  %v10067_v24 = vadd.f32 %v10066_v28, %v10065_v45  ;;  %v10167_v15 = vadd.f32 %v10166_v51, %v10165_v4 }
 0x50e   : > { %6925 = vmatmul.mubr.bf16.gmra.mrb[228].mxu1 %v12537_v13  ;;  %10719 = vmatmul.mubr.bf16.gmra.mrb[252].mxu0 %v11019_v3 }
 0x50f   : > { %v6326_v40 = vadd.f32 %v10067_v24, %v12931_v36  ;;  %v13074_v6 = vadd.f32 %v10167_v15, %v6310_v55  ;;  %6932 = vmatprep.mubr.bf16.mxu1 %v11019_v3 }
 0x511   : > { %v10068_v10 = vpop.f32.mrb[124].mxu1  ;;  %v10168_v19 = vpop.f32.mrb[148].mxu0 }
 0x512   : > { %v10069_v8 = vpop.f32.mrb[125].mxu1  ;;  %v10169_v57 = vpop.f32.mrb[149].mxu0 }
 0x513   : > { %v10070_v41 = vadd.f32 %v10069_v8, %v10068_v10  ;;  %v10170_v26 = vadd.f32 %v10169_v57, %v10168_v19  ;;  %v10071_v59 = vpop.f32.mrb[126].mxu1  ;;  %v10171_v18 = vpop.f32.mrb[150].mxu0 }
 0x514   : > { %v10072_v56 = vpop.f32.mrb[127].mxu1  ;;  %v10172_v61 = vpop.f32.mrb[151].mxu0 }
 0x515   : > { %v6331_v13 = vadd.f32 %v10070_v41, %v12938_v29  ;;  %v13078_v7 = vadd.f32 %v10170_v26, %v6315_v17  ;;  %v10073_v14 = vadd.f32 %v10072_v56, %v10071_v59  ;;  %v10173_v36 = vadd.f32 %v10172_v61, %v10171_v18 }
 0x516   : > { %6933 = vmatmul.mubr.bf16.gmra.mrb[232].mxu1 %v12530_v32 }
 0x517   : > { %v6334_v55 = vadd.f32 %v10073_v14, %v12943_v48  ;;  %v13082_v35 = vadd.f32 %v10173_v36, %v6318_v34  ;;  %6940 = vmatprep.mubr.bf16.mxu1 %v11019_v3 }
 0x519   : > { %v10174_v46 = vpop.f32.mrb[152].mxu0  ;;  %v10202_v11 = vpop.f32.mrb[128].mxu1 }
 0x51a   : > { %v10175_v22 = vpop.f32.mrb[153].mxu0  ;;  %v10203_v42 = vpop.f32.mrb[129].mxu1 }
 0x51b   : > { %v10176_v2 = vadd.f32 %v10175_v22, %v10174_v46  ;;  %v10204_v5 = vadd.f32 %v10203_v42, %v10202_v11  ;;  %v10177_v21 = vpop.f32.mrb[154].mxu0  ;;  %v10205_v29 = vpop.f32.mrb[130].mxu1 }
 0x51c   : > { %v10178_v17 = vpop.f32.mrb[155].mxu0  ;;  %v10206_v39 = vpop.f32.mrb[131].mxu1 }
 0x51d   : > { %v13085_v45 = vadd.f32 %v10176_v2, %v6323_v63  ;;  %v6533_v32 = vadd.f32 %v10204_v5, %v12949_v20  ;;  %v10179_v4 = vadd.f32 %v10178_v17, %v10177_v21  ;;  %v10207_v48 = vadd.f32 %v10206_v39, %v10205_v29 }
 0x51e   : > { %6941 = vmatmul.mubr.bf16.gmra.mrb[236].mxu1 %v11019_v3 }
 0x51f   : > { %v13089_v34 = vadd.f32 %v10179_v4, %v6326_v40  ;;  %v6536_v28 = vadd.f32 %v10207_v48, %v12954_v31  ;;  %6948 = vmatprep.mubr.bf16.mxu1 %v11019_v3 }
 0x521   : > { %v10180_v51 = vpop.f32.mrb[156].mxu0  ;;  %v10208_v24 = vpop.f32.mrb[132].mxu1 }
 0x522   : > { %v10181_v15 = vpop.f32.mrb[157].mxu0  ;;  %v10209_v10 = vpop.f32.mrb[133].mxu1 }
 0x523   : > { %v10182_v19 = vadd.f32 %v10181_v15, %v10180_v51  ;;  %v10210_v8 = vadd.f32 %v10209_v10, %v10208_v24  ;;  %v10183_v63 = vpop.f32.mrb[158].mxu0  ;;  %v10211_v57 = vpop.f32.mrb[134].mxu1 }
 0x524   : > { %v10184_v41 = vpop.f32.mrb[159].mxu0  ;;  %v10212_v20 = vpop.f32.mrb[135].mxu1 }
 0x525   : > { %v13093_v26 = vadd.f32 %v10182_v19, %v6331_v13  ;;  %v6541_v59 = vadd.f32 %v10210_v8, %v12959_v37  ;;  %v10185_v40 = vadd.f32 %v10184_v41, %v10183_v63  ;;  %v10213_v18 = vadd.f32 %v10212_v20, %v10211_v57 }
 0x526   : > { %6949 = vmatmul.mubr.bf16.gmra.mrb[240].mxu1 %v11019_v3 }
 0x527   : > { %v13097_v31 = vadd.f32 %v10185_v40, %v6334_v55  ;;  %v6544_v56 = vadd.f32 %v10213_v18, %v12964_v44  ;;  %6956 = vmatprep.mubr.bf16.mxu1 %v11019_v3 }
 0x529   : > { %v10214_v61 = vpop.f32.mrb[136].mxu1  ;;  %v10314_v14 = vpop.f32.mrb[160].mxu0 }
 0x52a   : > { %v10215_v36 = vpop.f32.mrb[137].mxu1  ;;  %v10315_v46 = vpop.f32.mrb[161].mxu0 }
 0x52b   : > { %v10216_v11 = vadd.f32 %v10215_v36, %v10214_v61  ;;  %v10316_v22 = vadd.f32 %v10315_v46, %v10314_v14  ;;  %v10217_v13 = vpop.f32.mrb[138].mxu1  ;;  %v10317_v42 = vpop.f32.mrb[162].mxu0 }
 0x52c   : > { %v10218_v2 = vpop.f32.mrb[139].mxu1  ;;  %v10318_v37 = vpop.f32.mrb[163].mxu0 }
 0x52d   : > { %v6549_v5 = vadd.f32 %v10216_v11, %v12969_v25  ;;  %v13102_v21 = vadd.f32 %v10316_v22, %v6533_v32  ;;  %v10219_v55 = vadd.f32 %v10218_v2, %v10217_v13  ;;  %v10319_v29 = vadd.f32 %v10318_v37, %v10317_v42 }
 0x52e   : > { %6957 = vmatmul.mubr.bf16.gmra.mrb[244].mxu1 %v11019_v3 }
 0x52f   : > { %v6552_v44 = vadd.f32 %v10219_v55, %v12974_v0  ;;  %v13106_v17 = vadd.f32 %v10319_v29, %v6536_v28  ;;  %6964 = vmatprep.mubr.bf16.mxu1 %v11019_v3 }
 0x531   : > { %v10220_v39 = vpop.f32.mrb[140].mxu1  ;;  %v10320_v4 = vpop.f32.mrb[164].mxu0 }
 0x532   : > { %v10221_v48 = vpop.f32.mrb[141].mxu1  ;;  %v10321_v51 = vpop.f32.mrb[165].mxu0 }
 0x533   : > { %v10222_v24 = vadd.f32 %v10221_v48, %v10220_v39  ;;  %v10322_v15 = vadd.f32 %v10321_v51, %v10320_v4  ;;  %v10223_v10 = vpop.f32.mrb[142].mxu1  ;;  %v10323_v25 = vpop.f32.mrb[166].mxu0 }
 0x534   : > { %v10224_v32 = vpop.f32.mrb[143].mxu1  ;;  %v10324_v19 = vpop.f32.mrb[167].mxu0 }
 0x535   : > { %v6557_v8 = vadd.f32 %v10222_v24, %v12979_v60  ;;  %v13110_v63 = vadd.f32 %v10322_v15, %v6541_v59  ;;  %v10225_v57 = vadd.f32 %v10224_v32, %v10223_v10  ;;  %v10325_v0 = vadd.f32 %v10324_v19, %v10323_v25 }
 0x536   : > { %6965 = vmatmul.mubr.bf16.gmra.mrb[248].mxu1 %v11019_v3 }
 0x537   : > { %v6560_v28 = vadd.f32 %v10225_v57, %v12984_v43  ;;  %v13114_v41 = vadd.f32 %v10325_v0, %v6544_v56  ;;  %6972 = vmatprep.mubr.bf16.mxu1 %v11019_v3 }
 0x539   : > { %v10226_v20 = vpop.f32.mrb[144].mxu1  ;;  %v10326_v40 = vpop.f32.mrb[168].mxu0 }
 0x53a   : > { %v10227_v18 = vpop.f32.mrb[145].mxu1  ;;  %v10327_v61 = vpop.f32.mrb[169].mxu0 }
 0x53b   : > { %v10228_v14 = vadd.f32 %v10227_v18, %v10226_v20  ;;  %v10328_v36 = vadd.f32 %v10327_v61, %v10326_v40  ;;  %v10229_v46 = vpop.f32.mrb[146].mxu1  ;;  %v10329_v60 = vpop.f32.mrb[170].mxu0 }
 0x53c   : > { %v10230_v59 = vpop.f32.mrb[147].mxu1  ;;  %v10330_v11 = vpop.f32.mrb[171].mxu0 }
 0x53d   : > { %v6565_v22 = vadd.f32 %v10228_v14, %v12989_v53  ;;  %v13118_v13 = vadd.f32 %v10328_v36, %v6549_v5  ;;  %v10231_v42 = vadd.f32 %v10230_v59, %v10229_v46  ;;  %v10331_v43 = vadd.f32 %v10330_v11, %v10329_v60 }
 0x53e   : > { %6973 = vmatmul.mubr.bf16.gmra.mrb[252].mxu1 %v11019_v3 }
 0x53f   : > { %v6568_v56 = vadd.f32 %v10231_v42, %v12994_v1  ;;  %v13122_v2 = vadd.f32 %v10331_v43, %v6552_v44 }
 0x541   : > { %v10232_v37 = vpop.f32.mrb[148].mxu1  ;;  %v10332_v55 = vpop.f32.mrb[172].mxu0 }
 0x542   : > { %v10233_v29 = vpop.f32.mrb[149].mxu1  ;;  %v10333_v39 = vpop.f32.mrb[173].mxu0 }
 0x543   : > { %v10234_v4 = vadd.f32 %v10233_v29, %v10232_v37  ;;  %v10334_v48 = vadd.f32 %v10333_v39, %v10332_v55  ;;  %v10235_v51 = vpop.f32.mrb[150].mxu1  ;;  %v10335_v24 = vpop.f32.mrb[174].mxu0 }
 0x544   : > { %v10236_v15 = vpop.f32.mrb[151].mxu1  ;;  %v10336_v53 = vpop.f32.mrb[175].mxu0 }
 0x545   : > { %v6573_v5 = vadd.f32 %v10234_v4, %v12999_v12  ;;  %v13125_v10 = vadd.f32 %v10334_v48, %v6557_v8  ;;  %v10237_v25 = vadd.f32 %v10236_v15, %v10235_v51  ;;  %v10337_v3 = vadd.f32 %v10336_v53, %v10335_v24 }
 0x547   : > { %v6576_v1 = vadd.f32 %v10237_v25, %v13004_v58  ;;  %v13128_v44 = vadd.f32 %v10337_v3, %v6560_v28 }
 0x549   : > { %v10238_v32 = vpop.f32.mrb[152].mxu1  ;;  %v10338_v19 = vpop.f32.mrb[176].mxu0 }
 0x54a   : > { %v10239_v57 = vpop.f32.mrb[153].mxu1  ;;  %v10339_v0 = vpop.f32.mrb[177].mxu0 }
 0x54b   : > { %v10240_v20 = vadd.f32 %v10239_v57, %v10238_v32  ;;  %v10340_v40 = vadd.f32 %v10339_v0, %v10338_v19  ;;  %v10241_v18 = vpop.f32.mrb[154].mxu1  ;;  %v10341_v61 = vpop.f32.mrb[178].mxu0 }
 0x54c   : > { %v10242_v14 = vpop.f32.mrb[155].mxu1  ;;  %v10342_v36 = vpop.f32.mrb[179].mxu0 }
 0x54d   : > { %v6581_v12 = vadd.f32 %v10240_v20, %v13009_v52  ;;  %v13131_v8 = vadd.f32 %v10340_v40, %v6565_v22  ;;  %v10243_v46 = vadd.f32 %v10242_v14, %v10241_v18  ;;  %v10343_v60 = vadd.f32 %v10342_v36, %v10341_v61 }
 0x54f   : > { %v6584_v58 = vadd.f32 %v10243_v46, %v13014_v50  ;;  %v13134_v28 = vadd.f32 %v10343_v60, %v6568_v56 }
 0x551   : > { %v10244_v59 = vpop.f32.mrb[156].mxu1  ;;  %v10344_v11 = vpop.f32.mrb[180].mxu0 }
 0x552   : > { %v10245_v42 = vpop.f32.mrb[157].mxu1  ;;  %v10345_v43 = vpop.f32.mrb[181].mxu0 }
 0x553   : > { %v10246_v37 = vadd.f32 %v10245_v42, %v10244_v59  ;;  %v10346_v55 = vadd.f32 %v10345_v43, %v10344_v11  ;;  %v10247_v29 = vpop.f32.mrb[158].mxu1  ;;  %v10347_v39 = vpop.f32.mrb[182].mxu0 }
 0x554   : > { %v10248_v4 = vpop.f32.mrb[159].mxu1  ;;  %v10348_v48 = vpop.f32.mrb[183].mxu0 }
 0x555   : > { %v6589_v52 = vadd.f32 %v10246_v37, %v13019_v33  ;;  %v13137_v22 = vadd.f32 %v10346_v55, %v6573_v5  ;;  %v10249_v51 = vadd.f32 %v10248_v4, %v10247_v29  ;;  %v10349_v24 = vadd.f32 %v10348_v48, %v10347_v39 }
 0x557   : > { %v6592_v50 = vadd.f32 %v10249_v51, %v13024_v30  ;;  %v13140_v56 = vadd.f32 %v10349_v24, %v6576_v1 }
 0x559   : > { %v10250_v15 = vpop.f32.mrb[160].mxu1  ;;  %v10350_v53 = vpop.f32.mrb[184].mxu0 }
 0x55a   : > { %v10251_v25 = vpop.f32.mrb[161].mxu1  ;;  %v10351_v3 = vpop.f32.mrb[185].mxu0 }
 0x55b   : > { %v10252_v32 = vadd.f32 %v10251_v25, %v10250_v15  ;;  %v10352_v19 = vadd.f32 %v10351_v3, %v10350_v53  ;;  %v10253_v57 = vpop.f32.mrb[162].mxu1  ;;  %v10353_v0 = vpop.f32.mrb[186].mxu0 }
 0x55c   : > { %v10254_v20 = vpop.f32.mrb[163].mxu1  ;;  %v10354_v40 = vpop.f32.mrb[187].mxu0 }
 0x55d   : > { %v6597_v33 = vadd.f32 %v10252_v32, %v13029_v23  ;;  %v13143_v5 = vadd.f32 %v10352_v19, %v6581_v12  ;;  %v10255_v18 = vadd.f32 %v10254_v20, %v10253_v57  ;;  %v10355_v61 = vadd.f32 %v10354_v40, %v10353_v0 }
 0x55f   : > { %v6600_v30 = vadd.f32 %v10255_v18, %v13034_v49  ;;  %v13146_v1 = vadd.f32 %v10355_v61, %v6584_v58 }
 0x561   : > { %v10256_v14 = vpop.f32.mrb[164].mxu1  ;;  %v10356_v36 = vpop.f32.mrb[188].mxu0 }
 0x562   : > { %v10257_v46 = vpop.f32.mrb[165].mxu1  ;;  %v10357_v60 = vpop.f32.mrb[189].mxu0 }
 0x563   : > { %v10258_v59 = vadd.f32 %v10257_v46, %v10256_v14  ;;  %v10358_v11 = vadd.f32 %v10357_v60, %v10356_v36  ;;  %v10259_v42 = vpop.f32.mrb[166].mxu1  ;;  %v10359_v43 = vpop.f32.mrb[190].mxu0 }
 0x564   : > { %v10260_v37 = vpop.f32.mrb[167].mxu1  ;;  %v10360_v55 = vpop.f32.mrb[191].mxu0 }
 0x565   : > { %v6605_v23 = vadd.f32 %v10258_v59, %v13039_v27  ;;  %v13149_v12 = vadd.f32 %v10358_v11, %v6589_v52  ;;  %v10261_v29 = vadd.f32 %v10260_v37, %v10259_v42  ;;  %v10361_v39 = vadd.f32 %v10360_v55, %v10359_v43  ;;  %v7224_v37 = vld [vmem:[#allocation4 + $0x11] sm:$0x1]  ;;  %v7143_v55 = vld [vmem:[#allocation4 + $0x10] sm:$0x1] }
 0x567   : > { %13792 = vst [vmem:[#allocation5_spill] sm:$0xff] %v13149_v12  ;;  %v6608_v49 = vadd.f32 %v10261_v29, %v13044_v38  ;;  %v13152_v58 = vadd.f32 %v10361_v39, %v6592_v50  ;;  %v7372_v29 = vld [vmem:[#allocation4 + $0x13] sm:$0x1]  ;;  %v7298_v39 = vld [vmem:[#allocation4 + $0x12] sm:$0x1] }
 0x569   : > { %13793 = vst [vmem:[#allocation6_spill] sm:$0xff] %v13152_v58  ;;  %v10262_v4 = vpop.f32.mrb[168].mxu1  ;;  %v10362_v48 = vpop.f32.mrb[192].mxu0 }
 0x56a   : > { %v10263_v51 = vpop.f32.mrb[169].mxu1  ;;  %v10363_v24 = vpop.f32.mrb[193].mxu0 }
 0x56b   : > { %v10264_v15 = vadd.f32 %v10263_v51, %v10262_v4  ;;  %v10364_v53 = vadd.f32 %v10363_v24, %v10362_v48  ;;  %v10265_v25 = vpop.f32.mrb[170].mxu1  ;;  %v10365_v3 = vpop.f32.mrb[194].mxu0  ;;  %v7446_v51 = vld [vmem:[#allocation4 + $0x14] sm:$0x1]  ;;  %v7520_v24 = vld [vmem:[#allocation4 + $0x15] sm:$0x1] }
 0x56c   : > { %v10266_v32 = vpop.f32.mrb[171].mxu1  ;;  %v10366_v19 = vpop.f32.mrb[195].mxu0 }
 0x56d   : > { %v6613_v27 = vadd.f32 %v10264_v15, %v13049_v62  ;;  %v13155_v52 = vadd.f32 %v10364_v53, %v6597_v33  ;;  %v10267_v57 = vadd.f32 %v10266_v32, %v10265_v25  ;;  %v10367_v0 = vadd.f32 %v10366_v19, %v10365_v3  ;;  %v7223_v19 = vld [vmem:[#allocation4 + $0x1] sm:$0x1] }
 0x56e   : > { %v7255_v53 = vrot.slane %v7224_v37, 7  ;;  %v7174_v25 = vrot.slane %v7143_v55, 7  ;;  %v7297_v37 = vld [vmem:[#allocation4 + $0x2] sm:$0x1]  ;;  %v7445_v55 = vld [vmem:[#allocation4 + $0x4] sm:$0x1] }
 0x56f   : > { %13794 = vst [vmem:[#allocation7_spill] sm:$0xff] %v13155_v52  ;;  %v6616_v38 = vadd.f32 %v10267_v57, %v13054_v54  ;;  %v13158_v50 = vadd.f32 %v10367_v0, %v6600_v30  ;;  %v7142_v57 = vld [vmem:[#allocation4] sm:$0x1] }
 0x570   : > { %v13172_v0 = vld [vmem:[#allocation4 + $0x20] sm:$0x1] }
 0x571   : > { %13795 = vst [vmem:[#allocation8_spill] sm:$0xff] %v13158_v50  ;;  %v10268_v20 = vpop.f32.mrb[172].mxu1  ;;  %v10368_v40 = vpop.f32.mrb[196].mxu0 }
 0x572   : > { %v10269_v18 = vpop.f32.mrb[173].mxu1  ;;  %v10369_v61 = vpop.f32.mrb[197].mxu0 }
 0x573   : > { %v10270_v14 = vadd.f32 %v10269_v18, %v10268_v20  ;;  %v10370_v36 = vadd.f32 %v10369_v61, %v10368_v40  ;;  %v10271_v46 = vpop.f32.mrb[174].mxu1  ;;  %v10371_v60 = vpop.f32.mrb[198].mxu0  ;;  %v13174_v20 = vld [vmem:[#allocation4 + $0x23] sm:$0x1] }
 0x574   : > { %v10272_v59 = vpop.f32.mrb[175].mxu1  ;;  %v10372_v11 = vpop.f32.mrb[199].mxu0  ;;  %v7371_v61 = vld [vmem:[#allocation4 + $0x3] sm:$0x1] }
 0x575   : > { %v13161_v62 = vadd.f32 %v10270_v14, %v13059_v16  ;;  %v13163_v33 = vadd.f32 %v10370_v36, %v6605_v23  ;;  %v10273_v42 = vadd.f32 %v10272_v59, %v10271_v46  ;;  %v10373_v43 = vadd.f32 %v10372_v11, %v10371_v60  ;;  %v13170_v23 = vld [vmem:[#allocation4 + $0x21] sm:$0x1] }
 0x576   : > { %v7403_v14 = vrot.slane %v7372_v29, 7  ;;  %v7329_v36 = vrot.slane %v7298_v39, 7  ;;  %v7477_v46 = vrot.slane %v7446_v51, 7  ;;  %v7551_v60 = vrot.slane %v7520_v24, 7  ;;  %v7299_v39 = vld [vmem:[#allocation4 + $0x22] sm:$0x1] }
 0x577   : > { %13796 = vst [vmem:[#allocation9_spill] sm:$0xff] %v13163_v33  ;;  %v13166_v54 = vadd.f32 %v10273_v42, %v13064_v47  ;;  %v13168_v30 = vadd.f32 %v10373_v43, %v6608_v49  ;;  %v7405_v29 = vrot.slane %v13174_v20, 6  ;;  %v7145_v24 = vld [vmem:[#allocation4 + $0x30] sm:$0x1] }
 0x579   : > { %13797 = vst [vmem:[#allocation10_spill] sm:$0xff] %v13168_v30  ;;  %v10274_v4 = vpop.f32.mrb[176].mxu1  ;;  %v10374_v48 = vpop.f32.mrb[200].mxu0 }
 0x57a   : > { %v10275_v16 = vpop.f32.mrb[177].mxu1  ;;  %v10375_v15 = vpop.f32.mrb[201].mxu0 }
 0x57b   : > { %v10276_v3 = vadd.f32 %v10275_v16, %v10274_v4  ;;  %v10376_v47 = vadd.f32 %v10375_v15, %v10374_v48  ;;  %v10277_v32 = vpop.f32.mrb[178].mxu1  ;;  %v10377_v49 = vpop.f32.mrb[202].mxu0  ;;  %v7519_v4 = vld [vmem:[#allocation4 + $0x5] sm:$0x1]  ;;  %v7257_v48 = vrot.slane %v13170_v23, 6  ;;  %v7177_v16 = vrot.slane %v13172_v0, 6 }
 0x57c   : > { %v10278_v40 = vpop.f32.mrb[179].mxu1  ;;  %v10378_v18 = vpop.f32.mrb[203].mxu0  ;;  %v7374_v15 = vld [vmem:[#allocation4 + $0x33] sm:$0x1]  ;;  %v7300_v23 = vld [vmem:[#allocation4 + $0x32] sm:$0x1] }
 0x57d   : > { %v13177_v59 = vadd.f32 %v10276_v3, %v13069_v9  ;;  %v13179_v11 = vadd.f32 %v10376_v47, %v6613_v27  ;;  %v10279_v42 = vadd.f32 %v10278_v40, %v10277_v32  ;;  %v10379_v43 = vadd.f32 %v10378_v18, %v10377_v49  ;;  %v7226_v27 = vld [vmem:[#allocation4 + $0x31] sm:$0x1]  ;;  %v13189_v3 = vld [vmem:[#allocation4 + $0x16] sm:$0x1]  ;;  %v7447_v49 = vld [vmem:[#allocation4 + $0x24] sm:$0x1] }
 0x57e   : > { %v7256_v47 = vsel %vm7175_vm1, %v7255_v53, %v7223_v19  ;;  %v7176_v32 = vsel %vm7175_vm1, %v7174_v25, %v7142_v57  ;;  %v7521_v0 = vld [vmem:[#allocation4 + $0x25] sm:$0x1]  ;;  %v7404_v18 = vsel %vm7175_vm1, %v7403_v14, %v7371_v61  ;;  %v7259_v53 = vrot.slane %v7226_v27, 5 }
 0x57f   : > { %13798 = vst [vmem:[#allocation11_spill] sm:$0xff] %v13179_v11  ;;  %v13185_v51 = vadd.f32 %v10279_v42, %v13074_v6  ;;  %v13187_v9 = vadd.f32 %v10379_v43, %v6616_v38  ;;  %v7330_v6 = vsel %vm7175_vm1, %v7329_v36, %v7297_v37  ;;  %v7448_v38 = vld [vmem:[#allocation4 + $0x34] sm:$0x1]  ;;  %v7478_v42 = vsel %vm7175_vm1, %v7477_v46, %v7445_v55  ;;  %v7522_v43 = vld [vmem:[#allocation4 + $0x35] sm:$0x1] }
 0x580   : > { %v7180_v19 = vrot.slane %v7145_v24, 5  ;;  %v7407_v25 = vrot.slane %v7374_v15, 5  ;;  %v7331_v57 = vrot.slane %v7299_v39, 6  ;;  %v7333_v61 = vrot.slane %v7300_v23, 5  ;;  %v13197_v36 = vld [vmem:[#allocation4 + $0x26] sm:$0x1] }
 0x581   : > { %13799 = vst [vmem:[#allocation12_spill] sm:$0xff] %v13187_v9  ;;  %v10280_v40 = vpop.f32.mrb[180].mxu1  ;;  %v10380_v20 = vpop.f32.mrb[204].mxu0  ;;  %v7552_v9 = vsel %vm7175_vm1, %v7551_v60, %v7519_v4  ;;  %v7479_v14 = vrot.slane %v7447_v49, 6  ;;  %v7481_v55 = vrot.slane %v7448_v38, 5  ;;  %v7553_v12 = vrot.slane %v7521_v0, 6 }
 0x582   : > { %v10281_v11 = vpop.f32.mrb[181].mxu1  ;;  %v10381_v30 = vpop.f32.mrb[205].mxu0  ;;  %v7555_v60 = vrot.slane %v7522_v43, 5  ;;  %v7625_v4 = vrot.slane %v13189_v3, 7  ;;  %v7593_v24 = vld [vmem:[#allocation4 + $0x6] sm:$0x1]  ;;  %v7258_v15 = vsel %vm7178_vm2, %v7257_v48, %v7256_v47  ;;  %v7179_v23 = vsel %vm7178_vm2, %v7177_v16, %v7176_v32 }
 0x583   : > { %v10282_v33 = vadd.f32 %v10281_v11, %v10280_v40  ;;  %v10382_v50 = vadd.f32 %v10381_v30, %v10380_v20  ;;  %v10283_v52 = vpop.f32.mrb[182].mxu1  ;;  %v10383_v58 = vpop.f32.mrb[206].mxu0  ;;  %v7406_v49 = vsel %vm7178_vm2, %v7405_v29, %v7404_v18  ;;  %v13209_v40 = vld [vmem:[#allocation4 + $0x36] sm:$0x1]  ;;  %v7627_v0 = vrot.slane %v13197_v36, 6 }
 0x584   : > { %v10284_v37 = vpop.f32.mrb[183].mxu1  ;;  %v10384_v46 = vpop.f32.mrb[207].mxu0  ;;  %v13212_v3 = vld [vmem:[#allocation4 + $0x17] sm:$0x1]  ;;  %v7332_v48 = vsel %vm7178_vm2, %v7331_v57, %v7330_v6  ;;  %v7182_v16 = vsel %vm7181_vm3, %v7180_v19, %v7179_v23  ;;  %v7408_v29 = vsel %vm7181_vm3, %v7407_v25, %v7406_v49  ;;  %v7301_v47 = vld [vmem:[#allocation4 + $0x42] sm:$0x1]  ;;  %v7480_v20 = vsel %vm7178_vm2, %v7479_v14, %v7478_v42 }
 0x585   : > { %v13201_v27 = vadd.f32 %v10282_v33, %v13078_v7  ;;  %v13204_v11 = vadd.f32 %v10382_v50, %v13161_v62  ;;  %v10285_v30 = vadd.f32 %v10284_v37, %v10283_v52  ;;  %v10385_v39 = vadd.f32 %v10384_v46, %v10383_v58  ;;  %v7227_v58 = vld [vmem:[#allocation4 + $0x41] sm:$0x1]  ;;  %v7146_v62 = vld [vmem:[#allocation4 + $0x40] sm:$0x1]  ;;  %v7375_v33 = vld [vmem:[#allocation4 + $0x43] sm:$0x1] }
 0x586   : > { %v7260_v52 = vsel %vm7181_vm3, %v7259_v53, %v7258_v15  ;;  %v7449_v32 = vld [vmem:[#allocation4 + $0x44] sm:$0x1]  ;;  %v13226_v18 = vld [vmem:[#allocation4 + $0x27] sm:$0x1]  ;;  %v7334_v43 = vsel %vm7181_vm3, %v7333_v61, %v7332_v48  ;;  %v7482_v53 = vsel %vm7181_vm3, %v7481_v55, %v7480_v20  ;;  %v7523_v6 = vld [vmem:[#allocation4 + $0x45] sm:$0x1]  ;;  %v7626_v25 = vsel %vm7175_vm1, %v7625_v4, %v7593_v24 }
 0x587   : > { %v13215_v7 = vadd.f32 %v10285_v30, %v13082_v35  ;;  %v13218_v50 = vadd.f32 %v10385_v39, %v13166_v54  ;;  %v7554_v35 = vsel %vm7178_vm2, %v7553_v12, %v7552_v9  ;;  %v7597_v57 = vld [vmem:[#allocation4 + $0x46] sm:$0x1]  ;;  %v7261_v42 = vrot.slane %v7227_v58, 4  ;;  %v7667_v23 = vld [vmem:[#allocation4 + $0x7] sm:$0x1] }
 0x588   : > { %v7556_v19 = vsel %vm7181_vm3, %v7555_v60, %v7554_v35  ;;  %v7183_v14 = vrot.slane %v7146_v62, 4  ;;  %v7409_v12 = vrot.slane %v7375_v33, 4  ;;  %v7629_v9 = vrot.slane %v13209_v40, 5  ;;  %v7228_v35 = vld [vmem:[#allocation4 + $0x51] sm:$0x1] }
 0x589   : > { %v10286_v54 = vpop.f32.mrb[184].mxu1  ;;  %v10386_v38 = vpop.f32.mrb[208].mxu0  ;;  %v7335_v61 = vrot.slane %v7301_v47, 4  ;;  %v7699_v55 = vrot.slane %v13212_v3, 7  ;;  %v7483_v48 = vrot.slane %v7449_v32, 4  ;;  %v7557_v20 = vrot.slane %v7523_v6, 4 }
 0x58a   : > { %v10287_v36 = vpop.f32.mrb[185].mxu1  ;;  %v10387_v37 = vpop.f32.mrb[209].mxu0  ;;  %v7631_v4 = vrot.slane %v7597_v57, 4  ;;  %v7701_v24 = vrot.slane %v13226_v18, 6  ;;  %v7147_v47 = vld [vmem:[#allocation4 + $0x50] sm:$0x1]  ;;  %v7262_v3 = vsel %vm7184_vm4, %v7261_v42, %v7260_v52  ;;  %v7410_v32 = vsel %vm7184_vm4, %v7409_v12, %v7408_v29 }
 0x58b   : > { %v10288_v46 = vadd.f32 %v10287_v36, %v10286_v54  ;;  %v10388_v30 = vadd.f32 %v10387_v37, %v10386_v38  ;;  %v10289_v39 = vpop.f32.mrb[186].mxu1  ;;  %v10389_v15 = vpop.f32.mrb[210].mxu0  ;;  %v7376_v54 = vld [vmem:[#allocation4 + $0x53] sm:$0x1]  ;;  %v7185_v38 = vsel %vm7184_vm4, %v7183_v14, %v7182_v16  ;;  %v7628_v6 = vsel %vm7178_vm2, %v7627_v0, %v7626_v25  ;;  %v7670_v18 = vld [vmem:[#allocation4 + $0x37] sm:$0x1] }
 0x58c   : > { %v10290_v49 = vpop.f32.mrb[187].mxu1  ;;  %v10390_v60 = vpop.f32.mrb[211].mxu0  ;;  %v13245_v57 = vld [vmem:[#allocation4 + $0x18] sm:$0x1]  ;;  %v7302_v36 = vld [vmem:[#allocation4 + $0x52] sm:$0x1]  ;;  %v7336_v37 = vsel %vm7184_vm4, %v7335_v61, %v7334_v43  ;;  %v7630_v16 = vsel %vm7181_vm3, %v7629_v9, %v7628_v6  ;;  %v7700_v25 = vsel %vm7175_vm1, %v7699_v55, %v7667_v23 }
 0x58d   : > { %v13236_v58 = vadd.f32 %v10288_v46, %v13085_v45  ;;  %v13239_v40 = vadd.f32 %v10388_v30, %v13177_v59  ;;  %v10291_v62 = vadd.f32 %v10290_v49, %v10289_v39  ;;  %v10391_v33 = vadd.f32 %v10390_v60, %v10389_v15  ;;  %v7450_v46 = vld [vmem:[#allocation4 + $0x54] sm:$0x1]  ;;  %v7524_v52 = vld [vmem:[#allocation4 + $0x55] sm:$0x1]  ;;  %v7671_v0 = vld [vmem:[#allocation4 + $0x47] sm:$0x1] }
 0x58e   : > { %v7263_v42 = vrot.slane %v7228_v35, 3  ;;  %v7186_v29 = vrot.slane %v7147_v47, 3  ;;  %v7411_v14 = vrot.slane %v7376_v54, 3  ;;  %v7598_v39 = vld [vmem:[#allocation4 + $0x56] sm:$0x1]  ;;  %v7632_v43 = vsel %vm7184_vm4, %v7631_v4, %v7630_v16 }
 0x58f   : > { %13800 = vst [vmem:[#allocation13_spill] sm:$0xff] %v13239_v40  ;;  %v13248_v45 = vadd.f32 %v10291_v62, %v13089_v34  ;;  %v13251_v59 = vadd.f32 %v10391_v33, %v13185_v51  ;;  %v7484_v34 = vsel %vm7184_vm4, %v7483_v48, %v7482_v53  ;;  %v7558_v51 = vsel %vm7184_vm4, %v7557_v20, %v7556_v19  ;;  %v13259_v15 = vld [vmem:[#allocation4 + $0x57] sm:$0x1]  ;;  %v7229_v4 = vld [vmem:[#allocation4 + $0x61] sm:$0x1] }
 0x590   : > { %v7702_v9 = vsel %vm7178_vm2, %v7701_v24, %v7700_v25  ;;  %v7337_v60 = vrot.slane %v7302_v36, 3  ;;  %v7485_v62 = vrot.slane %v7450_v46, 3  ;;  %v7559_v33 = vrot.slane %v7524_v52, 3  ;;  %v13266_v46 = vld [vmem:[#allocation4 + $0x28] sm:$0x1] }
 0x591   : > { %13801 = vst [vmem:[#allocation14_spill] sm:$0xff] %v13251_v59  ;;  %v10292_v12 = vpop.f32.mrb[188].mxu1  ;;  %v10392_v30 = vpop.f32.mrb[212].mxu0  ;;  %v7703_v23 = vrot.slane %v7670_v18, 5  ;;  %v7705_v53 = vrot.slane %v7671_v0, 4  ;;  %v7264_v6 = vsel %vm7187_vm5, %v7263_v42, %v7262_v3  ;;  %v7188_v24 = vsel %vm7187_vm5, %v7186_v29, %v7185_v38 }
 0x592   : > { %v10293_v61 = vpop.f32.mrb[189].mxu1  ;;  %v10393_v49 = vpop.f32.mrb[213].mxu0  ;;  %v7633_v16 = vrot.slane %v7598_v39, 3  ;;  %v7707_v36 = vrot.slane %v13259_v15, 3  ;;  %v7412_v3 = vsel %vm7187_vm5, %v7411_v14, %v7410_v32  ;;  %v7338_v38 = vsel %vm7187_vm5, %v7337_v60, %v7336_v37  ;;  %v7451_v42 = vld [vmem:[#allocation4 + $0x64] sm:$0x1] }
 0x593   : > { %v10294_v55 = vadd.f32 %v10293_v61, %v10292_v12  ;;  %v10394_v35 = vadd.f32 %v10393_v49, %v10392_v30  ;;  %v10295_v47 = vpop.f32.mrb[190].mxu1  ;;  %v10395_v54 = vpop.f32.mrb[214].mxu0  ;;  %v7148_v12 = vld [vmem:[#allocation4 + $0x60] sm:$0x1]  ;;  %v7377_v30 = vld [vmem:[#allocation4 + $0x63] sm:$0x1]  ;;  %v7486_v29 = vsel %vm7187_vm5, %v7485_v62, %v7484_v34  ;;  %v7560_v37 = vsel %vm7187_vm5, %v7559_v33, %v7558_v51 }
 0x594   : > { %v10296_v48 = vpop.f32.mrb[191].mxu1  ;;  %v10396_v20 = vpop.f32.mrb[215].mxu0  ;;  %v7303_v61 = vld [vmem:[#allocation4 + $0x62] sm:$0x1]  ;;  %v7525_v39 = vld [vmem:[#allocation4 + $0x65] sm:$0x1] }
 0x595   : > { %v13269_v18 = vadd.f32 %v10294_v55, %v13093_v26  ;;  %v13272_v52 = vadd.f32 %v10394_v35, %v13201_v27  ;;  %v10297_v0 = vadd.f32 %v10296_v48, %v10295_v47  ;;  %v10397_v25 = vadd.f32 %v10396_v20, %v10395_v54  ;;  %v13277_v15 = vld [vmem:[#allocation4 + $0x66] sm:$0x1]  ;;  %v13280_v49 = vld [vmem:[#allocation4 + $0x38] sm:$0x1]  ;;  %v13288_v35 = vld [vmem:[#allocation4 + $0x71] sm:$0x1] }
 0x596   : > { %v7704_v26 = vsel %vm7181_vm3, %v7703_v23, %v7702_v9  ;;  %v13290_v32 = vld [vmem:[#allocation4 + $0x70] sm:$0x1]  ;;  %v13293_v14 = vld [vmem:[#allocation4 + $0x67] sm:$0x1]  ;;  %v7741_v60 = vld [vmem:[#allocation4 + $0x8] sm:$0x1] }
 0x597   : > { %13802 = vst [vmem:[#allocation15_spill] sm:$0xff] %v13272_v52  ;;  %v13283_v27 = vadd.f32 %v10297_v0, %v13097_v31  ;;  %v13286_v55 = vadd.f32 %v10397_v25, %v13215_v7  ;;  %v7706_v34 = vsel %vm7184_vm4, %v7705_v53, %v7704_v26  ;;  %v7265_v9 = vrot.slane %v7229_v4, 2  ;;  %v13296_v23 = vld [vmem:[#allocation4 + $0x73] sm:$0x1]  ;;  %v13310_v52 = vld [vmem:[#allocation4 + $0x74] sm:$0x1] }
 0x598   : > { %v7189_v62 = vrot.slane %v7148_v12, 2  ;;  %v7413_v31 = vrot.slane %v7377_v30, 2  ;;  %v7634_v7 = vsel %vm7187_vm5, %v7633_v16, %v7632_v43  ;;  %v7339_v48 = vrot.slane %v7303_v61, 2  ;;  %v7156_v59 = vld [vmem:[#allocation4 + $0xe0] sm:$0x1] }
 0x599   : > { %13803 = vst [vmem:[#allocation16_spill] sm:$0xff] %v13286_v55  ;;  %v10398_v47 = vpop.f32.mrb[216].mxu0  ;;  %v10426_v54 = vpop.f32.mrb[192].mxu1  ;;  %v7487_v20 = vrot.slane %v7451_v42, 2  ;;  %v7561_v0 = vrot.slane %v7525_v39, 2  ;;  %v7775_v51 = vrot.slane %v13266_v46, 6 }
 0x59a   : > { %v10399_v33 = vpop.f32.mrb[217].mxu0  ;;  %v10427_v25 = vpop.f32.mrb[193].mxu1  ;;  %v7267_v53 = vrot.slane %v13288_v35, 1  ;;  %v7635_v4 = vrot.slane %v13277_v15, 2  ;;  %v7709_v12 = vrot.slane %v13293_v14, 2  ;;  %v7266_v35 = vsel %vm7190_vm6, %v7265_v9, %v7264_v6 }
 0x59b   : > { %v10400_v30 = vadd.f32 %v10399_v33, %v10398_v47  ;;  %v10428_v19 = vadd.f32 %v10427_v25, %v10426_v54  ;;  %v10401_v43 = vpop.f32.mrb[218].mxu0  ;;  %v10429_v16 = vpop.f32.mrb[194].mxu1  ;;  %v13305_v42 = vld [vmem:[#allocation4 + $0x72] sm:$0x1]  ;;  %v7191_v26 = vsel %vm7190_vm6, %v7189_v62, %v7188_v24  ;;  %v13312_v15 = vld [vmem:[#allocation4 + $0x75] sm:$0x1]  ;;  %v7708_v14 = vsel %vm7187_vm5, %v7707_v36, %v7706_v34 }
 0x59c   : > { %v10402_v39 = vpop.f32.mrb[219].mxu0  ;;  %v10430_v55 = vpop.f32.mrb[195].mxu1  ;;  %v13804_v47 = vrot.slane %v13245_v57, 7  ;;  %v7232_v6 = vld [vmem:[#allocation4 + $0x91] sm:$0x1]  ;;  %v7414_v36 = vsel %vm7190_vm6, %v7413_v31, %v7412_v3  ;;  %v7340_v57 = vsel %vm7190_vm6, %v7339_v48, %v7338_v38  ;;  %v13351_v31 = vsel %vm7190_vm6, %v7635_v4, %v7634_v7 }
 0x59d   : > { %v13319_v33 = vadd.f32 %v10400_v30, %v13236_v58  ;;  %v10403_v25 = vadd.f32 %v10402_v39, %v10401_v43  ;;  %v10431_v46 = vadd.f32 %v10430_v55, %v10429_v16  ;;  %v13322_v61 = vadd.f32 %v10428_v19, %v13102_v21  ;;  %v7151_v24 = vld [vmem:[#allocation4 + $0x90] sm:$0x1]  ;;  %v13324_v9 = vld [vmem:[#allocation4 + $0x76] sm:$0x1]  ;;  %v13326_v62 = vld [vmem:[#allocation4 + $0xa1] sm:$0x1] }
 0x59e   : > { %v7774_v54 = vsel %vm7175_vm1, %v13804_v47, %v7741_v60  ;;  %v13330_v34 = vld [vmem:[#allocation4 + $0x93] sm:$0x1]  ;;  %v13332_v60 = vld [vmem:[#allocation4 + $0x92] sm:$0x1]  ;;  %v13335_v58 = vsel %vm7190_vm6, %v7487_v20, %v7486_v29  ;;  %v13338_v21 = vsel %vm7190_vm6, %v7561_v0, %v7560_v37  ;;  %v13343_v55 = vld [vmem:[#allocation4 + $0xb1] sm:$0x1]  ;;  %v13367_v39 = vsel %vm7190_vm6, %v7709_v12, %v7708_v14 }
 0x59f   : > { %13805 = vst [vmem:[#allocation17_spill] sm:$0xff] %v13319_v33  ;;  %v13341_v19 = vadd.f32 %v10403_v25, %v13248_v45  ;;  %v13346_v30 = vadd.f32 %v10431_v46, %v13106_v17  ;;  %v7152_v3 = vld [vmem:[#allocation4 + $0xa0] sm:$0x1]  ;;  %v13348_v38 = vld [vmem:[#allocation4 + $0xb0] sm:$0x1]  ;;  %v7776_v29 = vsel %vm7178_vm2, %v7775_v51, %v7774_v54  ;;  %v7341_v48 = vrot.slane %v13305_v42, 1 }
 0x5a0   : > { %v7269_v17 = vrot.slane %v7232_v6, 7  ;;  %v7195_v16 = vrot.slane %v7151_v24, 7  ;;  %v7271_v51 = vrot.slane %v13326_v62, 6  ;;  %v7273_v42 = vrot.slane %v13343_v55, 5  ;;  %v7231_v24 = vld [vmem:[#allocation4 + $0x81] sm:$0x1] }
 0x5a1   : > { %13806 = vst [vmem:[#allocation18_spill] sm:$0xff] %v13341_v19  ;;  %v10404_v0 = vpop.f32.mrb[220].mxu0  ;;  %v10432_v43 = vpop.f32.mrb[196].mxu1  ;;  %v7197_v47 = vrot.slane %v7152_v3, 6  ;;  %v7199_v54 = vrot.slane %v13348_v38, 5  ;;  %v13364_v6 = vsel %vm7193_vm7, %v7267_v53, %v7266_v35  ;;  %v13807_v55 = vrot.slane %v13290_v32, 1 }
 0x5a2   : > { %v10405_v7 = vpop.f32.mrb[221].mxu0  ;;  %v10433_v4 = vpop.f32.mrb[197].mxu1  ;;  %v7235_v46 = vld [vmem:[#allocation4 + $0xc1] sm:$0x1]  ;;  %v7154_v19 = vld [vmem:[#allocation4 + $0xc0] sm:$0x1]  ;;  %v13380_v35 = vsel %vm7193_vm7, %v7341_v48, %v7340_v57 }
 0x5a3   : > { %v10406_v25 = vadd.f32 %v10405_v7, %v10404_v0  ;;  %v10434_v45 = vadd.f32 %v10433_v4, %v10432_v43  ;;  %v10407_v20 = vpop.f32.mrb[222].mxu0  ;;  %v10435_v37 = vpop.f32.mrb[198].mxu1  ;;  %v13372_v3 = vsel %vm7193_vm7, %v13807_v55, %v7191_v26  ;;  %v7236_v38 = vld [vmem:[#allocation4 + $0xd1] sm:$0x1]  ;;  %v7155_v0 = vld [vmem:[#allocation4 + $0xd0] sm:$0x1] }
 0x5a4   : > { %v10408_v33 = vpop.f32.mrb[223].mxu0  ;;  %v10436_v62 = vpop.f32.mrb[199].mxu1  ;;  %v13808_v43 = vrot.slane %v13296_v23, 1  ;;  %v13809_v12 = vrot.slane %v13280_v49, 5  ;;  %v7237_v55 = vld [vmem:[#allocation4 + $0xe1] sm:$0x1] }
 0x5a5   : > { %v13388_v32 = vadd.f32 %v10406_v25, %v13269_v18  ;;  %v10409_v26 = vadd.f32 %v10408_v33, %v10407_v20  ;;  %v10437_v7 = vadd.f32 %v10436_v62, %v10435_v37  ;;  %v6863_v4 = vadd.f32 %v10434_v45, %v13110_v63  ;;  %v7150_v23 = vld [vmem:[#allocation4 + $0x80] sm:$0x1]  ;;  %v13393_v40 = vld [vmem:[#allocation4 + $0xa3] sm:$0x1]  ;;  %v7157_v37 = vld [vmem:[#allocation4 + $0xf0] sm:$0x1] }
 0x5a6   : > { %v13377_v53 = vsel %vm7193_vm7, %v13808_v43, %v7414_v36  ;;  %v13385_v14 = vsel %vm7181_vm3, %v13809_v12, %v7776_v29  ;;  %v7238_v36 = vld [vmem:[#allocation4 + $0xf1] sm:$0x1]  ;;  %v7270_v43 = vsel %vm7175_vm1, %v7269_v17, %v7231_v24  ;;  %v7275_v57 = vrot.slane %v7235_v46, 4  ;;  %v7307_v12 = vld [vmem:[#allocation4 + $0xa2] sm:$0x1] }
 0x5a7   : > { %v7196_v48 = vsel %vm7175_vm1, %v7195_v16, %v7150_v23  ;;  %v7201_v49 = vrot.slane %v7154_v19, 4  ;;  %v13396_v29 = vadd.f32 %v10409_v26, %v13283_v27  ;;  %v6866_v18 = vadd.f32 %v10437_v7, %v13114_v41 }
 0x5a8   : > { %v7277_v33 = vrot.slane %v7236_v38, 3  ;;  %v7203_v63 = vrot.slane %v7155_v0, 3  ;;  %v7272_v45 = vsel %vm7178_vm2, %v7271_v51, %v7270_v43  ;;  %v7279_v20 = vrot.slane %v7237_v55, 2 }
 0x5a9   : > { %v7198_v25 = vsel %vm7178_vm2, %v7197_v47, %v7196_v48  ;;  %v7205_v17 = vrot.slane %v7156_v59, 2  ;;  %v10438_v46 = vpop.f32.mrb[200].mxu1  ;;  %v10692_v24 = vpop.f32.mrb[224].mxu0  ;;  %v7274_v19 = vsel %vm7181_vm3, %v7273_v42, %v7272_v45  ;;  %v7281_v16 = vrot.slane %v7238_v36, 1  ;;  %v7308_v36 = vld [vmem:[#allocation4 + $0xb2] sm:$0x1] }
 0x5aa   : > { %v7200_v62 = vsel %vm7181_vm3, %v7199_v54, %v7198_v25  ;;  %v7419_v27 = vrot.slane %v13393_v40, 6  ;;  %v7024_v41 = vadd.f32 %v10692_v24, %v6863_v4  ;;  %v10439_v38 = vpop.f32.mrb[201].mxu1  ;;  %v7015_v26 = vpop.f32.mrb[225].mxu0  ;;  %v7276_v0 = vsel %vm7184_vm4, %v7275_v57, %v7274_v19  ;;  %v7309_v25 = vld [vmem:[#allocation4 + $0xc2] sm:$0x1] }
 0x5ab   : > { %v7202_v51 = vsel %vm7184_vm4, %v7201_v49, %v7200_v62  ;;  %v7207_v7 = vrot.slane %v7157_v37, 1  ;;  %v10440_v47 = vadd.f32 %v10439_v38, %v10438_v46  ;;  %v7016_v59 = vadd.f32 %v7015_v26, %v13322_v61  ;;  %v10441_v55 = vpop.f32.mrb[202].mxu1  ;;  %v10693_v23 = vpop.f32.mrb[226].mxu0  ;;  %v7382_v24 = vld [vmem:[#allocation4 + $0xb3] sm:$0x1] }
 0x5ac   : > { %v7278_v42 = vsel %vm7187_vm5, %v7277_v33, %v7276_v0  ;;  %v7204_v54 = vsel %vm7187_vm5, %v7203_v63, %v7202_v51  ;;  %v7027_v43 = vadd.f32 %v10693_v23, %v6866_v18  ;;  %v10442_v48 = vpop.f32.mrb[203].mxu1  ;;  %v7018_v45 = vpop.f32.mrb[227].mxu0  ;;  %v7345_v49 = vrot.slane %v7307_v12, 6  ;;  %v7310_v63 = vld [vmem:[#allocation4 + $0xd2] sm:$0x1] }
 0x5ad   : > { %v7280_v4 = vsel %vm7190_vm6, %v7279_v20, %v7278_v42  ;;  %v7206_v57 = vsel %vm7190_vm6, %v7205_v17, %v7204_v54  ;;  %v10443_v61 = vadd.f32 %v10442_v48, %v10441_v55  ;;  %v7019_v46 = vadd.f32 %v7018_v45, %v13346_v30  ;;  %v13414_v19 = vld [vmem:[#allocation4 + $0x77] sm:$0x1]  ;;  %v7305_v17 = vld [vmem:[#allocation4 + $0x82] sm:$0x1]  ;;  %v7383_v30 = vld [vmem:[#allocation4 + $0xc3] sm:$0x1] }
 0x5ae   : > { %v7282_v37 = vsel %vm7193_vm7, %v7281_v16, %v7280_v4  ;;  %v6871_v33 = vadd.f32 %v10440_v47, %v13118_v13  ;;  %v7285_v18 = vadd.f32 %v13364_v6, %v7024_v41  ;;  %v7208_v62 = vsel %vm7193_vm7, %v7207_v7, %v7206_v57  ;;  %v7311_v38 = vld [vmem:[#allocation4 + $0xe2] sm:$0x1]  ;;  %v7312_v0 = vld [vmem:[#allocation4 + $0xf2] sm:$0x1]  ;;  %v7379_v51 = vld [vmem:[#allocation4 + $0x83] sm:$0x1] }
 0x5af   : > { %v7286_v20 = vadd.f32 %v7282_v37, %v7027_v43  ;;  %v7347_v26 = vrot.slane %v7308_v36, 5  ;;  %v7211_v12 = vadd.f32 %v13372_v3, %v7016_v59  ;;  %v7212_v13 = vadd.f32 %v7208_v62, %v7019_v46  ;;  %v7384_v7 = vld [vmem:[#allocation4 + $0xd3] sm:$0x1]  ;;  %v7385_v36 = vld [vmem:[#allocation4 + $0xe3] sm:$0x1] }
 0x5b0   : > { %v6874_v16 = vadd.f32 %v10443_v61, %v13122_v2  ;;  %v7349_v6 = vrot.slane %v7309_v25, 4  ;;  %v7421_v47 = vrot.slane %v7382_v24, 5  ;;  %v13810_v55 = vrot.slane %v13332_v60, 7  ;;  %v7455_v40 = vld [vmem:[#allocation4 + $0xa4] sm:$0x1] }
 0x5b1   : > { %v8803_v41 = vpack.c.bf16 %v7286_v20, %v7285_v18  ;;  %v7351_v59 = vrot.slane %v7310_v63, 3  ;;  %v8798_v23 = vpack.c.bf16 %v7212_v13, %v7211_v12  ;;  %v10444_v42 = vpop.f32.mrb[204].mxu1  ;;  %v10696_v54 = vpop.f32.mrb[228].mxu0  ;;  %v7353_v2 = vrot.slane %v7311_v38, 2 }
 0x5b2   : > { %v7344_v3 = vsel %vm7175_vm1, %v13810_v55, %v7305_v17  ;;  %v7711_v4 = vrot.slane %v13414_v19, 1  ;;  %v10445_v48 = vpop.f32.mrb[205].mxu1  ;;  %v7031_v45 = vpop.f32.mrb[229].mxu0  ;;  %v13811_v57 = vrot.slane %v13330_v34, 7  ;;  %v7423_v25 = vrot.slane %v7383_v30, 4 }
 0x5b3   : > { %v7346_v43 = vsel %vm7178_vm2, %v7345_v49, %v7344_v3  ;;  %8875 = vst [vmem:[%s13423_s24 + $0x8] sm:$0xff] %v8803_v41   ;;  %v7355_v61 = vrot.slane %v7312_v0, 1  ;;  %8799 = vst [vmem:[%s13423_s24] sm:$0xff] %v8798_v23   ;;  %v10446_v46 = vadd.f32 %v10445_v48, %v10444_v42  ;;  %v7032_v24 = vadd.f32 %v7031_v45, %v6871_v33  ;;  %v10447_v63 = vpop.f32.mrb[206].mxu1  ;;  %v10697_v18 = vpop.f32.mrb[230].mxu0  ;;  %v7386_v49 = vld [vmem:[#allocation4 + $0xf3] sm:$0x1] }
 0x5b4   : > { %v7418_v60 = vsel %vm7175_vm1, %v13811_v57, %v7379_v51  ;;  %v7348_v37 = vsel %vm7181_vm3, %v7347_v26, %v7346_v43  ;;  %v7454_v17 = vld [vmem:[#allocation4 + $0x94] sm:$0x1]  ;;  %v10448_v34 = vpop.f32.mrb[207].mxu1  ;;  %v7425_v12 = vrot.slane %v7384_v7, 3  ;;  %v7427_v13 = vrot.slane %v7385_v36, 2  ;;  %v7034_v26 = vpop.f32.mrb[231].mxu0 }
 0x5b5   : > { %v7420_v20 = vsel %vm7178_vm2, %v7419_v27, %v7418_v60  ;;  %v7350_v62 = vsel %vm7184_vm4, %v7349_v6, %v7348_v37  ;;  %v6879_v33 = vadd.f32 %v10446_v46, %v13125_v10  ;;  %v10449_v0 = vadd.f32 %v10448_v34, %v10447_v63  ;;  %v7745_v55 = vld [vmem:[#allocation4 + $0x48] sm:$0x1]  ;;  %v7456_v36 = vld [vmem:[#allocation4 + $0xb4] sm:$0x1]  ;;  %v7746_v10 = vld [vmem:[#allocation4 + $0x58] sm:$0x1] }
 0x5b6   : > { %v7422_v38 = vsel %vm7181_vm3, %v7421_v47, %v7420_v20  ;;  %v7352_v30 = vsel %vm7187_vm5, %v7351_v59, %v7350_v62  ;;  %v7035_v41 = vadd.f32 %v7034_v26, %v6874_v16  ;;  %v7429_v6 = vrot.slane %v7386_v49, 1  ;;  %v13449_v43 = vld [vmem:[#allocation4 + $0x68] sm:$0x1]  ;;  %v7453_v45 = vld [vmem:[#allocation4 + $0x84] sm:$0x1] }
 0x5b7   : > { %v7354_v51 = vsel %vm7190_vm6, %v7353_v2, %v7352_v30  ;;  %v7424_v27 = vsel %vm7184_vm4, %v7423_v25, %v7422_v38  ;;  %v7491_v23 = vrot.slane %v7454_v17, 7  ;;  %v7040_v47 = vadd.f32 %v10696_v54, %v6879_v33  ;;  %v7457_v57 = vld [vmem:[#allocation4 + $0xc4] sm:$0x1]  ;;  %v7458_v46 = vld [vmem:[#allocation4 + $0xd4] sm:$0x1] }
 0x5b8   : > { %v7356_v3 = vsel %vm7193_vm7, %v7355_v61, %v7354_v51  ;;  %v7359_v7 = vadd.f32 %v13380_v35, %v7032_v24  ;;  %v6882_v42 = vadd.f32 %v10449_v0, %v13128_v44  ;;  %v7426_v16 = vsel %vm7187_vm5, %v7425_v12, %v7424_v27  ;;  %v13475_v12 = vld [vmem:[#allocation4 + $0x78] sm:$0x1]  ;;  %v7460_v33 = vld [vmem:[#allocation4 + $0xf4] sm:$0x1] }
 0x5b9   : > { %v7360_v59 = vadd.f32 %v7356_v3, %v7035_v41  ;;  %v13812_v2 = vrot.slane %v13310_v52, 1  ;;  %v7493_v54 = vrot.slane %v7455_v40, 6  ;;  %v7779_v60 = vrot.slane %v7745_v55, 4  ;;  %v10450_v37 = vpop.f32.mrb[208].mxu1  ;;  %v13459_v61 = vpop.f32.mrb[232].mxu0 }
 0x5ba   : > { %v7043_v35 = vadd.f32 %v10697_v18, %v6882_v42  ;;  %v7428_v44 = vsel %vm7190_vm6, %v7427_v13, %v7426_v16  ;;  %v13813_v24 = vrot.slane %v13312_v15, 1  ;;  %v10451_v49 = vpop.f32.mrb[209].mxu1  ;;  %v7047_v20 = vpop.f32.mrb[233].mxu0  ;;  %v7459_v18 = vld [vmem:[#allocation4 + $0xe4] sm:$0x1]  ;;  %v7492_v62 = vsel %vm7175_vm1, %v7491_v23, %v7453_v45 }
 0x5bb   : > { %v13456_v48 = vsel %vm7193_vm7, %v13812_v2, %v13335_v58  ;;  %v8808_v25 = vpack.c.bf16 %v7360_v59, %v7359_v7  ;;  %v7528_v58 = vld [vmem:[#allocation4 + $0x95] sm:$0x1]  ;;  %v7430_v63 = vsel %vm7193_vm7, %v7429_v6, %v7428_v44  ;;  %v7495_v17 = vrot.slane %v7456_v36, 5  ;;  %v10453_v26 = vpop.f32.mrb[210].mxu1  ;;  %v13479_v30 = vpop.f32.mrb[234].mxu0 }
 0x5bc   : > { %v13465_v52 = vsel %vm7193_vm7, %v13813_v24, %v13338_v21  ;;  %v13814_v34 = vrot.slane %v13324_v9, 1  ;;  %v7433_v15 = vadd.f32 %v13377_v53, %v7040_v47  ;;  %v7434_v21 = vadd.f32 %v7430_v63, %v7043_v35  ;;  %v10454_v41 = vpop.f32.mrb[211].mxu1  ;;  %v7050_v51 = vpop.f32.mrb[235].mxu0  ;;  %v7529_v23 = vld [vmem:[#allocation4 + $0xa5] sm:$0x1] }
 0x5bd   : > { %8876 = vst [vmem:[%s13423_s24 + $0x10] sm:$0xff] %v8808_v25   ;;  %v10452_v13 = vadd.f32 %v10451_v49, %v10450_v37  ;;  %v7497_v0 = vrot.slane %v7457_v57, 4  ;;  %v7494_v9 = vsel %vm7178_vm2, %v7493_v54, %v7492_v62  ;;  %v7499_v40 = vrot.slane %v7458_v46, 3  ;;  %v13484_v47 = vld [vmem:[#allocation4 + $0x19] sm:$0x1] }
 0x5be   : > { %v13473_v38 = vsel %vm7193_vm7, %v13814_v34, %v13351_v31  ;;  %v7781_v31 = vrot.slane %v7746_v10, 3  ;;  %v7783_v55 = vrot.slane %v13449_v43, 2  ;;  %v8813_v27 = vpack.c.bf16 %v7434_v21, %v7433_v15  ;;  %v13489_v16 = vld [vmem:[#allocation4 + $0x29] sm:$0x1]  ;;  %v7527_v2 = vld [vmem:[#allocation4 + $0x85] sm:$0x1] }
 0x5bf   : > { %v6887_v53 = vadd.f32 %v10452_v13, %v13131_v8  ;;  %v10455_v6 = vadd.f32 %v10454_v41, %v10453_v26  ;;  %v7501_v3 = vrot.slane %v7459_v18, 2  ;;  %v7496_v7 = vsel %vm7181_vm3, %v7495_v17, %v7494_v9  ;;  %v7530_v45 = vld [vmem:[#allocation4 + $0xb5] sm:$0x1]  ;;  %v7531_v35 = vld [vmem:[#allocation4 + $0xc5] sm:$0x1] }
 0x5c0   : > { %v7503_v42 = vrot.slane %v7460_v33, 1  ;;  %v7565_v59 = vrot.slane %v7528_v58, 7  ;;  %v7780_v36 = vsel %vm7184_vm4, %v7779_v60, %v13385_v14  ;;  %8877 = vst [vmem:[%s13423_s24 + $0x18] sm:$0xff] %v8813_v27   ;;  %v7498_v8 = vsel %vm7184_vm4, %v7497_v0, %v7496_v7  ;;  %v13496_v25 = vld [vmem:[#allocation4 + $0x96] sm:$0x1] }
 0x5c1   : > { %v7048_v10 = vadd.f32 %v7047_v20, %v6887_v53  ;;  %v6890_v43 = vadd.f32 %v10455_v6, %v13134_v28  ;;  %v7785_v57 = vrot.slane %v13475_v12, 1  ;;  %v7500_v54 = vsel %vm7187_vm5, %v7499_v40, %v7498_v8  ;;  %v10456_v28 = vpop.f32.mrb[212].mxu1  ;;  %v13501_v24 = vpop.f32.mrb[236].mxu0  ;;  %v7532_v58 = vld [vmem:[#allocation4 + $0xd5] sm:$0x1] }
 0x5c2   : > { %v7567_v44 = vrot.slane %v7529_v23, 6  ;;  %v7782_v14 = vsel %vm7187_vm5, %v7781_v31, %v7780_v36  ;;  %v7847_v60 = vrot.slane %v13484_v47, 7  ;;  %v7502_v46 = vsel %vm7190_vm6, %v7501_v3, %v7500_v54  ;;  %v13509_v49 = vld [vmem:[#allocation4 + $0x97] sm:$0x1]  ;;  %v13512_v18 = vld [vmem:[#allocation4 + $0x39] sm:$0x1] }
 0x5c3   : > { %v7051_v37 = vadd.f32 %v7050_v51, %v6890_v43  ;;  %v13507_v63 = vsel %vm7193_vm7, %v7711_v4, %v13367_v39  ;;  %v7784_v20 = vsel %vm7190_vm6, %v7783_v55, %v7782_v14  ;;  %v7504_v62 = vsel %vm7193_vm7, %v7503_v42, %v7502_v46  ;;  %v10457_v17 = vpop.f32.mrb[213].mxu1  ;;  %v13515_v34 = vpop.f32.mrb[237].mxu0  ;;  %v7533_v12 = vld [vmem:[#allocation4 + $0xe5] sm:$0x1]  ;;  %v7534_v0 = vld [vmem:[#allocation4 + $0xf5] sm:$0x1] }
 0x5c4   : > { %v7566_v15 = vsel %vm7175_vm1, %v7565_v59, %v7527_v2  ;;  %v7569_v21 = vrot.slane %v7530_v45, 5  ;;  %v7849_v19 = vrot.slane %v13489_v16, 6  ;;  %v7507_v39 = vadd.f32 %v13456_v48, %v7048_v10  ;;  %v10459_v26 = vpop.f32.mrb[214].mxu1  ;;  %v13520_v33 = vpop.f32.mrb[238].mxu0  ;;  %v7815_v51 = vld [vmem:[#allocation4 + $0x9] sm:$0x1] }
 0x5c5   : > { %v7508_v4 = vadd.f32 %v7504_v62, %v7051_v37  ;;  %v10458_v13 = vadd.f32 %v10457_v17, %v10456_v28  ;;  %v7571_v41 = vrot.slane %v7531_v35, 4  ;;  %v10460_v9 = vpop.f32.mrb[215].mxu1  ;;  %v7568_v40 = vsel %vm7178_vm2, %v7567_v44, %v7566_v15  ;;  %v13523_v55 = vpop.f32.mrb[239].mxu0  ;;  %v7603_v27 = vld [vmem:[#allocation4 + $0xa6] sm:$0x1] }
 0x5c6   : > { %v7573_v31 = vrot.slane %v7532_v58, 3  ;;  %v7639_v53 = vrot.slane %v13496_v25, 7  ;;  %v13527_v48 = vsel %vm7193_vm7, %v7785_v57, %v7784_v20  ;;  %v10461_v23 = vadd.f32 %v10460_v9, %v10459_v26  ;;  %v13530_v7 = vld [vmem:[#allocation4 + $0xa7] sm:$0x1]  ;;  %v13532_v42 = vld [vmem:[#allocation4 + $0x98] sm:$0x1] }
 0x5c7   : > { %v8818_v6 = vpack.c.bf16 %v7508_v4, %v7507_v39  ;;  %v6895_v3 = vadd.f32 %v10458_v13, %v13137_v22  ;;  %v7575_v47 = vrot.slane %v7533_v12, 2  ;;  %v7570_v59 = vsel %vm7181_vm3, %v7569_v21, %v7568_v40  ;;  %v7601_v16 = vld [vmem:[#allocation4 + $0x86] sm:$0x1]  ;;  %v7604_v45 = vld [vmem:[#allocation4 + $0xb6] sm:$0x1] }
 0x5c8   : > { %v7577_v36 = vrot.slane %v7534_v0, 1  ;;  %v7713_v10 = vrot.slane %v13509_v49, 7  ;;  %v7851_v43 = vrot.slane %v13512_v18, 5  ;;  %v6898_v2 = vadd.f32 %v10461_v23, %v13140_v56  ;;  %v7605_v57 = vld [vmem:[#allocation4 + $0xc6] sm:$0x1] }
 0x5c9   : > { %8878 = vst [vmem:[%s13423_s24 + $0x20] sm:$0xff] %v8818_v6   ;;  %v7056_v8 = vadd.f32 %v13459_v61, %v6895_v3  ;;  %v7572_v22 = vsel %vm7184_vm4, %v7571_v41, %v7570_v59  ;;  %v7641_v54 = vrot.slane %v7603_v27, 6  ;;  %v7678_v44 = vld [vmem:[#allocation4 + $0xb7] sm:$0x1]  ;;  %v7715_v25 = vrot.slane %v13530_v7, 6  ;;  %v10462_v28 = vpop.f32.mrb[216].mxu1 }
 0x5ca   : > { %v7574_v35 = vsel %vm7187_vm5, %v7573_v31, %v7572_v22  ;;  %v13543_v14 = vld [vmem:[#allocation4 + $0xa8] sm:$0x1]  ;;  %v7787_v37 = vrot.slane %v13532_v42, 7  ;;  %v7848_v46 = vsel %vm7175_vm1, %v7847_v60, %v7815_v51  ;;  %v7059_v61 = vadd.f32 %v13479_v30, %v6898_v2  ;;  %v7606_v58 = vld [vmem:[#allocation4 + $0xd6] sm:$0x1]  ;;  %v13550_v18 = vpop.f32.mrb[240].mxu0 }
 0x5cb   : > { %v7576_v56 = vsel %vm7190_vm6, %v7575_v47, %v7574_v35  ;;  %v7640_v49 = vsel %vm7175_vm1, %v7639_v53, %v7601_v16  ;;  %v7679_v20 = vld [vmem:[#allocation4 + $0xc7] sm:$0x1]  ;;  %v7850_v62 = vsel %vm7178_vm2, %v7849_v19, %v7848_v46  ;;  %v10463_v12 = vpop.f32.mrb[217].mxu1  ;;  %v7607_v15 = vld [vmem:[#allocation4 + $0xe6] sm:$0x1]  ;;  %v7643_v21 = vrot.slane %v7604_v45, 5 }
 0x5cc   : > { %v7578_v17 = vsel %vm7193_vm7, %v7577_v36, %v7576_v56  ;;  %v7645_v39 = vrot.slane %v7605_v57, 4  ;;  %v13554_v60 = vpop.f32.mrb[241].mxu0  ;;  %v13557_v30 = vsel %vm7181_vm3, %v7851_v43, %v7850_v62  ;;  %v7581_v4 = vadd.f32 %v13465_v52, %v7056_v8  ;;  %v10465_v0 = vpop.f32.mrb[218].mxu1  ;;  %v7608_v41 = vld [vmem:[#allocation4 + $0xf6] sm:$0x1] }
 0x5cd   : > { %v7582_v13 = vadd.f32 %v7578_v17, %v7059_v61  ;;  %v10464_v26 = vadd.f32 %v10463_v12, %v10462_v28  ;;  %v7642_v51 = vsel %vm7178_vm2, %v7641_v54, %v7640_v49  ;;  %v7680_v19 = vld [vmem:[#allocation4 + $0xd7] sm:$0x1]  ;;  %v13561_v9 = vpop.f32.mrb[242].mxu0  ;;  %v10466_v40 = vpop.f32.mrb[219].mxu1  ;;  %v7647_v31 = vrot.slane %v7606_v58, 3 }
 0x5ce   : > { %v7717_v27 = vrot.slane %v7678_v44, 5  ;;  %v7719_v53 = vrot.slane %v7679_v20, 4  ;;  %v13563_v6 = vpop.f32.mrb[243].mxu0  ;;  %v7789_v3 = vrot.slane %v13543_v14, 6  ;;  %v10467_v47 = vadd.f32 %v10466_v40, %v10465_v0  ;;  %v7675_v42 = vld [vmem:[#allocation4 + $0x87] sm:$0x1] }
 0x5cf   : > { %v8823_v23 = vpack.c.bf16 %v7582_v13, %v7581_v4  ;;  %v6903_v52 = vadd.f32 %v10464_v26, %v13143_v5  ;;  %v7649_v7 = vrot.slane %v7607_v15, 2  ;;  %v7752_v59 = vld [vmem:[#allocation4 + $0xb8] sm:$0x1]  ;;  %v7644_v36 = vsel %vm7181_vm3, %v7643_v21, %v7642_v51  ;;  %v7681_v57 = vld [vmem:[#allocation4 + $0xe7] sm:$0x1] }
 0x5d0   : > { %v7651_v16 = vrot.slane %v7608_v41, 1  ;;  %v7714_v43 = vsel %vm7175_vm1, %v7713_v10, %v7675_v42  ;;  %v7721_v8 = vrot.slane %v7680_v19, 3  ;;  %v6906_v22 = vadd.f32 %v10467_v47, %v13146_v1  ;;  %v7749_v54 = vld [vmem:[#allocation4 + $0x88] sm:$0x1]  ;;  %v13574_v44 = vld [vmem:[#allocation4 + $0x49] sm:$0x1] }
 0x5d1   : > { %8879 = vst [vmem:[%s13423_s24 + $0x28] sm:$0xff] %v8823_v23   ;;  %v7064_v2 = vadd.f32 %v13515_v34, %v6903_v52  ;;  %v7646_v45 = vsel %vm7184_vm4, %v7645_v39, %v7644_v36  ;;  %v7716_v5 = vsel %vm7178_vm2, %v7715_v25, %v7714_v43  ;;  %v7753_v35 = vld [vmem:[#allocation4 + $0xc8] sm:$0x1]  ;;  %v7754_v10 = vld [vmem:[#allocation4 + $0xd8] sm:$0x1]  ;;  %v7788_v61 = vsel %vm7175_vm1, %v7787_v37, %v7749_v54  ;;  %v10468_v58 = vpop.f32.mrb[220].mxu1 }
 0x5d2   : > { %v7648_v14 = vsel %vm7187_vm5, %v7647_v31, %v7646_v45  ;;  %v7718_v46 = vsel %vm7181_vm3, %v7717_v27, %v7716_v5  ;;  %v7791_v56 = vrot.slane %v7752_v59, 5  ;;  %v7824_v34 = vld [vmem:[#allocation4 + $0x99] sm:$0x1]  ;;  %v7067_v1 = vadd.f32 %v13523_v55, %v6906_v22  ;;  %v7682_v49 = vld [vmem:[#allocation4 + $0xf7] sm:$0x1]  ;;  %v13583_v12 = vpop.f32.mrb[244].mxu0 }
 0x5d3   : > { %v7650_v28 = vsel %vm7190_vm6, %v7649_v7, %v7648_v14  ;;  %v7720_v25 = vsel %vm7184_vm4, %v7719_v53, %v7718_v46  ;;  %v7755_v20 = vld [vmem:[#allocation4 + $0xe8] sm:$0x1]  ;;  %v7790_v62 = vsel %vm7178_vm2, %v7789_v3, %v7788_v61  ;;  %v7820_v17 = vld [vmem:[#allocation4 + $0x59] sm:$0x1]  ;;  %v10469_v21 = vpop.f32.mrb[221].mxu1  ;;  %v7723_v39 = vrot.slane %v7681_v57, 2 }
 0x5d4   : > { %v7652_v15 = vsel %vm7193_vm7, %v7651_v16, %v7650_v28  ;;  %v7722_v37 = vsel %vm7187_vm5, %v7721_v8, %v7720_v25  ;;  %v7793_v4 = vrot.slane %v7753_v35, 4  ;;  %v7825_v55 = vld [vmem:[#allocation4 + $0xa9] sm:$0x1]  ;;  %v13587_v13 = vpop.f32.mrb[245].mxu0  ;;  %v7655_v26 = vadd.f32 %v13473_v38, %v7064_v2  ;;  %v10471_v51 = vpop.f32.mrb[222].mxu1  ;;  %v13815_v42 = vld [vmem:[#allocation5_spill] sm:$0xff] }
 0x5d5   : > { %v7656_v0 = vadd.f32 %v7652_v15, %v7067_v1  ;;  %v10470_v41 = vadd.f32 %v10469_v21, %v10468_v58  ;;  %v7756_v19 = vld [vmem:[#allocation4 + $0xf8] sm:$0x1]  ;;  %v7795_v40 = vrot.slane %v7754_v10, 3  ;;  %v13590_v31 = vpop.f32.mrb[246].mxu0  ;;  %v10472_v27 = vpop.f32.mrb[223].mxu1  ;;  %v7725_v53 = vrot.slane %v7682_v49, 1 }
 0x5d6   : > { %v7792_v3 = vsel %vm7181_vm3, %v7791_v56, %v7790_v62  ;;  %v7797_v23 = vrot.slane %v7755_v20, 2  ;;  %v7853_v52 = vrot.slane %v13574_v44, 4  ;;  %v13594_v47 = vpop.f32.mrb[247].mxu0  ;;  %v10473_v59 = vadd.f32 %v10472_v27, %v10471_v51  ;;  %v7821_v36 = vld [vmem:[#allocation4 + $0x69] sm:$0x1] }
 0x5d7   : > { %v8828_v7 = vpack.c.bf16 %v7656_v0, %v7655_v26  ;;  %v6911_v38 = vadd.f32 %v10470_v41, %v13815_v42  ;;  %v7826_v16 = vld [vmem:[#allocation4 + $0xb9] sm:$0x1]  ;;  %v7861_v43 = vrot.slane %v7824_v34, 7  ;;  %v7794_v8 = vsel %vm7184_vm4, %v7793_v4, %v7792_v3  ;;  %v13816_v54 = vld [vmem:[#allocation6_spill] sm:$0xff]  ;;  %v7890_v49 = vld [vmem:[#allocation4 + $0x1a] sm:$0x1] }
 0x5d8   : > { %v7799_v2 = vrot.slane %v7756_v19, 1  ;;  %v7822_v22 = vld [vmem:[#allocation4 + $0x79] sm:$0x1]  ;;  %v7855_v45 = vrot.slane %v7820_v17, 3  ;;  %v7863_v57 = vrot.slane %v7825_v55, 6  ;;  %v6914_v35 = vadd.f32 %v10473_v59, %v13816_v54 }
 0x5d9   : > { %8880 = vst [vmem:[%s13423_s24 + $0x30] sm:$0xff] %v8828_v7   ;;  %v7072_v5 = vadd.f32 %v13501_v24, %v6911_v38  ;;  %v7724_v44 = vsel %vm7190_vm6, %v7723_v39, %v7722_v37  ;;  %v7796_v14 = vsel %vm7187_vm5, %v7795_v40, %v7794_v8  ;;  %v7823_v46 = vld [vmem:[#allocation4 + $0x89] sm:$0x1]  ;;  %v7857_v34 = vrot.slane %v7821_v36, 2  ;;  %v7828_v1 = vld [vmem:[#allocation4 + $0xd9] sm:$0x1] }
 0x5da   : > { %v7827_v10 = vld [vmem:[#allocation4 + $0xc9] sm:$0x1]  ;;  %v7726_v61 = vsel %vm7193_vm7, %v7725_v53, %v7724_v44  ;;  %v7798_v56 = vsel %vm7190_vm6, %v7797_v23, %v7796_v14  ;;  %v7865_v58 = vrot.slane %v7826_v16, 5  ;;  %v7075_v25 = vadd.f32 %v13520_v33, %v6914_v35  ;;  %v10474_v24 = vpop.f32.mrb[224].mxu1  ;;  %v7830_v17 = vld [vmem:[#allocation4 + $0xf9] sm:$0x1] }
 0x5db   : > { %v7829_v28 = vld [vmem:[#allocation4 + $0xe9] sm:$0x1]  ;;  %v7854_v20 = vsel %vm7184_vm4, %v7853_v52, %v13557_v30  ;;  %v7859_v62 = vrot.slane %v7822_v22, 1  ;;  %v7862_v15 = vsel %vm7175_vm1, %v7861_v43, %v7823_v46  ;;  %v7891_v21 = vld [vmem:[#allocation4 + $0x2a] sm:$0x1]  ;;  %v13609_v37 = vpop.f32.mrb[248].mxu0  ;;  %v7800_v4 = vsel %vm7193_vm7, %v7799_v2, %v7798_v56 }
 0x5dc   : > { %v10475_v39 = vpop.f32.mrb[225].mxu1  ;;  %v7856_v55 = vsel %vm7187_vm5, %v7855_v45, %v7854_v20  ;;  %v7864_v26 = vsel %vm7178_vm2, %v7863_v57, %v7862_v15  ;;  %v7867_v0 = vrot.slane %v7827_v10, 4  ;;  %v7892_v33 = vld [vmem:[#allocation4 + $0x3a] sm:$0x1]  ;;  %v13614_v41 = vpop.f32.mrb[249].mxu0  ;;  %v7729_v30 = vadd.f32 %v13507_v63, %v7072_v5  ;;  %v13817_v8 = vld [vmem:[#allocation7_spill] sm:$0xff] }
 0x5dd   : > { %v7730_v51 = vadd.f32 %v7726_v61, %v7075_v25  ;;  %v10476_v19 = vadd.f32 %v10475_v39, %v10474_v24  ;;  %v10477_v40 = vpop.f32.mrb[226].mxu1  ;;  %v7869_v27 = vrot.slane %v7828_v1, 3  ;;  %v7898_v53 = vld [vmem:[#allocation4 + $0x9a] sm:$0x1]  ;;  %v13617_v3 = vpop.f32.mrb[250].mxu0  ;;  %v7858_v52 = vsel %vm7190_vm6, %v7857_v34, %v7856_v55 }
 0x5de   : > { %v10478_v23 = vpop.f32.mrb[227].mxu1  ;;  %v7866_v7 = vsel %vm7181_vm3, %v7865_v58, %v7864_v26  ;;  %v7871_v42 = vrot.slane %v7829_v28, 2  ;;  %v7873_v38 = vrot.slane %v7830_v17, 1  ;;  %v7889_v59 = vld [vmem:[#allocation4 + $0xa] sm:$0x1]  ;;  %v13621_v16 = vpop.f32.mrb[251].mxu0  ;;  %v13625_v5 = vsel %vm7193_vm7, %v7859_v62, %v7858_v52 }
 0x5df   : > { %v7893_v36 = vld [vmem:[#allocation4 + $0x4a] sm:$0x1]  ;;  %v8833_v63 = vpack.c.bf16 %v7730_v51, %v7729_v30  ;;  %v10479_v43 = vadd.f32 %v10478_v23, %v10477_v40  ;;  %v6919_v2 = vadd.f32 %v10476_v19, %v13817_v8  ;;  %v7894_v22 = vld [vmem:[#allocation4 + $0x5a] sm:$0x1]  ;;  %v7921_v45 = vrot.slane %v7890_v49, 7 }
 0x5e0   : > { %v7899_v57 = vld [vmem:[#allocation4 + $0xaa] sm:$0x1]  ;;  %v7868_v54 = vsel %vm7184_vm4, %v7867_v0, %v7866_v7  ;;  %v13628_v44 = vld [vmem:[#allocation4 + $0x7a] sm:$0x1]  ;;  %v7923_v14 = vrot.slane %v7891_v21, 6  ;;  %v7935_v46 = vrot.slane %v7898_v53, 7 }
 0x5e1   : > { %v7895_v35 = vld [vmem:[#allocation4 + $0x6a] sm:$0x1]  ;;  %8881 = vst [vmem:[%s13423_s24 + $0x38] sm:$0xff] %v8833_v63   ;;  %v7080_v10 = vadd.f32 %v13554_v60, %v6919_v2  ;;  %v13818_v61 = vld [vmem:[#allocation8_spill] sm:$0xff]  ;;  %v7870_v34 = vsel %vm7187_vm5, %v7869_v27, %v7868_v54  ;;  %v7925_v1 = vrot.slane %v7892_v33, 5  ;;  %v7927_v25 = vrot.slane %v7893_v36, 4 }
 0x5e2   : > { %v6922_v56 = vadd.f32 %v10479_v43, %v13818_v61  ;;  %v7897_v28 = vld [vmem:[#allocation4 + $0x8a] sm:$0x1]  ;;  %v7900_v58 = vld [vmem:[#allocation4 + $0xba] sm:$0x1]  ;;  %v7872_v49 = vsel %vm7190_vm6, %v7871_v42, %v7870_v34  ;;  %v7929_v24 = vrot.slane %v7894_v22, 3  ;;  %v7937_v62 = vrot.slane %v7899_v57, 6 }
 0x5e3   : > { %v7901_v20 = vld [vmem:[#allocation4 + $0xca] sm:$0x1]  ;;  %v10480_v15 = vpop.f32.mrb[228].mxu1  ;;  %v13637_v21 = vsel %vm7193_vm7, %v7873_v38, %v7872_v49  ;;  %v7922_v60 = vsel %vm7175_vm1, %v7921_v45, %v7889_v59  ;;  %v7931_v39 = vrot.slane %v7895_v35, 2  ;;  %v7902_v55 = vld [vmem:[#allocation4 + $0xda] sm:$0x1]  ;;  %v7936_v51 = vsel %vm7175_vm1, %v7935_v46, %v7897_v28 }
 0x5e4   : > { %v7083_v17 = vadd.f32 %v13563_v6, %v6922_v56  ;;  %v13640_v26 = vpop.f32.mrb[252].mxu0  ;;  %v10481_v0 = vpop.f32.mrb[229].mxu1  ;;  %v7924_v33 = vsel %vm7178_vm2, %v7923_v14, %v7922_v60  ;;  %v7933_v30 = vrot.slane %v13628_v44, 1  ;;  %v7939_v19 = vrot.slane %v7900_v58, 5  ;;  %v7964_v40 = vld [vmem:[#allocation4 + $0x1b] sm:$0x1] }
 0x5e5   : > { %v13645_v6 = vpop.f32.mrb[253].mxu0  ;;  %v7803_v27 = vadd.f32 %v13527_v48, %v7080_v10  ;;  %v10482_v23 = vadd.f32 %v10481_v0, %v10480_v15  ;;  %v10483_v52 = vpop.f32.mrb[230].mxu1  ;;  %v7926_v7 = vsel %vm7181_vm3, %v7925_v1, %v7924_v33  ;;  %v7903_v42 = vld [vmem:[#allocation4 + $0xea] sm:$0x1]  ;;  %v7965_v38 = vld [vmem:[#allocation4 + $0x2b] sm:$0x1]  ;;  %v7938_v8 = vsel %vm7178_vm2, %v7937_v62, %v7936_v51 }
 0x5e6   : > { %v7804_v53 = vadd.f32 %v7800_v4, %v7083_v17  ;;  %v13649_v59 = vpop.f32.mrb[254].mxu0  ;;  %v10484_v36 = vpop.f32.mrb[231].mxu1  ;;  %v7928_v63 = vsel %vm7184_vm4, %v7927_v25, %v7926_v7  ;;  %v7904_v43 = vld [vmem:[#allocation4 + $0xfa] sm:$0x1]  ;;  %v7941_v2 = vrot.slane %v7901_v20, 4  ;;  %v7943_v22 = vrot.slane %v7902_v55, 3 }
 0x5e7   : > { %v13653_v45 = vpop.f32.mrb[255].mxu0  ;;  %v13819_v4 = vld [vmem:[#allocation9_spill] sm:$0xff]  ;;  %v10485_v54 = vadd.f32 %v10484_v36, %v10483_v52  ;;  %v7966_v35 = vld [vmem:[#allocation4 + $0x3b] sm:$0x1]  ;;  %v7967_v44 = vld [vmem:[#allocation4 + $0x4b] sm:$0x1]  ;;  %v7930_v46 = vsel %vm7187_vm5, %v7929_v24, %v7928_v63  ;;  %v7940_v10 = vsel %vm7181_vm3, %v7939_v19, %v7938_v8 }
 0x5e8   : > { %v8838_v48 = vpack.c.bf16 %v7804_v53, %v7803_v27  ;;  %v6927_v57 = vadd.f32 %v10482_v23, %v13819_v4  ;;  %v7995_v14 = vrot.slane %v7964_v40, 7  ;;  %v7945_v61 = vrot.slane %v7903_v42, 2  ;;  %v7963_v56 = vld [vmem:[#allocation4 + $0xb] sm:$0x1]  ;;  %v7968_v34 = vld [vmem:[#allocation4 + $0x5b] sm:$0x1] }
 0x5e9   : > { %v7997_v1 = vrot.slane %v7965_v38, 6  ;;  %v13820_v58 = vld [vmem:[#allocation10_spill] sm:$0xff]  ;;  %v7932_v25 = vsel %vm7190_vm6, %v7931_v39, %v7930_v46  ;;  %v7947_v20 = vrot.slane %v7904_v43, 1  ;;  %v7972_v17 = vld [vmem:[#allocation4 + $0x9b] sm:$0x1]  ;;  %v7942_v24 = vsel %vm7184_vm4, %v7941_v2, %v7940_v10  ;;  %v10486_v51 = vpop.f32.mrb[232].mxu1 }
 0x5ea   : > { %8882 = vst [vmem:[%s13423_s24 + $0x40] sm:$0xff] %v8838_v48   ;;  %v7088_v28 = vadd.f32 %v13550_v18, %v6927_v57  ;;  %v6930_v49 = vadd.f32 %v10485_v54, %v13820_v58  ;;  %v7969_v62 = vld [vmem:[#allocation4 + $0x6b] sm:$0x1]  ;;  %v13663_v15 = vsel %vm7193_vm7, %v7933_v30, %v7932_v25  ;;  %v13666_v60 = vld [vmem:[#allocation4 + $0x7b] sm:$0x1]  ;;  %v7999_v55 = vrot.slane %v7966_v35, 5 }
 0x5eb   : > { %v8001_v0 = vrot.slane %v7967_v44, 4  ;;  %v7944_v18 = vsel %vm7187_vm5, %v7943_v22, %v7942_v24  ;;  %v7996_v19 = vsel %vm7175_vm1, %v7995_v14, %v7963_v56  ;;  %v8003_v39 = vrot.slane %v7968_v34, 3  ;;  %v7973_v40 = vld [vmem:[#allocation4 + $0xab] sm:$0x1]  ;;  %v7974_v27 = vld [vmem:[#allocation4 + $0xbb] sm:$0x1] }
 0x5ec   : > { %v7091_v33 = vadd.f32 %v13561_v9, %v6930_v49  ;;  %v10487_v53 = vpop.f32.mrb[233].mxu1  ;;  %v7946_v30 = vsel %vm7190_vm6, %v7945_v61, %v7944_v18  ;;  %v7998_v23 = vsel %vm7178_vm2, %v7997_v1, %v7996_v19  ;;  %v8005_v52 = vrot.slane %v7969_v62, 2  ;;  %v8038_v42 = vld [vmem:[#allocation4 + $0x1c] sm:$0x1]  ;;  %v7971_v8 = vld [vmem:[#allocation4 + $0x8b] sm:$0x1] }
 0x5ed   : > { %v8009_v7 = vrot.slane %v7972_v17, 7  ;;  %v7877_v38 = vadd.f32 %v13625_v5, %v7088_v28  ;;  %v10488_v36 = vadd.f32 %v10487_v53, %v10486_v51  ;;  %v10489_v63 = vpop.f32.mrb[234].mxu1  ;;  %v8007_v43 = vrot.slane %v13666_v60, 1  ;;  %v7975_v2 = vld [vmem:[#allocation4 + $0xcb] sm:$0x1]  ;;  %v13821_v46 = vld [vmem:[#allocation11_spill] sm:$0xff] }
 0x5ee   : > { %v7878_v9 = vadd.f32 %v13637_v21, %v7091_v33  ;;  %v8039_v22 = vld [vmem:[#allocation4 + $0x2c] sm:$0x1]  ;;  %v10490_v48 = vpop.f32.mrb[235].mxu1  ;;  %v7948_v4 = vsel %vm7193_vm7, %v7947_v20, %v7946_v30  ;;  %v8000_v57 = vsel %vm7181_vm3, %v7999_v55, %v7998_v23  ;;  %v7976_v54 = vld [vmem:[#allocation4 + $0xdb] sm:$0x1]  ;;  %v8011_v35 = vrot.slane %v7973_v40, 6 }
 0x5ef   : > { %v8013_v44 = vrot.slane %v7974_v27, 5  ;;  %v10491_v5 = vadd.f32 %v10490_v48, %v10489_v63  ;;  %v6935_v21 = vadd.f32 %v10488_v36, %v13821_v46  ;;  %v7977_v10 = vld [vmem:[#allocation4 + $0xeb] sm:$0x1]  ;;  %v8040_v61 = vld [vmem:[#allocation4 + $0x3c] sm:$0x1]  ;;  %v8069_v56 = vrot.slane %v8038_v42, 7 }
 0x5f0   : > { %v8843_v14 = vpack.c.bf16 %v7878_v9, %v7877_v38  ;;  %v8002_v34 = vsel %vm7184_vm4, %v8001_v0, %v8000_v57  ;;  %v7978_v1 = vld [vmem:[#allocation4 + $0xfb] sm:$0x1]  ;;  %v8010_v28 = vsel %vm7175_vm1, %v8009_v7, %v7971_v8  ;;  %v8015_v58 = vrot.slane %v7975_v2, 4  ;;  %v8037_v49 = vld [vmem:[#allocation4 + $0xc] sm:$0x1] }
 0x5f1   : > { %v8071_v25 = vrot.slane %v8039_v22, 6  ;;  %v7096_v20 = vadd.f32 %v13587_v13, %v6935_v21  ;;  %v13822_v62 = vld [vmem:[#allocation12_spill] sm:$0xff]  ;;  %v8004_v24 = vsel %vm7187_vm5, %v8003_v39, %v8002_v34  ;;  %v8017_v55 = vrot.slane %v7976_v54, 3  ;;  %v8041_v33 = vld [vmem:[#allocation4 + $0x4c] sm:$0x1]  ;;  %v10492_v30 = vpop.f32.mrb[236].mxu1 }
 0x5f2   : > { %8883 = vst [vmem:[%s13423_s24 + $0x48] sm:$0xff] %v8843_v14   ;;  %v6938_v17 = vadd.f32 %v10491_v5, %v13822_v62  ;;  %v8042_v51 = vld [vmem:[#allocation4 + $0x5c] sm:$0x1]  ;;  %v8006_v18 = vsel %vm7190_vm6, %v8005_v52, %v8004_v24  ;;  %v8012_v0 = vsel %vm7178_vm2, %v8011_v35, %v8010_v28  ;;  %v8019_v19 = vrot.slane %v7977_v10, 2  ;;  %v8043_v40 = vld [vmem:[#allocation4 + $0x6c] sm:$0x1] }
 0x5f3   : > { %v8073_v27 = vrot.slane %v8040_v61, 5  ;;  %v8014_v23 = vsel %vm7181_vm3, %v8013_v44, %v8012_v0  ;;  %v8021_v13 = vrot.slane %v7978_v1, 1  ;;  %v8044_v7 = vld [vmem:[#allocation4 + $0x7c] sm:$0x1]  ;;  %v8070_v42 = vsel %vm7175_vm1, %v8069_v56, %v8037_v49  ;;  %v10493_v38 = vpop.f32.mrb[237].mxu1 }
 0x5f4   : > { %v7099_v53 = vadd.f32 %v13594_v47, %v6938_v17  ;;  %v8046_v39 = vld [vmem:[#allocation4 + $0x9c] sm:$0x1]  ;;  %v8016_v9 = vsel %vm7184_vm4, %v8015_v58, %v8014_v23  ;;  %v8072_v52 = vsel %vm7178_vm2, %v8071_v25, %v8070_v42  ;;  %v8075_v36 = vrot.slane %v8041_v33, 4  ;;  %v8047_v8 = vld [vmem:[#allocation4 + $0xac] sm:$0x1]  ;;  %v10495_v48 = vpop.f32.mrb[238].mxu1 }
 0x5f5   : > { %v8077_v63 = vrot.slane %v8042_v51, 3  ;;  %v7951_v2 = vadd.f32 %v13663_v15, %v7096_v20  ;;  %v10494_v47 = vadd.f32 %v10493_v38, %v10492_v30  ;;  %v8079_v57 = vrot.slane %v8043_v40, 2  ;;  %v8048_v54 = vld [vmem:[#allocation4 + $0xbc] sm:$0x1]  ;;  %v10496_v35 = vpop.f32.mrb[239].mxu1 }
 0x5f6   : > { %v7952_v22 = vadd.f32 %v7948_v4, %v7099_v53  ;;  %v8018_v44 = vsel %vm7187_vm5, %v8017_v55, %v8016_v9  ;;  %v8074_v14 = vsel %vm7181_vm3, %v8073_v27, %v8072_v52  ;;  %v8081_v5 = vrot.slane %v8044_v7, 1  ;;  %v8049_v56 = vld [vmem:[#allocation4 + $0xcc] sm:$0x1]  ;;  %v8050_v34 = vld [vmem:[#allocation4 + $0xdc] sm:$0x1] }
 0x5f7   : > { %v8083_v46 = vrot.slane %v8046_v39, 7  ;;  %v6943_v10 = vadd.f32 %v10494_v47, %v13204_v11  ;;  %v10497_v61 = vadd.f32 %v10496_v35, %v10495_v48  ;;  %v8085_v15 = vrot.slane %v8047_v8, 6  ;;  %v8045_v58 = vld [vmem:[#allocation4 + $0x8c] sm:$0x1]  ;;  %v8052_v24 = vld [vmem:[#allocation4 + $0xfc] sm:$0x1] }
 0x5f8   : > { %v8848_v21 = vpack.c.bf16 %v7952_v22, %v7951_v2  ;;  %v8008_v4 = vsel %vm7193_vm7, %v8007_v43, %v8006_v18  ;;  %v8020_v1 = vsel %vm7190_vm6, %v8019_v19, %v8018_v44  ;;  %v8076_v28 = vsel %vm7184_vm4, %v8075_v36, %v8074_v14  ;;  %v8051_v49 = vld [vmem:[#allocation4 + $0xec] sm:$0x1]  ;;  %v8112_v60 = vld [vmem:[#allocation4 + $0x1d] sm:$0x1]  ;;  %v8113_v55 = vld [vmem:[#allocation4 + $0x2d] sm:$0x1] }
 0x5f9   : > { %v8087_v25 = vrot.slane %v8048_v54, 5  ;;  %v7104_v20 = vadd.f32 %v13583_v12, %v6943_v10  ;;  %v6946_v11 = vadd.f32 %v10497_v61, %v13218_v50  ;;  %v8022_v62 = vsel %vm7193_vm7, %v8021_v13, %v8020_v1  ;;  %v8114_v0 = vld [vmem:[#allocation4 + $0x3d] sm:$0x1]  ;;  %v8115_v19 = vld [vmem:[#allocation4 + $0x4d] sm:$0x1]  ;;  %v10498_v12 = vpop.f32.mrb[240].mxu1 }
 0x5fa   : > { %8884 = vst [vmem:[%s13423_s24 + $0x50] sm:$0xff] %v8848_v21   ;;  %v8078_v17 = vsel %vm7187_vm5, %v8077_v63, %v8076_v28  ;;  %v8084_v33 = vsel %vm7175_vm1, %v8083_v46, %v8045_v58  ;;  %v8089_v51 = vrot.slane %v8049_v56, 4  ;;  %v8091_v18 = vrot.slane %v8050_v34, 3  ;;  %v8111_v30 = vld [vmem:[#allocation4 + $0xd] sm:$0x1]  ;;  %v10499_v7 = vpop.f32.mrb[241].mxu1 }
 0x5fb   : > { %v8080_v43 = vsel %vm7190_vm6, %v8079_v57, %v8078_v17  ;;  %v7107_v40 = vadd.f32 %v13590_v31, %v6946_v11  ;;  %v8086_v27 = vsel %vm7178_vm2, %v8085_v15, %v8084_v33  ;;  %v8093_v53 = vrot.slane %v8051_v49, 2  ;;  %v8116_v23 = vld [vmem:[#allocation4 + $0x5d] sm:$0x1]  ;;  %v8121_v52 = vld [vmem:[#allocation4 + $0xad] sm:$0x1]  ;;  %v10501_v31 = vpop.f32.mrb[242].mxu1 }
 0x5fc   : > { %v8082_v50 = vsel %vm7193_vm7, %v8081_v5, %v8080_v43  ;;  %v8120_v13 = vld [vmem:[#allocation4 + $0x9d] sm:$0x1]  ;;  %v8088_v42 = vsel %vm7181_vm3, %v8087_v25, %v8086_v27  ;;  %v8095_v39 = vrot.slane %v8052_v24, 1  ;;  %v8143_v38 = vrot.slane %v8112_v60, 7  ;;  %v8117_v2 = vld [vmem:[#allocation4 + $0x6d] sm:$0x1] }
 0x5fd   : > { %v8145_v9 = vrot.slane %v8113_v55, 6  ;;  %v8025_v36 = vadd.f32 %v8008_v4, %v7104_v20  ;;  %v8026_v63 = vadd.f32 %v8022_v62, %v7107_v40  ;;  %v10500_v8 = vadd.f32 %v10499_v7, %v10498_v12  ;;  %v8122_v47 = vld [vmem:[#allocation4 + $0xbd] sm:$0x1]  ;;  %v10502_v48 = vpop.f32.mrb[243].mxu1  ;;  %v13823_v21 = vld [vmem:[#allocation13_spill] sm:$0xff]  ;;  %v13824_v49 = vld [vmem:[#allocation14_spill] sm:$0xff] }
 0x5fe   : > { %v8147_v22 = vrot.slane %v8114_v0, 5  ;;  %v8090_v57 = vsel %vm7184_vm4, %v8089_v51, %v8088_v42  ;;  %v8118_v54 = vld [vmem:[#allocation4 + $0x7d] sm:$0x1]  ;;  %v8149_v35 = vrot.slane %v8115_v19, 4  ;;  %v8151_v44 = vrot.slane %v8116_v23, 3 }
 0x5ff   : > { %v8157_v14 = vrot.slane %v8120_v13, 7  ;;  %v8853_v5 = vpack.c.bf16 %v8026_v63, %v8025_v36  ;;  %v10503_v46 = vadd.f32 %v10502_v48, %v10501_v31  ;;  %v6951_v10 = vadd.f32 %v10500_v8, %v13823_v21  ;;  %v8123_v61 = vld [vmem:[#allocation4 + $0xcd] sm:$0x1]  ;;  %v8124_v62 = vld [vmem:[#allocation4 + $0xdd] sm:$0x1] }
 0x600   : > { %v8159_v56 = vrot.slane %v8121_v52, 6  ;;  %v8092_v34 = vsel %vm7187_vm5, %v8091_v18, %v8090_v57  ;;  %v8144_v15 = vsel %vm7175_vm1, %v8143_v38, %v8111_v30  ;;  %v8153_v4 = vrot.slane %v8117_v2, 2  ;;  %v8119_v1 = vld [vmem:[#allocation4 + $0x8d] sm:$0x1]  ;;  %v8186_v33 = vld [vmem:[#allocation4 + $0x1e] sm:$0x1] }
 0x601   : > { %v8161_v28 = vrot.slane %v8122_v47, 5  ;;  %8885 = vst [vmem:[%s13423_s24 + $0x58] sm:$0xff] %v8853_v5   ;;  %v7112_v58 = vadd.f32 %v13614_v41, %v6951_v10  ;;  %v6954_v25 = vadd.f32 %v10503_v46, %v13824_v49  ;;  %v8146_v20 = vsel %vm7178_vm2, %v8145_v9, %v8144_v15  ;;  %v8125_v17 = vld [vmem:[#allocation4 + $0xed] sm:$0x1]  ;;  %v10504_v41 = vpop.f32.mrb[244].mxu1  ;;  %v13825_v57 = vld [vmem:[#allocation15_spill] sm:$0xff] }
 0x602   : > { %v8155_v11 = vrot.slane %v8118_v54, 1  ;;  %v8094_v24 = vsel %vm7190_vm6, %v8093_v53, %v8092_v34  ;;  %v8148_v60 = vsel %vm7181_vm3, %v8147_v22, %v8146_v20  ;;  %v8158_v55 = vsel %vm7175_vm1, %v8157_v14, %v8119_v1  ;;  %v8126_v19 = vld [vmem:[#allocation4 + $0xfd] sm:$0x1]  ;;  %v8187_v12 = vld [vmem:[#allocation4 + $0x2e] sm:$0x1]  ;;  %v10505_v27 = vpop.f32.mrb[245].mxu1 }
 0x603   : > { %v8163_v43 = vrot.slane %v8123_v61, 4  ;;  %v7115_v51 = vadd.f32 %v13621_v16, %v6954_v25  ;;  %v8096_v18 = vsel %vm7193_vm7, %v8095_v39, %v8094_v24  ;;  %v8150_v0 = vsel %vm7184_vm4, %v8149_v35, %v8148_v60  ;;  %v8188_v7 = vld [vmem:[#allocation4 + $0x3e] sm:$0x1]  ;;  %v10507_v9 = vpop.f32.mrb[246].mxu1  ;;  %v8185_v39 = vld [vmem:[#allocation4 + $0xe] sm:$0x1] }
 0x604   : > { %v8160_v40 = vsel %vm7178_vm2, %v8159_v56, %v8158_v55  ;;  %v8152_v53 = vsel %vm7187_vm5, %v8151_v44, %v8150_v0  ;;  %v8165_v23 = vrot.slane %v8124_v62, 3  ;;  %v8167_v13 = vrot.slane %v8125_v17, 2  ;;  %v8189_v52 = vld [vmem:[#allocation4 + $0x4e] sm:$0x1]  ;;  %v10508_v8 = vpop.f32.mrb[247].mxu1  ;;  %v13826_v34 = vld [vmem:[#allocation16_spill] sm:$0xff] }
 0x605   : > { %v8162_v30 = vsel %vm7181_vm3, %v8161_v28, %v8160_v40  ;;  %v8099_v42 = vadd.f32 %v8082_v50, %v7112_v58  ;;  %v8100_v38 = vadd.f32 %v8096_v18, %v7115_v51  ;;  %v10506_v16 = vadd.f32 %v10505_v27, %v10504_v41  ;;  %v8190_v22 = vld [vmem:[#allocation4 + $0x5e] sm:$0x1]  ;;  %v8191_v50 = vld [vmem:[#allocation4 + $0x6e] sm:$0x1] }
 0x606   : > { %v8217_v36 = vrot.slane %v8186_v33, 7  ;;  %v8154_v63 = vsel %vm7190_vm6, %v8153_v4, %v8152_v53  ;;  %v8164_v31 = vsel %vm7184_vm4, %v8163_v43, %v8162_v30  ;;  %v8169_v2 = vrot.slane %v8126_v19, 1  ;;  %v8194_v14 = vld [vmem:[#allocation4 + $0x9e] sm:$0x1]  ;;  %v8195_v61 = vld [vmem:[#allocation4 + $0xae] sm:$0x1] }
 0x607   : > { %v8219_v47 = vrot.slane %v8187_v12, 6  ;;  %v8858_v48 = vpack.c.bf16 %v8100_v38, %v8099_v42  ;;  %v6959_v54 = vadd.f32 %v10506_v16, %v13825_v57  ;;  %v10509_v35 = vadd.f32 %v10508_v8, %v10507_v9  ;;  %v8192_v21 = vld [vmem:[#allocation4 + $0x7e] sm:$0x1]  ;;  %v8197_v58 = vld [vmem:[#allocation4 + $0xce] sm:$0x1] }
 0x608   : > { %v8221_v44 = vrot.slane %v8188_v7, 5  ;;  %v8156_v5 = vsel %vm7193_vm7, %v8155_v11, %v8154_v63  ;;  %v8166_v46 = vsel %vm7187_vm5, %v8165_v23, %v8164_v31  ;;  %v8223_v10 = vrot.slane %v8189_v52, 4  ;;  %v8196_v28 = vld [vmem:[#allocation4 + $0xbe] sm:$0x1]  ;;  %v8199_v55 = vld [vmem:[#allocation4 + $0xee] sm:$0x1] }
 0x609   : > { %8886 = vst [vmem:[%s13423_s24 + $0x60] sm:$0xff] %v8858_v48   ;;  %v7120_v56 = vadd.f32 %v13609_v37, %v6959_v54  ;;  %v6962_v15 = vadd.f32 %v10509_v35, %v13826_v34  ;;  %v8218_v4 = vsel %vm7175_vm1, %v8217_v36, %v8185_v39  ;;  %v8225_v1 = vrot.slane %v8190_v22, 3  ;;  %v8198_v11 = vld [vmem:[#allocation4 + $0xde] sm:$0x1]  ;;  %v10510_v60 = vpop.f32.mrb[248].mxu1  ;;  %v13827_v36 = vld [vmem:[#allocation17_spill] sm:$0xff] }
 0x60a   : > { %v8168_v49 = vsel %vm7190_vm6, %v8167_v13, %v8166_v46  ;;  %v8220_v25 = vsel %vm7178_vm2, %v8219_v47, %v8218_v4  ;;  %v8227_v20 = vrot.slane %v8191_v50, 2  ;;  %v8231_v62 = vrot.slane %v8194_v14, 7  ;;  %v8260_v33 = vld [vmem:[#allocation4 + $0x1f] sm:$0x1]  ;;  %v10511_v51 = vpop.f32.mrb[249].mxu1 }
 0x60b   : > { %v7123_v17 = vadd.f32 %v13617_v3, %v6962_v15  ;;  %v8170_v24 = vsel %vm7193_vm7, %v8169_v2, %v8168_v49  ;;  %v8222_v37 = vsel %vm7181_vm3, %v8221_v44, %v8220_v25  ;;  %v8233_v43 = vrot.slane %v8195_v61, 6  ;;  %v8193_v0 = vld [vmem:[#allocation4 + $0x8e] sm:$0x1]  ;;  %v10513_v30 = vpop.f32.mrb[250].mxu1  ;;  %v8200_v23 = vld [vmem:[#allocation4 + $0xfe] sm:$0x1] }
 0x60c   : > { %v8224_v18 = vsel %vm7184_vm4, %v8223_v10, %v8222_v37  ;;  %v8229_v41 = vrot.slane %v8192_v21, 1  ;;  %v8235_v19 = vrot.slane %v8196_v28, 5  ;;  %v8237_v40 = vrot.slane %v8197_v58, 4  ;;  %v8261_v13 = vld [vmem:[#allocation4 + $0x2f] sm:$0x1]  ;;  %v10514_v7 = vpop.f32.mrb[251].mxu1 }
 0x60d   : > { %v8173_v12 = vadd.f32 %v8156_v5, %v7120_v56  ;;  %v8174_v27 = vadd.f32 %v8170_v24, %v7123_v17  ;;  %v10512_v53 = vadd.f32 %v10511_v51, %v10510_v60  ;;  %v8226_v3 = vsel %vm7187_vm5, %v8225_v1, %v8224_v18  ;;  %v8259_v31 = vld [vmem:[#allocation4 + $0xf] sm:$0x1]  ;;  %v8262_v2 = vld [vmem:[#allocation4 + $0x3f] sm:$0x1] }
 0x60e   : > { %v8232_v42 = vsel %vm7175_vm1, %v8231_v62, %v8193_v0  ;;  %v8239_v38 = vrot.slane %v8198_v11, 3  ;;  %v8241_v16 = vrot.slane %v8199_v55, 2  ;;  %v8291_v9 = vrot.slane %v8260_v33, 7  ;;  %v8268_v22 = vld [vmem:[#allocation4 + $0x9f] sm:$0x1]  ;;  %v13828_v5 = vld [vmem:[#allocation18_spill] sm:$0xff] }
 0x60f   : > { %v8863_v39 = vpack.c.bf16 %v8174_v27, %v8173_v12  ;;  %v10515_v52 = vadd.f32 %v10514_v7, %v10513_v30  ;;  %v6967_v63 = vadd.f32 %v10512_v53, %v13827_v36  ;;  %v8234_v8 = vsel %vm7178_vm2, %v8233_v43, %v8232_v42  ;;  %v8263_v54 = vld [vmem:[#allocation4 + $0x4f] sm:$0x1]  ;;  %v8264_v10 = vld [vmem:[#allocation4 + $0x5f] sm:$0x1] }
 0x610   : > { %v8228_v47 = vsel %vm7190_vm6, %v8227_v20, %v8226_v3  ;;  %v8236_v48 = vsel %vm7181_vm3, %v8235_v19, %v8234_v8  ;;  %v8243_v57 = vrot.slane %v8200_v23, 1  ;;  %v8293_v35 = vrot.slane %v8261_v13, 6  ;;  %v8269_v50 = vld [vmem:[#allocation4 + $0xaf] sm:$0x1]  ;;  %v8270_v56 = vld [vmem:[#allocation4 + $0xbf] sm:$0x1] }
 0x611   : > { %8887 = vst [vmem:[%s13423_s24 + $0x68] sm:$0xff] %v8863_v39   ;;  %v7128_v44 = vadd.f32 %v13645_v6, %v6967_v63  ;;  %v8230_v14 = vsel %vm7193_vm7, %v8229_v41, %v8228_v47  ;;  %v6970_v46 = vadd.f32 %v10515_v52, %v13828_v5  ;;  %v8238_v21 = vsel %vm7184_vm4, %v8237_v40, %v8236_v48  ;;  %v8265_v61 = vld [vmem:[#allocation4 + $0x6f] sm:$0x1]  ;;  %v8272_v28 = vld [vmem:[#allocation4 + $0xdf] sm:$0x1]  ;;  %v10516_v25 = vpop.f32.mrb[252].mxu1 }
 0x612   : > { %v8240_v34 = vsel %vm7187_vm5, %v8239_v38, %v8238_v21  ;;  %v8292_v15 = vsel %vm7175_vm1, %v8291_v9, %v8259_v31  ;;  %v8295_v4 = vrot.slane %v8262_v2, 5  ;;  %v8271_v1 = vld [vmem:[#allocation4 + $0xcf] sm:$0x1]  ;;  %v8305_v58 = vrot.slane %v8268_v22, 7  ;;  %v10517_v24 = vpop.f32.mrb[253].mxu1 }
 0x613   : > { %v7131_v49 = vadd.f32 %v13653_v45, %v6970_v46  ;;  %v8242_v6 = vsel %vm7190_vm6, %v8241_v16, %v8240_v34  ;;  %v8297_v20 = vrot.slane %v8263_v54, 4  ;;  %v8273_v11 = vld [vmem:[#allocation4 + $0xef] sm:$0x1]  ;;  %v8307_v62 = vrot.slane %v8269_v50, 6  ;;  %v8266_v60 = vld [vmem:[#allocation4 + $0x7f] sm:$0x1] }
 0x614   : > { %v8244_v17 = vsel %vm7193_vm7, %v8243_v57, %v8242_v6  ;;  %v8294_v37 = vsel %vm7178_vm2, %v8293_v35, %v8292_v15  ;;  %v8299_v55 = vrot.slane %v8264_v10, 3  ;;  %v8309_v43 = vrot.slane %v8270_v56, 5  ;;  %v10519_v41 = vpop.f32.mrb[254].mxu1  ;;  %v8267_v0 = vld [vmem:[#allocation4 + $0x8f] sm:$0x1] }
 0x615   : > { %v8247_v33 = vadd.f32 %v8230_v14, %v7128_v44  ;;  %v8248_v51 = vadd.f32 %v8244_v17, %v7131_v49  ;;  %v10518_v18 = vadd.f32 %v10517_v24, %v10516_v25  ;;  %v8274_v45 = vld [vmem:[#allocation4 + $0xff] sm:$0x1]  ;;  %v8311_v19 = vrot.slane %v8271_v1, 4  ;;  %v10520_v12 = vpop.f32.mrb[255].mxu1 }
 0x616   : > { %v8301_v40 = vrot.slane %v8265_v61, 2  ;;  %v8306_v27 = vsel %vm7175_vm1, %v8305_v58, %v8267_v0  ;;  %v8313_v53 = vrot.slane %v8272_v28, 3  ;;  %v8315_v30 = vrot.slane %v8273_v11, 2 }
 0x617   : > { %v8868_v3 = vpack.c.bf16 %v8248_v51, %v8247_v33  ;;  %v6975_v23 = vadd.f32 %v10518_v18, %v13388_v32  ;;  %v10521_v13 = vadd.f32 %v10520_v12, %v10519_v41  ;;  %v8308_v7 = vsel %vm7178_vm2, %v8307_v62, %v8306_v27 }
 0x618   : > { %v8296_v42 = vsel %vm7181_vm3, %v8295_v4, %v8294_v37  ;;  %v8303_v38 = vrot.slane %v8266_v60, 1  ;;  %v8310_v16 = vsel %vm7181_vm3, %v8309_v43, %v8308_v7  ;;  %v8317_v9 = vrot.slane %v8274_v45, 1 }
 0x619   : > { %8888 = vst [vmem:[%s13423_s24 + $0x70] sm:$0xff] %v8868_v3   ;;  %v7136_v39 = vadd.f32 %v13640_v26, %v6975_v23  ;;  %v8298_v52 = vsel %vm7184_vm4, %v8297_v20, %v8296_v42  ;;  %v6978_v36 = vadd.f32 %v10521_v13, %v13396_v29  ;;  %v8312_v63 = vsel %vm7184_vm4, %v8311_v19, %v8310_v16 }
 0x61a   : > { %v8300_v32 = vsel %vm7187_vm5, %v8299_v55, %v8298_v52  ;;  %v8314_v8 = vsel %vm7187_vm5, %v8313_v53, %v8312_v63 }
 0x61b   : > { %v8302_v31 = vsel %vm7190_vm6, %v8301_v40, %v8300_v32  ;;  %v7139_v2 = vadd.f32 %v13649_v59, %v6978_v36  ;;  %v8316_v22 = vsel %vm7190_vm6, %v8315_v30, %v8314_v8 }
 0x61c   : > { %v8304_v47 = vsel %vm7193_vm7, %v8303_v38, %v8302_v31  ;;  %v8318_v26 = vsel %vm7193_vm7, %v8317_v9, %v8316_v22 }
 0x61d   : > { %v8321_v48 = vadd.f32 %v8304_v47, %v7136_v39  ;;  %v8322_v57 = vadd.f32 %v8318_v26, %v7139_v2 }
 0x61f   : > { %v8873_v54 = vpack.c.bf16 %v8322_v57, %v8321_v48 }
 0x621   : > { %8889 = vst [vmem:[%s13423_s24 + $0x78] sm:$0xff] %v8873_v54  }
 0x622 PF: > { %s19_s30 = sadd.s32 1, %s11017_s30  }
 0x623   : > { %p16_p4 = scmp.ge.s32.totalorder %s19_s30, 4  }
 0x625   :  { %18 = sbr.rel (!%p16_p4) target bundleno = 1 (0x1), region = 89 }

</bundles_post_ra>
